<compile_context>
chip_gen: v5e
topology: v5e:2x2
jax: 0.10.0
libtpu: 0.0.40
codegen_flags: <defaults>
</compile_context>

<pallas_src>
import functools

import jax
import jax.numpy as jnp
from jax.experimental import pallas as pl
from jax.experimental.pallas import tpu as pltpu

_BN_EPS = 1e-5


def _full_spec(shape):
    zeros = (0,) * len(shape)
    return pl.BlockSpec(shape, lambda *_: zeros)


# --------------------------------------------------------------------------- #
# Kernel A: fused  Linear -> BN1d -> ReLU -> Linear -> BN1d -> ReLU
# --------------------------------------------------------------------------- #
def _linear_stack_kernel(x_ref, w1_ref, b1_ref, g1_ref, bt1_ref,
                         w2_ref, b2_ref, g2_ref, bt2_ref, o_ref, *, eps):
    h = jnp.dot(x_ref[...], w1_ref[...], preferred_element_type=jnp.float32)
    h = h + b1_ref[...]
    m1 = jnp.mean(h, axis=0, keepdims=True)
    v1 = jnp.mean((h - m1) ** 2, axis=0, keepdims=True)   # biased var (PyTorch train BN)
    h = (h - m1) * jax.lax.rsqrt(v1 + eps) * g1_ref[...] + bt1_ref[...]
    h = jnp.maximum(h, 0.0)

    y = jnp.dot(h, w2_ref[...], preferred_element_type=jnp.float32)
    y = y + b2_ref[...]
    m2 = jnp.mean(y, axis=0, keepdims=True)
    v2 = jnp.mean((y - m2) ** 2, axis=0, keepdims=True)
    y = (y - m2) * jax.lax.rsqrt(v2 + eps) * g2_ref[...] + bt2_ref[...]
    o_ref[...] = jnp.maximum(y, 0.0).astype(o_ref.dtype)


def linear_stack(x, p):
    B, nd = x.shape
    D1 = p["W1"].shape[1]
    D2 = p["W2p"].shape[1]
    return pl.pallas_call(
        functools.partial(_linear_stack_kernel, eps=_BN_EPS),
        out_shape=jax.ShapeDtypeStruct((B, D2), jnp.float32),
        grid=(1,),
        in_specs=[_full_spec((B, nd)),
                  _full_spec((nd, D1)), _full_spec((1, D1)),
                  _full_spec((1, D1)), _full_spec((1, D1)),
                  _full_spec((D1, D2)), _full_spec((1, D2)),
                  _full_spec((1, D2)), _full_spec((1, D2))],
        out_specs=_full_spec((B, D2)),
        compiler_params=pltpu.CompilerParams(vmem_limit_bytes=28 * 1024 * 1024),
    )(x, p["W1"], p["b1"], p["g1"], p["bt1"],
      p["W2p"], p["b2p"], p["g2p"], p["bt2p"])


# --------------------------------------------------------------------------- #
# Kernel B: fused  ConvTranspose2d(64->64) + BN2d + ReLU
#   patches: (R, 9*Cin) union-window im2col; weights parity-folded (9*Cin, 4*Cout)
#   output column = parity*Cout + channel  (lane-dense, 256 lanes)
#   BN stats per channel, reduced over rows AND the 4 parity column blocks.
# --------------------------------------------------------------------------- #
def _deconv_bn_relu_kernel(p_ref, w_ref, b_ref, g_ref, bt_ref, o_ref,
                           *, n_par, cout, eps):
    acc = jnp.dot(p_ref[...], w_ref[...], preferred_element_type=jnp.float32)
    acc = acc + b_ref[...]
    R = acc.shape[0]
    blocks = [acc[:, i * cout:(i + 1) * cout] for i in range(n_par)]
    n = float(n_par * R)
    mean = sum([jnp.sum(blk, axis=0, keepdims=True) for blk in blocks]) / n
    var = sum([jnp.sum((blk - mean) ** 2, axis=0, keepdims=True)
               for blk in blocks]) / n
    scale_c = g_ref[...] * jax.lax.rsqrt(var + eps)        # (1, cout)
    shift_c = bt_ref[...] - mean * scale_c                 # (1, cout)
    scale = jnp.concatenate([scale_c] * n_par, axis=1)     # (1, n_par*cout)
    shift = jnp.concatenate([shift_c] * n_par, axis=1)
    o_ref[...] = jnp.maximum(acc * scale + shift, 0.0).astype(o_ref.dtype)


def deconv1_bn_relu(patches, p):
    R, K = patches.shape            # (B*49, 576)
    N = p["Wu1"].shape[1]           # 256
    C = p["g3"].shape[1]            # 64
    return pl.pallas_call(
        functools.partial(_deconv_bn_relu_kernel, n_par=N // C, cout=C, eps=_BN_EPS),
        out_shape=jax.ShapeDtypeStruct((R, N), jnp.float32),
        grid=(1,),
        in_specs=[_full_spec((R, K)), _full_spec((K, N)), _full_spec((1, N)),
                  _full_spec((1, C)), _full_spec((1, C))],
        out_specs=_full_spec((R, N)),
    )(patches, p["Wu1"], p["bu1"], p["g3"], p["bt3"])


# --------------------------------------------------------------------------- #
# Kernel C: fused  ConvTranspose2d(64->1) + Tanh
#   Cout=1, so the matmul is transposed to keep the output lane-dense:
#   (4 parities, 9*Cin) @ (9*Cin, B*H*W)  ->  (4, B*H*W)
# --------------------------------------------------------------------------- #
def _deconv_tanh_kernel(w_ref, p_ref, b_ref, o_ref):
    acc = jnp.dot(w_ref[...], p_ref[...], preferred_element_type=jnp.float32)
    o_ref[...] = jnp.tanh(acc + b_ref[...]).astype(o_ref.dtype)


def deconv2_tanh(patches_t, p):
    K, R = patches_t.shape          # (576, B*196)
    M = p["Wu2T"].shape[0]          # 4
    return pl.pallas_call(
        _deconv_tanh_kernel,
        out_shape=jax.ShapeDtypeStruct((M, R), jnp.float32),
        grid=(1,),
        in_specs=[_full_spec((M, K)), _full_spec((K, R)), _full_spec((1, 1))],
        out_specs=_full_spec((M, R)),
    )(p["Wu2T"], patches_t, p["bu2"])


# --------------------------------------------------------------------------- #
# XLA layout glue (tiny tensors; fused under jax.jit)
# --------------------------------------------------------------------------- #
def _union_patches(x_pad, H, W):
    """(B, H+2, W+2, C) -> (B*H*W, 9*C); column = (oy*3+ox)*C + c."""
    B, _, _, C = x_pad.shape
    wins = [x_pad[:, oy:oy + H, ox:ox + W, :] for oy in range(3) for ox in range(3)]
    cols = jnp.stack(wins, axis=3)                    # (B, H, W, 9, C)
    return cols.reshape(B * H * W, 9 * C)


def _union_patches_t(x_pad, H, W):
    """(B, H+2, W+2, C) -> (9*C, B*H*W); row = (oy*3+ox)*C + c."""
    B, _, _, C = x_pad.shape
    wins = [x_pad[:, oy:oy + H, ox:ox + W, :] for oy in range(3) for ox in range(3)]
    cols = jnp.stack(wins, axis=0)                    # (9, B, H, W, C)
    return jnp.transpose(cols, (0, 4, 1, 2, 3)).reshape(9 * C, B * H * W)


@jax.jit
def generator_forward(x, p):
    B = x.shape[0]

    # Fused linear stack; W2 columns were pre-permuted so output is NHWC-flat.
    y = linear_stack(x, p)                                     # (B, 3136)
    y = y.reshape(B, 7, 7, 64)                                 # NHWC, free reshape
    y = jnp.pad(y, ((0, 0), (1, 1), (1, 1), (0, 0)))           # (B, 9, 9, 64)

    # Deconv1 (+BN+ReLU) via parity-folded union matmul.
    pats1 = _union_patches(y, 7, 7)                            # (B*49, 576)
    z = deconv1_bn_relu(pats1, p)                              # (B*49, 4*64)

    # Interleave parities -> NHWC 14x14, pad for deconv2.
    z = z.reshape(B, 7, 7, 2, 2, 64)                           # [b,m,n,py,px,c]
    z = jnp.transpose(z, (0, 1, 3, 2, 4, 5)).reshape(B, 14, 14, 64)
    z = jnp.pad(z, ((0, 0), (1, 1), (1, 1), (0, 0)))           # (B, 16, 16, 64)

    # Deconv2 (+Tanh), transposed so the kernel's store is lane-dense.
    pats2 = _union_patches_t(z, 14, 14)                        # (576, B*196)
    o = deconv2_tanh(pats2, p)                                 # (4, B*196)

    # Interleave parities -> (B, 1, 28, 28) NCHW.
    o = o.reshape(2, 2, B, 14, 14)                             # [py,px,b,m,n]
    o = jnp.transpose(o, (2, 3, 0, 4, 1)).reshape(B, 28, 28)
    return o[:, None, :, :]


# --------------------------------------------------------------------------- #
# Parameters (PyTorch-equivalent init) + one-time kernel-ready preprocessing
# --------------------------------------------------------------------------- #
def init_params(key, noise_dim):
    ks = jax.random.split(key, 6)
    f32 = jnp.float32

    # Linear: N(0, 0.01), bias 0.   (stored as (in, out))
    W1 = 0.01 * jax.random.normal(ks[0], (noise_dim, 512), f32)
    b1 = jnp.zeros((512,), f32)
    W2 = 0.01 * jax.random.normal(ks[1], (512, 49 * 64), f32)
    b2 = jnp.zeros((49 * 64,), f32)

    # BatchNorm: gamma ~ N(1, 0.02), beta 0
    g1 = 1.0 + 0.02 * jax.random.normal(ks[2], (512,), f32)
    bt1 = jnp.zeros((512,), f32)
    g2 = 1.0 + 0.02 * jax.random.normal(ks[3], (49 * 64,), f32)
    bt2 = jnp.zeros((49 * 64,), f32)
    g3 = 1.0 + 0.02 * jax.random.normal(ks[4], (64,), f32)
    bt3 = jnp.zeros((64,), f32)

    # ConvTranspose2d weights (PyTorch shape (Cin, Cout, kH, kW)), Xavier-normal, bias 0
    kc = jax.random.split(ks[5], 2)
    std1 = (2.0 / (64 * 16 + 64 * 16)) ** 0.5
    wct1 = std1 * jax.random.normal(kc[0], (64, 64, 4, 4), f32)
    bct1 = jnp.zeros((64,), f32)
    std2 = (2.0 / (1 * 16 + 64 * 16)) ** 0.5
    wct2 = std2 * jax.random.normal(kc[1], (64, 1, 4, 4), f32)
    bct2 = jnp.zeros((1,), f32)

    return dict(W1=W1, b1=b1, W2=W2, b2=b2,
                g1=g1, bt1=bt1, g2=g2, bt2=bt2, g3=g3, bt3=bt3,
                wct1=wct1, bct1=bct1, wct2=wct2, bct2=bct2)


def _deconv_union_weight(w_ct):
    """ConvTranspose2d weight (Cin,Cout,4,4), stride 2, pad 1 -> (9*Cin, 4*Cout).

    Output column p*Cout+co holds parity p = 2*py+px of the output grid; row
    (oy*3+ox)*Cin+ci holds the tap at window offset (oy,ox) of the 3x3 union
    window over the 1-padded input (unused taps of a parity are zero)."""
    Cin, Cout, K, _ = w_ct.shape
    assert K == 4
    KIDX = ((3, 1), (2, 0))   # kernel index used by (parity, tap)
    wu = jnp.zeros((3, 3, Cin, 4, Cout), w_ct.dtype)
    for py in range(2):
        for px in range(2):
            par = 2 * py + px
            for dy in range(2):
                for dx in range(2):
                    wu = wu.at[py + dy, px + dx, :, par, :].set(
                        w_ct[:, :, KIDX[py][dy], KIDX[px][dx]])
    return wu.reshape(9 * Cin, 4 * Cout)


def prepare_params(raw):
    """One-time transform of PyTorch-layout params into kernel-ready tensors."""
    f32 = jnp.float32

    def nhwc_perm(v):   # column order c*49+hw  ->  hw*64+c
        return v.reshape(64, 49).T.reshape(49 * 64)

    W2p = raw["W2"].reshape(-1, 64, 49).transpose(0, 2, 1).reshape(-1, 49 * 64)

    return {
        "W1": raw["W1"].astype(f32),
        "b1": raw["b1"].reshape(1, -1).astype(f32),
        "g1": raw["g1"].reshape(1, -1).astype(f32),
        "bt1": raw["bt1"].reshape(1, -1).astype(f32),
        "W2p": W2p.astype(f32),
        "b2p": nhwc_perm(raw["b2"]).reshape(1, -1).astype(f32),
        "g2p": nhwc_perm(raw["g2"]).reshape(1, -1).astype(f32),
        "bt2p": nhwc_perm(raw["bt2"]).reshape(1, -1).astype(f32),
        "Wu1": _deconv_union_weight(raw["wct1"]).astype(f32),          # (576, 256)
        "bu1": jnp.tile(raw["bct1"], 4).reshape(1, -1).astype(f32),    # (1, 256)
        "g3": raw["g3"].reshape(1, -1).astype(f32),
        "bt3": raw["bt3"].reshape(1, -1).astype(f32),
        "Wu2T": _deconv_union_weight(raw["wct2"]).T.astype(f32),       # (4, 576)
        "bu2": raw["bct2"].reshape(1, 1).astype(f32),
    }


if __name__ == "__main__":
    key = jax.random.PRNGKey(0)
    k_param, k_input = jax.random.split(key)

    B, noise_dim = 2, 32
    raw = init_params(k_param, noise_dim)
    params = prepare_params(raw)
    x = jax.random.normal(k_input, (B, noise_dim), jnp.float32)

    out = generator_forward(x, params)
    out = jax.block_until_ready(out)

    assert out.shape == (B, 1, 28, 28), out.shape
    assert bool(jnp.all(jnp.isfinite(out)))
    assert bool(jnp.all(jnp.abs(out) <= 1.0 + 1e-6))  # tanh range
    print("KERNEL_OK")
</pallas_src>

<mosaic_0001>
module attributes {stable_mosaic.version = 11 : i64} {
  func.func @_linear_stack_kernel(%arg0: i32, %arg1: memref<2x32xf32, #tpu.memory_space<vmem>>, %arg2: memref<32x512xf32, #tpu.memory_space<vmem>>, %arg3: memref<1x512xf32, #tpu.memory_space<vmem>>, %arg4: memref<1x512xf32, #tpu.memory_space<vmem>>, %arg5: memref<1x512xf32, #tpu.memory_space<vmem>>, %arg6: memref<512x3136xf32, #tpu.memory_space<vmem>>, %arg7: memref<1x3136xf32, #tpu.memory_space<vmem>>, %arg8: memref<1x3136xf32, #tpu.memory_space<vmem>>, %arg9: memref<1x3136xf32, #tpu.memory_space<vmem>>, %arg10: memref<2x3136xf32, #tpu.memory_space<vmem>>) attributes {dimension_semantics = [#tpu.dimension_semantics<arbitrary>], iteration_bounds = array<i64: 1>, scalar_prefetch = 0 : i64, scratch_operands = 0 : i64, tpu.core_type = #tpu.core_type<tc>, window_params = [{pipeline_mode = #tpu.pipeline_mode<synchronous>, transform_indices = @transform_0, window_bounds = array<i64: 2, 32>}, {pipeline_mode = #tpu.pipeline_mode<synchronous>, transform_indices = @transform_1, window_bounds = array<i64: 32, 512>}, {pipeline_mode = #tpu.pipeline_mode<synchronous>, transform_indices = @transform_2, window_bounds = array<i64: 1, 512>}, {pipeline_mode = #tpu.pipeline_mode<synchronous>, transform_indices = @transform_3, window_bounds = array<i64: 1, 512>}, {pipeline_mode = #tpu.pipeline_mode<synchronous>, transform_indices = @transform_4, window_bounds = array<i64: 1, 512>}, {pipeline_mode = #tpu.pipeline_mode<synchronous>, transform_indices = @transform_5, window_bounds = array<i64: 512, 3136>}, {pipeline_mode = #tpu.pipeline_mode<synchronous>, transform_indices = @transform_6, window_bounds = array<i64: 1, 3136>}, {pipeline_mode = #tpu.pipeline_mode<synchronous>, transform_indices = @transform_7, window_bounds = array<i64: 1, 3136>}, {pipeline_mode = #tpu.pipeline_mode<synchronous>, transform_indices = @transform_8, window_bounds = array<i64: 1, 3136>}, {pipeline_mode = #tpu.pipeline_mode<synchronous>, transform_indices = @transform_9, window_bounds = array<i64: 2, 3136>}]} {
    %c0 = arith.constant 0 : index
    %c0_0 = arith.constant 0 : index
    %0 = vector.load %arg1[%c0, %c0_0] : memref<2x32xf32, #tpu.memory_space<vmem>>, vector<2x32xf32>
    %c0_1 = arith.constant 0 : index
    %c0_2 = arith.constant 0 : index
    %1 = vector.load %arg2[%c0_1, %c0_2] : memref<32x512xf32, #tpu.memory_space<vmem>>, vector<32x512xf32>
    %cst = arith.constant dense<0.000000e+00> : vector<2x512xf32>
    %2 = tpu.matmul %0, %1, %cst {dimension_numbers = #tpu.dot_dimension_numbers<[1], [0], [0], [1], [0, 0, 1, 1], [], []>} : vector<2x32xf32>, vector<32x512xf32>, vector<2x512xf32> -> vector<2x512xf32>
    %c0_3 = arith.constant 0 : index
    %c0_4 = arith.constant 0 : index
    %3 = vector.load %arg3[%c0_3, %c0_4] : memref<1x512xf32, #tpu.memory_space<vmem>>, vector<1x512xf32>
    %4 = vector.broadcast %3 : vector<1x512xf32> to vector<2x512xf32>
    %5 = arith.addf %2, %4 : vector<2x512xf32>
    %cst_5 = arith.constant dense<0.000000e+00> : vector<512xf32>
    %6 = vector.multi_reduction <add>, %5, %cst_5 [0] : vector<2x512xf32> to vector<512xf32>
    %7 = vector.shape_cast %6 : vector<512xf32> to vector<1x512xf32>
    %cst_6 = arith.constant 2.000000e+00 : f32
    %8 = vector.broadcast %cst_6 : f32 to vector<1x512xf32>
    %9 = arith.divf %7, %8 : vector<1x512xf32>
    %10 = vector.broadcast %9 : vector<1x512xf32> to vector<2x512xf32>
    %11 = arith.subf %5, %10 : vector<2x512xf32>
    %12 = arith.mulf %11, %11 : vector<2x512xf32>
    %cst_7 = arith.constant dense<0.000000e+00> : vector<512xf32>
    %13 = vector.multi_reduction <add>, %12, %cst_7 [0] : vector<2x512xf32> to vector<512xf32>
    %14 = vector.shape_cast %13 : vector<512xf32> to vector<1x512xf32>
    %cst_8 = arith.constant 2.000000e+00 : f32
    %15 = vector.broadcast %cst_8 : f32 to vector<1x512xf32>
    %16 = arith.divf %14, %15 : vector<1x512xf32>
    %17 = vector.broadcast %9 : vector<1x512xf32> to vector<2x512xf32>
    %18 = arith.subf %5, %17 : vector<2x512xf32>
    %cst_9 = arith.constant 9.99999974E-6 : f32
    %19 = vector.broadcast %cst_9 : f32 to vector<1x512xf32>
    %20 = arith.addf %16, %19 : vector<1x512xf32>
    %21 = math.rsqrt %20 : vector<1x512xf32>
    %22 = vector.broadcast %21 : vector<1x512xf32> to vector<2x512xf32>
    %23 = arith.mulf %18, %22 : vector<2x512xf32>
    %c0_10 = arith.constant 0 : index
    %c0_11 = arith.constant 0 : index
    %24 = vector.load %arg4[%c0_10, %c0_11] : memref<1x512xf32, #tpu.memory_space<vmem>>, vector<1x512xf32>
    %25 = vector.broadcast %24 : vector<1x512xf32> to vector<2x512xf32>
    %26 = arith.mulf %23, %25 : vector<2x512xf32>
    %c0_12 = arith.constant 0 : index
    %c0_13 = arith.constant 0 : index
    %27 = vector.load %arg5[%c0_12, %c0_13] : memref<1x512xf32, #tpu.memory_space<vmem>>, vector<1x512xf32>
    %28 = vector.broadcast %27 : vector<1x512xf32> to vector<2x512xf32>
    %29 = arith.addf %26, %28 : vector<2x512xf32>
    %cst_14 = arith.constant 0.000000e+00 : f32
    %30 = vector.broadcast %cst_14 : f32 to vector<2x512xf32>
    %31 = arith.maximumf %29, %30 : vector<2x512xf32>
    %c0_15 = arith.constant 0 : index
    %c0_16 = arith.constant 0 : index
    %32 = vector.load %arg6[%c0_15, %c0_16] : memref<512x3136xf32, #tpu.memory_space<vmem>>, vector<512x3136xf32>
    %cst_17 = arith.constant dense<0.000000e+00> : vector<2x3136xf32>
    %33 = tpu.matmul %31, %32, %cst_17 {dimension_numbers = #tpu.dot_dimension_numbers<[1], [0], [0], [1], [0, 0, 1, 1], [], []>} : vector<2x512xf32>, vector<512x3136xf32>, vector<2x3136xf32> -> vector<2x3136xf32>
    %c0_18 = arith.constant 0 : index
    %c0_19 = arith.constant 0 : index
    %34 = vector.load %arg7[%c0_18, %c0_19] : memref<1x3136xf32, #tpu.memory_space<vmem>>, vector<1x3136xf32>
    %35 = vector.broadcast %34 : vector<1x3136xf32> to vector<2x3136xf32>
    %36 = arith.addf %33, %35 : vector<2x3136xf32>
    %cst_20 = arith.constant dense<0.000000e+00> : vector<3136xf32>
    %37 = vector.multi_reduction <add>, %36, %cst_20 [0] : vector<2x3136xf32> to vector<3136xf32>
    %38 = vector.shape_cast %37 : vector<3136xf32> to vector<1x3136xf32>
    %cst_21 = arith.constant 2.000000e+00 : f32
    %39 = vector.broadcast %cst_21 : f32 to vector<1x3136xf32>
    %40 = arith.divf %38, %39 : vector<1x3136xf32>
    %41 = vector.broadcast %40 : vector<1x3136xf32> to vector<2x3136xf32>
    %42 = arith.subf %36, %41 : vector<2x3136xf32>
    %43 = arith.mulf %42, %42 : vector<2x3136xf32>
    %cst_22 = arith.constant dense<0.000000e+00> : vector<3136xf32>
    %44 = vector.multi_reduction <add>, %43, %cst_22 [0] : vector<2x3136xf32> to vector<3136xf32>
    %45 = vector.shape_cast %44 : vector<3136xf32> to vector<1x3136xf32>
    %cst_23 = arith.constant 2.000000e+00 : f32
    %46 = vector.broadcast %cst_23 : f32 to vector<1x3136xf32>
    %47 = arith.divf %45, %46 : vector<1x3136xf32>
    %48 = vector.broadcast %40 : vector<1x3136xf32> to vector<2x3136xf32>
    %49 = arith.subf %36, %48 : vector<2x3136xf32>
    %cst_24 = arith.constant 9.99999974E-6 : f32
    %50 = vector.broadcast %cst_24 : f32 to vector<1x3136xf32>
    %51 = arith.addf %47, %50 : vector<1x3136xf32>
    %52 = math.rsqrt %51 : vector<1x3136xf32>
    %53 = vector.broadcast %52 : vector<1x3136xf32> to vector<2x3136xf32>
    %54 = arith.mulf %49, %53 : vector<2x3136xf32>
    %c0_25 = arith.constant 0 : index
    %c0_26 = arith.constant 0 : index
    %55 = vector.load %arg8[%c0_25, %c0_26] : memref<1x3136xf32, #tpu.memory_space<vmem>>, vector<1x3136xf32>
    %56 = vector.broadcast %55 : vector<1x3136xf32> to vector<2x3136xf32>
    %57 = arith.mulf %54, %56 : vector<2x3136xf32>
    %c0_27 = arith.constant 0 : index
    %c0_28 = arith.constant 0 : index
    %58 = vector.load %arg9[%c0_27, %c0_28] : memref<1x3136xf32, #tpu.memory_space<vmem>>, vector<1x3136xf32>
    %59 = vector.broadcast %58 : vector<1x3136xf32> to vector<2x3136xf32>
    %60 = arith.addf %57, %59 : vector<2x3136xf32>
    %cst_29 = arith.constant 0.000000e+00 : f32
    %61 = vector.broadcast %cst_29 : f32 to vector<2x3136xf32>
    %62 = arith.maximumf %60, %61 : vector<2x3136xf32>
    %c0_30 = arith.constant 0 : index
    %c0_31 = arith.constant 0 : index
    %63 = vector.load %arg10[%c0_30, %c0_31] : memref<2x3136xf32, #tpu.memory_space<vmem>>, vector<2x3136xf32>
    tpu.vector_store %arg10[%c0_30, %c0_31], %62 {strides = array<i32>} : memref<2x3136xf32, #tpu.memory_space<vmem>>, vector<2x3136xf32>,
    return
  }
  func.func @transform_0(%arg0: i32) -> (i32, i32) {
    %c0_i32 = arith.constant 0 : i32
    %c0_i32_0 = arith.constant 0 : i32
    %c0_i32_1 = arith.constant 0 : i32
    return %c0_i32, %c0_i32_0 : i32, i32
  }
  func.func @transform_1(%arg0: i32) -> (i32, i32) {
    %c0_i32 = arith.constant 0 : i32
    %c0_i32_0 = arith.constant 0 : i32
    %c0_i32_1 = arith.constant 0 : i32
    return %c0_i32, %c0_i32_0 : i32, i32
  }
  func.func @transform_2(%arg0: i32) -> (i32, i32) {
    %c0_i32 = arith.constant 0 : i32
    %c0_i32_0 = arith.constant 0 : i32
    %c0_i32_1 = arith.constant 0 : i32
    return %c0_i32, %c0_i32_0 : i32, i32
  }
  func.func @transform_3(%arg0: i32) -> (i32, i32) {
    %c0_i32 = arith.constant 0 : i32
    %c0_i32_0 = arith.constant 0 : i32
    %c0_i32_1 = arith.constant 0 : i32
    return %c0_i32, %c0_i32_0 : i32, i32
  }
  func.func @transform_4(%arg0: i32) -> (i32, i32) {
    %c0_i32 = arith.constant 0 : i32
    %c0_i32_0 = arith.constant 0 : i32
    %c0_i32_1 = arith.constant 0 : i32
    return %c0_i32, %c0_i32_0 : i32, i32
  }
  func.func @transform_5(%arg0: i32) -> (i32, i32) {
    %c0_i32 = arith.constant 0 : i32
    %c0_i32_0 = arith.constant 0 : i32
    %c0_i32_1 = arith.constant 0 : i32
    return %c0_i32, %c0_i32_0 : i32, i32
  }
  func.func @transform_6(%arg0: i32) -> (i32, i32) {
    %c0_i32 = arith.constant 0 : i32
    %c0_i32_0 = arith.constant 0 : i32
    %c0_i32_1 = arith.constant 0 : i32
    return %c0_i32, %c0_i32_0 : i32, i32
  }
  func.func @transform_7(%arg0: i32) -> (i32, i32) {
    %c0_i32 = arith.constant 0 : i32
    %c0_i32_0 = arith.constant 0 : i32
    %c0_i32_1 = arith.constant 0 : i32
    return %c0_i32, %c0_i32_0 : i32, i32
  }
  func.func @transform_8(%arg0: i32) -> (i32, i32) {
    %c0_i32 = arith.constant 0 : i32
    %c0_i32_0 = arith.constant 0 : i32
    %c0_i32_1 = arith.constant 0 : i32
    return %c0_i32, %c0_i32_0 : i32, i32
  }
  func.func @transform_9(%arg0: i32) -> (i32, i32) {
    %c0_i32 = arith.constant 0 : i32
    %c0_i32_0 = arith.constant 0 : i32
    %c0_i32_1 = arith.constant 0 : i32
    return %c0_i32, %c0_i32_0 : i32, i32
  }
}

module attributes {stable_mosaic.version = 11 : i64} {
  func.func @_deconv_bn_relu_kernel(%arg0: i32, %arg1: memref<98x576xf32, #tpu.memory_space<vmem>>, %arg2: memref<576x256xf32, #tpu.memory_space<vmem>>, %arg3: memref<1x256xf32, #tpu.memory_space<vmem>>, %arg4: memref<1x64xf32, #tpu.memory_space<vmem>>, %arg5: memref<1x64xf32, #tpu.memory_space<vmem>>, %arg6: memref<98x256xf32, #tpu.memory_space<vmem>>) attributes {dimension_semantics = [#tpu.dimension_semantics<arbitrary>], iteration_bounds = array<i64: 1>, scalar_prefetch = 0 : i64, scratch_operands = 0 : i64, tpu.core_type = #tpu.core_type<tc>, window_params = [{pipeline_mode = #tpu.pipeline_mode<synchronous>, transform_indices = @transform_0, window_bounds = array<i64: 98, 576>}, {pipeline_mode = #tpu.pipeline_mode<synchronous>, transform_indices = @transform_1, window_bounds = array<i64: 576, 256>}, {pipeline_mode = #tpu.pipeline_mode<synchronous>, transform_indices = @transform_2, window_bounds = array<i64: 1, 256>}, {pipeline_mode = #tpu.pipeline_mode<synchronous>, transform_indices = @transform_3, window_bounds = array<i64: 1, 64>}, {pipeline_mode = #tpu.pipeline_mode<synchronous>, transform_indices = @transform_4, window_bounds = array<i64: 1, 64>}, {pipeline_mode = #tpu.pipeline_mode<synchronous>, transform_indices = @transform_5, window_bounds = array<i64: 98, 256>}]} {
    %c0 = arith.constant 0 : index
    %c0_0 = arith.constant 0 : index
    %0 = vector.load %arg1[%c0, %c0_0] : memref<98x576xf32, #tpu.memory_space<vmem>>, vector<98x576xf32>
    %c0_1 = arith.constant 0 : index
    %c0_2 = arith.constant 0 : index
    %1 = vector.load %arg2[%c0_1, %c0_2] : memref<576x256xf32, #tpu.memory_space<vmem>>, vector<576x256xf32>
    %cst = arith.constant dense<0.000000e+00> : vector<98x256xf32>
    %2 = tpu.matmul %0, %1, %cst {dimension_numbers = #tpu.dot_dimension_numbers<[1], [0], [0], [1], [0, 0, 1, 1], [], []>} : vector<98x576xf32>, vector<576x256xf32>, vector<98x256xf32> -> vector<98x256xf32>
    %c0_3 = arith.constant 0 : index
    %c0_4 = arith.constant 0 : index
    %3 = vector.load %arg3[%c0_3, %c0_4] : memref<1x256xf32, #tpu.memory_space<vmem>>, vector<1x256xf32>
    %4 = vector.broadcast %3 : vector<1x256xf32> to vector<98x256xf32>
    %5 = arith.addf %2, %4 : vector<98x256xf32>
    %6 = vector.extract_strided_slice %5 {offsets = [0, 0], sizes = [98, 64], strides = [1, 1]} : vector<98x256xf32> to vector<98x64xf32>
    %7 = vector.extract_strided_slice %5 {offsets = [0, 64], sizes = [98, 64], strides = [1, 1]} : vector<98x256xf32> to vector<98x64xf32>
    %8 = vector.extract_strided_slice %5 {offsets = [0, 128], sizes = [98, 64], strides = [1, 1]} : vector<98x256xf32> to vector<98x64xf32>
    %9 = vector.extract_strided_slice %5 {offsets = [0, 192], sizes = [98, 64], strides = [1, 1]} : vector<98x256xf32> to vector<98x64xf32>
    %cst_5 = arith.constant dense<0.000000e+00> : vector<64xf32>
    %10 = vector.multi_reduction <add>, %6, %cst_5 [0] : vector<98x64xf32> to vector<64xf32>
    %11 = vector.shape_cast %10 : vector<64xf32> to vector<1x64xf32>
    %cst_6 = arith.constant dense<0.000000e+00> : vector<64xf32>
    %12 = vector.multi_reduction <add>, %7, %cst_6 [0] : vector<98x64xf32> to vector<64xf32>
    %13 = vector.shape_cast %12 : vector<64xf32> to vector<1x64xf32>
    %cst_7 = arith.constant dense<0.000000e+00> : vector<64xf32>
    %14 = vector.multi_reduction <add>, %8, %cst_7 [0] : vector<98x64xf32> to vector<64xf32>
    %15 = vector.shape_cast %14 : vector<64xf32> to vector<1x64xf32>
    %cst_8 = arith.constant dense<0.000000e+00> : vector<64xf32>
    %16 = vector.multi_reduction <add>, %9, %cst_8 [0] : vector<98x64xf32> to vector<64xf32>
    %17 = vector.shape_cast %16 : vector<64xf32> to vector<1x64xf32>
    %cst_9 = arith.constant 0.000000e+00 : f32
    %18 = vector.broadcast %cst_9 : f32 to vector<1x64xf32>
    %19 = arith.addf %18, %11 : vector<1x64xf32>
    %20 = arith.addf %19, %13 : vector<1x64xf32>
    %21 = arith.addf %20, %15 : vector<1x64xf32>
    %22 = arith.addf %21, %17 : vector<1x64xf32>
    %cst_10 = arith.constant 3.920000e+02 : f32
    %23 = vector.broadcast %cst_10 : f32 to vector<1x64xf32>
    %24 = arith.divf %22, %23 : vector<1x64xf32>
    %25 = vector.broadcast %24 : vector<1x64xf32> to vector<98x64xf32>
    %26 = arith.subf %6, %25 : vector<98x64xf32>
    %27 = arith.mulf %26, %26 : vector<98x64xf32>
    %cst_11 = arith.constant dense<0.000000e+00> : vector<64xf32>
    %28 = vector.multi_reduction <add>, %27, %cst_11 [0] : vector<98x64xf32> to vector<64xf32>
    %29 = vector.shape_cast %28 : vector<64xf32> to vector<1x64xf32>
    %30 = vector.broadcast %24 : vector<1x64xf32> to vector<98x64xf32>
    %31 = arith.subf %7, %30 : vector<98x64xf32>
    %32 = arith.mulf %31, %31 : vector<98x64xf32>
    %cst_12 = arith.constant dense<0.000000e+00> : vector<64xf32>
    %33 = vector.multi_reduction <add>, %32, %cst_12 [0] : vector<98x64xf32> to vector<64xf32>
    %34 = vector.shape_cast %33 : vector<64xf32> to vector<1x64xf32>
    %35 = vector.broadcast %24 : vector<1x64xf32> to vector<98x64xf32>
    %36 = arith.subf %8, %35 : vector<98x64xf32>
    %37 = arith.mulf %36, %36 : vector<98x64xf32>
    %cst_13 = arith.constant dense<0.000000e+00> : vector<64xf32>
    %38 = vector.multi_reduction <add>, %37, %cst_13 [0] : vector<98x64xf32> to vector<64xf32>
    %39 = vector.shape_cast %38 : vector<64xf32> to vector<1x64xf32>
    %40 = vector.broadcast %24 : vector<1x64xf32> to vector<98x64xf32>
    %41 = arith.subf %9, %40 : vector<98x64xf32>
    %42 = arith.mulf %41, %41 : vector<98x64xf32>
    %cst_14 = arith.constant dense<0.000000e+00> : vector<64xf32>
    %43 = vector.multi_reduction <add>, %42, %cst_14 [0] : vector<98x64xf32> to vector<64xf32>
    %44 = vector.shape_cast %43 : vector<64xf32> to vector<1x64xf32>
    %cst_15 = arith.constant 0.000000e+00 : f32
    %45 = vector.broadcast %cst_15 : f32 to vector<1x64xf32>
    %46 = arith.addf %45, %29 : vector<1x64xf32>
    %47 = arith.addf %46, %34 : vector<1x64xf32>
    %48 = arith.addf %47, %39 : vector<1x64xf32>
    %49 = arith.addf %48, %44 : vector<1x64xf32>
    %cst_16 = arith.constant 3.920000e+02 : f32
    %50 = vector.broadcast %cst_16 : f32 to vector<1x64xf32>
    %51 = arith.divf %49, %50 : vector<1x64xf32>
    %c0_17 = arith.constant 0 : index
    %c0_18 = arith.constant 0 : index
    %52 = vector.load %arg4[%c0_17, %c0_18] : memref<1x64xf32, #tpu.memory_space<vmem>>, vector<1x64xf32>
    %cst_19 = arith.constant 9.99999974E-6 : f32
    %53 = vector.broadcast %cst_19 : f32 to vector<1x64xf32>
    %54 = arith.addf %51, %53 : vector<1x64xf32>
    %55 = math.rsqrt %54 : vector<1x64xf32>
    %56 = arith.mulf %52, %55 : vector<1x64xf32>
    %c0_20 = arith.constant 0 : index
    %c0_21 = arith.constant 0 : index
    %57 = vector.load %arg5[%c0_20, %c0_21] : memref<1x64xf32, #tpu.memory_space<vmem>>, vector<1x64xf32>
    %58 = arith.mulf %24, %56 : vector<1x64xf32>
    %59 = arith.subf %57, %58 : vector<1x64xf32>
    %60 = tpu.concatenate %56, %56, %56, %56 in 1 : vector<1x64xf32>, vector<1x64xf32>, vector<1x64xf32>, vector<1x64xf32> -> vector<1x256xf32>
    %61 = tpu.concatenate %59, %59, %59, %59 in 1 : vector<1x64xf32>, vector<1x64xf32>, vector<1x64xf32>, vector<1x64xf32> -> vector<1x256xf32>
    %62 = vector.broadcast %60 : vector<1x256xf32> to vector<98x256xf32>
    %63 = arith.mulf %5, %62 : vector<98x256xf32>
    %64 = vector.broadcast %61 : vector<1x256xf32> to vector<98x256xf32>
    %65 = arith.addf %63, %64 : vector<98x256xf32>
    %cst_22 = arith.constant 0.000000e+00 : f32
    %66 = vector.broadcast %cst_22 : f32 to vector<98x256xf32>
    %67 = arith.maximumf %65, %66 : vector<98x256xf32>
    %c0_23 = arith.constant 0 : index
    %c0_24 = arith.constant 0 : index
    %68 = vector.load %arg6[%c0_23, %c0_24] : memref<98x256xf32, #tpu.memory_space<vmem>>, vector<98x256xf32>
    tpu.vector_store %arg6[%c0_23, %c0_24], %67 {strides = array<i32>} : memref<98x256xf32, #tpu.memory_space<vmem>>, vector<98x256xf32>,
    return
  }
  func.func @transform_0(%arg0: i32) -> (i32, i32) {
    %c0_i32 = arith.constant 0 : i32
    %c0_i32_0 = arith.constant 0 : i32
    %c0_i32_1 = arith.constant 0 : i32
    return %c0_i32, %c0_i32_0 : i32, i32
  }
  func.func @transform_1(%arg0: i32) -> (i32, i32) {
    %c0_i32 = arith.constant 0 : i32
    %c0_i32_0 = arith.constant 0 : i32
    %c0_i32_1 = arith.constant 0 : i32
    return %c0_i32, %c0_i32_0 : i32, i32
  }
  func.func @transform_2(%arg0: i32) -> (i32, i32) {
    %c0_i32 = arith.constant 0 : i32
    %c0_i32_0 = arith.constant 0 : i32
    %c0_i32_1 = arith.constant 0 : i32
    return %c0_i32, %c0_i32_0 : i32, i32
  }
  func.func @transform_3(%arg0: i32) -> (i32, i32) {
    %c0_i32 = arith.constant 0 : i32
    %c0_i32_0 = arith.constant 0 : i32
    %c0_i32_1 = arith.constant 0 : i32
    return %c0_i32, %c0_i32_0 : i32, i32
  }
  func.func @transform_4(%arg0: i32) -> (i32, i32) {
    %c0_i32 = arith.constant 0 : i32
    %c0_i32_0 = arith.constant 0 : i32
    %c0_i32_1 = arith.constant 0 : i32
    return %c0_i32, %c0_i32_0 : i32, i32
  }
  func.func @transform_5(%arg0: i32) -> (i32, i32) {
    %c0_i32 = arith.constant 0 : i32
    %c0_i32_0 = arith.constant 0 : i32
    %c0_i32_1 = arith.constant 0 : i32
    return %c0_i32, %c0_i32_0 : i32, i32
  }
}

module attributes {stable_mosaic.version = 11 : i64} {
  func.func @_deconv_tanh_kernel(%arg0: i32, %arg1: memref<4x576xf32, #tpu.memory_space<vmem>>, %arg2: memref<576x392xf32, #tpu.memory_space<vmem>>, %arg3: memref<1x1xf32, #tpu.memory_space<vmem>>, %arg4: memref<4x392xf32, #tpu.memory_space<vmem>>) attributes {dimension_semantics = [#tpu.dimension_semantics<arbitrary>], iteration_bounds = array<i64: 1>, scalar_prefetch = 0 : i64, scratch_operands = 0 : i64, tpu.core_type = #tpu.core_type<tc>, window_params = [{pipeline_mode = #tpu.pipeline_mode<synchronous>, transform_indices = @transform_0, window_bounds = array<i64: 4, 576>}, {pipeline_mode = #tpu.pipeline_mode<synchronous>, transform_indices = @transform_1, window_bounds = array<i64: 576, 392>}, {pipeline_mode = #tpu.pipeline_mode<synchronous>, transform_indices = @transform_2, window_bounds = array<i64: 1, 1>}, {pipeline_mode = #tpu.pipeline_mode<synchronous>, transform_indices = @transform_3, window_bounds = array<i64: 4, 392>}]} {
    %c0 = arith.constant 0 : index
    %c0_0 = arith.constant 0 : index
    %0 = vector.load %arg1[%c0, %c0_0] : memref<4x576xf32, #tpu.memory_space<vmem>>, vector<4x576xf32>
    %c0_1 = arith.constant 0 : index
    %c0_2 = arith.constant 0 : index
    %1 = vector.load %arg2[%c0_1, %c0_2] : memref<576x392xf32, #tpu.memory_space<vmem>>, vector<576x392xf32>
    %cst = arith.constant dense<0.000000e+00> : vector<4x392xf32>
    %2 = tpu.matmul %0, %1, %cst {dimension_numbers = #tpu.dot_dimension_numbers<[1], [0], [0], [1], [0, 0, 1, 1], [], []>} : vector<4x576xf32>, vector<576x392xf32>, vector<4x392xf32> -> vector<4x392xf32>
    %c0_3 = arith.constant 0 : index
    %c0_4 = arith.constant 0 : index
    %3 = vector.load %arg3[%c0_3, %c0_4] : memref<1x1xf32, #tpu.memory_space<vmem>>, vector<1x1xf32>
    %4 = vector.broadcast %3 : vector<1x1xf32> to vector<4x392xf32>
    %5 = arith.addf %2, %4 : vector<4x392xf32>
    %6 = math.tanh %5 : vector<4x392xf32>
    %c0_5 = arith.constant 0 : index
    %c0_6 = arith.constant 0 : index
    %7 = vector.load %arg4[%c0_5, %c0_6] : memref<4x392xf32, #tpu.memory_space<vmem>>, vector<4x392xf32>
    tpu.vector_store %arg4[%c0_5, %c0_6], %6 {strides = array<i32>} : memref<4x392xf32, #tpu.memory_space<vmem>>, vector<4x392xf32>,
    return
  }
  func.func @transform_0(%arg0: i32) -> (i32, i32) {
    %c0_i32 = arith.constant 0 : i32
    %c0_i32_0 = arith.constant 0 : i32
    %c0_i32_1 = arith.constant 0 : i32
    return %c0_i32, %c0_i32_0 : i32, i32
  }
  func.func @transform_1(%arg0: i32) -> (i32, i32) {
    %c0_i32 = arith.constant 0 : i32
    %c0_i32_0 = arith.constant 0 : i32
    %c0_i32_1 = arith.constant 0 : i32
    return %c0_i32, %c0_i32_0 : i32, i32
  }
  func.func @transform_2(%arg0: i32) -> (i32, i32) {
    %c0_i32 = arith.constant 0 : i32
    %c0_i32_0 = arith.constant 0 : i32
    %c0_i32_1 = arith.constant 0 : i32
    return %c0_i32, %c0_i32_0 : i32, i32
  }
  func.func @transform_3(%arg0: i32) -> (i32, i32) {
    %c0_i32 = arith.constant 0 : i32
    %c0_i32_0 = arith.constant 0 : i32
    %c0_i32_1 = arith.constant 0 : i32
    return %c0_i32, %c0_i32_0 : i32, i32
  }
}

</mosaic_0001>

<bundles_post_ra>
// kernel: generator_forward.4
= control target key start
LH: loop header
LB: loop body
LE: loop exit
PB: predicated region body
PF: predicated region fallthrough
CT: control target
= control target key end

     0   :  { %vm235_vm0 = vcmask 523264   ;;  %vm867_vm1 = vcmask 1048064   ;;  %vm891_vm2 = vcmask 1041920   ;;  %vm858_vm3 = vcmask 517120   ;;  %s3050_s1 = inlined_call_operand.vmem [shape: f32[576,256], index: 1, kind: input, shape index: {}]   ;;  %s3051_s0 = inlined_call_operand.vmem [shape: f32[98,576], index: 0, kind: input, shape index: {}]   ;;  %s3052_s2 = inlined_call_operand.vmem [shape: f32[1,256], index: 2, kind: input, shape index: {}]   ;;  %s3053_s3 = inlined_call_operand.vmem [shape: f32[1,64], index: 3, kind: input, shape index: {}]   ;;  %s3054_s4 = inlined_call_operand.vmem [shape: f32[1,64], index: 4, kind: input, shape index: {}]   ;;  %s3055_s5 = inlined_call_operand.vmem [shape: f32[98,256], index: 5, kind: output, shape index: {}]  }
   0x1   :  { %v115_v0 = vld [vmem:[%s3050_s1 + $0xf0] sm:$0xff]  ;;  %v113_v1 = vld [vmem:[%s3050_s1 + $0xe0] sm:$0xff]  ;;  %v1558_v31 = vld [vmem:[%s3051_s0 + $0x118] sm:$0xff] }
   0x2   :  { %v147_v2 = vld [vmem:[%s3050_s1 + $0x1f0] sm:$0xff]  ;;  %1392 = vmatpush.msra.mxu2 %v115_v0  ;;  %275 = vmatpush.msra.mxu0 %v115_v0  ;;  %v145_v3 = vld [vmem:[%s3050_s1 + $0x1e0] sm:$0xff]  ;;  %v1590_v39 = vld [vmem:[%s3051_s0 + $0x8] sm:$0xff] }
   0x3   :  { %1408 = vmatpush.msra.mxu3 %v147_v2  ;;  %v111_v4 = vld [vmem:[%s3050_s1 + $0xd0] sm:$0xff]  ;;  %331 = vmatpush.msra.mxu1 %v147_v2  ;;  %v109_v6 = vld [vmem:[%s3050_s1 + $0xc0] sm:$0xff]  ;;  %v116_v40 = vld [vmem:[%s3050_s1 + $0xf8] sm:$0xff] }
   0x4   :  { %1393 = vmatpush.msra.mxu2 %v113_v1  ;;  %276 = vmatpush.msra.mxu0 %v113_v1  ;;  %v143_v5 = vld [vmem:[%s3050_s1 + $0x1d0] sm:$0xff]  ;;  %v141_v7 = vld [vmem:[%s3050_s1 + $0x1c0] sm:$0xff]  ;;  %v114_v45 = vld [vmem:[%s3050_s1 + $0xe8] sm:$0xff] }
   0x5   :  { %1409 = vmatpush.msra.mxu3 %v145_v3  ;;  %332 = vmatpush.msra.mxu1 %v145_v3  ;;  %v107_v8 = vld [vmem:[%s3050_s1 + $0xb0] sm:$0xff]  ;;  %v105_v10 = vld [vmem:[%s3050_s1 + $0xa0] sm:$0xff]  ;;  %v1626_v49 = vld [vmem:[%s3051_s0 + $0x28] sm:$0xff] }
   0x6   :  { %1394 = vmatpush.msra.mxu2 %v111_v4  ;;  %277 = vmatpush.msra.mxu0 %v111_v4  ;;  %v139_v9 = vld [vmem:[%s3050_s1 + $0x1b0] sm:$0xff]  ;;  %v137_v11 = vld [vmem:[%s3050_s1 + $0x1a0] sm:$0xff]  ;;  %v1631_v50 = vld [vmem:[%s3051_s0 + $0x148] sm:$0xff] }
   0x7   :  { %1410 = vmatpush.msra.mxu3 %v143_v5  ;;  %333 = vmatpush.msra.mxu1 %v143_v5  ;;  %v103_v12 = vld [vmem:[%s3050_s1 + $0x90] sm:$0xff]  ;;  %v101_v14 = vld [vmem:[%s3050_s1 + $0x80] sm:$0xff]  ;;  %v112_v51 = vld [vmem:[%s3050_s1 + $0xd8] sm:$0xff] }
   0x8   :  { %1395 = vmatpush.msra.mxu2 %v109_v6  ;;  %278 = vmatpush.msra.mxu0 %v109_v6  ;;  %v135_v13 = vld [vmem:[%s3050_s1 + $0x190] sm:$0xff]  ;;  %v133_v15 = vld [vmem:[%s3050_s1 + $0x180] sm:$0xff]  ;;  %v110_v58 = vld [vmem:[%s3050_s1 + $0xc8] sm:$0xff] }
   0x9   :  { %1411 = vmatpush.msra.mxu3 %v141_v7  ;;  %334 = vmatpush.msra.mxu1 %v141_v7  ;;  %v99_v16 = vld [vmem:[%s3050_s1 + $0x70] sm:$0xff]  ;;  %v97_v18 = vld [vmem:[%s3050_s1 + $0x60] sm:$0xff]  ;;  %v1675_v62 = vld [vmem:[%s3051_s0 + $0x168] sm:$0xff] }
   0xa   :  { %1396 = vmatpush.msra.mxu2 %v107_v8  ;;  %279 = vmatpush.msra.mxu0 %v107_v8  ;;  %v131_v17 = vld [vmem:[%s3050_s1 + $0x170] sm:$0xff]  ;;  %v129_v19 = vld [vmem:[%s3050_s1 + $0x160] sm:$0xff]  ;;  %v108_v63 = vld [vmem:[%s3050_s1 + $0xb8] sm:$0xff] }
   0xb   :  { %1412 = vmatpush.msra.mxu3 %v139_v9  ;;  %335 = vmatpush.msra.mxu1 %v139_v9  ;;  %v95_v20 = vld [vmem:[%s3050_s1 + $0x50] sm:$0xff]  ;;  %v93_v22 = vld [vmem:[%s3050_s1 + $0x40] sm:$0xff]  ;;  %v106_v4 = vld [vmem:[%s3050_s1 + $0xa8] sm:$0xff] }
   0xc   :  { %1397 = vmatpush.msra.mxu2 %v105_v10  ;;  %280 = vmatpush.msra.mxu0 %v105_v10  ;;  %v127_v21 = vld [vmem:[%s3050_s1 + $0x150] sm:$0xff]  ;;  %v125_v23 = vld [vmem:[%s3050_s1 + $0x140] sm:$0xff]  ;;  %v1707_v6 = vld [vmem:[%s3051_s0 + $0x58] sm:$0xff] }
   0xd   :  { %1413 = vmatpush.msra.mxu3 %v137_v11  ;;  %336 = vmatpush.msra.mxu1 %v137_v11  ;;  %v91_v24 = vld [vmem:[%s3050_s1 + $0x30] sm:$0xff]  ;;  %v89_v26 = vld [vmem:[%s3050_s1 + $0x20] sm:$0xff]  ;;  %v104_v8 = vld [vmem:[%s3050_s1 + $0x98] sm:$0xff] }
   0xe   :  { %1398 = vmatpush.msra.mxu2 %v103_v12  ;;  %281 = vmatpush.msra.mxu0 %v103_v12  ;;  %v123_v25 = vld [vmem:[%s3050_s1 + $0x130] sm:$0xff]  ;;  %v121_v27 = vld [vmem:[%s3050_s1 + $0x120] sm:$0xff] }
   0xf   :  { %1414 = vmatpush.msra.mxu3 %v135_v13  ;;  %337 = vmatpush.msra.mxu1 %v135_v13  ;;  %v87_v28 = vld [vmem:[%s3050_s1 + $0x10] sm:$0xff]  ;;  %v85_v30 = vld [vmem:[%s3050_s1] sm:$0xff]  ;;  %v102_v13 = vld [vmem:[%s3050_s1 + $0x88] sm:$0xff] }
  0x10   :  { %1399 = vmatpush.msra.mxu2 %v101_v14  ;;  %282 = vmatpush.msra.mxu0 %v101_v14  ;;  %v119_v29 = vld [vmem:[%s3050_s1 + $0x110] sm:$0xff]  ;;  %v117_v32 = vld [vmem:[%s3050_s1 + $0x100] sm:$0xff] }
  0x11   :  { %1415 = vmatpush.msra.mxu3 %v133_v15  ;;  %338 = vmatpush.msra.mxu1 %v133_v15  ;;  %v179_v33 = vld [vmem:[%s3050_s1 + $0x2f0] sm:$0xff]  ;;  %v1569_v34 = vld [vmem:[%s3051_s0] sm:$0xff] }
  0x12   :  { %1400 = vmatpush.msra.mxu2 %v99_v16  ;;  %283 = vmatpush.msra.mxu0 %v99_v16  ;;  %v1574_v35 = vld [vmem:[%s3051_s0 + $0x120] sm:$0xff]  ;;  %v227_v36 = vld [vmem:[%s3050_s1 + $0x470] sm:$0xff]  ;;  %v1743_v16 = vld [vmem:[%s3051_s0 + $0x78] sm:$0xff] }
  0x13   :  { %1416 = vmatpush.msra.mxu3 %v131_v17  ;;  %339 = vmatpush.msra.mxu1 %v131_v17  ;;  %v211_v37 = vld [vmem:[%s3050_s1 + $0x3f0] sm:$0xff]  ;;  %v177_v38 = vld [vmem:[%s3050_s1 + $0x2e0] sm:$0xff] }
  0x14   :  { %1401 = vmatpush.msra.mxu2 %v97_v18  ;;  %284 = vmatpush.msra.mxu0 %v97_v18  ;;  %v209_v41 = vld [vmem:[%s3050_s1 + $0x3e0] sm:$0xff]  ;;  %v175_v42 = vld [vmem:[%s3050_s1 + $0x2d0] sm:$0xff]  ;;  %v1751_v18 = vld [vmem:[%s3051_s0 + $0x198] sm:$0xff] }
  0x15   :  { %1417 = vmatpush.msra.mxu3 %v129_v19  ;;  %340 = vmatpush.msra.mxu1 %v129_v19  ;;  %v225_v43 = vld [vmem:[%s3050_s1 + $0x460] sm:$0xff]  ;;  %v207_v44 = vld [vmem:[%s3050_s1 + $0x3d0] sm:$0xff]  ;;  %v100_v19 = vld [vmem:[%s3050_s1 + $0x78] sm:$0xff] }
  0x16   :  { %1402 = vmatpush.msra.mxu2 %v95_v20  ;;  %285 = vmatpush.msra.mxu0 %v95_v20  ;;  %v1615_v46 = vld [vmem:[%s3051_s0 + $0x140] sm:$0xff]  ;;  %v223_v47 = vld [vmem:[%s3050_s1 + $0x450] sm:$0xff] }
  0x17   :  { %1418 = vmatpush.msra.mxu3 %v127_v21  ;;  %341 = vmatpush.msra.mxu1 %v127_v21  ;;  %v173_v48 = vld [vmem:[%s3050_s1 + $0x2c0] sm:$0xff]  ;;  %v171_v53 = vld [vmem:[%s3050_s1 + $0x2b0] sm:$0xff] }
  0x18   :  { %1403 = vmatpush.msra.mxu2 %v93_v22  ;;  %286 = vmatpush.msra.mxu0 %v93_v22  ;;  %v205_v52 = vld [vmem:[%s3050_s1 + $0x3c0] sm:$0xff]  ;;  %v1647_v54 = vld [vmem:[%s3051_s0 + $0x30] sm:$0xff] }
  0x19   :  { %1419 = vmatpush.msra.mxu3 %v125_v23  ;;  %342 = vmatpush.msra.mxu1 %v125_v23  ;;  %v221_v55 = vld [vmem:[%s3050_s1 + $0x440] sm:$0xff]  ;;  %v203_v56 = vld [vmem:[%s3050_s1 + $0x3b0] sm:$0xff] }
  0x1a   :  { %1404 = vmatpush.msra.mxu2 %v91_v24  ;;  %287 = vmatpush.msra.mxu0 %v91_v24  ;;  %v169_v57 = vld [vmem:[%s3050_s1 + $0x2a0] sm:$0xff]  ;;  %v219_v59 = vld [vmem:[%s3050_s1 + $0x430] sm:$0xff] }
  0x1b   :  { %1420 = vmatpush.msra.mxu3 %v123_v25  ;;  %343 = vmatpush.msra.mxu1 %v123_v25  ;;  %v201_v60 = vld [vmem:[%s3050_s1 + $0x3a0] sm:$0xff]  ;;  %v167_v61 = vld [vmem:[%s3050_s1 + $0x290] sm:$0xff] }
  0x1c   :  { %1405 = vmatpush.msra.mxu2 %v89_v26  ;;  %288 = vmatpush.msra.mxu0 %v89_v26  ;;  %v1683_v0 = vld [vmem:[%s3051_s0 + $0x50] sm:$0xff]  ;;  %v165_v3 = vld [vmem:[%s3050_s1 + $0x280] sm:$0xff]  ;;  %v98_v26 = vld [vmem:[%s3050_s1 + $0x68] sm:$0xff] }
  0x1d   :  { %1421 = vmatpush.msra.mxu3 %v121_v27  ;;  %344 = vmatpush.msra.mxu1 %v121_v27  ;;  %v199_v1 = vld [vmem:[%s3050_s1 + $0x390] sm:$0xff]  ;;  %v197_v5 = vld [vmem:[%s3050_s1 + $0x380] sm:$0xff]  ;;  %v212_v27 = vld [vmem:[%s3050_s1 + $0x3f8] sm:$0xff] }
  0x1e   :  { %1406 = vmatpush.msra.mxu2 %v87_v28  ;;  %289 = vmatpush.msra.mxu0 %v87_v28  ;;  %v1691_v2 = vld [vmem:[%s3051_s0 + $0x170] sm:$0xff]  ;;  %v161_v10 = vld [vmem:[%s3050_s1 + $0x260] sm:$0xff] }
  0x1f   :  { %1422 = vmatpush.msra.mxu3 %v119_v29  ;;  %345 = vmatpush.msra.mxu1 %v119_v29  ;;  %v163_v7 = vld [vmem:[%s3050_s1 + $0x270] sm:$0xff]  ;;  %v217_v11 = vld [vmem:[%s3050_s1 + $0x420] sm:$0xff] }
  0x20   :  { %1407 = vmatpush.msra.mxu2 %v85_v30  ;;  %290 = vmatpush.msra.mxu0 %v85_v30  ;;  %v195_v9 = vld [vmem:[%s3050_s1 + $0x370] sm:$0xff]  ;;  %v193_v12 = vld [vmem:[%s3050_s1 + $0x360] sm:$0xff]  ;;  %v1795_v30 = vld [vmem:[%s3051_s0 + $0x1b8] sm:$0xff] }
  0x21   :  { %312 = vmatmul.f32.vlgmr.msra.gmra.mxu2 %v1558_v31  ;;  %1423 = vmatpush.msra.mxu3 %v117_v32  ;;  %v1735_v14 = vld [vmem:[%s3051_s0 + $0x190] sm:$0xff]  ;;  %v157_v21 = vld [vmem:[%s3050_s1 + $0x240] sm:$0xff] }
  0x22   :  { %387 = vmatpush.msrb.mxu2 %v179_v33  ;;  %291 = vmatmul.f32.vlgmr.msra.gmra.mxu0 %v1569_v34  ;;  %v215_v15 = vld [vmem:[%s3050_s1 + $0x410] sm:$0xff]  ;;  %v1767_v22 = vld [vmem:[%s3051_s0 + $0x80] sm:$0xff] }
  0x23   :  { %368 = vmatmul.f32.vlgmr.msra.gmra.mxu3 %v1574_v35  ;;  %507 = vmatpush.msrb.mxu0 %v227_v36  ;;  %v159_v17 = vld [vmem:[%s3050_s1 + $0x250] sm:$0xff]  ;;  %v213_v23 = vld [vmem:[%s3050_s1 + $0x400] sm:$0xff] }
  0x24   :  { %443 = vmatpush.msrb.mxu3 %v211_v37  ;;  %346 = vmatpush.msra.mxu1 %v117_v32  ;;  %v191_v20 = vld [vmem:[%s3050_s1 + $0x350] sm:$0xff]  ;;  %v189_v24 = vld [vmem:[%s3050_s1 + $0x340] sm:$0xff]  ;;  %v96_v32 = vld [vmem:[%s3050_s1 + $0x58] sm:$0xff] }
  0x25   :  { %388 = vmatpush.msrb.mxu2 %v177_v38  ;;  %347 = vmatmul.f32.vlgmr.msra.gmra.mxu1 %v1590_v39  ;;  %v155_v25 = vld [vmem:[%s3050_s1 + $0x230] sm:$0xff]  ;;  %v153_v29 = vld [vmem:[%s3050_s1 + $0x220] sm:$0xff] }
  0x26   :  { %555 = vmatpush.msrb.mxu1 %v116_v40  ;;  %444 = vmatpush.msrb.mxu3 %v209_v41  ;;  %v187_v28 = vld [vmem:[%s3050_s1 + $0x330] sm:$0xff]  ;;  %v1803_v33 = vld [vmem:[%s3051_s0 + $0xa0] sm:$0xff]  ;;  %v94_v40 = vld [vmem:[%s3050_s1 + $0x48] sm:$0xff] }
  0x27   :  { %389 = vmatpush.msrb.mxu2 %v175_v42  ;;  %508 = vmatpush.msrb.mxu0 %v225_v43  ;;  %v185_v36 = vld [vmem:[%s3050_s1 + $0x320] sm:$0xff]  ;;  %v151_v38 = vld [vmem:[%s3050_s1 + $0x210] sm:$0xff]  ;;  %v1827_v42 = vld [vmem:[%s3051_s0 + $0xa8] sm:$0xff] }
  0x28   :  { %445 = vmatpush.msrb.mxu3 %v207_v44  ;;  %556 = vmatpush.msrb.mxu1 %v114_v45  ;;  %v1811_v37 = vld [vmem:[%s3051_s0 + $0x1c0] sm:$0xff]  ;;  %v183_v41 = vld [vmem:[%s3050_s1 + $0x310] sm:$0xff]  ;;  %v92_v44 = vld [vmem:[%s3050_s1 + $0x38] sm:$0xff] }
  0x29   :  { %315 = vmatmul.f32.gmra.mxu2 %v1615_v46  ;;  %509 = vmatpush.msrb.mxu0 %v223_v47  ;;  %v149_v43 = vld [vmem:[%s3050_s1 + $0x200] sm:$0xff]  ;;  %v148_v47 = vld [vmem:[%s3050_s1 + $0x1f8] sm:$0xff] }
  0x2a   :  { %390 = vmatpush.msrb.mxu2 %v173_v48  ;;  %294 = vmatmul.f32.gmra.mxu0 %v1626_v49  ;;  %v181_v45 = vld [vmem:[%s3050_s1 + $0x300] sm:$0xff]  ;;  %v180_v48 = vld [vmem:[%s3050_s1 + $0x2f8] sm:$0xff] }
  0x2b   :  { %371 = vmatmul.f32.gmra.mxu3 %v1631_v50  ;;  %557 = vmatpush.msrb.mxu1 %v112_v51  ;;  %v90_v51 = vld [vmem:[%s3050_s1 + $0x28] sm:$0xff] }
  0x2c   :  { %446 = vmatpush.msrb.mxu3 %v205_v52  ;;  %391 = vmatpush.msrb.mxu2 %v171_v53  ;;  %v210_v52 = vld [vmem:[%s3050_s1 + $0x3e8] sm:$0xff]  ;;  %v1855_v53 = vld [vmem:[%s3051_s0 + $0x1e0] sm:$0x3] }
  0x2d   :  { %350 = vmatmul.f32.gmra.mxu1 %v1647_v54  ;;  %510 = vmatpush.msrb.mxu0 %v221_v55  ;;  %v178_v55 = vld [vmem:[%s3050_s1 + $0x2e8] sm:$0xff] }
  0x2e   :  { %447 = vmatpush.msrb.mxu3 %v203_v56  ;;  %392 = vmatpush.msrb.mxu2 %v169_v57  ;;  %v1863_v56 = vld [vmem:[%s3051_s0 + $0xc8] sm:$0xff]  ;;  %v88_v57 = vld [vmem:[%s3050_s1 + $0x18] sm:$0xff] }
  0x2f   :  { %558 = vmatpush.msrb.mxu1 %v110_v58  ;;  %511 = vmatpush.msrb.mxu0 %v219_v59  ;;  %v1871_v58 = vld [vmem:[%s3051_s0 + $0x1e8] sm:$0x3] }
  0x30   :  { %448 = vmatpush.msrb.mxu3 %v201_v60  ;;  %393 = vmatpush.msrb.mxu2 %v167_v61  ;;  %3069 = vst [vmem:[#allocation2_spill] sm:$0xff] %v1871_v58  ;;  %v146_v59 = vld [vmem:[%s3050_s1 + $0x1e8] sm:$0xff]  ;;  %v176_v61 = vld [vmem:[%s3050_s1 + $0x2d8] sm:$0xff] }
  0x31   :  { %318 = vmatmul.f32.gmra.mxu2 %v1675_v62  ;;  %559 = vmatpush.msrb.mxu1 %v108_v63  ;;  %v86_v60 = vld [vmem:[%s3050_s1 + $0x8] sm:$0xff]  ;;  %v1887_v63 = vld [vmem:[%s3051_s0 + $0xd0] sm:$0xff] }
  0x32   :  { %297 = vmatmul.f32.gmra.mxu0 %v1683_v0  ;;  %449 = vmatpush.msrb.mxu3 %v199_v1  ;;  %v144_v1 = vld [vmem:[%s3050_s1 + $0x1d8] sm:$0xff] }
  0x33   :  { %374 = vmatmul.f32.gmra.mxu3 %v1691_v2  ;;  %394 = vmatpush.msrb.mxu2 %v165_v3  ;;  %v228_v3 = vld [vmem:[%s3050_s1 + $0x478] sm:$0xff] }
  0x34   :  { %560 = vmatpush.msrb.mxu1 %v106_v4  ;;  %450 = vmatpush.msrb.mxu3 %v197_v5  ;;  %v174_v4 = vld [vmem:[%s3050_s1 + $0x2c8] sm:$0xff] }
  0x35   :  { %353 = vmatmul.f32.gmra.mxu1 %v1707_v6  ;;  %395 = vmatpush.msrb.mxu2 %v163_v7  ;;  %v142_v5 = vld [vmem:[%s3050_s1 + $0x1c8] sm:$0xff]  ;;  %v208_v7 = vld [vmem:[%s3050_s1 + $0x3d8] sm:$0xff] }
  0x36   :  { %561 = vmatpush.msrb.mxu1 %v104_v8  ;;  %451 = vmatpush.msrb.mxu3 %v195_v9  ;;  %v226_v8 = vld [vmem:[%s3050_s1 + $0x468] sm:$0xff]  ;;  %v172_v9 = vld [vmem:[%s3050_s1 + $0x2b8] sm:$0xff] }
  0x37   :  { %396 = vmatpush.msrb.mxu2 %v161_v10  ;;  %512 = vmatpush.msrb.mxu0 %v217_v11  ;;  %v1915_v10 = vld [vmem:[%s3051_s0 + $0x10] sm:$0xff]  ;;  %v206_v11 = vld [vmem:[%s3050_s1 + $0x3c8] sm:$0xff] }
  0x38   :  { %452 = vmatpush.msrb.mxu3 %v193_v12  ;;  %562 = vmatpush.msrb.mxu1 %v102_v13  ;;  %v1923_v12 = vld [vmem:[%s3051_s0 + $0xf0] sm:$0xff]  ;;  %v140_v13 = vld [vmem:[%s3050_s1 + $0x1b8] sm:$0xff] }
  0x39   :  { %321 = vmatmul.f32.gmra.mxu2 %v1735_v14  ;;  %513 = vmatpush.msrb.mxu0 %v215_v15  ;;  %v1931_v15 = vld [vmem:[%s3051_s0 + $0x18] sm:$0xff] }
  0x3a   :  { %300 = vmatmul.f32.gmra.mxu0 %v1743_v16  ;;  %397 = vmatpush.msrb.mxu2 %v159_v17  ;;  %v138_v17 = vld [vmem:[%s3050_s1 + $0x1a8] sm:$0xff] }
  0x3b   :  { %377 = vmatmul.f32.gmra.mxu3 %v1751_v18  ;;  %563 = vmatpush.msrb.mxu1 %v100_v19  ;;  %v1941_v19 = vld [vmem:[%s3051_s0 + $0xf8] sm:$0xff] }
  0x3c   :  { %453 = vmatpush.msrb.mxu3 %v191_v20  ;;  %398 = vmatpush.msrb.mxu2 %v157_v21  ;;  %v170_v20 = vld [vmem:[%s3050_s1 + $0x2a8] sm:$0xff]  ;;  %v204_v21 = vld [vmem:[%s3050_s1 + $0x3b8] sm:$0xff] }
  0x3d   :  { %356 = vmatmul.f32.gmra.mxu1 %v1767_v22  ;;  %514 = vmatpush.msrb.mxu0 %v213_v23  ;;  %v224_v23 = vld [vmem:[%s3050_s1 + $0x458] sm:$0xff] }
  0x3e   :  { %454 = vmatpush.msrb.mxu3 %v189_v24  ;;  %399 = vmatpush.msrb.mxu2 %v155_v25  ;;  %v136_v24 = vld [vmem:[%s3050_s1 + $0x198] sm:$0xff] }
  0x3f   :  { %564 = vmatpush.msrb.mxu1 %v98_v26  ;;  %723 = vmatpush.msra.mxu0 %v212_v27  ;;  %v1960_v25 = vld [vmem:[%s3051_s0 + $0x38] sm:$0xff]  ;;  %v1965_v26 = vld [vmem:[%s3051_s0 + $0x20] sm:$0xff] }
  0x40   :  { %455 = vmatpush.msrb.mxu3 %v187_v28  ;;  %400 = vmatpush.msrb.mxu2 %v153_v29  ;;  %v1970_v27 = vld [vmem:[%s3051_s0 + $0x40] sm:$0xff]  ;;  %v168_v28 = vld [vmem:[%s3050_s1 + $0x298] sm:$0xff]  ;;  %v202_v29 = vld [vmem:[%s3050_s1 + $0x3a8] sm:$0xff] }
  0x41   :  { %324 = vmatmul.f32.gmra.mxu2 %v1795_v30  ;;  %565 = vmatpush.msrb.mxu1 %v96_v32  ;;  %v134_v32 = vld [vmem:[%s3050_s1 + $0x188] sm:$0xff] }
  0x42   :  { %303 = vmatmul.f32.gmra.mxu0 %v1803_v33  ;;  %456 = vmatpush.msrb.mxu3 %v185_v36  ;;  %v1989_v36 = vld [vmem:[%s3051_s0 + $0x60] sm:$0xff] }
  0x43   :  { %380 = vmatmul.f32.gmra.mxu3 %v1811_v37  ;;  %401 = vmatpush.msrb.mxu2 %v151_v38  ;;  %v1994_v38 = vld [vmem:[%s3051_s0 + $0x48] sm:$0xff] }
  0x44   :  { %566 = vmatpush.msrb.mxu1 %v94_v40  ;;  %457 = vmatpush.msrb.mxu3 %v183_v41  ;;  %v1999_v40 = vld [vmem:[%s3051_s0 + $0x68] sm:$0xff]  ;;  %v200_v41 = vld [vmem:[%s3050_s1 + $0x398] sm:$0xff] }
  0x45   :  { %359 = vmatmul.f32.gmra.mxu1 %v1827_v42  ;;  %402 = vmatpush.msrb.mxu2 %v149_v43  ;;  %v222_v43 = vld [vmem:[%s3050_s1 + $0x448] sm:$0xff] }
  0x46   :  { %567 = vmatpush.msrb.mxu1 %v92_v44  ;;  %458 = vmatpush.msrb.mxu3 %v181_v45  ;;  %v132_v44 = vld [vmem:[%s3050_s1 + $0x178] sm:$0xff] }
  0x47   :  { %611 = vmatpush.msra.mxu2 %v148_v47  ;;  %724 = vmatpush.msra.mxu0 %v210_v52  ;;  %v164_v45 = vld [vmem:[%s3050_s1 + $0x278] sm:$0xff]  ;;  %v2024_v47 = vld [vmem:[%s3051_s0 + $0x88] sm:$0xff] }
  0x48   :  { %667 = vmatpush.msra.mxu3 %v180_v48  ;;  %568 = vmatpush.msrb.mxu1 %v90_v51  ;;  %v2029_v48 = vld [vmem:[%s3051_s0 + $0x70] sm:$0xff]  ;;  %v198_v51 = vld [vmem:[%s3050_s1 + $0x388] sm:$0xff] }
  0x49   :  { %327 = vmatmul.f32.gmra.mxu2 %v1855_v53  ;;  %725 = vmatpush.msra.mxu0 %v208_v7  ;;  %v130_v52 = vld [vmem:[%s3050_s1 + $0x168] sm:$0xff]  ;;  %v2093_v7 = vld [vmem:[%s3051_s0 + $0xc0] sm:$0xff] }
  0x4a   :  { %668 = vmatpush.msra.mxu3 %v178_v55  ;;  %306 = vmatmul.f32.gmra.mxu0 %v1863_v56  ;;  %v162_v55 = vld [vmem:[%s3050_s1 + $0x268] sm:$0xff] }
  0x4b   :  { %569 = vmatpush.msrb.mxu1 %v88_v57  ;;  %383 = vmatmul.f32.gmra.mxu3 %v1871_v58  ;;  %v196_v57 = vld [vmem:[%s3050_s1 + $0x378] sm:$0xff] }
  0x4c   :  { %612 = vmatpush.msra.mxu2 %v146_v59  ;;  %669 = vmatpush.msra.mxu3 %v176_v61  ;;  %v2056_v59 = vld [vmem:[%s3051_s0 + $0xb0] sm:$0xff]  ;;  %v220_v61 = vld [vmem:[%s3050_s1 + $0x438] sm:$0xff] }
  0x4d   :  { %570 = vmatpush.msrb.mxu1 %v86_v60  ;;  %726 = vmatpush.msra.mxu0 %v206_v11  ;;  %v2061_v60 = vld [vmem:[%s3051_s0 + $0x98] sm:$0xff] }
  0x4e   :  { %362 = vmatmul.f32.gmra.mxu1 %v1887_v63  ;;  %613 = vmatpush.msra.mxu2 %v144_v1  ;;  %v128_v1 = vld [vmem:[%s3050_s1 + $0x158] sm:$0xff] }
  0x4f   :  { %787 = vmatpush.msra.mxu1 %v228_v3  ;;  %670 = vmatpush.msra.mxu3 %v174_v4  ;;  %v160_v3 = vld [vmem:[%s3050_s1 + $0x258] sm:$0xff]  ;;  %v194_v4 = vld [vmem:[%s3050_s1 + $0x368] sm:$0xff] }
  0x50   :  { %614 = vmatpush.msra.mxu2 %v142_v5  ;;  %727 = vmatpush.msra.mxu0 %v204_v21  ;;  %v2088_v5 = vld [vmem:[%s3051_s0 + $0xd8] sm:$0xff]  ;;  %v2128_v21 = vld [vmem:[%s3051_s0 + $0xe8] sm:$0xff] }
  0x51   :  { %788 = vmatpush.msra.mxu1 %v226_v8  ;;  %671 = vmatpush.msra.mxu3 %v172_v9  ;;  %v2098_v8 = vld [vmem:[%s3051_s0 + $0xe0] sm:$0xff]  ;;  %v158_v9 = vld [vmem:[%s3050_s1 + $0x248] sm:$0xff]  ;;  %v192_v11 = vld [vmem:[%s3050_s1 + $0x358] sm:$0xff] }
  0x52   :  { %403 = vmatmul.f32.vlgmr.msrb.gmra.mxu2 %v1915_v10  ;;  %309 = vmatmul.f32.gmra.mxu0 %v1923_v12 }
  0x53   :  { %615 = vmatpush.msra.mxu2 %v140_v13  ;;  %459 = vmatmul.f32.vlgmr.msrb.gmra.mxu3 %v1931_v15  ;;  %v218_v13 = vld [vmem:[%s3050_s1 + $0x428] sm:$0xff] }
  0x54   :  { %672 = vmatpush.msra.mxu3 %v170_v20  ;;  %789 = vmatpush.msra.mxu1 %v224_v23  ;;  %v2123_v20 = vld [vmem:[%s3051_s0 + $0x100] sm:$0xff]  ;;  %v156_v23 = vld [vmem:[%s3050_s1 + $0x238] sm:$0xff] }
  0x55   :  { %616 = vmatpush.msra.mxu2 %v138_v17  ;;  %728 = vmatpush.msra.mxu0 %v202_v29  ;;  %v124_v17 = vld [vmem:[%s3050_s1 + $0x138] sm:$0xff]  ;;  %v2154_v29 = vld [vmem:[%s3051_s0 + $0x110] sm:$0xff] }
  0x56   :  { %365 = vmatmul.f32.gmra.mxu1 %v1941_v19  ;;  %673 = vmatpush.msra.mxu3 %v168_v28  ;;  %v2149_v28 = vld [vmem:[%s3051_s0 + $0x128] sm:$0xff] }
  0x57   :  { %617 = vmatpush.msra.mxu2 %v136_v24  ;;  %729 = vmatpush.msra.mxu0 %v200_v41  ;;  %v190_v24 = vld [vmem:[%s3050_s1 + $0x348] sm:$0xff]  ;;  %v188_v41 = vld [vmem:[%s3050_s1 + $0x338] sm:$0xff] }
  0x58   :  { %790 = vmatpush.msra.mxu1 %v222_v43  ;;  %v216_v43 = vld [vmem:[%s3050_s1 + $0x418] sm:$0xff] }
  0x59   :  { %618 = vmatpush.msra.mxu2 %v134_v32  ;;  %730 = vmatpush.msra.mxu0 %v198_v51  ;;  %v122_v32 = vld [vmem:[%s3050_s1 + $0x128] sm:$0xff]  ;;  %v2189_v51 = vld [vmem:[%s3051_s0 + $0x138] sm:$0xff] }
  0x5a   :  { %406 = vmatmul.f32.gmra.mxu2 %v1960_v25  ;;  %1366 = vmatmul.msk.f32.vlgmr.msrb.gmra.mxu0 %vm235_vm0, %v1965_v26 }
  0x5b   :  { %462 = vmatmul.f32.gmra.mxu3 %v1970_v27  ;;  %619 = vmatpush.msra.mxu2 %v132_v44  ;;  %v120_v44 = vld [vmem:[%s3050_s1 + $0x118] sm:$0xff] }
  0x5c   :  { %731 = vmatpush.msra.mxu0 %v196_v57  ;;  %791 = vmatpush.msra.mxu1 %v220_v61  ;;  %v118_v57 = vld [vmem:[%s3050_s1 + $0x108] sm:$0xff] }
  0x5d   :  { %620 = vmatpush.msra.mxu2 %v130_v52  ;;  %v152_v52 = vld [vmem:[%s3050_s1 + $0x218] sm:$0xff]  ;;  %v150_v61 = vld [vmem:[%s3050_s1 + $0x208] sm:$0xff] }
  0x5e   :  { %571 = vmatmul.f32.vlgmr.msrb.gmra.mxu1 %v1569_v34  ;;  %v166_v34 = vld [vmem:[%s3050_s1 + $0x288] sm:$0xff]  ;;  %732 = vmatpush.msra.mxu0 %v194_v4  ;;  %v184_v4 = vld [vmem:[%s3050_s1 + $0x318] sm:$0xff] }
  0x5f   :  { %674 = vmatpush.msra.mxu3 %v166_v34  ;;  %621 = vmatpush.msra.mxu2 %v128_v1  ;;  %v2162_v34 = vld [vmem:[%s3051_s0 + $0x130] sm:$0xff]  ;;  %v2216_v1 = vld [vmem:[%s3051_s0 + $0x178] sm:$0xff] }
  0x60   :  { %733 = vmatpush.msra.mxu0 %v192_v11  ;;  %792 = vmatpush.msra.mxu1 %v218_v13  ;;  %v2245_v11 = vld [vmem:[%s3051_s0 + $0x1a0] sm:$0xff] }
  0x61   :  { %675 = vmatpush.msra.mxu3 %v164_v45  ;;  %v2184_v45 = vld [vmem:[%s3051_s0 + $0x150] sm:$0xff] }
  0x62   :  { %409 = vmatmul.f32.gmra.mxu2 %v1989_v36  ;;  %1367 = vmatmul.msk.f32.gmra.mxu0 %vm235_vm0, %v1994_v38 }
  0x63   :  { %465 = vmatmul.f32.gmra.mxu3 %v1999_v40  ;;  %734 = vmatpush.msra.mxu0 %v190_v24 }
  0x64   :  { %676 = vmatpush.msra.mxu3 %v162_v55  ;;  %793 = vmatpush.msra.mxu1 %v216_v43  ;;  %v186_v55 = vld [vmem:[%s3050_s1 + $0x328] sm:$0xff] }
  0x65   :  { %735 = vmatpush.msra.mxu0 %v188_v41 }
  0x66   :  { %574 = vmatmul.f32.gmra.mxu1 %v1626_v49  ;;  %v2034_v49 = vld [vmem:[%s3051_s0 + $0x90] sm:$0xff]  ;;  %677 = vmatpush.msra.mxu3 %v160_v3  ;;  %v2221_v3 = vld [vmem:[%s3051_s0 + $0x160] sm:$0xff] }
  0x67   :  { %736 = vmatpush.msra.mxu0 %v186_v55 }
  0x68   :  { %678 = vmatpush.msra.mxu3 %v158_v9  ;;  %v182_v9 = vld [vmem:[%s3050_s1 + $0x308] sm:$0xff] }
  0x69   :  { %737 = vmatpush.msra.mxu0 %v184_v4 }
  0x6a   :  { %412 = vmatmul.f32.gmra.mxu2 %v2024_v47  ;;  %1368 = vmatmul.msk.f32.gmra.mxu0 %vm235_vm0, %v2029_v48 }
  0x6b   :  { %468 = vmatmul.f32.gmra.mxu3 %v2034_v49  ;;  %738 = vmatpush.msra.mxu0 %v182_v9 }
  0x6c   :  { %679 = vmatpush.msra.mxu3 %v156_v23  ;;  %v2262_v23 = vld [vmem:[%s3051_s0 + $0x1a8] sm:$0xff] }
  0x6e   :  { %577 = vmatmul.f32.gmra.mxu1 %v1683_v0  ;;  %v2066_v0 = vld [vmem:[%s3051_s0 + $0xb8] sm:$0xff] }
  0x72   :  { %415 = vmatmul.f32.gmra.mxu2 %v2056_v59  ;;  %1369 = vmatmul.msk.f32.gmra.mxu0 %vm235_vm0, %v2061_v60 }
  0x73   :  { %471 = vmatmul.f32.gmra.mxu3 %v2066_v0 }
  0x76   :  { %580 = vmatmul.f32.gmra.mxu1 %v1743_v16  ;;  %v126_v16 = vld [vmem:[%s3050_s1 + $0x148] sm:$0xff] }
  0x77   :  { %622 = vmatpush.msra.mxu2 %v126_v16  ;;  %v214_v16 = vld [vmem:[%s3050_s1 + $0x408] sm:$0xff] }
  0x78   :  { %794 = vmatpush.msra.mxu1 %v214_v16 }
  0x79   :  { %623 = vmatpush.msra.mxu2 %v124_v17  ;;  %v2252_v17 = vld [vmem:[%s3051_s0 + $0x188] sm:$0xff] }
  0x7a   :  { %418 = vmatmul.f32.gmra.mxu2 %v2088_v5  ;;  %1370 = vmatmul.msk.f32.gmra.mxu0 %vm235_vm0, %v2093_v7 }
  0x7b   :  { %474 = vmatmul.f32.gmra.mxu3 %v2098_v8  ;;  %624 = vmatpush.msra.mxu2 %v122_v32 }
  0x7d   :  { %625 = vmatpush.msra.mxu2 %v120_v44  ;;  %v2278_v44 = vld [vmem:[%s3051_s0 + $0x1c8] sm:$0xff] }
  0x7e   :  { %583 = vmatmul.f32.gmra.mxu1 %v1803_v33  ;;  %v2133_v33 = vld [vmem:[%s3051_s0 + $0x108] sm:$0xff] }
  0x7f   :  { %626 = vmatpush.msra.mxu2 %v118_v57  ;;  %v2287_v57 = vld [vmem:[%s3051_s0 + $0x1b0] sm:$0xff] }
  0x82   :  { %421 = vmatmul.f32.gmra.mxu2 %v2123_v20  ;;  %1371 = vmatmul.msk.f32.gmra.mxu0 %vm235_vm0, %v2128_v21 }
  0x83   :  { %477 = vmatmul.f32.gmra.mxu3 %v2133_v33 }
  0x86   :  { %586 = vmatmul.f32.gmra.mxu1 %v1863_v56  ;;  %v154_v56 = vld [vmem:[%s3050_s1 + $0x228] sm:$0xff] }
  0x87   :  { %680 = vmatpush.msra.mxu3 %v154_v56 }
  0x89   :  { %681 = vmatpush.msra.mxu3 %v152_v52 }
  0x8a   :  { %424 = vmatmul.f32.gmra.mxu2 %v2149_v28  ;;  %1372 = vmatmul.msk.f32.gmra.mxu0 %vm235_vm0, %v2154_v29 }
  0x8b   :  { %480 = vmatmul.f32.gmra.mxu3 %v2162_v34 }
  0x8c   :  { %682 = vmatpush.msra.mxu3 %v150_v61  ;;  %v2292_v61 = vld [vmem:[%s3051_s0 + $0x1d0] sm:$0xff] }
  0x8d   :  { %3071 = vst [vmem:[#allocation4_spill] sm:$0xff] %v2292_v61 }
  0x8e   :  { %589 = vmatmul.f32.gmra.mxu1 %v1923_v12  ;;  %v2197_v12 = vld [vmem:[%s3051_s0 + $0x158] sm:$0xff] }
  0x92   :  { %427 = vmatmul.f32.gmra.mxu2 %v2184_v45  ;;  %1373 = vmatmul.msk.f32.gmra.mxu0 %vm235_vm0, %v2189_v51 }
  0x93   :  { %483 = vmatmul.f32.gmra.mxu3 %v2197_v12 }
  0x96   :  { %592 = vmatmul.f32.gmra.mxu1 %v1558_v31  ;;  %v2229_v31 = vld [vmem:[%s3051_s0 + $0x180] sm:$0xff] }
  0x9a   :  { %430 = vmatmul.f32.gmra.mxu2 %v2216_v1  ;;  %1374 = vmatmul.msk.f32.gmra.mxu0 %vm235_vm0, %v2221_v3 }
  0x9b   :  { %486 = vmatmul.f32.gmra.mxu3 %v2229_v31 }
  0x9e   :  { %595 = vmatmul.f32.gmra.mxu1 %v1615_v46  ;;  %v2257_v46 = vld [vmem:[%s3052_s2] sm:$0x3] }
  0x9f   :  { %v2247_v13 = vpop.f32.mrf.mxu0  ;;  %v2270_v32 = vperm.slane %v2257_v46, 0 }
  0xa2   :  { %433 = vmatmul.f32.gmra.mxu2 %v2245_v11  ;;  %v2265_v24 = vpop.f32.mrf.mxu1  ;;  %1375 = vmatmul.msk.f32.gmra.mxu0 %vm235_vm0, %v2252_v17 }
  0xa3   :  { %489 = vmatmul.f32.gmra.mxu3 %v2262_v23 }
  0xa4   :  { %v313_v56 = vpop.f32.mrf.mxu2 }
  0xa5   :  { %v314_v41 = vadd.f32 %v313_v56, %v2270_v32  ;;  %v2305_v56 = vld [vmem:[%s3051_s0 + $0x1f0] sm:$0x3] }
  0xa6   :  { %598 = vmatmul.f32.gmra.mxu1 %v1675_v62  ;;  %v369_v43 = vpop.f32.mrf.mxu3  ;;  %3072 = vst [vmem:[#allocation5_spill] sm:$0xff] %v2305_v56 }
  0xa7   :  { %v2280_v52 = vadd.f32 %v369_v43, %v314_v41  ;;  %v2282_v55 = vpop.f32.mrf.mxu0 }
  0xa9   :  { %3070 = vst [vmem:[#allocation3_spill] sm:$0xff] %v2280_v52  ;;  %v2314_v52 = vld [vmem:[%s3051_s0 + $0x1d8] sm:$0xff] }
  0xaa   :  { %436 = vmatmul.f32.gmra.mxu2 %v2278_v44  ;;  %v2295_v62 = vpop.f32.mrf.mxu1  ;;  %1376 = vmatmul.msk.f32.gmra.mxu0 %vm235_vm0, %v2287_v57  ;;  %3074 = vst [vmem:[#allocation7_spill] sm:$0xff] %v2314_v52 }
  0xab   :  { %492 = vmatmul.f32.gmra.mxu3 %v2292_v61 }
  0xac   :  { %v316_v4 = vpop.f32.mrf.mxu2 }
  0xad   :  { %v317_v16 = vadd.f32 %v316_v4, %v2270_v32  ;;  %v2319_v4 = vld [vmem:[%s3051_s0 + $0x1f8] sm:$0x3] }
  0xae   :  { %601 = vmatmul.f32.gmra.mxu1 %v1735_v14  ;;  %v372_v9 = vpop.f32.mrf.mxu3 }
  0xaf   :  { %v2307_v41 = vadd.f32 %v372_v9, %v317_v16  ;;  %v2309_v43 = vpop.f32.mrf.mxu0 }
  0xb1   :  { %3073 = vst [vmem:[#allocation6_spill] sm:$0xff] %v2307_v41 }
  0xb2   :  { %439 = vmatmul.f32.gmra.mxu2 %v2305_v56  ;;  %v2322_v14 = vpop.f32.mrf.mxu1  ;;  %1377 = vmatmul.msk.f32.gmra.mxu0 %vm235_vm0, %v2314_v52  ;;  %v2336_v56 = vld [vmem:[%s3051_s0 + $0x200] sm:$0x3]  ;;  %s1430_s0 = smov 64  }
  0xb3   :  { %495 = vmatmul.f32.gmra.mxu3 %v2319_v4  ;;  %3076 = vst [vmem:[#allocation9_spill] sm:$0xff] %v2336_v56 }
  0xb4   :  { %v319_v16 = vpop.f32.mrf.mxu2 }
  0xb5   :  { %v320_v9 = vadd.f32 %v319_v16, %v2270_v32 }
  0xb6   :  { %604 = vmatmul.f32.gmra.mxu1 %v1795_v30  ;;  %v375_v41 = vpop.f32.mrf.mxu3 }
  0xb7   :  { %v2329_v61 = vadd.f32 %v375_v41, %v320_v9  ;;  %v2331_v58 = vpop.f32.mrf.mxu0 }
  0xb9   :  { %3075 = vst [vmem:[#allocation8_spill] sm:$0xff] %v2329_v61 }
  0xba   :  { %627 = vmatmul.f32.vlgmr.msra.gmra.mxu2 %v1590_v39  ;;  %v2339_v52 = vpop.f32.mrf.mxu1  ;;  %1378 = vmatmul.msk.f32.gmra.mxu0 %vm235_vm0, %v2336_v56 }
  0xbb   :  { %683 = vmatmul.f32.vlgmr.msra.gmra.mxu3 %v1915_v10 }
  0xbc   :  { %v322_v30 = vpop.f32.mrf.mxu2 }
  0xbd   :  { %v323_v41 = vadd.f32 %v322_v30, %v2270_v32 }
  0xbe   :  { %607 = vmatmul.f32.gmra.mxu1 %v1855_v53  ;;  %v378_v16 = vpop.f32.mrf.mxu3 }
  0xbf   :  { %v2346_v9 = vadd.f32 %v378_v16, %v323_v41  ;;  %v2348_v61 = vpop.f32.mrf.mxu0 }
  0xc2   :  { %630 = vmatmul.f32.gmra.mxu2 %v1647_v54  ;;  %v2351_v39 = vpop.f32.mrf.mxu1  ;;  %739 = vmatmul.f32.vlgmr.msra.gmra.mxu0 %v1931_v15 }
  0xc3   :  { %686 = vmatmul.f32.gmra.mxu3 %v1960_v25 }
  0xc4   :  { %v325_v56 = vpop.f32.mrf.mxu2 }
  0xc5   :  { %v326_v10 = vadd.f32 %v325_v56, %v2270_v32  ;;  %v293_v56 = vadd.f32 %v2247_v13, %v2270_v32 }
  0xc6   :  { %1379 = vmatmul.msk.f32.vlgmr.msra.gmra.mxu1 %vm235_vm0, %v1965_v26  ;;  %v381_v53 = vpop.f32.mrf.mxu3 }
  0xc7   :  { %v2358_v30 = vadd.f32 %v381_v53, %v326_v10  ;;  %v2360_v41 = vpop.f32.mrf.mxu0  ;;  %v296_v53 = vadd.f32 %v2282_v55, %v2270_v32 }
  0xca   :  { %633 = vmatmul.f32.gmra.mxu2 %v1707_v6  ;;  %742 = vmatmul.f32.gmra.mxu0 %v1970_v27  ;;  %v349_v27 = vadd.f32 %v2265_v24, %v293_v56 }
  0xcb   :  { %v2363_v54 = vpop.f32.mrf.mxu1  ;;  %689 = vmatmul.f32.gmra.mxu3 %v1989_v36 }
  0xcc   :  { %v328_v15 = vpop.f32.mrf.mxu2 }
  0xcd   :  { %v329_v25 = vadd.f32 %v328_v15, %v2270_v32 }
  0xce   :  { %1380 = vmatmul.msk.f32.gmra.mxu1 %vm235_vm0, %v1994_v38  ;;  %v384_v26 = vpop.f32.mrf.mxu3 }
  0xcf   :  { %v2372_v16 = vadd.f32 %v384_v26, %v329_v25  ;;  %v2374_v10 = vpop.f32.mrf.mxu0 }
  0xd2   :  { %636 = vmatmul.f32.gmra.mxu2 %v1767_v22  ;;  %745 = vmatmul.f32.gmra.mxu0 %v1999_v40 }
  0xd3   :  { %v2377_v6 = vpop.f32.mrf.mxu1  ;;  %692 = vmatmul.f32.gmra.mxu3 %v2024_v47  ;;  %v352_v47 = vadd.f32 %v2295_v62, %v296_v53  ;;  %v2414_v62 = vperm.slane %v2257_v46, 1 }
  0xd5   :  { %v404_v36 = vpop.f32.mrf.mxu2 }
  0xd6   :  { %v405_v38 = vadd.f32 %v404_v36, %v349_v27  ;;  %1381 = vmatmul.msk.f32.gmra.mxu1 %vm235_vm0, %v2029_v48  ;;  %v460_v13 = vpop.f32.mrf.mxu3 }
  0xd7   :  { %v2388_v22 = vpop.f32.mrf.mxu0 }
  0xd8   :  { %v2386_v15 = vadd.f32 %v460_v13, %v405_v38 }
  0xda   :  { %639 = vmatmul.f32.gmra.mxu2 %v1827_v42  ;;  %748 = vmatmul.f32.gmra.mxu0 %v2034_v49 }
  0xdb   :  { %v2391_v40 = vpop.f32.mrf.mxu1  ;;  %695 = vmatmul.f32.gmra.mxu3 %v2056_v59 }
  0xdd   :  { %v407_v24 = vpop.f32.mrf.mxu2 }
  0xde   :  { %v408_v48 = vadd.f32 %v407_v24, %v352_v47  ;;  %1382 = vmatmul.msk.f32.gmra.mxu1 %vm235_vm0, %v2061_v60  ;;  %v463_v55 = vpop.f32.mrf.mxu3 }
  0xdf   :  { %v519_v26 = vpop.f32.mrf.mxu0 }
  0xe0   :  { %v464_v25 = vadd.f32 %v463_v55, %v408_v48  ;;  %v308_v48 = vadd.f32 %v2360_v41, %v2270_v32  ;;  %v3077_v55 = vld [vmem:[#allocation2_spill] sm:$0xff] }
  0xe2   :  { %v2398_v56 = vadd.f32 %v519_v26, %v464_v25  ;;  %642 = vmatmul.f32.gmra.mxu2 %v1887_v63  ;;  %751 = vmatmul.f32.gmra.mxu0 %v2066_v0  ;;  %v3078_v25 = vld [vmem:[#allocation4_spill] sm:$0xff]  ;;  %v364_v41 = vadd.f32 %v2363_v54, %v308_v48 }
  0xe3   :  { %v2401_v42 = vpop.f32.mrf.mxu1  ;;  %698 = vmatmul.f32.gmra.mxu3 %v2088_v5 }
  0xe5   :  { %v2405_v49 = vpop.f32.mrf.mxu2 }
  0xe6   :  { %1383 = vmatmul.msk.f32.gmra.mxu1 %vm235_vm0, %v2093_v7  ;;  %v2409_v59 = vpop.f32.mrf.mxu3 }
  0xe7   :  { %v2411_v60 = vpop.f32.mrf.mxu0 }
  0xea   :  { %645 = vmatmul.f32.gmra.mxu2 %v1941_v19  ;;  %754 = vmatmul.f32.gmra.mxu0 %v2098_v8 }
  0xeb   :  { %v578_v63 = vpop.f32.mrf.mxu1  ;;  %701 = vmatmul.f32.gmra.mxu3 %v2123_v20 }
  0xec   :  { %v2419_v0 = vadd.f32 %v578_v63, %v2414_v62 }
  0xed   :  { %v413_v5 = vpop.f32.mrf.mxu2 }
  0xee   :  { %1384 = vmatmul.msk.f32.gmra.mxu1 %vm235_vm0, %v2128_v21  ;;  %v2424_v7 = vpop.f32.mrf.mxu3 }
  0xef   :  { %v2426_v27 = vpop.f32.mrf.mxu0 }
  0xf2   :  { %648 = vmatmul.f32.gmra.mxu2 %v1574_v35  ;;  %757 = vmatmul.f32.gmra.mxu0 %v2133_v33 }
  0xf3   :  { %v581_v46 = vpop.f32.mrf.mxu1  ;;  %704 = vmatmul.f32.gmra.mxu3 %v2149_v28 }
  0xf4   :  { %v2431_v19 = vadd.f32 %v581_v46, %v2414_v62 }
  0xf5   :  { %v416_v8 = vpop.f32.mrf.mxu2 }
  0xf6   :  { %1385 = vmatmul.msk.f32.gmra.mxu1 %vm235_vm0, %v2154_v29  ;;  %v2436_v20 = vpop.f32.mrf.mxu3 }
  0xf7   :  { %v2438_v21 = vpop.f32.mrf.mxu0 }
  0xfa   :  { %651 = vmatmul.f32.gmra.mxu2 %v1631_v50  ;;  %760 = vmatmul.f32.gmra.mxu0 %v2162_v34 }
  0xfb   :  { %v584_v36 = vpop.f32.mrf.mxu1  ;;  %707 = vmatmul.f32.gmra.mxu3 %v2184_v45 }
  0xfc   :  { %v2443_v35 = vadd.f32 %v584_v36, %v2414_v62  ;;  %v3080_v36 = vld [vmem:[#allocation7_spill] sm:$0xff] }
  0xfd   :  { %v419_v33 = vpop.f32.mrf.mxu2 }
  0xfe   :  { %1386 = vmatmul.msk.f32.gmra.mxu1 %vm235_vm0, %v2189_v51  ;;  %v2448_v28 = vpop.f32.mrf.mxu3 }
  0xff   :  { %v2450_v29 = vpop.f32.mrf.mxu0 }
 0x102   :  { %654 = vmatmul.f32.gmra.mxu2 %v1691_v2  ;;  %763 = vmatmul.f32.gmra.mxu0 %v2197_v12 }
 0x103   :  { %v587_v38 = vpop.f32.mrf.mxu1  ;;  %710 = vmatmul.f32.gmra.mxu3 %v2216_v1 }
 0x104   :  { %v2455_v50 = vadd.f32 %v587_v38, %v2414_v62 }
 0x105   :  { %v422_v34 = vpop.f32.mrf.mxu2 }
 0x106   :  { %1387 = vmatmul.msk.f32.gmra.mxu1 %vm235_vm0, %v2221_v3  ;;  %v478_v45 = vpop.f32.mrf.mxu3 }
 0x107   :  { %v2460_v51 = vpop.f32.mrf.mxu0 }
 0x10a   :  { %657 = vmatmul.f32.gmra.mxu2 %v1751_v18  ;;  %766 = vmatmul.f32.gmra.mxu0 %v2229_v31  ;;  %v299_v18 = vadd.f32 %v2309_v43, %v2270_v32 }
 0x10b   :  { %v590_v13 = vpop.f32.mrf.mxu1  ;;  %713 = vmatmul.f32.gmra.mxu3 %v2245_v11 }
 0x10c   :  { %v2465_v2 = vadd.f32 %v590_v13, %v2414_v62  ;;  %v2508_v13 = vadd.f32 %v2388_v22, %v2386_v15  ;;  %v3081_v15 = vld [vmem:[#allocation3_spill] sm:$0xff] }
 0x10d   :  { %v425_v12 = vpop.f32.mrf.mxu2 }
 0x10e   :  { %1388 = vmatmul.msk.f32.gmra.mxu1 %vm235_vm0, %v2252_v17  ;;  %v481_v1 = vpop.f32.mrf.mxu3  ;;  %v302_v17 = vadd.f32 %v2331_v58, %v2270_v32  ;;  %v426_v22 = vadd.f32 %v425_v12, %v3081_v15 }
 0x10f   :  { %v2470_v53 = vpop.f32.mrf.mxu0 }
 0x110   :  { %v358_v43 = vadd.f32 %v2339_v52, %v302_v17  ;;  %v3079_v52 = vld [vmem:[#allocation5_spill] sm:$0xff] }
 0x112   :  { %660 = vmatmul.f32.gmra.mxu2 %v1811_v37  ;;  %769 = vmatmul.f32.gmra.mxu0 %v2262_v23  ;;  %v355_v37 = vadd.f32 %v2322_v14, %v299_v18  ;;  %v305_v23 = vadd.f32 %v2348_v61, %v2270_v32  ;;  %v311_v14 = vadd.f32 %v2374_v10, %v2270_v32 }
 0x113   :  { %v593_v3 = vpop.f32.mrf.mxu1  ;;  %716 = vmatmul.f32.gmra.mxu3 %v2278_v44  ;;  %v414_v26 = vadd.f32 %v413_v5, %v358_v43  ;;  %v420_v10 = vadd.f32 %v419_v33, %v364_v41 }
 0x114   :  { %v2477_v31 = vadd.f32 %v593_v3, %v2414_v62  ;;  %v411_v44 = vadd.f32 %v2405_v49, %v355_v37  ;;  %v869_v3 = vsel %vm867_vm1, %v2398_v56, 0.0 }
 0x115   :  { %v428_v11 = vpop.f32.mrf.mxu2  ;;  %v470_v32 = vadd.f32 %v2424_v7, %v414_v26  ;;  %v476_v7 = vadd.f32 %v2448_v28, %v420_v10 }
 0x116   :  { %1389 = vmatmul.msk.f32.gmra.mxu1 %vm235_vm0, %v2287_v57  ;;  %v484_v47 = vpop.f32.mrf.mxu3  ;;  %v361_v57 = vadd.f32 %v2351_v39, %v305_v23  ;;  %v467_v49 = vadd.f32 %v2409_v59, %v411_v44  ;;  %v367_v39 = vadd.f32 %v2377_v6, %v311_v14  ;;  %v3083_v23 = vld [vmem:[#allocation9_spill] sm:$0xff]  ;;  %v482_v44 = vadd.f32 %v481_v1, %v426_v22 }
 0x117   :  { %v540_v24 = vpop.f32.mrf.mxu0  ;;  %v2518_v6 = vadd.f32 %v2426_v27, %v470_v32  ;;  %v3082_v27 = vld [vmem:[#allocation6_spill] sm:$0xff]  ;;  %v2538_v48 = vadd.f32 %v2450_v29, %v476_v7 }
 0x118   :  { %v417_v46 = vadd.f32 %v416_v8, %v361_v57  ;;  %v2511_v54 = vadd.f32 %v2411_v60, %v467_v49  ;;  %v423_v8 = vadd.f32 %v422_v34, %v367_v39  ;;  %v868_v60 = vsel %vm867_vm1, %v2508_v13, 0.0 }
 0x119   :  { %v429_v37 = vadd.f32 %v428_v11, %v3082_v27  ;;  %v870_v28 = vadd.f32 %v869_v3, %v868_v60  ;;  %v873_v43 = vsel %vm867_vm1, %v2518_v6, 0.0  ;;  %v877_v29 = vsel %vm867_vm1, %v2538_v48, 0.0 }
 0x11a   :  { %663 = vmatmul.f32.gmra.mxu2 %v3077_v55  ;;  %772 = vmatmul.f32.gmra.mxu0 %v3078_v25  ;;  %v473_v59 = vadd.f32 %v2436_v20, %v417_v46  ;;  %v871_v34 = vsel %vm867_vm1, %v2511_v54, 0.0  ;;  %v3084_v55 = vld [vmem:[#allocation8_spill] sm:$0xff]  ;;  %v2550_v1 = vadd.f32 %v2470_v53, %v482_v44 }
 0x11b   :  { %v596_v58 = vpop.f32.mrf.mxu1  ;;  %719 = vmatmul.f32.gmra.mxu3 %v3079_v52  ;;  %v485_v57 = vadd.f32 %v484_v47, %v429_v37 }
 0x11c   :  { %v2497_v61 = vadd.f32 %v596_v58, %v2414_v62  ;;  %v2530_v17 = vadd.f32 %v2438_v21, %v473_v59  ;;  %v872_v21 = vadd.f32 %v871_v34, %v870_v28  ;;  %v881_v53 = vsel %vm867_vm1, %v2550_v1, 0.0 }
 0x11d   :  { %v431_v63 = vpop.f32.mrf.mxu2  ;;  %v2557_v47 = vadd.f32 %v540_v24, %v485_v57 }
 0x11e   :  { %1390 = vmatmul.msk.f32.gmra.mxu1 %vm235_vm0, %v3080_v36  ;;  %v487_v38 = vpop.f32.mrf.mxu3  ;;  %v432_v58 = vadd.f32 %v431_v63, %v3084_v55  ;;  %v874_v26 = vadd.f32 %v873_v43, %v872_v21 }
 0x11f   :  { %v543_v5 = vpop.f32.mrf.mxu0  ;;  %v883_v3 = vsel %vm867_vm1, %v2557_v47, 0.0 }
 0x120   :  { %v488_v63 = vadd.f32 %v487_v38, %v432_v58  ;;  %v573_v58 = vadd.f32 %v2391_v40, %v2414_v62  ;;  %v576_v40 = vadd.f32 %v2401_v42, %v2414_v62 }
 0x122   :  { %775 = vmatmul.f32.gmra.mxu0 %v2319_v4  ;;  %v479_v4 = vadd.f32 %v478_v45, %v423_v8  ;;  %v875_v45 = vsel %vm867_vm1, %v2530_v17, 0.0  ;;  %v2562_v10 = vadd.f32 %v543_v5, %v488_v63 }
 0x123   :  { %v599_v18 = vpop.f32.mrf.mxu1  ;;  %v876_v49 = vadd.f32 %v875_v45, %v874_v26 }
 0x124   :  { %v2523_v33 = vadd.f32 %v599_v18, %v2414_v62  ;;  %v2544_v11 = vadd.f32 %v2460_v51, %v479_v4  ;;  %3085 = vst [vmem:[#allocation2_spill] sm:$0xff] %v2562_v10 }
 0x125   :  { %v434_v20 = vpop.f32.mrf.mxu2  ;;  %v878_v39 = vadd.f32 %v877_v29, %v876_v49 }
 0x126   :  { %1391 = vmatmul.msk.f32.gmra.mxu1 %vm235_vm0, %v3083_v23  ;;  %v490_v12 = vpop.f32.mrf.mxu3  ;;  %v435_v14 = vadd.f32 %v434_v20, %v2346_v9  ;;  %v879_v51 = vsel %vm867_vm1, %v2544_v11, 0.0 }
 0x127   :  { %v546_v25 = vpop.f32.mrf.mxu0  ;;  %v880_v8 = vadd.f32 %v879_v51, %v878_v39 }
 0x128   :  { %v491_v9 = vadd.f32 %v490_v12, %v435_v14 }
 0x129   :  { %v882_v24 = vadd.f32 %v881_v53, %v880_v8 }
 0x12a   :  { %v2566_v18 = vadd.f32 %v546_v25, %v491_v9 }
 0x12b   :  { %v602_v52 = vpop.f32.mrf.mxu1  ;;  %v884_v5 = vadd.f32 %v883_v3, %v882_v24 }
 0x12c   :  { %v2553_v41 = vadd.f32 %v602_v52, %v2414_v62  ;;  %3086 = vst [vmem:[#allocation4_spill] sm:$0xff] %v2566_v18  ;;  %v887_v34 = vsel %vm867_vm1, %v2566_v18, 0.0 }
 0x12d   :  { %v437_v46 = vpop.f32.mrf.mxu2 }
 0x12e   :  { %v438_v36 = vadd.f32 %v437_v46, %v2358_v30  ;;  %v493_v32 = vpop.f32.mrf.mxu3  ;;  %v885_v30 = vsel %vm867_vm1, %v2562_v10, 0.0 }
 0x12f   :  { %v549_v59 = vpop.f32.mrf.mxu0  ;;  %v886_v27 = vadd.f32 %v885_v30, %v884_v5 }
 0x130   :  { %v494_v38 = vadd.f32 %v493_v32, %v438_v36 }
 0x131   :  { %v888_v12 = vadd.f32 %v887_v34, %v886_v27 }
 0x132   :  { %v2570_v15 = vadd.f32 %v549_v59, %v494_v38 }
 0x133   :  { %v605_v7 = vpop.f32.mrf.mxu1 }
 0x134   :  { %3087 = vst [vmem:[#allocation5_spill] sm:$0xff] %v2570_v15  ;;  %v2573_v22 = vadd.f32 %v605_v7, %v2414_v62  ;;  %v889_v28 = vsel %vm867_vm1, %v2570_v15, 0.0 }
 0x135   :  { %v440_v60 = vpop.f32.mrf.mxu2  ;;  %v890_v55 = vadd.f32 %v889_v28, %v888_v12 }
 0x136   :  { %v441_v20 = vadd.f32 %v440_v60, %v2372_v16  ;;  %v496_v4 = vpop.f32.mrf.mxu3 }
 0x137   :  { %v552_v23 = vpop.f32.mrf.mxu0 }
 0x138   :  { %v497_v37 = vadd.f32 %v496_v4, %v441_v20 }
 0x13a   :  { %v2580_v43 = vadd.f32 %v552_v23, %v497_v37 }
 0x13b   :  { %v608_v44 = vpop.f32.mrf.mxu1 }
 0x13c   :  { %3088 = vst [vmem:[#allocation7_spill] sm:$0xff] %v2580_v43  ;;  %v2585_v16 = vadd.f32 %v608_v44, %v2414_v62  ;;  %v892_v25 = vsel %vm891_vm2, %v2580_v43, 0.0 }
 0x13d   :  { %v628_v21 = vpop.f32.mrf.mxu2  ;;  %v893_v45 = vadd.f32 %v892_v25, %v890_v55 }
 0x13e   :  { %v629_v57 = vadd.f32 %v628_v21, %v573_v58  ;;  %v684_v14 = vpop.f32.mrf.mxu3 }
 0x13f   :  { %v894_v26 = vrot.slane %v893_v45, 4  ;;  %v740_v29 = vpop.f32.mrf.mxu0 }
 0x140   :  { %v685_v52 = vadd.f32 %v684_v14, %v629_v57 }
 0x141   :  { %v895_v63 = vadd.f32 %v894_v26, %v893_v45 }
 0x142   :  { %v741_v49 = vadd.f32 %v740_v29, %v685_v52 }
 0x143   :  { %v796_v46 = vpop.f32.mrf.mxu1  ;;  %v896_v51 = vrot.slane %v895_v63, 2 }
 0x144   :  { %v2591_v9 = vadd.f32 %v796_v46, %v741_v49 }
 0x145   :  { %v631_v36 = vpop.f32.mrf.mxu2  ;;  %v897_v39 = vadd.f32 %v896_v51, %v895_v63 }
 0x146   :  { %v632_v32 = vadd.f32 %v631_v36, %v576_v40  ;;  %v687_v53 = vpop.f32.mrf.mxu3 }
 0x147   :  { %v898_v38 = vrot.slane %v897_v39, 1  ;;  %v743_v8 = vpop.f32.mrf.mxu0 }
 0x148   :  { %v688_v59 = vadd.f32 %v687_v53, %v632_v32 }
 0x149   :  { %v899_v3 = vadd.f32 %v898_v38, %v897_v39 }
 0x14a   :  { %v744_v24 = vadd.f32 %v743_v8, %v688_v59 }
 0x14b   :  { %v799_v7 = vpop.f32.mrf.mxu1  ;;  %964 = vrot.lane.b32.xlu0 %v899_v3, %s1430_s0 }
 0x14c   :  { %v2594_v30 = vadd.f32 %v799_v7, %v744_v24 }
 0x14d   :  { %v634_v5 = vpop.f32.mrf.mxu2 }
 0x14e   :  { %v690_v60 = vpop.f32.mrf.mxu3  ;;  %v635_v46 = vadd.f32 %v634_v5, %v2419_v0 }
 0x14f   :  { %v746_v42 = vpop.f32.mrf.mxu0 }
 0x150   :  { %v691_v39 = vadd.f32 %v690_v60, %v635_v46 }
 0x152   :  { %v747_v3 = vadd.f32 %v746_v42, %v691_v39 }
 0x153   :  { %v802_v62 = vpop.f32.mrf.mxu1 }
 0x154   :  { %v2602_v10 = vadd.f32 %v802_v62, %v747_v3 }
 0x155   :  { %v637_v20 = vpop.f32.mrf.mxu2 }
 0x156   :  { %v693_v34 = vpop.f32.mrf.mxu3  ;;  %v638_v36 = vadd.f32 %v637_v20, %v2431_v19  ;;  %v934_v62 = vsel %vm867_vm1, %v2602_v10, 0.0 }
 0x157   :  { %v749_v4 = vpop.f32.mrf.mxu0 }
 0x158   :  { %v694_v59 = vadd.f32 %v693_v34, %v638_v36 }
 0x15a   :  { %v750_v18 = vadd.f32 %v749_v4, %v694_v59 }
 0x15b   :  { %v805_v27 = vpop.f32.mrf.mxu1 }
 0x15c   :  { %v2607_v34 = vadd.f32 %v805_v27, %v750_v18 }
 0x15d   :  { %v640_v37 = vpop.f32.mrf.mxu2 }
 0x15e   :  { %v696_v23 = vpop.f32.mrf.mxu3  ;;  %v641_v53 = vadd.f32 %v640_v37, %v2443_v35  ;;  %v936_v27 = vsel %vm867_vm1, %v2607_v34, 0.0 }
 0x15f   :  { %v752_v28 = vpop.f32.mrf.mxu0 }
 0x160   :  { %v697_v7 = vadd.f32 %v696_v23, %v641_v53 }
 0x162   :  { %v753_v60 = vadd.f32 %v752_v28, %v697_v7 }
 0x163   :  { %v808_v12 = vpop.f32.mrf.mxu1 }
 0x165   :  { %v643_v44 = vpop.f32.mrf.mxu2 }
 0x166   :  { %v699_v55 = vpop.f32.mrf.mxu3  ;;  %v644_v8 = vadd.f32 %v643_v44, %v2455_v50  ;;  %v932_v50 = vsel %vm867_vm1, %v2594_v30, 0.0 }
 0x167   :  { %v755_v58 = vpop.f32.mrf.mxu0 }
 0x168   :  { %v700_v0 = vadd.f32 %v699_v55, %v644_v8 }
 0x16a   :  { %v756_v37 = vadd.f32 %v755_v58, %v700_v0 }
 0x16b   :  { %v811_v25 = vpop.f32.mrf.mxu1 }
 0x16c   :  { %v2619_v58 = vadd.f32 %v811_v25, %v756_v37 }
 0x16d   :  { %v646_v21 = vpop.f32.mrf.mxu2 }
 0x16e   :  { %v702_v45 = vpop.f32.mrf.mxu3  ;;  %v647_v43 = vadd.f32 %v646_v21, %v2465_v2 }
 0x16f   :  { %v758_v57 = vpop.f32.mrf.mxu0 }
 0x170   :  { %v703_v20 = vadd.f32 %v702_v45, %v647_v43  ;;  %v2614_v43 = vadd.f32 %v808_v12, %v753_v60 }
 0x173   :  { %v814_v14 = vpop.f32.mrf.mxu1 }
 0x175   :  { %v649_v26 = vpop.f32.mrf.mxu2 }
 0x176   :  { %v705_v52 = vpop.f32.mrf.mxu3  ;;  %v650_v5 = vadd.f32 %v649_v26, %v2477_v31  ;;  %v931_v31 = vsel %vm867_vm1, %v2591_v9, 0.0 }
 0x177   :  { %v761_v29 = vpop.f32.mrf.mxu0  ;;  %v933_v18 = vadd.f32 %v932_v50, %v931_v31 }
 0x178   :  { %v706_v2 = vadd.f32 %v705_v52, %v650_v5  ;;  %v938_v52 = vsel %vm867_vm1, %v2614_v43, 0.0 }
 0x179   :  { %v935_v45 = vadd.f32 %v934_v62, %v933_v18 }
 0x17b   :  { %v817_v63 = vpop.f32.mrf.mxu1  ;;  %v937_v46 = vadd.f32 %v936_v27, %v935_v45 }
 0x17d   :  { %v652_v49 = vpop.f32.mrf.mxu2  ;;  %v939_v39 = vadd.f32 %v938_v52, %v937_v46  ;;  %v838_v46 = vsel %vm235_vm0, %v2511_v54, 0.0 }
 0x17e   :  { %v708_v51 = vpop.f32.mrf.mxu3  ;;  %v653_v35 = vadd.f32 %v652_v49, %v2497_v61  ;;  %v759_v61 = vadd.f32 %v758_v57, %v703_v20 }
 0x17f   :  { %v764_v40 = vpop.f32.mrf.mxu0 }
 0x180   :  { %v709_v28 = vadd.f32 %v708_v51, %v653_v35  ;;  %v2623_v12 = vadd.f32 %v814_v14, %v759_v61  ;;  %v940_v51 = vsel %vm867_vm1, %v2619_v58, 0.0 }
 0x181   :  { %v941_v3 = vadd.f32 %v940_v51, %v939_v39  ;;  %v840_v51 = vsel %vm235_vm0, %v2518_v6, 0.0  ;;  %v842_v39 = vsel %vm235_vm0, %v2530_v17, 0.0 }
 0x182   :  { %v765_v57 = vadd.f32 %v764_v40, %v709_v28 }
 0x183   :  { %v820_v32 = vpop.f32.mrf.mxu1 }
 0x184   :  { %v2632_v59 = vadd.f32 %v820_v32, %v765_v57  ;;  %v836_v57 = vsel %vm235_vm0, %v2398_v56, 0.0 }
 0x185   :  { %v655_v38 = vpop.f32.mrf.mxu2 }
 0x186   :  { %v711_v24 = vpop.f32.mrf.mxu3  ;;  %v656_v4 = vadd.f32 %v655_v38, %v2523_v33  ;;  %v762_v33 = vadd.f32 %v761_v29, %v706_v2  ;;  %v942_v38 = vsel %vm867_vm1, %v2623_v12, 0.0 }
 0x187   :  { %v767_v15 = vpop.f32.mrf.mxu0 }
 0x188   :  { %v712_v21 = vadd.f32 %v711_v24, %v656_v4  ;;  %v2627_v36 = vadd.f32 %v817_v63, %v762_v33 }
 0x18a   :  { %v768_v25 = vadd.f32 %v767_v15, %v712_v21  ;;  %v944_v24 = vsel %vm867_vm1, %v2627_v36, 0.0  ;;  %v943_v15 = vadd.f32 %v942_v38, %v941_v3  ;;  %v903_v38 = vsel %vm235_vm0, %v2602_v10, 0.0 }
 0x18b   :  { %v823_v19 = vpop.f32.mrf.mxu1  ;;  %v905_v3 = vsel %vm235_vm0, %v2607_v34, 0.0 }
 0x18c   :  { %v2636_v7 = vadd.f32 %v823_v19, %v768_v25  ;;  %v945_v60 = vadd.f32 %v944_v24, %v943_v15  ;;  %v901_v25 = vsel %vm235_vm0, %v2594_v30, 0.0  ;;  %v846_v15 = vsel %vm235_vm0, %v2544_v11, 0.0 }
 0x18d   :  { %v658_v42 = vpop.f32.mrf.mxu2 }
 0x18e   :  { %v714_v23 = vpop.f32.mrf.mxu3  ;;  %v659_v44 = vadd.f32 %v658_v42, %v2553_v41  ;;  %v948_v20 = vsel %vm867_vm1, %v2636_v7, 0.0 }
 0x18f   :  { %v770_v55 = vpop.f32.mrf.mxu0 }
 0x190   :  { %v715_v49 = vadd.f32 %v714_v23, %v659_v44 }
 0x192   :  { %v771_v14 = vadd.f32 %v770_v55, %v715_v49  ;;  %v835_v49 = vsel %vm235_vm0, %v2508_v13, 0.0 }
 0x193   :  { %v826_v26 = vpop.f32.mrf.mxu1 }
 0x194   :  { %v2640_v5 = vadd.f32 %v826_v26, %v771_v14 }
 0x195   :  { %v661_v41 = vpop.f32.mrf.mxu2 }
 0x196   :  { %v662_v29 = vadd.f32 %v661_v41, %v2573_v22  ;;  %v717_v53 = vpop.f32.mrf.mxu3  ;;  %v946_v22 = vsel %vm867_vm1, %v2632_v59, 0.0  ;;  %v950_v37 = vsel %vm867_vm1, %v2640_v5, 0.0  ;;  %v837_v41 = vadd.f32 %v836_v57, %v835_v49 }
 0x197   :  { %v773_v8 = vpop.f32.mrf.mxu0  ;;  %v947_v42 = vadd.f32 %v946_v22, %v945_v60  ;;  %v919_v49 = vsel %vm235_vm0, %v2640_v5, 0.0 }
 0x198   :  { %v718_v40 = vadd.f32 %v717_v53, %v662_v29  ;;  %v839_v29 = vadd.f32 %v838_v46, %v837_v41  ;;  %v900_v53 = vsel %vm235_vm0, %v2591_v9, 0.0  ;;  %v3092_v46 = vld [vmem:[#allocation7_spill] sm:$0xff] }
 0x199   :  { %v949_v31 = vadd.f32 %v948_v20, %v947_v42  ;;  %v909_v20 = vsel %vm235_vm0, %v2619_v58, 0.0  ;;  %v859_v41 = vsel %vm858_vm3, %v3092_v46, 0.0 }
 0x19a   :  { %v774_v63 = vadd.f32 %v773_v8, %v718_v40  ;;  %v841_v14 = vadd.f32 %v840_v51, %v839_v29  ;;  %v902_v40 = vadd.f32 %v901_v25, %v900_v53  ;;  %v844_v8 = vsel %vm235_vm0, %v2538_v48, 0.0 }
 0x19b   :  { %v829_v0 = vpop.f32.mrf.mxu1  ;;  %v951_v28 = vadd.f32 %v950_v37, %v949_v31  ;;  %v911_v37 = vsel %vm235_vm0, %v2623_v12, 0.0  ;;  %v3089_v31 = vld [vmem:[#allocation2_spill] sm:$0xff] }
 0x19c   :  { %v2644_v35 = vadd.f32 %v829_v0, %v774_v63  ;;  %v843_v24 = vadd.f32 %v842_v39, %v841_v14  ;;  %v904_v63 = vadd.f32 %v903_v38, %v902_v40  ;;  %v907_v0 = vsel %vm235_vm0, %v2614_v43, 0.0 }
 0x19d   :  { %v664_v32 = vpop.f32.mrf.mxu2 }
 0x19e   :  { %v665_v50 = vadd.f32 %v664_v32, %v2585_v16  ;;  %v720_v19 = vpop.f32.mrf.mxu3  ;;  %v952_v23 = vsel %vm867_vm1, %v2644_v35, 0.0  ;;  %v845_v22 = vadd.f32 %v844_v8, %v843_v24  ;;  %v906_v60 = vadd.f32 %v905_v3, %v904_v63 }
 0x19f   :  { %v776_v4 = vpop.f32.mrf.mxu0  ;;  %v953_v55 = vadd.f32 %v952_v23, %v951_v28  ;;  %v848_v32 = vsel %vm235_vm0, %v2550_v1, 0.0  ;;  %v913_v23 = vsel %vm235_vm0, %v2627_v36, 0.0  ;;  %v921_v29 = vsel %vm235_vm0, %v2644_v35, 0.0 }
 0x1a0   :  { %v721_v2 = vadd.f32 %v720_v19, %v665_v50  ;;  %v847_v50 = vadd.f32 %v846_v15, %v845_v22  ;;  %v908_v42 = vadd.f32 %v907_v0, %v906_v60  ;;  %v850_v19 = vsel %vm235_vm0, %v2557_v47, 0.0 }
 0x1a1   :  { %v1431_v3 = vmov 392.0  }
 0x1a2   :  { %v777_v62 = vadd.f32 %v776_v4, %v721_v2  ;;  %v849_v2 = vadd.f32 %v848_v32, %v847_v50  ;;  %v910_v4 = vadd.f32 %v909_v20, %v908_v42  ;;  %1426 = vrcp.f32 %v1431_v3 }
 0x1a3   :  { %v832_v61 = vpop.f32.mrf.mxu1 }
 0x1a4   :  { %v2651_v44 = vadd.f32 %v832_v61, %v777_v62  ;;  %v852_v62 = vsel %vm235_vm0, %v3089_v31, 0.0  ;;  %v851_v61 = vadd.f32 %v850_v19, %v849_v2  ;;  %v912_v28 = vadd.f32 %v911_v37, %v910_v4 }
 0x1a6   :  { %v954_v16 = vsel %vm891_vm2, %v2651_v44, 0.0  ;;  %v923_v38 = vsel %vm858_vm3, %v2651_v44, 0.0 }
 0x1a7   :  { %v955_v18 = vadd.f32 %v954_v16, %v953_v55  ;;  %v3090_v55 = vld [vmem:[#allocation4_spill] sm:$0xff] }
 0x1a8   :  { %v854_v16 = vsel %vm235_vm0, %v3090_v55, 0.0  ;;  %v1427_v15 = vpop.eup %1426 }
 0x1a9   :  { %v956_v27 = vrot.slane %v955_v18, 4  ;;  %v975_v60 = vmul.f32 392.0, %v1427_v15  ;;  %vm979_vm4 = vweird.f32 %v1427_v15 }
 0x1ab   :  { %v957_v33 = vadd.f32 %v956_v27, %v955_v18  ;;  %v915_v18 = vsel %vm235_vm0, %v2632_v59, 0.0  ;;  %v853_v27 = vadd.f32 %v852_v62, %v851_v61  ;;  %v976_v50 = vsub.f32 1.0, %v975_v60 }
 0x1ad   :  { %v958_v21 = vrot.slane %v957_v33, 2  ;;  %v855_v57 = vadd.f32 %v854_v16, %v853_v27  ;;  %v977_v2 = vmul.f32 %v1427_v15, %v976_v50 }
 0x1af   :  { %v959_v45 = vadd.f32 %v958_v21, %v957_v33  ;;  %v914_v33 = vadd.f32 %v913_v23, %v912_v28  ;;  %v917_v21 = vsel %vm235_vm0, %v2636_v7, 0.0  ;;  %v978_v61 = vadd.f32 %v1427_v15, %v977_v2 }
 0x1b1   :  { %v960_v26 = vrot.slane %v959_v45, 1 }
 0x1b3   :  { %v961_v52 = vadd.f32 %v960_v26, %v959_v45  ;;  %v3091_v45 = vld [vmem:[#allocation5_spill] sm:$0xff] }
 0x1b4   :  { %v856_v26 = vsel %vm235_vm0, %v3091_v45, 0.0 }
 0x1b5   :  { %970 = vrot.lane.b32.xlu0 %v961_v52, %s1430_s0  ;;  %v916_v52 = vadd.f32 %v915_v18, %v914_v33  ;;  %v857_v25 = vadd.f32 %v856_v26, %v855_v57  ;;  %v2708_v18 = vsel %vm979_vm4, %v1427_v15, %v978_v61 }
 0x1b7   :  { %v918_v51 = vadd.f32 %v917_v21, %v916_v52  ;;  %v860_v53 = vadd.f32 %v859_v41, %v857_v25 }
 0x1b9   :  { %v920_v39 = vadd.f32 %v919_v49, %v918_v51  ;;  %v861_v40 = vrot.slane %v860_v53, 4 }
 0x1bb   :  { %v922_v14 = vadd.f32 %v921_v29, %v920_v39  ;;  %v862_v24 = vadd.f32 %v861_v40, %v860_v53 }
 0x1bd   :  { %v924_v8 = vadd.f32 %v923_v38, %v922_v14  ;;  %v863_v0 = vrot.slane %v862_v24, 2  ;;  %v965_v37 = vpop.permute.xlu0 %964 }
 0x1bf   :  { %v925_v63 = vrot.slane %v924_v8, 4  ;;  %v864_v32 = vadd.f32 %v863_v0, %v862_v24 }
 0x1c1   :  { %v926_v22 = vadd.f32 %v925_v63, %v924_v8  ;;  %v865_v42 = vrot.slane %v864_v32, 1 }
 0x1c3   :  { %v927_v20 = vrot.slane %v926_v22, 2  ;;  %v866_v4 = vadd.f32 %v865_v42, %v864_v32 }
 0x1c5   :  { %v928_v19 = vadd.f32 %v927_v20, %v926_v22  ;;  %v967_v23 = vadd.f32 %v965_v37, %v866_v4 }
 0x1c7   :  { %v929_v62 = vrot.slane %v928_v19, 1 }
 0x1c9   :  { %v930_v28 = vadd.f32 %v929_v62, %v928_v19 }
 0x1cb   :  { %v968_v16 = vadd.f32 %v967_v23, %v930_v28 }
 0x227   :  { %v971_v27 = vpop.permute.xlu0 %970 }
 0x228   :  { %v973_v33 = vadd.f32 %v971_v27, %v968_v16 }
 0x22a   :  { %v2711_v21 = vmul.f32 %v2708_v18, %v973_v33 }
 0x22c   :  { %v2714_v26 = vperm.slane %v2711_v21, 0 }
 0x22e   :  { %1041 = vrot.lane.b32.xlu1 %v2714_v26, %s1430_s0 }
 0x2a0   :  { %v2718_v52 = vpop.permute.xlu1 %1041 }
 0x2a1   :  { %v1158_v57 = vsub.f32 %v2591_v9, %v2718_v52  ;;  %v1159_v49 = vsub.f32 %v2594_v30, %v2718_v52  ;;  %v1160_v41 = vsub.f32 %v2602_v10, %v2718_v52  ;;  %v1161_v51 = vsub.f32 %v2607_v34, %v2718_v52 }
 0x2a2   :  { %v1162_v39 = vsub.f32 %v2614_v43, %v2718_v52  ;;  %v1163_v38 = vsub.f32 %v2619_v58, %v2718_v52  ;;  %v1164_v24 = vsub.f32 %v2623_v12, %v2718_v52  ;;  %v1165_v0 = vsub.f32 %v2627_v36, %v2718_v52 }
 0x2a3   :  { %v1171_v25 = vmul.f32 %v1158_v57, %v1158_v57  ;;  %v1172_v29 = vmul.f32 %v1159_v49, %v1159_v49  ;;  %v1173_v53 = vmul.f32 %v1160_v41, %v1160_v41  ;;  %v1174_v14 = vmul.f32 %v1161_v51, %v1161_v51 }
 0x2a4   :  { %v1175_v63 = vmul.f32 %v1162_v39, %v1162_v39  ;;  %v1176_v60 = vmul.f32 %v1163_v38, %v1163_v38  ;;  %v1044_v20 = vsub.f32 %v2508_v13, %v2718_v52  ;;  %v1045_v50 = vsub.f32 %v2398_v56, %v2718_v52 }
 0x2a5   :  { %v1184_v40 = vsel %vm867_vm1, %v1171_v25, 0.0  ;;  %v1185_v8 = vsel %vm867_vm1, %v1172_v29, 0.0  ;;  %v1187_v15 = vsel %vm867_vm1, %v1173_v53, 0.0  ;;  %v1189_v32 = vsel %vm867_vm1, %v1174_v14, 0.0 }
 0x2a6   :  { %v1186_v3 = vadd.f32 %v1185_v8, %v1184_v40  ;;  %v1166_v19 = vsub.f32 %v2632_v59, %v2718_v52  ;;  %v1177_v37 = vmul.f32 %v1164_v24, %v1164_v24  ;;  %v1191_v2 = vsel %vm867_vm1, %v1175_v63, 0.0 }
 0x2a7   :  { %v1046_v4 = vsub.f32 %v2511_v54, %v2718_v52  ;;  %v1167_v62 = vsub.f32 %v2636_v7, %v2718_v52  ;;  %v1178_v23 = vmul.f32 %v1165_v0, %v1165_v0  ;;  %v1193_v28 = vsel %vm867_vm1, %v1176_v60, 0.0 }
 0x2a8   :  { %v1188_v22 = vadd.f32 %v1187_v15, %v1186_v3  ;;  %v1047_v16 = vsub.f32 %v2518_v6, %v2718_v52  ;;  %v1057_v27 = vmul.f32 %v1044_v20, %v1044_v20  ;;  %v1058_v33 = vmul.f32 %v1045_v50, %v1045_v50 }
 0x2a9   :  { %v1168_v57 = vsub.f32 %v2640_v5, %v2718_v52  ;;  %v1179_v41 = vmul.f32 %v1166_v19, %v1166_v19  ;;  %v1195_v51 = vsel %vm867_vm1, %v1177_v37, 0.0  ;;  %v1048_v25 = vsub.f32 %v2530_v17, %v2718_v52 }
 0x2aa   :  { %v1190_v42 = vadd.f32 %v1189_v32, %v1188_v22  ;;  %v1059_v29 = vmul.f32 %v1046_v4, %v1046_v4  ;;  %v1169_v39 = vsub.f32 %v2644_v35, %v2718_v52  ;;  %v1180_v53 = vmul.f32 %v1167_v62, %v1167_v62 }
 0x2ab   :  { %v1070_v14 = vsel %vm867_vm1, %v1057_v27, 0.0  ;;  %v1197_v40 = vsel %vm867_vm1, %v1178_v23, 0.0  ;;  %v1049_v8 = vsub.f32 %v2538_v48, %v2718_v52  ;;  %v1060_v3 = vmul.f32 %v1047_v16, %v1047_v16 }
 0x2ac   :  { %v1192_v61 = vadd.f32 %v1191_v2, %v1190_v42  ;;  %v1071_v24 = vsel %vm867_vm1, %v1058_v33, 0.0  ;;  %v1170_v63 = vsub.f32 %v2651_v44, %v2718_v52  ;;  %v1181_v15 = vmul.f32 %v1168_v57, %v1168_v57 }
 0x2ad   :  { %v1072_v22 = vadd.f32 %v1071_v24, %v1070_v14  ;;  %v1199_v60 = vsel %vm867_vm1, %v1179_v41, 0.0  ;;  %v1050_v32 = vsub.f32 %v2544_v11, %v2718_v52  ;;  %v1061_v20 = vmul.f32 %v1048_v25, %v1048_v25 }
 0x2ae   :  { %v1194_v49 = vadd.f32 %v1193_v28, %v1192_v61  ;;  %v1073_v50 = vsel %vm867_vm1, %v1059_v29, 0.0  ;;  %v1182_v42 = vmul.f32 %v1169_v39, %v1169_v39  ;;  %v1201_v2 = vsel %vm867_vm1, %v1180_v53, 0.0 }
 0x2af   :  { %v1074_v37 = vadd.f32 %v1073_v50, %v1072_v22  ;;  %v1051_v4 = vsub.f32 %v2550_v1, %v2718_v52  ;;  %v1062_v62 = vmul.f32 %v1049_v8, %v1049_v8  ;;  %v1075_v23 = vsel %vm867_vm1, %v1060_v3, 0.0 }
 0x2b0   :  { %v1196_v38 = vadd.f32 %v1195_v51, %v1194_v49  ;;  %v1183_v61 = vmul.f32 %v1170_v63, %v1170_v63  ;;  %v1203_v27 = vsel %vm867_vm1, %v1181_v15, 0.0  ;;  %v1052_v33 = vsub.f32 %v2557_v47, %v2718_v52 }
 0x2b1   :  { %v1076_v16 = vadd.f32 %v1075_v23, %v1074_v37  ;;  %v1063_v57 = vmul.f32 %v1050_v32, %v1050_v32  ;;  %v1077_v49 = vsel %vm867_vm1, %v1061_v20, 0.0  ;;  %v1205_v25 = vsel %vm867_vm1, %v1182_v42, 0.0 }
 0x2b2   :  { %v1198_v0 = vadd.f32 %v1197_v40, %v1196_v38  ;;  %v1053_v29 = vsub.f32 %v3089_v31, %v2718_v52  ;;  %v1064_v39 = vmul.f32 %v1051_v4, %v1051_v4  ;;  %v1079_v53 = vsel %vm867_vm1, %v1062_v62, 0.0 }
 0x2b3   :  { %v1078_v51 = vadd.f32 %v1077_v49, %v1076_v16  ;;  %v1207_v40 = vsel %vm891_vm2, %v1183_v61, 0.0  ;;  %v1054_v8 = vsub.f32 %v3090_v55, %v2718_v52  ;;  %v1065_v3 = vmul.f32 %v1052_v33, %v1052_v33 }
 0x2b4   :  { %v1200_v19 = vadd.f32 %v1199_v60, %v1198_v0  ;;  %v1081_v24 = vsel %vm867_vm1, %v1063_v57, 0.0  ;;  %v1055_v0 = vsub.f32 %v3091_v45, %v2718_v52  ;;  %v1066_v22 = vmul.f32 %v1053_v29, %v1053_v29 }
 0x2b5   :  { %v1080_v14 = vadd.f32 %v1079_v53, %v1078_v51  ;;  %v1083_v60 = vsel %vm867_vm1, %v1064_v39, 0.0  ;;  %v1056_v50 = vsub.f32 %v3092_v46, %v2718_v52  ;;  %v1067_v42 = vmul.f32 %v1054_v8, %v1054_v8 }
 0x2b6   :  { %v1202_v28 = vadd.f32 %v1201_v2, %v1200_v19  ;;  %v1085_v19 = vsel %vm867_vm1, %v1065_v3, 0.0  ;;  %v1068_v4 = vmul.f32 %v1055_v0, %v1055_v0  ;;  %v1087_v62 = vsel %vm867_vm1, %v1066_v22, 0.0 }
 0x2b7   :  { %v1082_v15 = vadd.f32 %v1081_v24, %v1080_v14  ;;  %v1089_v16 = vsel %vm867_vm1, %v1067_v42, 0.0  ;;  %v983_v8 = vsub.f32 %v2508_v13, %v2714_v26  ;;  %v984_v3 = vsub.f32 %v2398_v56, %v2714_v26 }
 0x2b8   :  { %v1204_v41 = vadd.f32 %v1203_v27, %v1202_v28  ;;  %v1069_v28 = vmul.f32 %v1056_v50, %v1056_v50  ;;  %v1091_v57 = vsel %vm867_vm1, %v1068_v4, 0.0  ;;  %v1101_v24 = vsub.f32 %v2591_v9, %v2714_v26 }
 0x2b9   :  { %v1084_v20 = vadd.f32 %v1083_v60, %v1082_v15  ;;  %v996_v15 = vmul.f32 %v983_v8, %v983_v8  ;;  %v997_v0 = vmul.f32 %v984_v3, %v984_v3  ;;  %v985_v22 = vsub.f32 %v2511_v54, %v2714_v26 }
 0x2ba   :  { %v1206_v38 = vadd.f32 %v1205_v25, %v1204_v41  ;;  %v1093_v52 = vsel %vm891_vm2, %v1069_v28, 0.0  ;;  %v1114_v60 = vmul.f32 %v1101_v24, %v1101_v24  ;;  %v1103_v42 = vsub.f32 %v2602_v10, %v2714_v26 }
 0x2bb   :  { %v1086_v2 = vadd.f32 %v1085_v19, %v1084_v20  ;;  %v1009_v20 = vsel %vm235_vm0, %v996_v15, 0.0  ;;  %v1010_v50 = vsel %vm235_vm0, %v997_v0, 0.0  ;;  %v986_v19 = vsub.f32 %v2518_v6, %v2714_v26 }
 0x2bc   :  { %v1208_v63 = vadd.f32 %v1207_v40, %v1206_v38  ;;  %v989_v3 = vsub.f32 %v2544_v11, %v2714_v26  ;;  %v1107_v0 = vsub.f32 %v2623_v12, %v2714_v26 }
 0x2bd   :  { %v1088_v61 = vadd.f32 %v1087_v62, %v1086_v2  ;;  %v1127_v2 = vsel %vm235_vm0, %v1114_v60, 0.0  ;;  %v1011_v62 = vadd.f32 %v1010_v50, %v1009_v20  ;;  %v990_v20 = vsub.f32 %v2550_v1, %v2714_v26 }
 0x2be   :  { %v1209_v32 = vrot.slane %v1208_v63, 4  ;;  %v1002_v50 = vmul.f32 %v989_v3, %v989_v3 }
 0x2bf   :  { %v1090_v33 = vadd.f32 %v1089_v16, %v1088_v61  ;;  %v1116_v61 = vmul.f32 %v1103_v42, %v1103_v42  ;;  %v987_v16 = vsub.f32 %v2530_v17, %v2714_v26 }
 0x2c0   :  { %v1210_v37 = vadd.f32 %v1209_v32, %v1208_v63  ;;  %v1102_v63 = vsub.f32 %v2594_v30, %v2714_v26 }
 0x2c1   :  { %v1092_v41 = vadd.f32 %v1091_v57, %v1090_v33 }
 0x2c2   :  { %v1211_v23 = vrot.slane %v1210_v37, 2  ;;  %v1115_v32 = vmul.f32 %v1102_v63, %v1102_v63 }
 0x2c3   :  { %v1094_v25 = vadd.f32 %v1093_v52, %v1092_v41  ;;  %v1130_v52 = vsel %vm235_vm0, %v1116_v61, 0.0  ;;  %v1003_v61 = vmul.f32 %v990_v20, %v990_v20 }
 0x2c4   :  { %v1212_v27 = vadd.f32 %v1211_v23, %v1210_v37  ;;  %v998_v37 = vmul.f32 %v985_v22, %v985_v22  ;;  %v1128_v4 = vsel %vm235_vm0, %v1115_v32, 0.0  ;;  %v1104_v23 = vsub.f32 %v2607_v34, %v2714_v26 }
 0x2c5   :  { %v1095_v29 = vrot.slane %v1094_v25, 4  ;;  %v1129_v28 = vadd.f32 %v1128_v4, %v1127_v2  ;;  %v1120_v2 = vmul.f32 %v1107_v0, %v1107_v0 }
 0x2c6   :  { %v1213_v49 = vrot.slane %v1212_v27, 1  ;;  %v1012_v33 = vsel %vm235_vm0, %v998_v37, 0.0  ;;  %v1117_v41 = vmul.f32 %v1104_v23, %v1104_v23  ;;  %v1108_v37 = vsub.f32 %v2627_v36, %v2714_v26 }
 0x2c7   :  { %v1096_v39 = vadd.f32 %v1095_v29, %v1094_v25  ;;  %v1013_v57 = vadd.f32 %v1012_v33, %v1011_v62  ;;  %v988_v25 = vsub.f32 %v2538_v48, %v2714_v26  ;;  %v1000_v29 = vmul.f32 %v987_v16, %v987_v16 }
 0x2c8   :  { %v1214_v51 = vadd.f32 %v1213_v49, %v1212_v27  ;;  %v999_v27 = vmul.f32 %v986_v19, %v986_v19  ;;  %v1105_v49 = vsub.f32 %v2614_v43, %v2714_v26  ;;  %v991_v23 = vsub.f32 %v2557_v47, %v2714_v26 }
 0x2c9   :  { %v1097_v53 = vrot.slane %v1096_v39, 2  ;;  %v1001_v24 = vmul.f32 %v988_v25, %v988_v25  ;;  %v1016_v63 = vsel %vm235_vm0, %v1000_v29, 0.0  ;;  %v1121_v33 = vmul.f32 %v1108_v37, %v1108_v37 }
 0x2ca   :  { %1223 = vrot.lane.b32.xlu2 %v1214_v51, %s1430_s0  ;;  %v1131_v51 = vadd.f32 %v1130_v52, %v1129_v28  ;;  %v1020_v28 = vsel %vm235_vm0, %v1002_v50, 0.0  ;;  %v1004_v52 = vmul.f32 %v991_v23, %v991_v23  ;;  %v1110_v29 = vsub.f32 %v2636_v7, %v2714_v26 }
 0x2cb   :  { %v1098_v38 = vadd.f32 %v1097_v53, %v1096_v39  ;;  %v1014_v39 = vsel %vm235_vm0, %v999_v27, 0.0  ;;  %v1018_v42 = vsel %vm235_vm0, %v1001_v24, 0.0  ;;  %v1109_v27 = vsub.f32 %v2632_v59, %v2714_v26 }
 0x2cc   :  { %v1015_v53 = vadd.f32 %v1014_v39, %v1013_v57  ;;  %v1138_v57 = vsel %vm235_vm0, %v1120_v2, 0.0  ;;  %v1111_v24 = vsub.f32 %v2640_v5, %v2714_v26  ;;  %v1112_v50 = vsub.f32 %v2644_v35, %v2714_v26 }
 0x2cd   :  { %v1099_v14 = vrot.slane %v1098_v38, 1  ;;  %v1122_v39 = vmul.f32 %v1109_v27, %v1109_v27  ;;  %v995_v2 = vsub.f32 %v3092_v46, %v2714_v26 }
 0x2ce   :  { %v1017_v15 = vadd.f32 %v1016_v63, %v1015_v53  ;;  %v1140_v53 = vsel %vm235_vm0, %v1121_v33, 0.0  ;;  %v1123_v63 = vmul.f32 %v1110_v29, %v1110_v29 }
 0x2cf   :  { %v1100_v40 = vadd.f32 %v1099_v14, %v1098_v38  ;;  %v1106_v38 = vsub.f32 %v2619_v58, %v2714_v26  ;;  %v1118_v14 = vmul.f32 %v1105_v49, %v1105_v49  ;;  %v1008_v33 = vmul.f32 %v995_v2, %v995_v2 }
 0x2d0   :  { %v1019_v19 = vadd.f32 %v1018_v42, %v1017_v15  ;;  %v1142_v15 = vsel %vm235_vm0, %v1122_v39, 0.0  ;;  %v1124_v42 = vmul.f32 %v1111_v24, %v1111_v24 }
 0x2d1   :  { %1217 = vrot.lane.b32.xlu1 %v1100_v40, %s1430_s0  ;;  %v1132_v40 = vsel %vm235_vm0, %v1117_v41, 0.0  ;;  %v1119_v22 = vmul.f32 %v1106_v38, %v1106_v38  ;;  %v1134_v60 = vsel %vm235_vm0, %v1118_v14, 0.0  ;;  %v992_v41 = vsub.f32 %v3089_v31, %v2714_v26 }
 0x2d2   :  { %v1133_v8 = vadd.f32 %v1132_v40, %v1131_v51  ;;  %v1021_v16 = vadd.f32 %v1020_v28, %v1019_v19  ;;  %v1022_v51 = vsel %vm235_vm0, %v1003_v61, 0.0  ;;  %v993_v14 = vsub.f32 %v3090_v55, %v2714_v26 }
 0x2d3   :  { %v1136_v4 = vsel %vm235_vm0, %v1119_v22, 0.0  ;;  %v1005_v40 = vmul.f32 %v992_v41, %v992_v41  ;;  %v994_v22 = vsub.f32 %v3091_v45, %v2714_v26  ;;  %v1144_v19 = vsel %vm235_vm0, %v1123_v63, 0.0 }
 0x2d4   :  { %v1135_v32 = vadd.f32 %v1134_v60, %v1133_v8  ;;  %v1023_v25 = vadd.f32 %v1022_v51, %v1021_v16  ;;  %v1024_v8 = vsel %vm235_vm0, %v1004_v52, 0.0  ;;  %v1006_v60 = vmul.f32 %v993_v14, %v993_v14 }
 0x2d5   :  { %v1113_v61 = vsub.f32 %v2651_v44, %v2714_v26  ;;  %v1125_v28 = vmul.f32 %v1112_v50, %v1112_v50  ;;  %v1146_v16 = vsel %vm235_vm0, %v1124_v42, 0.0 }
 0x2d6   :  { %v1137_v62 = vadd.f32 %v1136_v4, %v1135_v32  ;;  %v1025_v3 = vadd.f32 %v1024_v8, %v1023_v25  ;;  %v1026_v32 = vsel %vm235_vm0, %v1005_v40, 0.0  ;;  %v1007_v4 = vmul.f32 %v994_v22, %v994_v22 }
 0x2d7   :  { %v1126_v41 = vmul.f32 %v1113_v61, %v1113_v61  ;;  %v1148_v52 = vsel %vm235_vm0, %v1125_v28, 0.0  ;;  %v1032_v25 = vsel %vm858_vm3, %v1008_v33, 0.0 }
 0x2d8   :  { %v1139_v49 = vadd.f32 %v1138_v57, %v1137_v62  ;;  %v1027_v20 = vadd.f32 %v1026_v32, %v1025_v3  ;;  %v1028_v62 = vsel %vm235_vm0, %v1006_v60, 0.0  ;;  %v1030_v57 = vsel %vm235_vm0, %v1007_v4, 0.0 }
 0x2d9   :  { %v1150_v39 = vsel %vm858_vm3, %v1126_v41, 0.0 }
 0x2da   :  { %v1141_v38 = vadd.f32 %v1140_v53, %v1139_v49  ;;  %v1029_v23 = vadd.f32 %v1028_v62, %v1027_v20 }
 0x2dc   :  { %v1143_v0 = vadd.f32 %v1142_v15, %v1141_v38  ;;  %v1031_v49 = vadd.f32 %v1030_v57, %v1029_v23 }
 0x2de   :  { %v1145_v37 = vadd.f32 %v1144_v19, %v1143_v0  ;;  %v1033_v29 = vadd.f32 %v1032_v25, %v1031_v49 }
 0x2e0   :  { %v1147_v27 = vadd.f32 %v1146_v16, %v1145_v37  ;;  %v1034_v38 = vrot.slane %v1033_v29, 4  ;;  %v1228_v16 = vld [vmem:[%s3053_s3] sm:$0x1] }
 0x2e2   :  { %v1149_v51 = vadd.f32 %v1148_v52, %v1147_v27  ;;  %v1035_v14 = vadd.f32 %v1034_v38, %v1033_v29 }
 0x2e4   :  { %v1151_v53 = vadd.f32 %v1150_v39, %v1149_v51  ;;  %v1036_v8 = vrot.slane %v1035_v14, 2 }
 0x2e6   :  { %v1152_v26 = vrot.slane %v1151_v53, 4  ;;  %v1037_v24 = vadd.f32 %v1036_v8, %v1035_v14 }
 0x2e8   :  { %v1153_v40 = vadd.f32 %v1152_v26, %v1151_v53  ;;  %v1038_v15 = vrot.slane %v1037_v24, 1 }
 0x2ea   :  { %v1154_v3 = vrot.slane %v1153_v40, 2  ;;  %v1039_v22 = vadd.f32 %v1038_v15, %v1037_v24 }
 0x2ec   :  { %v1155_v63 = vadd.f32 %v1154_v3, %v1153_v40 }
 0x2ee   :  { %v1156_v0 = vrot.slane %v1155_v63, 1 }
 0x2f0   :  { %v1157_v32 = vadd.f32 %v1156_v0, %v1155_v63 }
 0x324   :  { %v1224_v42 = vpop.permute.xlu2 %1223 }
 0x343   :  { %v1218_v60 = vpop.permute.xlu1 %1217 }
 0x344   :  { %v1220_v20 = vadd.f32 %v1218_v60, %v1039_v22 }
 0x346   :  { %v1221_v50 = vadd.f32 %v1220_v20, %v1157_v32 }
 0x348   :  { %v1226_v19 = vadd.f32 %v1224_v42, %v1221_v50 }
 0x34a   :  { %v1227_v37 = vmul.f32 %v1226_v19, %v2708_v18  ;;  %v1241_v18 = vld [vmem:[%s3054_s4] sm:$0x1] }
 0x34c   :  { %v1229_v2 = vadd.f32 1e-05, %v1227_v37 }
 0x34e   :  { %1428 = vrsqrt.f32 %v1229_v2  ;;  %vm1236_vm6 = vweird.f32 %v1229_v2 }
 0x354   :  { %v1429_v4 = vpop.eup %1428 }
 0x355   :  { %v1231_v62 = vmul.f32 %v1429_v4, %v1229_v2  ;;  %vm1237_vm5 = vweird.f32 %v1429_v4 }
 0x356   :  { %vm1238_vm7 = vmor %vm1236_vm6, %vm1237_vm5 }
 0x357   :  { %v1232_v23 = vmul.f32 %v1429_v4, %v1231_v62 }
 0x359   :  { %v1233_v61 = vmul.f32 0.5, %v1232_v23 }
 0x35b   :  { %v1234_v28 = vsub.f32 1.5, %v1233_v61 }
 0x35d   :  { %v1235_v27 = vmul.f32 %v1429_v4, %v1234_v28 }
 0x35f   :  { %v1239_v33 = vsel %vm1238_vm7, %v1429_v4, %v1235_v27 }
 0x360   :  { %v1240_v57 = vmul.f32 %v1239_v33, %v1228_v16 }
 0x362   :  { %v1245_v49 = vperm.slane %v1240_v57, 0  ;;  %v1242_v41 = vmul.f32 %v1240_v57, %v2711_v21 }
 0x364   :  { %1246 = vrot.lane.b32.xlu2 %v1245_v49, %s1430_s0  ;;  %v1243_v52 = vsub.f32 %v1241_v18, %v1242_v41 }
 0x366   :  { %v1251_v51 = vperm.slane %v1243_v52, 0 }
 0x368   :  { %1252 = vrot.lane.b32.xlu0 %v1251_v51, %s1430_s0 }
 0x3be   :  { %v1247_v25 = vpop.permute.xlu2 %1246 }
 0x3bf   :  { %v1249_v29 = vsel %vm235_vm0, %v1240_v57, %v1247_v25 }
 0x3c0   :  { %v2889_v39 = vperm.slane %v1249_v29, 0 }
 0x3c2   :  { %v1257_v14 = vmul.f32 %v2889_v39, %v2508_v13  ;;  %v1258_v21 = vmul.f32 %v2889_v39, %v2591_v9  ;;  %v1259_v40 = vmul.f32 %v2889_v39, %v2398_v56  ;;  %v1260_v8 = vmul.f32 %v2889_v39, %v2594_v30 }
 0x3c3   :  { %v1261_v3 = vmul.f32 %v2889_v39, %v2511_v54  ;;  %v1262_v15 = vmul.f32 %v2889_v39, %v2602_v10  ;;  %v1263_v56 = vmul.f32 %v2889_v39, %v2518_v6  ;;  %v1264_v30 = vmul.f32 %v2889_v39, %v2607_v34 }
 0x3c4   :  { %v1265_v22 = vmul.f32 %v2889_v39, %v2530_v17  ;;  %v1266_v20 = vmul.f32 %v2889_v39, %v2614_v43  ;;  %v1267_v19 = vmul.f32 %v2889_v39, %v2538_v48  ;;  %v1268_v17 = vmul.f32 %v2889_v39, %v2619_v58 }
 0x3c5   :  { %v1269_v48 = vmul.f32 %v2889_v39, %v2544_v11  ;;  %v1270_v58 = vmul.f32 %v2889_v39, %v2623_v12  ;;  %v1271_v11 = vmul.f32 %v2889_v39, %v2550_v1  ;;  %v1272_v12 = vmul.f32 %v2889_v39, %v2627_v36 }
 0x3c6   :  { %v1273_v1 = vmul.f32 %v2889_v39, %v2557_v47  ;;  %v1274_v36 = vmul.f32 %v2889_v39, %v2632_v59  ;;  %v1275_v47 = vmul.f32 %v2889_v39, %v3089_v31  ;;  %v1276_v59 = vmul.f32 %v2889_v39, %v2636_v7 }
 0x3c7   :  { %v1277_v31 = vmul.f32 %v2889_v39, %v3090_v55  ;;  %v1278_v7 = vmul.f32 %v2889_v39, %v2640_v5  ;;  %v1279_v55 = vmul.f32 %v2889_v39, %v3091_v45  ;;  %v1280_v5 = vmul.f32 %v2889_v39, %v2644_v35 }
 0x3c8   :  { %v1281_v45 = vmul.f32 %v2889_v39, %v3092_v46  ;;  %v1282_v35 = vmul.f32 %v2889_v39, %v2651_v44 }
 0x3da   :  { %v1253_v53 = vpop.permute.xlu0 %1252 }
 0x3db   :  { %v1255_v38 = vsel %vm235_vm0, %v1243_v52, %v1253_v53 }
 0x3dc   :  { %v2892_v26 = vperm.slane %v1255_v38, 0 }
 0x3de   :  { %v1284_v24 = vadd.f32 %v2892_v26, %v1257_v14  ;;  %v1285_v63 = vadd.f32 %v2892_v26, %v1258_v21  ;;  %v1286_v13 = vadd.f32 %v2892_v26, %v1259_v40  ;;  %v1287_v9 = vadd.f32 %v2892_v26, %v1260_v8 }
 0x3df   :  { %v1288_v0 = vadd.f32 %v2892_v26, %v1261_v3  ;;  %v1289_v54 = vadd.f32 %v2892_v26, %v1262_v15  ;;  %v1290_v60 = vadd.f32 %v2892_v26, %v1263_v56  ;;  %v1291_v50 = vadd.f32 %v2892_v26, %v1264_v30 }
 0x3e0   :  { %v1310_v10 = vmax.f32 %v1284_v24, 0.0  ;;  %v1311_v32 = vmax.f32 %v1285_v63, 0.0  ;;  %v1312_v6 = vmax.f32 %v1286_v13, 0.0  ;;  %v1313_v42 = vmax.f32 %v1287_v9, 0.0 }
 0x3e1   :  { %v1292_v34 = vadd.f32 %v2892_v26, %v1265_v22  ;;  %v1314_v37 = vmax.f32 %v1288_v0, 0.0  ;;  %v1293_v2 = vadd.f32 %v2892_v26, %v1266_v20  ;;  %v1315_v43 = vmax.f32 %v1289_v54, 0.0 }
 0x3e2   :  { %1336 = vst [vmem:[%s3055_s5] sm:$0xff] %v1310_v10  ;;  %v1294_v4 = vadd.f32 %v2892_v26, %v1267_v19  ;;  %v1316_v62 = vmax.f32 %v1290_v60, 0.0  ;;  %v1295_v23 = vadd.f32 %v2892_v26, %v1268_v17  ;;  %v1317_v61 = vmax.f32 %v1291_v50, 0.0 }
 0x3e3   :  { %1337 = vst [vmem:[%s3055_s5 + $0x8] sm:$0xff] %v1311_v32  ;;  %v1296_v28 = vadd.f32 %v2892_v26, %v1269_v48  ;;  %v1318_v16 = vmax.f32 %v1292_v34, 0.0  ;;  %v1297_v27 = vadd.f32 %v2892_v26, %v1270_v58  ;;  %v1319_v33 = vmax.f32 %v1293_v2, 0.0 }
 0x3e4   :  { %1338 = vst [vmem:[%s3055_s5 + $0x10] sm:$0xff] %v1312_v6  ;;  %v1298_v57 = vadd.f32 %v2892_v26, %v1271_v11  ;;  %v1320_v18 = vmax.f32 %v1294_v4, 0.0  ;;  %v1299_v49 = vadd.f32 %v2892_v26, %v1272_v12  ;;  %v1321_v41 = vmax.f32 %v1295_v23, 0.0 }
 0x3e5   :  { %1339 = vst [vmem:[%s3055_s5 + $0x18] sm:$0xff] %v1313_v42  ;;  %v1300_v52 = vadd.f32 %v2892_v26, %v1273_v1  ;;  %v1322_v51 = vmax.f32 %v1296_v28, 0.0  ;;  %v1301_v25 = vadd.f32 %v2892_v26, %v1274_v36  ;;  %v1323_v29 = vmax.f32 %v1297_v27, 0.0 }
 0x3e6   :  { %1340 = vst [vmem:[%s3055_s5 + $0x20] sm:$0xff] %v1314_v37  ;;  %v1302_v53 = vadd.f32 %v2892_v26, %v1275_v47  ;;  %v1324_v38 = vmax.f32 %v1298_v57, 0.0  ;;  %v1303_v14 = vadd.f32 %v2892_v26, %v1276_v59  ;;  %v1325_v21 = vmax.f32 %v1299_v49, 0.0 }
 0x3e7   :  { %1341 = vst [vmem:[%s3055_s5 + $0x28] sm:$0xff] %v1315_v43  ;;  %v1304_v40 = vadd.f32 %v2892_v26, %v1277_v31  ;;  %v1326_v8 = vmax.f32 %v1300_v52, 0.0  ;;  %v1305_v3 = vadd.f32 %v2892_v26, %v1278_v7  ;;  %v1327_v24 = vmax.f32 %v1301_v25, 0.0 }
 0x3e8   :  { %1342 = vst [vmem:[%s3055_s5 + $0x30] sm:$0xff] %v1316_v62  ;;  %v1306_v63 = vadd.f32 %v2892_v26, %v1279_v55  ;;  %v1328_v15 = vmax.f32 %v1302_v53, 0.0  ;;  %v1307_v13 = vadd.f32 %v2892_v26, %v1280_v5  ;;  %v1329_v9 = vmax.f32 %v1303_v14, 0.0 }
 0x3e9   :  { %1343 = vst [vmem:[%s3055_s5 + $0x38] sm:$0xff] %v1317_v61  ;;  %v1308_v56 = vadd.f32 %v2892_v26, %v1281_v45  ;;  %v1330_v46 = vmax.f32 %v1304_v40, 0.0  ;;  %v1309_v0 = vadd.f32 %v2892_v26, %v1282_v35  ;;  %v1331_v30 = vmax.f32 %v1305_v3, 0.0 }
 0x3ea   :  { %1344 = vst [vmem:[%s3055_s5 + $0x40] sm:$0xff] %v1318_v16  ;;  %v1332_v44 = vmax.f32 %v1306_v63, 0.0  ;;  %v1333_v39 = vmax.f32 %v1307_v13, 0.0 }
 0x3eb   :  { %1345 = vst [vmem:[%s3055_s5 + $0x48] sm:$0xff] %v1319_v33  ;;  %v1334_v54 = vmax.f32 %v1308_v56, 0.0  ;;  %v1335_v26 = vmax.f32 %v1309_v0, 0.0 }
 0x3ec   :  { %1346 = vst [vmem:[%s3055_s5 + $0x50] sm:$0xff] %v1320_v18 }
 0x3ed   :  { %1347 = vst [vmem:[%s3055_s5 + $0x58] sm:$0xff] %v1321_v41 }
 0x3ee   :  { %1348 = vst [vmem:[%s3055_s5 + $0x60] sm:$0xff] %v1322_v51 }
 0x3ef   :  { %1349 = vst [vmem:[%s3055_s5 + $0x68] sm:$0xff] %v1323_v29 }
 0x3f0   :  { %1350 = vst [vmem:[%s3055_s5 + $0x70] sm:$0xff] %v1324_v38 }
 0x3f1   :  { %1351 = vst [vmem:[%s3055_s5 + $0x78] sm:$0xff] %v1325_v21 }
 0x3f2   :  { %1352 = vst [vmem:[%s3055_s5 + $0x80] sm:$0xff] %v1326_v8 }
 0x3f3   :  { %1353 = vst [vmem:[%s3055_s5 + $0x88] sm:$0xff] %v1327_v24 }
 0x3f4   :  { %1354 = vst [vmem:[%s3055_s5 + $0x90] sm:$0xff] %v1328_v15 }
 0x3f5   :  { %1355 = vst [vmem:[%s3055_s5 + $0x98] sm:$0xff] %v1329_v9 }
 0x3f6   :  { %1356 = vst [vmem:[%s3055_s5 + $0xa0] sm:$0xff] %v1330_v46 }
 0x3f7   :  { %1357 = vst [vmem:[%s3055_s5 + $0xa8] sm:$0xff] %v1331_v30 }
 0x3f8   :  { %1358 = vst [vmem:[%s3055_s5 + $0xb0] sm:$0xff] %v1332_v44 }
 0x3f9   :  { %1359 = vst [vmem:[%s3055_s5 + $0xb8] sm:$0xff] %v1333_v39 }
 0x3fa   :  { %1360 = vst [vmem:[%s3055_s5 + $0xc0] sm:$0x3] %v1334_v54 }
 0x3fb   :  { %1361 = vst [vmem:[%s3055_s5 + $0xc8] sm:$0x3] %v1335_v26 }

// kernel: generator_forward.3
= control target key start
LH: loop header
LB: loop body
LE: loop exit
PB: predicated region body
PF: predicated region fallthrough
CT: control target
= control target key end

     0   :  { %vm59_vm0 = vcmask 261120   ;;  %v5057_v43 = vmov 2.0   ;;  %vm143_vm1 = vcmask 1041408   ;;  %s11038_s1 = inlined_call_operand.vmem [shape: f32[32,512], index: 1, kind: input, shape index: {}]   ;;  %s11039_s0 = inlined_call_operand.vmem [shape: f32[2,32], index: 0, kind: input, shape index: {}]   ;;  %s11040_s5 = inlined_call_operand.vmem [shape: f32[512,3136], index: 5, kind: input, shape index: {}]   ;;  %s11041_s2 = inlined_call_operand.vmem [shape: f32[1,512], index: 2, kind: input, shape index: {}]   ;;  %s11042_s3 = inlined_call_operand.vmem [shape: f32[1,512], index: 3, kind: input, shape index: {}]   ;;  %s11043_s4 = inlined_call_operand.vmem [shape: f32[1,512], index: 4, kind: input, shape index: {}]   ;;  %s11044_s6 = inlined_call_operand.vmem [shape: f32[1,3136], index: 6, kind: input, shape index: {}]   ;;  %s11045_s7 = inlined_call_operand.vmem [shape: f32[1,3136], index: 7, kind: input, shape index: {}]   ;;  %s11046_s8 = inlined_call_operand.vmem [shape: f32[1,3136], index: 8, kind: input, shape index: {}]   ;;  %s11047_s9 = inlined_call_operand.vmem [shape: f32[2,3136], index: 9, kind: output, shape index: {}]  }
   0x1   :  { %v45_v0 = vld [vmem:[%s11038_s1 + $0x60] sm:$0xff]  ;;  %v46_v1 = vld [vmem:[%s11038_s1 + $0x68] sm:$0xff]  ;;  %v47_v2 = vld [vmem:[%s11038_s1 + $0x70] sm:$0xff]  ;;  %4990 = vrcp.f32 %v5057_v43 }
   0x2   :  { %75 = vmatpush.msra.mxu0 %v45_v0  ;;  %95 = vmatpush.msra.mxu1 %v46_v1  ;;  %v48_v3 = vld [vmem:[%s11038_s1 + $0x78] sm:$0xff]  ;;  %v41_v4 = vld [vmem:[%s11038_s1 + $0x40] sm:$0xff]  ;;  %v42_v5 = vld [vmem:[%s11038_s1 + $0x48] sm:$0xff] }
   0x3   :  { %115 = vmatpush.msra.mxu2 %v47_v2  ;;  %135 = vmatpush.msra.mxu3 %v48_v3  ;;  %v43_v6 = vld [vmem:[%s11038_s1 + $0x50] sm:$0xff]  ;;  %v44_v7 = vld [vmem:[%s11038_s1 + $0x58] sm:$0xff]  ;;  %v37_v8 = vld [vmem:[%s11038_s1 + $0x20] sm:$0xff] }
   0x4   :  { %76 = vmatpush.msra.mxu0 %v41_v4  ;;  %96 = vmatpush.msra.mxu1 %v42_v5  ;;  %v38_v9 = vld [vmem:[%s11038_s1 + $0x28] sm:$0xff]  ;;  %v39_v10 = vld [vmem:[%s11038_s1 + $0x30] sm:$0xff]  ;;  %v40_v11 = vld [vmem:[%s11038_s1 + $0x38] sm:$0xff] }
   0x5   :  { %116 = vmatpush.msra.mxu2 %v43_v6  ;;  %136 = vmatpush.msra.mxu3 %v44_v7  ;;  %v33_v12 = vld [vmem:[%s11038_s1] sm:$0xff]  ;;  %v34_v13 = vld [vmem:[%s11038_s1 + $0x8] sm:$0xff]  ;;  %v35_v14 = vld [vmem:[%s11038_s1 + $0x10] sm:$0xff] }
   0x6   :  { %77 = vmatpush.msra.mxu0 %v37_v8  ;;  %97 = vmatpush.msra.mxu1 %v38_v9  ;;  %v36_v15 = vld [vmem:[%s11038_s1 + $0x18] sm:$0xff]  ;;  %v32_v16 = vld [vmem:[%s11039_s0] sm:$0x3]  ;;  %v653_v19 = vld [vmem:[%s11040_s5 + $0xaf0] sm:$0xff] }
   0x7   :  { %117 = vmatpush.msra.mxu2 %v39_v10  ;;  %137 = vmatpush.msra.mxu3 %v40_v11  ;;  %v678_v17 = vld [vmem:[%s11040_s5 + $0xbb8] sm:$0xff]  ;;  %v1053_v20 = vld [vmem:[%s11040_s5 + $0x1770] sm:$0xff]  ;;  %v628_v21 = vld [vmem:[%s11040_s5 + $0xa28] sm:$0xff]  ;;  %v5278_v57 = vpop.eup %4990 }
   0x8   :  { %78 = vmatpush.msra.mxu0 %v33_v12  ;;  %98 = vmatpush.msra.mxu1 %v34_v13  ;;  %v1078_v18 = vld [vmem:[%s11040_s5 + $0x1838] sm:$0xff]  ;;  %v1028_v22 = vld [vmem:[%s11040_s5 + $0x16a8] sm:$0xff]  ;;  %v603_v23 = vld [vmem:[%s11040_s5 + $0x960] sm:$0xff]  ;;  %v173_v2 = vmul.f32 2.0, %v5278_v57  ;;  %vm177_vm2 = vweird.f32 %v5278_v57 }
   0x9   :  { %118 = vmatpush.msra.mxu2 %v35_v14  ;;  %138 = vmatpush.msra.mxu3 %v36_v15  ;;  %v1003_v24 = vld [vmem:[%s11040_s5 + $0x15e0] sm:$0xff]  ;;  %v1478_v25 = vld [vmem:[%s11040_s5 + $0x24b8] sm:$0xff]  ;;  %v1453_v29 = vld [vmem:[%s11040_s5 + $0x23f0] sm:$0xff] }
   0xa   :  { %4982 = vmatmul.msk.f32.vlgmr.msra.gmra.mxu0 %vm59_vm0, %v32_v16  ;;  %4983 = vmatmul.msk.f32.vlgmr.msra.gmra.mxu1 %vm59_vm0, %v32_v16  ;;  %v1878_v26 = vld [vmem:[%s11040_s5 + $0x3138] sm:$0xff]  ;;  %v1853_v30 = vld [vmem:[%s11040_s5 + $0x3070] sm:$0xff]  ;;  %v1428_v33 = vld [vmem:[%s11040_s5 + $0x2328] sm:$0xff]  ;;  %v174_v15 = vsub.f32 1.0, %v173_v2 }
   0xb   :  { %4984 = vmatmul.msk.f32.vlgmr.msra.gmra.mxu2 %vm59_vm0, %v32_v16  ;;  %4985 = vmatmul.msk.f32.vlgmr.msra.gmra.mxu3 %vm59_vm0, %v32_v16  ;;  %v578_v27 = vld [vmem:[%s11040_s5 + $0x898] sm:$0xff]  ;;  %v553_v31 = vld [vmem:[%s11040_s5 + $0x7d0] sm:$0xff]  ;;  %v1828_v34 = vld [vmem:[%s11040_s5 + $0x2fa8] sm:$0xff] }
   0xc   :  { %1961 = vmatpush.msrb.mxu0 %v678_v17  ;;  %1981 = vmatpush.msrb.mxu1 %v1078_v18  ;;  %v978_v28 = vld [vmem:[%s11040_s5 + $0x1518] sm:$0xff]  ;;  %v953_v32 = vld [vmem:[%s11040_s5 + $0x1450] sm:$0xff]  ;;  %v528_v35 = vld [vmem:[%s11040_s5 + $0x708] sm:$0xff] }
   0xd   :  { %2001 = vmatpush.msrb.mxu2 %v1478_v25  ;;  %2021 = vmatpush.msrb.mxu3 %v1878_v26  ;;  %v928_v36 = vld [vmem:[%s11040_s5 + $0x1388] sm:$0xff]  ;;  %v1403_v37 = vld [vmem:[%s11040_s5 + $0x2260] sm:$0xff]  ;;  %v1378_v41 = vld [vmem:[%s11040_s5 + $0x2198] sm:$0xff] }
   0xe   :  { %1962 = vmatpush.msrb.mxu0 %v653_v19  ;;  %1982 = vmatpush.msrb.mxu1 %v1053_v20  ;;  %v1803_v38 = vld [vmem:[%s11040_s5 + $0x2ee0] sm:$0xff]  ;;  %v1778_v42 = vld [vmem:[%s11040_s5 + $0x2e18] sm:$0xff]  ;;  %v1353_v46 = vld [vmem:[%s11040_s5 + $0x20d0] sm:$0xff] }
   0xf   :  { %2002 = vmatpush.msrb.mxu2 %v1453_v29  ;;  %2022 = vmatpush.msrb.mxu3 %v1853_v30  ;;  %v503_v39 = vld [vmem:[%s11040_s5 + $0x640] sm:$0xff]  ;;  %v478_v44 = vld [vmem:[%s11040_s5 + $0x578] sm:$0xff]  ;;  %v1753_v47 = vld [vmem:[%s11040_s5 + $0x2d50] sm:$0xff] }
  0x10   :  { %1963 = vmatpush.msrb.mxu0 %v628_v21  ;;  %1983 = vmatpush.msrb.mxu1 %v1028_v22  ;;  %v903_v40 = vld [vmem:[%s11040_s5 + $0x12c0] sm:$0xff]  ;;  %v878_v45 = vld [vmem:[%s11040_s5 + $0x11f8] sm:$0xff]  ;;  %v453_v48 = vld [vmem:[%s11040_s5 + $0x4b0] sm:$0xff] }
  0x11   :  { %2003 = vmatpush.msrb.mxu2 %v1428_v33  ;;  %2023 = vmatpush.msrb.mxu3 %v1828_v34  ;;  %v853_v49 = vld [vmem:[%s11040_s5 + $0x1130] sm:$0xff]  ;;  %v1328_v50 = vld [vmem:[%s11040_s5 + $0x2008] sm:$0xff]  ;;  %v1303_v54 = vld [vmem:[%s11040_s5 + $0x1f40] sm:$0xff] }
  0x12   :  { %1964 = vmatpush.msrb.mxu0 %v603_v23  ;;  %1984 = vmatpush.msrb.mxu1 %v1003_v24  ;;  %v1728_v51 = vld [vmem:[%s11040_s5 + $0x2c88] sm:$0xff]  ;;  %v5273_v55 = vld [vmem:[%s11041_s2] sm:$0xf]  ;;  %v1278_v60 = vld [vmem:[%s11040_s5 + $0x1e78] sm:$0xff] }
  0x13   :  { %2004 = vmatpush.msrb.mxu2 %v1403_v37  ;;  %2024 = vmatpush.msrb.mxu3 %v1803_v38  ;;  %v428_v52 = vld [vmem:[%s11040_s5 + $0x3e8] sm:$0xff]  ;;  %v1703_v56 = vld [vmem:[%s11040_s5 + $0x2bc0] sm:$0xff]  ;;  %v1678_v61 = vld [vmem:[%s11040_s5 + $0x2af8] sm:$0xff]  ;;  %v51_v1 = vperm.slane %v5273_v55, 0  ;;  %v52_v3 = vperm.slane %v5273_v55, 1  ;;  %v54_v29 = vperm.slane %v5273_v55, 3 }
  0x14   :  { %1965 = vmatpush.msrb.mxu0 %v578_v27  ;;  %1985 = vmatpush.msrb.mxu1 %v978_v28  ;;  %v828_v53 = vld [vmem:[%s11040_s5 + $0x1068] sm:$0xff]  ;;  %v403_v58 = vld [vmem:[%s11040_s5 + $0x320] sm:$0xff]  ;;  %v378_v62 = vld [vmem:[%s11040_s5 + $0x258] sm:$0xff]  ;;  %v53_v28 = vperm.slane %v5273_v55, 2 }
  0x15   :  { %2005 = vmatpush.msrb.mxu2 %v1378_v41  ;;  %2025 = vmatpush.msrb.mxu3 %v1778_v42  ;;  %v803_v59 = vld [vmem:[%s11040_s5 + $0xfa0] sm:$0xff]  ;;  %v778_v63 = vld [vmem:[%s11040_s5 + $0xed8] sm:$0xff]  ;;  %v1253_v0 = vld [vmem:[%s11040_s5 + $0x1db0] sm:$0xff] }
  0x16   :  { %1966 = vmatpush.msrb.mxu0 %v553_v31  ;;  %1986 = vmatpush.msrb.mxu1 %v953_v32  ;;  %v1653_v4 = vld [vmem:[%s11040_s5 + $0x2a30] sm:$0xff]  ;;  %v1228_v7 = vld [vmem:[%s11040_s5 + $0x1ce8] sm:$0xff]  ;;  %v1203_v13 = vld [vmem:[%s11040_s5 + $0x1c20] sm:$0xff]  ;;  %v175_v32 = vmul.f32 %v5278_v57, %v174_v15 }
  0x17   :  { %2006 = vmatpush.msrb.mxu2 %v1353_v46  ;;  %2026 = vmatpush.msrb.mxu3 %v1753_v47  ;;  %v353_v5 = vld [vmem:[%s11040_s5 + $0x190] sm:$0xff]  ;;  %v1628_v8 = vld [vmem:[%s11040_s5 + $0x2968] sm:$0xff]  ;;  %v1603_v17 = vld [vmem:[%s11040_s5 + $0x28a0] sm:$0xff] }
  0x18   :  { %1967 = vmatpush.msrb.mxu0 %v528_v35  ;;  %1987 = vmatpush.msrb.mxu1 %v928_v36  ;;  %v753_v6 = vld [vmem:[%s11040_s5 + $0xe10] sm:$0xff]  ;;  %v328_v11 = vld [vmem:[%s11040_s5 + $0xc8] sm:$0xff]  ;;  %v303_v18 = vld [vmem:[%s11040_s5] sm:$0xff] }
  0x19   :  { %2007 = vmatpush.msrb.mxu2 %v1328_v50  ;;  %2027 = vmatpush.msrb.mxu3 %v1728_v51  ;;  %v728_v12 = vld [vmem:[%s11040_s5 + $0xd48] sm:$0xff]  ;;  %v703_v19 = vld [vmem:[%s11040_s5 + $0xc80] sm:$0xff]  ;;  %v1178_v20 = vld [vmem:[%s11040_s5 + $0x1b58] sm:$0xff] }
  0x1a   :  { %1968 = vmatpush.msrb.mxu0 %v503_v39  ;;  %1988 = vmatpush.msrb.mxu1 %v903_v40  ;;  %v1578_v23 = vld [vmem:[%s11040_s5 + $0x27d8] sm:$0xff]  ;;  %v679_v24 = vld [vmem:[%s11040_s5 + $0xbc0] sm:$0xff]  ;;  %v1153_v30 = vld [vmem:[%s11040_s5 + $0x1a90] sm:$0xff] }
  0x1b   :  { %2008 = vmatpush.msrb.mxu2 %v1303_v54  ;;  %2028 = vmatpush.msrb.mxu3 %v1703_v56  ;;  %v1079_v25 = vld [vmem:[%s11040_s5 + $0x1840] sm:$0xff]  ;;  %v1553_v31 = vld [vmem:[%s11040_s5 + $0x2710] sm:$0xff]  ;;  %v654_v33 = vld [vmem:[%s11040_s5 + $0xaf8] sm:$0xff] }
  0x1c   :  { %1969 = vmatpush.msrb.mxu0 %v478_v44  ;;  %1989 = vmatpush.msrb.mxu1 %v878_v45  ;;  %v1054_v34 = vld [vmem:[%s11040_s5 + $0x1778] sm:$0xff]  ;;  %v1128_v37 = vld [vmem:[%s11040_s5 + $0x19c8] sm:$0xff]  ;;  %v629_v41 = vld [vmem:[%s11040_s5 + $0xa30] sm:$0xff] }
  0x1d   :  { %2009 = vmatpush.msrb.mxu2 %v1278_v60  ;;  %2029 = vmatpush.msrb.mxu3 %v1678_v61  ;;  %v1528_v38 = vld [vmem:[%s11040_s5 + $0x2648] sm:$0xff]  ;;  %v1029_v42 = vld [vmem:[%s11040_s5 + $0x16b0] sm:$0xff]  ;;  %v1103_v47 = vld [vmem:[%s11040_s5 + $0x1900] sm:$0xff] }
  0x1e   :  { %1970 = vmatpush.msrb.mxu0 %v453_v48  ;;  %1990 = vmatpush.msrb.mxu1 %v853_v49  ;;  %v1503_v48 = vld [vmem:[%s11040_s5 + $0x2580] sm:$0xff]  ;;  %v176_v49 = vadd.f32 %v5278_v57, %v175_v32  ;;  %v604_v50 = vld [vmem:[%s11040_s5 + $0x968] sm:$0xff]  ;;  %v1854_v2 = vld [vmem:[%s11040_s5 + $0x3078] sm:$0xff] }
  0x1f   :  { %2010 = vmatpush.msrb.mxu2 %v1253_v0  ;;  %2030 = vmatpush.msrb.mxu3 %v1653_v4  ;;  %v1004_v51 = vld [vmem:[%s11040_s5 + $0x15e8] sm:$0xff]  ;;  %v579_v61 = vld [vmem:[%s11040_s5 + $0x8a0] sm:$0xff]  ;;  %v929_v15 = vld [vmem:[%s11040_s5 + $0x1390] sm:$0xff] }
  0x20   :  { %1971 = vmatpush.msrb.mxu0 %v428_v52  ;;  %1991 = vmatpush.msrb.mxu1 %v828_v53  ;;  %v1479_v52 = vld [vmem:[%s11040_s5 + $0x24c0] sm:$0xff] }
  0x21   :  { %2011 = vmatpush.msrb.mxu2 %v1228_v7  ;;  %2031 = vmatpush.msrb.mxu3 %v1628_v8  ;;  %v954_v7 = vld [vmem:[%s11040_s5 + $0x1458] sm:$0xff]  ;;  %v1429_v8 = vld [vmem:[%s11040_s5 + $0x2330] sm:$0xff] }
  0x22   :  { %1972 = vmatpush.msrb.mxu0 %v403_v58  ;;  %1992 = vmatpush.msrb.mxu1 %v803_v59  ;;  %v1879_v58 = vld [vmem:[%s11040_s5 + $0x3140] sm:$0xff] }
  0x23   :  { %2012 = vmatpush.msrb.mxu2 %v1203_v13  ;;  %2032 = vmatpush.msrb.mxu3 %v1603_v17  ;;  %v529_v13 = vld [vmem:[%s11040_s5 + $0x710] sm:$0xff]  ;;  %v1404_v17 = vld [vmem:[%s11040_s5 + $0x2268] sm:$0xff] }
  0x24   :  { %1973 = vmatpush.msrb.mxu0 %v378_v62  ;;  %1993 = vmatpush.msrb.mxu1 %v778_v63  ;;  %v979_v62 = vld [vmem:[%s11040_s5 + $0x1520] sm:$0xff]  ;;  %v1454_v63 = vld [vmem:[%s11040_s5 + $0x23f8] sm:$0xff] }
  0x25   :  { %2013 = vmatpush.msrb.mxu2 %v1178_v20  ;;  %2033 = vmatpush.msrb.mxu3 %v1578_v23  ;;  %v1804_v20 = vld [vmem:[%s11040_s5 + $0x2ee8] sm:$0xff] }
  0x26   :  { %1974 = vmatpush.msrb.mxu0 %v353_v5  ;;  %1994 = vmatpush.msrb.mxu1 %v753_v6  ;;  %v554_v6 = vld [vmem:[%s11040_s5 + $0x7d8] sm:$0xff]  ;;  %v504_v23 = vld [vmem:[%s11040_s5 + $0x648] sm:$0xff] }
  0x27   :  { %2014 = vmatpush.msrb.mxu2 %v1153_v30  ;;  %2034 = vmatpush.msrb.mxu3 %v1553_v31  ;;  %v479_v31 = vld [vmem:[%s11040_s5 + $0x580] sm:$0xff] }
  0x28   :  { %1975 = vmatpush.msrb.mxu0 %v328_v11  ;;  %1995 = vmatpush.msrb.mxu1 %v728_v12 }
  0x29   :  { %2015 = vmatpush.msrb.mxu2 %v1128_v37  ;;  %2035 = vmatpush.msrb.mxu3 %v1528_v38  ;;  %v454_v37 = vld [vmem:[%s11040_s5 + $0x4b8] sm:$0xff] }
  0x2a   :  { %1976 = vmatpush.msrb.mxu0 %v303_v18  ;;  %1996 = vmatpush.msrb.mxu1 %v703_v19  ;;  %v854_v38 = vld [vmem:[%s11040_s5 + $0x1138] sm:$0xff] }
  0x2b   :  { %2016 = vmatpush.msrb.mxu2 %v1103_v47  ;;  %2036 = vmatpush.msrb.mxu3 %v1503_v48 }
  0x2c   :  { %2041 = vmatpush.msra.mxu0 %v679_v24  ;;  %2061 = vmatpush.msra.mxu1 %v1079_v25  ;;  %v904_v24 = vld [vmem:[%s11040_s5 + $0x12c8] sm:$0xff]  ;;  %v1379_v25 = vld [vmem:[%s11040_s5 + $0x21a0] sm:$0xff] }
  0x2d   :  { %2081 = vmatpush.msra.mxu2 %v1479_v52  ;;  %2101 = vmatpush.msra.mxu3 %v1879_v58  ;;  %v1704_v52 = vld [vmem:[%s11040_s5 + $0x2bc8] sm:$0xff] }
  0x2e   :  { %2042 = vmatpush.msra.mxu0 %v654_v33  ;;  %2062 = vmatpush.msra.mxu1 %v1054_v34  ;;  %v1754_v34 = vld [vmem:[%s11040_s5 + $0x2d58] sm:$0xff]  ;;  %v404_v58 = vld [vmem:[%s11040_s5 + $0x328] sm:$0xff] }
  0x2f   :  { %2082 = vmatpush.msra.mxu2 %v1454_v63  ;;  %2102 = vmatpush.msra.mxu3 %v1854_v2  ;;  %v1254_v2 = vld [vmem:[%s11040_s5 + $0x1db8] sm:$0xff] }
  0x30   :  { %2043 = vmatpush.msra.mxu0 %v629_v41  ;;  %2063 = vmatpush.msra.mxu1 %v1029_v42  ;;  %v1729_v42 = vld [vmem:[%s11040_s5 + $0x2c90] sm:$0xff] }
  0x31   :  { %2083 = vmatpush.msra.mxu2 %v1429_v8 }
  0x32   :  { %2044 = vmatpush.msra.mxu0 %v604_v50  ;;  %2064 = vmatpush.msra.mxu1 %v1004_v51  ;;  %v829_v50 = vld [vmem:[%s11040_s5 + $0x1070] sm:$0xff]  ;;  %v1304_v51 = vld [vmem:[%s11040_s5 + $0x1f48] sm:$0xff] }
  0x33   :  { %2084 = vmatpush.msra.mxu2 %v1404_v17 }
  0x34   :  { %2045 = vmatpush.msra.mxu0 %v579_v61  ;;  %2065 = vmatpush.msra.mxu1 %v979_v62 }
  0x35   :  { %2085 = vmatpush.msra.mxu2 %v1379_v25 }
  0x36   :  { %2046 = vmatpush.msra.mxu0 %v554_v6  ;;  %2066 = vmatpush.msra.mxu1 %v954_v7 }
  0x38   :  { %2047 = vmatpush.msra.mxu0 %v529_v13  ;;  %2067 = vmatpush.msra.mxu1 %v929_v15  ;;  %v1629_v13 = vld [vmem:[%s11040_s5 + $0x2970] sm:$0xff] }
  0x3a   :  { %2048 = vmatpush.msra.mxu0 %v504_v23  ;;  %2068 = vmatpush.msra.mxu1 %v904_v24  ;;  %v1604_v23 = vld [vmem:[%s11040_s5 + $0x28a8] sm:$0xff] }
  0x3c   :  { %2049 = vmatpush.msra.mxu0 %v479_v31 }
  0x3e   :  { %2050 = vmatpush.msra.mxu0 %v454_v37  ;;  %v1554_v37 = vld [vmem:[%s11040_s5 + $0x2718] sm:$0xff] }
  0x87   :  { %v80_v9 = vpop.f32.mrf.mxu0  ;;  %v100_v10 = vpop.f32.mrf.mxu1 }
  0x88   :  { %v5328_v14 = vadd.f32 %v80_v9, %v51_v1  ;;  %v5330_v16 = vadd.f32 %v100_v10, %v52_v3  ;;  %v5427_v3 = vsel %vm177_vm2, %v5278_v57, %v176_v49  ;;  %v1829_v57 = vld [vmem:[%s11040_s5 + $0x2fb0] sm:$0xff] }
  0x89   :  { %2103 = vmatpush.msra.mxu3 %v1829_v57  ;;  %v429_v49 = vld [vmem:[%s11040_s5 + $0x3f0] sm:$0xff] }
  0x8a   :  { %v144_v21 = vsel %vm143_vm1, %v5328_v14, 0.0  ;;  %v151_v22 = vsel %vm143_vm1, %v5330_v16, 0.0  ;;  %2051 = vmatpush.msra.mxu0 %v429_v49  ;;  %v1229_v57 = vld [vmem:[%s11040_s5 + $0x1cf0] sm:$0xff]  ;;  %v1504_v49 = vld [vmem:[%s11040_s5 + $0x2588] sm:$0xff] }
  0x8b   :  { %v145_v26 = vrot.slane %v144_v21, 4  ;;  %v152_v27 = vrot.slane %v151_v22, 4  ;;  %2104 = vmatpush.msra.mxu3 %v1804_v20  ;;  %v1204_v20 = vld [vmem:[%s11040_s5 + $0x1c28] sm:$0xff] }
  0x8c   :  { %2052 = vmatpush.msra.mxu0 %v404_v58 }
  0x8d   :  { %v146_v35 = vadd.f32 %v145_v26, %v144_v21  ;;  %v153_v36 = vadd.f32 %v152_v27, %v151_v22 }
  0x8e   :  { %v120_v39 = vpop.f32.mrf.mxu2  ;;  %v140_v40 = vpop.f32.mrf.mxu3 }
  0x8f   :  { %v147_v43 = vrot.slane %v146_v35, 2  ;;  %v154_v44 = vrot.slane %v153_v36, 2  ;;  %v5384_v45 = vadd.f32 %v120_v39, %v53_v28  ;;  %v5386_v46 = vadd.f32 %v140_v40, %v54_v29  ;;  %v1779_v28 = vld [vmem:[%s11040_s5 + $0x2e20] sm:$0xff]  ;;  %v1329_v39 = vld [vmem:[%s11040_s5 + $0x2010] sm:$0xff] }
  0x90   :  { %2105 = vmatpush.msra.mxu3 %v1779_v28  ;;  %v304_v28 = vld [vmem:[%s11040_s5 + $0x8] sm:$0xff] }
  0x91   :  { %v148_v53 = vadd.f32 %v147_v43, %v146_v35  ;;  %v155_v54 = vadd.f32 %v154_v44, %v153_v36  ;;  %v158_v55 = vsel %vm143_vm1, %v5384_v45, 0.0  ;;  %v165_v56 = vsel %vm143_vm1, %v5386_v46, 0.0 }
  0x92   :  { %v159_v59 = vrot.slane %v158_v55, 4  ;;  %v166_v60 = vrot.slane %v165_v56, 4  ;;  %2106 = vmatpush.msra.mxu3 %v1754_v34  ;;  %v1154_v34 = vld [vmem:[%s11040_s5 + $0x1a98] sm:$0xff] }
  0x93   :  { %v149_v0 = vrot.slane %v148_v53, 1  ;;  %v156_v1 = vrot.slane %v155_v54, 1 }
  0x94   :  { %v160_v4 = vadd.f32 %v159_v59, %v158_v55  ;;  %v167_v5 = vadd.f32 %v166_v60, %v165_v56  ;;  %2107 = vmatpush.msra.mxu3 %v1729_v42  ;;  %v804_v59 = vld [vmem:[%s11040_s5 + $0xfa8] sm:$0xff]  ;;  %v1279_v60 = vld [vmem:[%s11040_s5 + $0x1e80] sm:$0xff] }
  0x95   :  { %v150_v9 = vadd.f32 %v149_v0, %v148_v53  ;;  %v157_v10 = vadd.f32 %v156_v1, %v155_v54  ;;  %v379_v0 = vld [vmem:[%s11040_s5 + $0x260] sm:$0xff] }
  0x96   :  { %v161_v11 = vrot.slane %v160_v4, 2  ;;  %v168_v12 = vrot.slane %v167_v5, 2  ;;  %2108 = vmatpush.msra.mxu3 %v1704_v52  ;;  %v779_v1 = vld [vmem:[%s11040_s5 + $0xee0] sm:$0xff]  ;;  %2053 = vmatpush.msra.mxu0 %v379_v0 }
  0x97   :  { %v179_v18 = vmul.f32 %v5427_v3, %v150_v9  ;;  %v180_v19 = vmul.f32 %v5427_v3, %v157_v10  ;;  %v354_v9 = vld [vmem:[%s11040_s5 + $0x198] sm:$0xff] }
  0x98   :  { %v162_v21 = vadd.f32 %v161_v11, %v160_v4  ;;  %v169_v22 = vadd.f32 %v168_v12, %v167_v5  ;;  %v1654_v4 = vld [vmem:[%s11040_s5 + $0x2a38] sm:$0xff]  ;;  %2054 = vmatpush.msra.mxu0 %v354_v9 }
  0x99   :  { %v5465_v26 = vsub.f32 %v5328_v14, %v179_v18  ;;  %v5468_v27 = vsub.f32 %v5330_v16, %v180_v19  ;;  %v879_v14 = vld [vmem:[%s11040_s5 + $0x1200] sm:$0xff]  ;;  %v1354_v16 = vld [vmem:[%s11040_s5 + $0x20d8] sm:$0xff]  ;;  %v329_v18 = vld [vmem:[%s11040_s5 + $0xd0] sm:$0xff] }
  0x9a   :  { %v163_v29 = vrot.slane %v162_v21, 1  ;;  %v170_v30 = vrot.slane %v169_v22, 1  ;;  %2069 = vmatpush.msra.mxu1 %v879_v14  ;;  %2086 = vmatpush.msra.mxu2 %v1354_v16  ;;  %v754_v10 = vld [vmem:[%s11040_s5 + $0xe18] sm:$0xff]  ;;  %v729_v19 = vld [vmem:[%s11040_s5 + $0xd50] sm:$0xff]  ;;  %v1579_v16 = vld [vmem:[%s11040_s5 + $0x27e0] sm:$0xff] }
  0x9b   :  { %v187_v32 = vmul.f32 %v5465_v26, %v5465_v26  ;;  %v188_v33 = vmul.f32 %v5468_v27, %v5468_v27  ;;  %2055 = vmatpush.msra.mxu0 %v329_v18 }
  0x9c   :  { %v164_v35 = vadd.f32 %v163_v29, %v162_v21  ;;  %v171_v36 = vadd.f32 %v170_v30, %v169_v22  ;;  %2070 = vmatpush.msra.mxu1 %v854_v38  ;;  %2087 = vmatpush.msra.mxu2 %v1329_v39  ;;  %v704_v29 = vld [vmem:[%s11040_s5 + $0xc88] sm:$0xff]  ;;  %v1179_v30 = vld [vmem:[%s11040_s5 + $0x1b60] sm:$0xff] }
  0x9d   :  { %v191_v40 = vsel %vm143_vm1, %v187_v32, 0.0  ;;  %v198_v41 = vsel %vm143_vm1, %v188_v33, 0.0  ;;  %2056 = vmatpush.msra.mxu0 %v304_v28 }
  0x9e   :  { %v192_v43 = vrot.slane %v191_v40, 4  ;;  %v199_v44 = vrot.slane %v198_v41, 4  ;;  %v181_v47 = vmul.f32 %v5427_v3, %v164_v35  ;;  %v182_v48 = vmul.f32 %v5427_v3, %v171_v36  ;;  %2071 = vmatpush.msra.mxu1 %v829_v50  ;;  %2088 = vmatpush.msra.mxu2 %v1304_v51 }
  0xa0   :  { %v193_v53 = vadd.f32 %v192_v43, %v191_v40  ;;  %v200_v54 = vadd.f32 %v199_v44, %v198_v41  ;;  %v5518_v55 = vsub.f32 %v5384_v45, %v181_v47  ;;  %v5521_v56 = vsub.f32 %v5386_v46, %v182_v48  ;;  %v1679_v45 = vld [vmem:[%s11040_s5 + $0x2b00] sm:$0xff]  ;;  %2072 = vmatpush.msra.mxu1 %v804_v59  ;;  %v1129_v40 = vld [vmem:[%s11040_s5 + $0x19d0] sm:$0xff]  ;;  %v1104_v44 = vld [vmem:[%s11040_s5 + $0x1908] sm:$0xff] }
  0xa1   :  { %2089 = vmatpush.msra.mxu2 %v1279_v60  ;;  %2109 = vmatpush.msra.mxu3 %v1679_v45  ;;  %v1529_v43 = vld [vmem:[%s11040_s5 + $0x2650] sm:$0xff] }
  0xa2   :  { %v194_v46 = vrot.slane %v193_v53, 2  ;;  %v201_v61 = vrot.slane %v200_v54, 2  ;;  %v189_v62 = vmul.f32 %v5518_v55, %v5518_v55  ;;  %v190_v63 = vmul.f32 %v5521_v56, %v5521_v56  ;;  %2073 = vmatpush.msra.mxu1 %v779_v1  ;;  %v271_v1 = vld [vmem:[%s11042_s3] sm:$0xf] }
  0xa3   :  { %2090 = vmatpush.msra.mxu2 %v1254_v2  ;;  %2110 = vmatpush.msra.mxu3 %v1654_v4  ;;  %v273_v9 = vperm.slane %v271_v1, 0 }
  0xa4   :  { %v195_v5 = vadd.f32 %v194_v46, %v193_v53  ;;  %v202_v6 = vadd.f32 %v201_v61, %v200_v54  ;;  %v205_v7 = vsel %vm143_vm1, %v189_v62, 0.0  ;;  %v212_v8 = vsel %vm143_vm1, %v190_v63, 0.0  ;;  %2074 = vmatpush.msra.mxu1 %v754_v10 }
  0xa5   :  { %v206_v11 = vrot.slane %v205_v7, 4  ;;  %v213_v12 = vrot.slane %v212_v8, 4  ;;  %2091 = vmatpush.msra.mxu2 %v1229_v57  ;;  %2111 = vmatpush.msra.mxu3 %v1629_v13 }
  0xa6   :  { %v196_v15 = vrot.slane %v195_v5, 1  ;;  %v203_v17 = vrot.slane %v202_v6, 1  ;;  %2075 = vmatpush.msra.mxu1 %v729_v19 }
  0xa7   :  { %v207_v21 = vadd.f32 %v206_v11, %v205_v7  ;;  %v214_v22 = vadd.f32 %v213_v12, %v212_v8  ;;  %2092 = vmatpush.msra.mxu2 %v1204_v20  ;;  %2112 = vmatpush.msra.mxu3 %v1604_v23  ;;  %v285_v7 = vld [vmem:[%s11043_s4] sm:$0xf]  ;;  %v274_v12 = vperm.slane %v271_v1, 1 }
  0xa8   :  { %v197_v24 = vadd.f32 %v196_v15, %v195_v5  ;;  %v204_v25 = vadd.f32 %v203_v17, %v202_v6  ;;  %2076 = vmatpush.msra.mxu1 %v704_v29  ;;  %v287_v17 = vperm.slane %v285_v7, 0 }
  0xa9   :  { %v208_v31 = vrot.slane %v207_v21, 2  ;;  %v215_v14 = vrot.slane %v214_v22, 2  ;;  %2093 = vmatpush.msra.mxu2 %v1179_v30  ;;  %2113 = vmatpush.msra.mxu3 %v1579_v16 }
  0xaa   :  { %v219_v32 = vmul.f32 %v197_v24, %v5427_v3  ;;  %v220_v33 = vmul.f32 %v204_v25, %v5427_v3 }
  0xab   :  { %v209_v35 = vadd.f32 %v208_v31, %v207_v21  ;;  %v216_v36 = vadd.f32 %v215_v14, %v214_v22  ;;  %2094 = vmatpush.msra.mxu2 %v1154_v34  ;;  %2114 = vmatpush.msra.mxu3 %v1554_v37  ;;  %v288_v21 = vperm.slane %v285_v7, 1  ;;  %v275_v14 = vperm.slane %v271_v1, 2 }
  0xac   :  { %v223_v38 = vadd.f32 1e-05, %v219_v32  ;;  %v224_v39 = vadd.f32 1e-05, %v220_v33  ;;  %v680_v33 = vld [vmem:[%s11040_s5 + $0xbc8] sm:$0xff] }
  0xad   :  { %v210_v41 = vrot.slane %v209_v35, 1  ;;  %v217_v42 = vrot.slane %v216_v36, 1  ;;  %2095 = vmatpush.msra.mxu2 %v1129_v40  ;;  %2115 = vmatpush.msra.mxu3 %v1529_v43  ;;  %v290_v40 = vperm.slane %v285_v7, 3 }
  0xae   :  { %4992 = vrsqrt.f32 %v223_v38  ;;  %vm233_vm5 = vweird.f32 %v223_v38  ;;  %vm243_vm7 = vweird.f32 %v224_v39 }
  0xaf   :  { %4994 = vrsqrt.f32 %v224_v39  ;;  %v211_v47 = vadd.f32 %v210_v41, %v209_v35  ;;  %v218_v48 = vadd.f32 %v217_v42, %v216_v36  ;;  %2096 = vmatpush.msra.mxu2 %v1104_v44  ;;  %2116 = vmatpush.msra.mxu3 %v1504_v49  ;;  %v289_v36 = vperm.slane %v285_v7, 2  ;;  %v655_v41 = vld [vmem:[%s11040_s5 + $0xb00] sm:$0xff]  ;;  %v605_v49 = vld [vmem:[%s11040_s5 + $0x970] sm:$0xff]  ;;  %v1380_v7 = vld [vmem:[%s11040_s5 + $0x21a8] sm:$0xff] }
  0xb1   :  { %v221_v50 = vmul.f32 %v211_v47, %v5427_v3  ;;  %v222_v51 = vmul.f32 %v218_v48, %v5427_v3  ;;  %v1030_v47 = vld [vmem:[%s11040_s5 + $0x16b8] sm:$0xff] }
  0xb3   :  { %v225_v52 = vadd.f32 1e-05, %v221_v50  ;;  %v226_v53 = vadd.f32 1e-05, %v222_v51  ;;  %v1005_v51 = vld [vmem:[%s11040_s5 + $0x15f0] sm:$0xff] }
  0xb4   :  { %v4993_v54 = vpop.eup %4992 }
  0xb5   :  { %v4995_v58 = vpop.eup %4994  ;;  %v228_v59 = vmul.f32 %v4993_v54, %v223_v38  ;;  %4996 = vrsqrt.f32 %v225_v52  ;;  %vm234_vm3 = vweird.f32 %v4993_v54  ;;  %vm253_vm11 = vweird.f32 %v225_v52  ;;  %v1080_v38 = vld [vmem:[%s11040_s5 + $0x1848] sm:$0xff] }
  0xb6   :  { %v238_v60 = vmul.f32 %v4995_v58, %v224_v39  ;;  %4998 = vrsqrt.f32 %v226_v53  ;;  %vm244_vm4 = vweird.f32 %v4995_v58  ;;  %vm235_vm6 = vmor %vm233_vm5, %vm234_vm3  ;;  %vm263_vm13 = vweird.f32 %v226_v53 }
  0xb7   :  { %v229_v45 = vmul.f32 %v4993_v54, %v228_v59  ;;  %vm245_vm8 = vmor %vm243_vm7, %vm244_vm4  ;;  %v980_v59 = vld [vmem:[%s11040_s5 + $0x1528] sm:$0xff] }
  0xb8   :  { %v239_v46 = vmul.f32 %v4995_v58, %v238_v60  ;;  %v1455_v60 = vld [vmem:[%s11040_s5 + $0x2400] sm:$0xff] }
  0xb9   :  { %v230_v61 = vmul.f32 0.5, %v229_v45  ;;  %v1855_v45 = vld [vmem:[%s11040_s5 + $0x3080] sm:$0xff] }
  0xba   :  { %v240_v62 = vmul.f32 0.5, %v239_v46  ;;  %v555_v46 = vld [vmem:[%s11040_s5 + $0x7e0] sm:$0xff] }
  0xbb   :  { %v4997_v63 = vpop.eup %4996  ;;  %v231_v0 = vsub.f32 1.5, %v230_v61  ;;  %v955_v61 = vld [vmem:[%s11040_s5 + $0x1460] sm:$0xff] }
  0xbc   :  { %v4999_v2 = vpop.eup %4998  ;;  %v241_v4 = vsub.f32 1.5, %v240_v62  ;;  %v248_v5 = vmul.f32 %v4997_v63, %v225_v52  ;;  %vm254_vm9 = vweird.f32 %v4997_v63  ;;  %v1430_v62 = vld [vmem:[%s11040_s5 + $0x2338] sm:$0xff] }
  0xbd   :  { %v232_v6 = vmul.f32 %v4993_v54, %v231_v0  ;;  %v258_v8 = vmul.f32 %v4999_v2, %v226_v53  ;;  %vm264_vm10 = vweird.f32 %v4999_v2  ;;  %vm255_vm12 = vmor %vm253_vm11, %vm254_vm9  ;;  %v1480_v53 = vld [vmem:[%s11040_s5 + $0x24c8] sm:$0xff]  ;;  %v530_v0 = vld [vmem:[%s11040_s5 + $0x718] sm:$0xff] }
  0xbe   :  { %v242_v10 = vmul.f32 %v4995_v58, %v241_v4  ;;  %v249_v57 = vmul.f32 %v4997_v63, %v248_v5  ;;  %vm265_vm14 = vmor %vm263_vm13, %vm264_vm10  ;;  %v1805_v4 = vld [vmem:[%s11040_s5 + $0x2ef0] sm:$0xff]  ;;  %vm4948_vm13 = vcmask 1043456  }
  0xbf   :  { %v236_v11 = vsel %vm235_vm6, %v4993_v54, %v232_v6  ;;  %v259_v13 = vmul.f32 %v4999_v2, %v258_v8  ;;  %v1880_v54 = vld [vmem:[%s11040_s5 + $0x3148] sm:$0xff]  ;;  %v505_v5 = vld [vmem:[%s11040_s5 + $0x650] sm:$0xff] }
  0xc0   :  { %v267_v15 = vmul.f32 %v236_v11, %v5465_v26  ;;  %v246_v18 = vsel %vm245_vm8, %v4995_v58, %v242_v10  ;;  %v250_v19 = vmul.f32 0.5, %v249_v57  ;;  %v580_v58 = vld [vmem:[%s11040_s5 + $0x8a8] sm:$0xff]  ;;  %v905_v6 = vld [vmem:[%s11040_s5 + $0x12d0] sm:$0xff]  ;;  %v1355_v57 = vld [vmem:[%s11040_s5 + $0x20e0] sm:$0xff] }
  0xc1   :  { %v268_v20 = vmul.f32 %v246_v18, %v5468_v27  ;;  %v260_v22 = vmul.f32 0.5, %v259_v13  ;;  %v276_v27 = vperm.slane %v271_v1, 3  ;;  %v930_v1 = vld [vmem:[%s11040_s5 + $0x1398] sm:$0xff]  ;;  %v1780_v8 = vld [vmem:[%s11040_s5 + $0x2e28] sm:$0xff]  ;;  %v1755_v11 = vld [vmem:[%s11040_s5 + $0x2d60] sm:$0xff] }
  0xc2   :  { %v281_v23 = vmul.f32 %v273_v9, %v267_v15  ;;  %v251_v24 = vsub.f32 1.5, %v250_v19  ;;  %v480_v9 = vld [vmem:[%s11040_s5 + $0x588] sm:$0xff]  ;;  %v855_v13 = vld [vmem:[%s11040_s5 + $0x1140] sm:$0xff]  ;;  %v1330_v15 = vld [vmem:[%s11040_s5 + $0x2018] sm:$0xff] }
  0xc3   :  { %v282_v25 = vmul.f32 %v274_v12, %v268_v20  ;;  %v261_v28 = vsub.f32 1.5, %v260_v22  ;;  %v880_v10 = vld [vmem:[%s11040_s5 + $0x1208] sm:$0xff]  ;;  %v455_v12 = vld [vmem:[%s11040_s5 + $0x4c0] sm:$0xff]  ;;  %v430_v18 = vld [vmem:[%s11040_s5 + $0x3f8] sm:$0xff] }
  0xc4   :  { %v295_v29 = vadd.f32 %v287_v17, %v281_v23  ;;  %v252_v30 = vmul.f32 %v4997_v63, %v251_v24  ;;  %v1730_v17 = vld [vmem:[%s11040_s5 + $0x2c98] sm:$0xff]  ;;  %v1305_v20 = vld [vmem:[%s11040_s5 + $0x1f50] sm:$0xff]  ;;  %v1280_v24 = vld [vmem:[%s11040_s5 + $0x1e88] sm:$0xff] }
  0xc5   :  { %v296_v31 = vadd.f32 %v288_v21, %v282_v25  ;;  %v262_v26 = vmul.f32 %v4999_v2, %v261_v28  ;;  %v830_v19 = vld [vmem:[%s11040_s5 + $0x1078] sm:$0xff]  ;;  %v1705_v21 = vld [vmem:[%s11040_s5 + $0x2bd0] sm:$0xff]  ;;  %v1680_v25 = vld [vmem:[%s11040_s5 + $0x2b08] sm:$0xff] }
  0xc6   :  { %v5619_v16 = vmax.f32 %v295_v29, 0.0  ;;  %v256_v32 = vsel %vm255_vm12, %v4997_v63, %v252_v30  ;;  %v1830_v63 = vld [vmem:[%s11040_s5 + $0x2fb8] sm:$0xff]  ;;  %v405_v22 = vld [vmem:[%s11040_s5 + $0x330] sm:$0xff]  ;;  %v380_v28 = vld [vmem:[%s11040_s5 + $0x268] sm:$0xff]  ;;  %vm4946_vm12 = vcmask 1045508  }
  0xc7   :  { %v5624_v34 = vmax.f32 %v296_v31, 0.0  ;;  %v269_v35 = vmul.f32 %v256_v32, %v5518_v55  ;;  %v266_v37 = vsel %vm265_vm14, %v4999_v2, %v262_v26  ;;  %v1055_v55 = vld [vmem:[%s11040_s5 + $0x1780] sm:$0xff]  ;;  %v1405_v2 = vld [vmem:[%s11040_s5 + $0x2270] sm:$0xff]  ;;  %v780_v29 = vld [vmem:[%s11040_s5 + $0xee8] sm:$0xff] }
  0xc8   :  { %v270_v39 = vmul.f32 %v266_v37, %v5521_v56  ;;  %1977 = vmatmul.f32.vlgmr.msrb.gmra.mxu0 %v5619_v16  ;;  %v630_v56 = vld [vmem:[%s11040_s5 + $0xa38] sm:$0xff]  ;;  %v805_v23 = vld [vmem:[%s11040_s5 + $0xfb0] sm:$0xff]  ;;  %v1255_v30 = vld [vmem:[%s11040_s5 + $0x1dc0] sm:$0xff] }
  0xc9   :  { %v283_v42 = vmul.f32 %v275_v14, %v269_v35  ;;  %1997 = vmatmul.f32.vlgmr.msrb.gmra.mxu1 %v5624_v34  ;;  %2121 = vmatpush.msrb.mxu0 %v680_v33  ;;  %v1655_v31 = vld [vmem:[%s11040_s5 + $0x2a40] sm:$0xff]  ;;  %v1230_v32 = vld [vmem:[%s11040_s5 + $0x1cf8] sm:$0xff]  ;;  %v1605_v37 = vld [vmem:[%s11040_s5 + $0x28b0] sm:$0xff] }
  0xca   :  { %v284_v43 = vmul.f32 %v276_v27, %v270_v39  ;;  %2141 = vmatpush.msrb.mxu1 %v1080_v38  ;;  %v355_v14 = vld [vmem:[%s11040_s5 + $0x1a0] sm:$0xff]  ;;  %v1630_v27 = vld [vmem:[%s11040_s5 + $0x2978] sm:$0xff]  ;;  %v305_v38 = vld [vmem:[%s11040_s5 + $0x10] sm:$0xff] }
  0xcb   :  { %v297_v44 = vadd.f32 %v289_v36, %v283_v42  ;;  %2122 = vmatpush.msrb.mxu0 %v655_v41  ;;  %v755_v26 = vld [vmem:[%s11040_s5 + $0xe20] sm:$0xff]  ;;  %v330_v33 = vld [vmem:[%s11040_s5 + $0xd8] sm:$0xff]  ;;  %v1205_v36 = vld [vmem:[%s11040_s5 + $0x1c30] sm:$0xff] }
  0xcc   :  { %v298_v48 = vadd.f32 %v290_v40, %v284_v43  ;;  %2142 = vmatpush.msrb.mxu1 %v1055_v55  ;;  %v730_v35 = vld [vmem:[%s11040_s5 + $0xd58] sm:$0xff]  ;;  %v705_v39 = vld [vmem:[%s11040_s5 + $0xc90] sm:$0xff]  ;;  %v1180_v40 = vld [vmem:[%s11040_s5 + $0x1b68] sm:$0xff] }
  0xcd   :  { %v5648_v50 = vmax.f32 %v297_v44, 0.0  ;;  %2123 = vmatpush.msrb.mxu0 %v630_v56  ;;  %v1580_v41 = vld [vmem:[%s11040_s5 + $0x27e8] sm:$0xff]  ;;  %v681_v42 = vld [vmem:[%s11040_s5 + $0xbd0] sm:$0xff]  ;;  %v1155_v43 = vld [vmem:[%s11040_s5 + $0x1aa0] sm:$0xff] }
  0xce   :  { %v5653_v52 = vmax.f32 %v298_v48, 0.0  ;;  %2143 = vmatpush.msrb.mxu1 %v1030_v47  ;;  %v1081_v55 = vld [vmem:[%s11040_s5 + $0x1850] sm:$0xff]  ;;  %v1555_v56 = vld [vmem:[%s11040_s5 + $0x2720] sm:$0xff]  ;;  %v656_v44 = vld [vmem:[%s11040_s5 + $0xb08] sm:$0xff] }
  0xcf   :  { %2017 = vmatmul.f32.vlgmr.msrb.gmra.mxu2 %v5648_v50  ;;  %2124 = vmatpush.msrb.mxu0 %v605_v49  ;;  %v1056_v47 = vld [vmem:[%s11040_s5 + $0x1788] sm:$0xff]  ;;  %v1130_v48 = vld [vmem:[%s11040_s5 + $0x19d8] sm:$0xff] }
  0xd0   :  { %2037 = vmatmul.f32.vlgmr.msrb.gmra.mxu3 %v5653_v52  ;;  %2144 = vmatpush.msrb.mxu1 %v1005_v51  ;;  %v1530_v49 = vld [vmem:[%s11040_s5 + $0x2658] sm:$0xff]  ;;  %v631_v51 = vld [vmem:[%s11040_s5 + $0xa40] sm:$0xff] }
  0xd1   :  { %2161 = vmatpush.msrb.mxu2 %v1480_v53  ;;  %2181 = vmatpush.msrb.mxu3 %v1880_v54  ;;  %v1031_v53 = vld [vmem:[%s11040_s5 + $0x16c0] sm:$0xff]  ;;  %v1105_v54 = vld [vmem:[%s11040_s5 + $0x1910] sm:$0xff] }
  0xd2   :  { %2057 = vmatmul.f32.vlgmr.msra.gmra.mxu0 %v5619_v16  ;;  %2077 = vmatmul.f32.vlgmr.msra.gmra.mxu1 %v5624_v34 }
  0xd3   :  { %2125 = vmatpush.msrb.mxu0 %v580_v58  ;;  %2145 = vmatpush.msrb.mxu1 %v980_v59  ;;  %v1505_v58 = vld [vmem:[%s11040_s5 + $0x2590] sm:$0xff]  ;;  %v606_v59 = vld [vmem:[%s11040_s5 + $0x978] sm:$0xff] }
  0xd4   :  { %2162 = vmatpush.msrb.mxu2 %v1455_v60  ;;  %2182 = vmatpush.msrb.mxu3 %v1855_v45  ;;  %v1006_v60 = vld [vmem:[%s11040_s5 + $0x15f8] sm:$0xff]  ;;  %v1481_v45 = vld [vmem:[%s11040_s5 + $0x24d0] sm:$0xff] }
  0xd5   :  { %2126 = vmatpush.msrb.mxu0 %v555_v46  ;;  %2146 = vmatpush.msrb.mxu1 %v955_v61  ;;  %v1881_v46 = vld [vmem:[%s11040_s5 + $0x3150] sm:$0xff] }
  0xd6   :  { %2163 = vmatpush.msrb.mxu2 %v1430_v62  ;;  %2183 = vmatpush.msrb.mxu3 %v1830_v63  ;;  %v581_v61 = vld [vmem:[%s11040_s5 + $0x8b0] sm:$0xff]  ;;  %v1456_v63 = vld [vmem:[%s11040_s5 + $0x2408] sm:$0xff] }
  0xd7   :  { %2127 = vmatpush.msrb.mxu0 %v530_v0  ;;  %2147 = vmatpush.msrb.mxu1 %v930_v1  ;;  %v981_v62 = vld [vmem:[%s11040_s5 + $0x1530] sm:$0xff]  ;;  %v1856_v0 = vld [vmem:[%s11040_s5 + $0x3088] sm:$0xff] }
  0xd8   :  { %2164 = vmatpush.msrb.mxu2 %v1405_v2  ;;  %2184 = vmatpush.msrb.mxu3 %v1805_v4  ;;  %v556_v1 = vld [vmem:[%s11040_s5 + $0x7e8] sm:$0xff]  ;;  %v1431_v4 = vld [vmem:[%s11040_s5 + $0x2340] sm:$0xff] }
  0xd9   :  { %2097 = vmatmul.f32.vlgmr.msra.gmra.mxu2 %v5648_v50  ;;  %2117 = vmatmul.f32.vlgmr.msra.gmra.mxu3 %v5653_v52  ;;  %v956_v2 = vld [vmem:[%s11040_s5 + $0x1468] sm:$0xff] }
  0xda   :  { %2128 = vmatpush.msrb.mxu0 %v505_v5  ;;  %2148 = vmatpush.msrb.mxu1 %v905_v6  ;;  %v1831_v5 = vld [vmem:[%s11040_s5 + $0x2fc0] sm:$0xff] }
  0xdb   :  { %2165 = vmatpush.msrb.mxu2 %v1380_v7  ;;  %2185 = vmatpush.msrb.mxu3 %v1780_v8  ;;  %v531_v6 = vld [vmem:[%s11040_s5 + $0x720] sm:$0xff]  ;;  %v1406_v8 = vld [vmem:[%s11040_s5 + $0x2278] sm:$0xff] }
  0xdc   :  { %2129 = vmatpush.msrb.mxu0 %v480_v9  ;;  %2149 = vmatpush.msrb.mxu1 %v880_v10  ;;  %v931_v7 = vld [vmem:[%s11040_s5 + $0x13a0] sm:$0xff]  ;;  %v1806_v9 = vld [vmem:[%s11040_s5 + $0x2ef8] sm:$0xff] }
  0xdd   :  { %2166 = vmatpush.msrb.mxu2 %v1355_v57  ;;  %2186 = vmatpush.msrb.mxu3 %v1755_v11  ;;  %v506_v10 = vld [vmem:[%s11040_s5 + $0x658] sm:$0xff]  ;;  %v1381_v11 = vld [vmem:[%s11040_s5 + $0x21b0] sm:$0xff] }
  0xde   :  { %2130 = vmatpush.msrb.mxu0 %v455_v12  ;;  %2150 = vmatpush.msrb.mxu1 %v855_v13  ;;  %v906_v57 = vld [vmem:[%s11040_s5 + $0x12d8] sm:$0xff]  ;;  %v1781_v12 = vld [vmem:[%s11040_s5 + $0x2e30] sm:$0xff] }
  0xdf   :  { %2167 = vmatpush.msrb.mxu2 %v1330_v15  ;;  %2187 = vmatpush.msrb.mxu3 %v1730_v17  ;;  %v481_v13 = vld [vmem:[%s11040_s5 + $0x590] sm:$0xff]  ;;  %v1356_v17 = vld [vmem:[%s11040_s5 + $0x20e8] sm:$0xff] }
  0xe0   :  { %2131 = vmatpush.msrb.mxu0 %v430_v18  ;;  %2151 = vmatpush.msrb.mxu1 %v830_v19  ;;  %v881_v15 = vld [vmem:[%s11040_s5 + $0x1210] sm:$0xff]  ;;  %v1756_v18 = vld [vmem:[%s11040_s5 + $0x2d68] sm:$0xff] }
  0xe1   :  { %2168 = vmatpush.msrb.mxu2 %v1305_v20  ;;  %2188 = vmatpush.msrb.mxu3 %v1705_v21  ;;  %v456_v19 = vld [vmem:[%s11040_s5 + $0x4c8] sm:$0xff]  ;;  %v1331_v21 = vld [vmem:[%s11040_s5 + $0x2020] sm:$0xff] }
  0xe2   :  { %2132 = vmatpush.msrb.mxu0 %v405_v22  ;;  %2152 = vmatpush.msrb.mxu1 %v805_v23  ;;  %v856_v20 = vld [vmem:[%s11040_s5 + $0x1148] sm:$0xff]  ;;  %v1731_v22 = vld [vmem:[%s11040_s5 + $0x2ca0] sm:$0xff] }
  0xe3   :  { %2169 = vmatpush.msrb.mxu2 %v1280_v24  ;;  %2189 = vmatpush.msrb.mxu3 %v1680_v25  ;;  %v431_v23 = vld [vmem:[%s11040_s5 + $0x400] sm:$0xff]  ;;  %v1306_v25 = vld [vmem:[%s11040_s5 + $0x1f58] sm:$0xff] }
  0xe4   :  { %2133 = vmatpush.msrb.mxu0 %v380_v28  ;;  %2153 = vmatpush.msrb.mxu1 %v780_v29  ;;  %v831_v24 = vld [vmem:[%s11040_s5 + $0x1080] sm:$0xff]  ;;  %v1706_v28 = vld [vmem:[%s11040_s5 + $0x2bd8] sm:$0xff] }
  0xe5   :  { %2170 = vmatpush.msrb.mxu2 %v1255_v30  ;;  %2190 = vmatpush.msrb.mxu3 %v1655_v31  ;;  %v406_v29 = vld [vmem:[%s11040_s5 + $0x338] sm:$0xff]  ;;  %v1281_v31 = vld [vmem:[%s11040_s5 + $0x1e90] sm:$0xff] }
  0xe6   :  { %2134 = vmatpush.msrb.mxu0 %v355_v14  ;;  %2154 = vmatpush.msrb.mxu1 %v755_v26  ;;  %v806_v30 = vld [vmem:[%s11040_s5 + $0xfb8] sm:$0xff]  ;;  %v1681_v14 = vld [vmem:[%s11040_s5 + $0x2b10] sm:$0xff] }
  0xe7   :  { %2171 = vmatpush.msrb.mxu2 %v1230_v32  ;;  %2191 = vmatpush.msrb.mxu3 %v1630_v27  ;;  %v381_v26 = vld [vmem:[%s11040_s5 + $0x270] sm:$0xff]  ;;  %v1256_v27 = vld [vmem:[%s11040_s5 + $0x1dc8] sm:$0xff] }
  0xe8   :  { %2135 = vmatpush.msrb.mxu0 %v330_v33  ;;  %2155 = vmatpush.msrb.mxu1 %v730_v35  ;;  %v781_v32 = vld [vmem:[%s11040_s5 + $0xef0] sm:$0xff]  ;;  %v1656_v33 = vld [vmem:[%s11040_s5 + $0x2a48] sm:$0xff] }
  0xe9   :  { %2172 = vmatpush.msrb.mxu2 %v1205_v36  ;;  %2192 = vmatpush.msrb.mxu3 %v1605_v37  ;;  %v356_v35 = vld [vmem:[%s11040_s5 + $0x1a8] sm:$0xff]  ;;  %v1231_v37 = vld [vmem:[%s11040_s5 + $0x1d00] sm:$0xff] }
  0xea   :  { %2136 = vmatpush.msrb.mxu0 %v305_v38  ;;  %2156 = vmatpush.msrb.mxu1 %v705_v39  ;;  %v756_v36 = vld [vmem:[%s11040_s5 + $0xe28] sm:$0xff]  ;;  %v1631_v38 = vld [vmem:[%s11040_s5 + $0x2980] sm:$0xff] }
  0xeb   :  { %2173 = vmatpush.msrb.mxu2 %v1180_v40  ;;  %2193 = vmatpush.msrb.mxu3 %v1580_v41  ;;  %v331_v39 = vld [vmem:[%s11040_s5 + $0xe0] sm:$0xff]  ;;  %v1206_v41 = vld [vmem:[%s11040_s5 + $0x1c38] sm:$0xff] }
  0xec   :  { %2137 = vmatmul.f32.vlgmr.msrb.gmra.mxu0 %v5619_v16  ;;  %2157 = vmatmul.f32.vlgmr.msrb.gmra.mxu1 %v5624_v34  ;;  %v731_v40 = vld [vmem:[%s11040_s5 + $0xd60] sm:$0xff] }
  0xed   :  { %2201 = vmatpush.msra.mxu0 %v681_v42  ;;  %2221 = vmatpush.msra.mxu1 %v1081_v55  ;;  %v1606_v42 = vld [vmem:[%s11040_s5 + $0x28b8] sm:$0xff] }
  0xee   :  { %2174 = vmatpush.msrb.mxu2 %v1155_v43  ;;  %2194 = vmatpush.msrb.mxu3 %v1555_v56  ;;  %v306_v55 = vld [vmem:[%s11040_s5 + $0x18] sm:$0xff]  ;;  %v1181_v56 = vld [vmem:[%s11040_s5 + $0x1b70] sm:$0xff] }
  0xef   :  { %2202 = vmatpush.msra.mxu0 %v656_v44  ;;  %2222 = vmatpush.msra.mxu1 %v1056_v47  ;;  %v706_v43 = vld [vmem:[%s11040_s5 + $0xc98] sm:$0xff]  ;;  %v1581_v44 = vld [vmem:[%s11040_s5 + $0x27f0] sm:$0xff] }
  0xf0   :  { %2175 = vmatpush.msrb.mxu2 %v1130_v48  ;;  %2195 = vmatpush.msrb.mxu3 %v1530_v49  ;;  %v682_v47 = vld [vmem:[%s11040_s5 + $0xbd8] sm:$0xff]  ;;  %v1156_v49 = vld [vmem:[%s11040_s5 + $0x1aa8] sm:$0xff] }
  0xf1   :  { %2203 = vmatpush.msra.mxu0 %v631_v51  ;;  %2223 = vmatpush.msra.mxu1 %v1031_v53  ;;  %v1082_v48 = vld [vmem:[%s11040_s5 + $0x1858] sm:$0xff]  ;;  %v1556_v51 = vld [vmem:[%s11040_s5 + $0x2728] sm:$0xff]  ;;  %v657_v53 = vld [vmem:[%s11040_s5 + $0xb10] sm:$0xff] }
  0xf2   :  { %2176 = vmatpush.msrb.mxu2 %v1105_v54  ;;  %2196 = vmatpush.msrb.mxu3 %v1505_v58  ;;  %v1057_v54 = vld [vmem:[%s11040_s5 + $0x1790] sm:$0xff]  ;;  %v1131_v58 = vld [vmem:[%s11040_s5 + $0x19e0] sm:$0xff] }
  0xf3   :  { %2177 = vmatmul.f32.vlgmr.msrb.gmra.mxu2 %v5648_v50  ;;  %2197 = vmatmul.f32.vlgmr.msrb.gmra.mxu3 %v5653_v52 }
  0xf4   :  { %2204 = vmatpush.msra.mxu0 %v606_v59  ;;  %2224 = vmatpush.msra.mxu1 %v1006_v60  ;;  %v1531_v59 = vld [vmem:[%s11040_s5 + $0x2660] sm:$0xff]  ;;  %v632_v60 = vld [vmem:[%s11040_s5 + $0xa48] sm:$0xff] }
  0xf5   :  { %2241 = vmatpush.msra.mxu2 %v1481_v45  ;;  %2261 = vmatpush.msra.mxu3 %v1881_v46  ;;  %v1032_v45 = vld [vmem:[%s11040_s5 + $0x16c8] sm:$0xff]  ;;  %v1106_v46 = vld [vmem:[%s11040_s5 + $0x1918] sm:$0xff] }
  0xf6   :  { %2205 = vmatpush.msra.mxu0 %v581_v61  ;;  %2225 = vmatpush.msra.mxu1 %v981_v62  ;;  %v1506_v61 = vld [vmem:[%s11040_s5 + $0x2598] sm:$0xff]  ;;  %v607_v62 = vld [vmem:[%s11040_s5 + $0x980] sm:$0xff] }
  0xf7   :  { %2242 = vmatpush.msra.mxu2 %v1456_v63  ;;  %2262 = vmatpush.msra.mxu3 %v1856_v0  ;;  %v1007_v63 = vld [vmem:[%s11040_s5 + $0x1600] sm:$0xff]  ;;  %v1482_v0 = vld [vmem:[%s11040_s5 + $0x24d8] sm:$0xff] }
  0xf8   :  { %2206 = vmatpush.msra.mxu0 %v556_v1  ;;  %2226 = vmatpush.msra.mxu1 %v956_v2  ;;  %v1882_v1 = vld [vmem:[%s11040_s5 + $0x3158] sm:$0xff] }
  0xf9   :  { %2243 = vmatpush.msra.mxu2 %v1431_v4  ;;  %2263 = vmatpush.msra.mxu3 %v1831_v5  ;;  %v582_v2 = vld [vmem:[%s11040_s5 + $0x8b8] sm:$0xff]  ;;  %v1457_v5 = vld [vmem:[%s11040_s5 + $0x2410] sm:$0xff] }
  0xfa   :  { %2207 = vmatpush.msra.mxu0 %v531_v6  ;;  %2227 = vmatpush.msra.mxu1 %v931_v7  ;;  %v982_v4 = vld [vmem:[%s11040_s5 + $0x1538] sm:$0xff]  ;;  %v1857_v6 = vld [vmem:[%s11040_s5 + $0x3090] sm:$0xff] }
  0xfb   :  { %2244 = vmatpush.msra.mxu2 %v1406_v8  ;;  %2264 = vmatpush.msra.mxu3 %v1806_v9  ;;  %v557_v7 = vld [vmem:[%s11040_s5 + $0x7f0] sm:$0xff]  ;;  %v1432_v9 = vld [vmem:[%s11040_s5 + $0x2348] sm:$0xff] }
  0xfc   :  { %2208 = vmatpush.msra.mxu0 %v506_v10  ;;  %2228 = vmatpush.msra.mxu1 %v906_v57  ;;  %v957_v8 = vld [vmem:[%s11040_s5 + $0x1470] sm:$0xff]  ;;  %v1832_v10 = vld [vmem:[%s11040_s5 + $0x2fc8] sm:$0xff] }
  0xfd   :  { %2245 = vmatpush.msra.mxu2 %v1381_v11  ;;  %2265 = vmatpush.msra.mxu3 %v1781_v12  ;;  %v532_v57 = vld [vmem:[%s11040_s5 + $0x728] sm:$0xff]  ;;  %v1407_v12 = vld [vmem:[%s11040_s5 + $0x2280] sm:$0xff] }
  0xfe   :  { %2209 = vmatpush.msra.mxu0 %v481_v13  ;;  %2229 = vmatpush.msra.mxu1 %v881_v15  ;;  %v932_v11 = vld [vmem:[%s11040_s5 + $0x13a8] sm:$0xff]  ;;  %v1807_v13 = vld [vmem:[%s11040_s5 + $0x2f00] sm:$0xff] }
  0xff   :  { %2246 = vmatpush.msra.mxu2 %v1356_v17  ;;  %2266 = vmatpush.msra.mxu3 %v1756_v18  ;;  %v507_v15 = vld [vmem:[%s11040_s5 + $0x660] sm:$0xff]  ;;  %v1382_v18 = vld [vmem:[%s11040_s5 + $0x21b8] sm:$0xff] }
 0x100   :  { %2210 = vmatpush.msra.mxu0 %v456_v19  ;;  %2230 = vmatpush.msra.mxu1 %v856_v20  ;;  %v907_v17 = vld [vmem:[%s11040_s5 + $0x12e0] sm:$0xff]  ;;  %v1782_v19 = vld [vmem:[%s11040_s5 + $0x2e38] sm:$0xff] }
 0x101   :  { %2247 = vmatpush.msra.mxu2 %v1331_v21  ;;  %2267 = vmatpush.msra.mxu3 %v1731_v22  ;;  %v482_v20 = vld [vmem:[%s11040_s5 + $0x598] sm:$0xff]  ;;  %v1357_v22 = vld [vmem:[%s11040_s5 + $0x20f0] sm:$0xff] }
 0x102   :  { %2211 = vmatpush.msra.mxu0 %v431_v23  ;;  %2231 = vmatpush.msra.mxu1 %v831_v24  ;;  %v882_v21 = vld [vmem:[%s11040_s5 + $0x1218] sm:$0xff]  ;;  %v1757_v23 = vld [vmem:[%s11040_s5 + $0x2d70] sm:$0xff] }
 0x103   :  { %2248 = vmatpush.msra.mxu2 %v1306_v25  ;;  %2268 = vmatpush.msra.mxu3 %v1706_v28  ;;  %v457_v24 = vld [vmem:[%s11040_s5 + $0x4d0] sm:$0xff]  ;;  %v1332_v28 = vld [vmem:[%s11040_s5 + $0x2028] sm:$0xff] }
 0x104   :  { %2212 = vmatpush.msra.mxu0 %v406_v29  ;;  %2232 = vmatpush.msra.mxu1 %v806_v30  ;;  %v857_v25 = vld [vmem:[%s11040_s5 + $0x1150] sm:$0xff]  ;;  %v1732_v29 = vld [vmem:[%s11040_s5 + $0x2ca8] sm:$0xff] }
 0x105   :  { %2249 = vmatpush.msra.mxu2 %v1281_v31  ;;  %2269 = vmatpush.msra.mxu3 %v1681_v14  ;;  %v432_v30 = vld [vmem:[%s11040_s5 + $0x408] sm:$0xff]  ;;  %v1307_v14 = vld [vmem:[%s11040_s5 + $0x1f60] sm:$0xff] }
 0x106   :  { %2213 = vmatpush.msra.mxu0 %v381_v26  ;;  %2233 = vmatpush.msra.mxu1 %v781_v32  ;;  %v832_v31 = vld [vmem:[%s11040_s5 + $0x1088] sm:$0xff]  ;;  %v1707_v26 = vld [vmem:[%s11040_s5 + $0x2be0] sm:$0xff] }
 0x107   :  { %2250 = vmatpush.msra.mxu2 %v1256_v27  ;;  %2270 = vmatpush.msra.mxu3 %v1656_v33  ;;  %v407_v32 = vld [vmem:[%s11040_s5 + $0x340] sm:$0xff]  ;;  %v1282_v33 = vld [vmem:[%s11040_s5 + $0x1e98] sm:$0xff] }
 0x108   :  { %2214 = vmatpush.msra.mxu0 %v356_v35  ;;  %2234 = vmatpush.msra.mxu1 %v756_v36  ;;  %v807_v27 = vld [vmem:[%s11040_s5 + $0xfc0] sm:$0xff]  ;;  %v1682_v35 = vld [vmem:[%s11040_s5 + $0x2b18] sm:$0xff] }
 0x109   :  { %2251 = vmatpush.msra.mxu2 %v1231_v37  ;;  %2271 = vmatpush.msra.mxu3 %v1631_v38  ;;  %v382_v36 = vld [vmem:[%s11040_s5 + $0x278] sm:$0xff]  ;;  %v1257_v38 = vld [vmem:[%s11040_s5 + $0x1dd0] sm:$0xff] }
 0x10a   :  { %2215 = vmatpush.msra.mxu0 %v331_v39  ;;  %2235 = vmatpush.msra.mxu1 %v731_v40  ;;  %v782_v37 = vld [vmem:[%s11040_s5 + $0xef8] sm:$0xff]  ;;  %v1657_v39 = vld [vmem:[%s11040_s5 + $0x2a50] sm:$0xff] }
 0x10b   :  { %2252 = vmatpush.msra.mxu2 %v1206_v41  ;;  %2272 = vmatpush.msra.mxu3 %v1606_v42  ;;  %v357_v40 = vld [vmem:[%s11040_s5 + $0x1b0] sm:$0xff]  ;;  %v1232_v42 = vld [vmem:[%s11040_s5 + $0x1d08] sm:$0xff] }
 0x10c   :  { %2216 = vmatpush.msra.mxu0 %v306_v55  ;;  %2236 = vmatpush.msra.mxu1 %v706_v43  ;;  %v757_v41 = vld [vmem:[%s11040_s5 + $0xe30] sm:$0xff]  ;;  %v1632_v55 = vld [vmem:[%s11040_s5 + $0x2988] sm:$0xff] }
 0x10d   :  { %2253 = vmatpush.msra.mxu2 %v1181_v56  ;;  %2273 = vmatpush.msra.mxu3 %v1581_v44  ;;  %v332_v43 = vld [vmem:[%s11040_s5 + $0xe8] sm:$0xff]  ;;  %v1207_v44 = vld [vmem:[%s11040_s5 + $0x1c40] sm:$0xff] }
 0x10e   :  { %2217 = vmatmul.f32.vlgmr.msra.gmra.mxu0 %v5619_v16  ;;  %2237 = vmatmul.f32.vlgmr.msra.gmra.mxu1 %v5624_v34  ;;  %v732_v56 = vld [vmem:[%s11040_s5 + $0xd68] sm:$0xff] }
 0x10f   :  { %2281 = vmatpush.msrb.mxu0 %v682_v47  ;;  %2301 = vmatpush.msrb.mxu1 %v1082_v48  ;;  %v1607_v47 = vld [vmem:[%s11040_s5 + $0x28c0] sm:$0xff] }
 0x110   :  { %2254 = vmatpush.msra.mxu2 %v1156_v49  ;;  %2274 = vmatpush.msra.mxu3 %v1556_v51  ;;  %v307_v48 = vld [vmem:[%s11040_s5 + $0x20] sm:$0xff]  ;;  %v1182_v51 = vld [vmem:[%s11040_s5 + $0x1b78] sm:$0xff] }
 0x111   :  { %2282 = vmatpush.msrb.mxu0 %v657_v53  ;;  %2302 = vmatpush.msrb.mxu1 %v1057_v54  ;;  %v707_v49 = vld [vmem:[%s11040_s5 + $0xca0] sm:$0xff]  ;;  %v1582_v53 = vld [vmem:[%s11040_s5 + $0x27f8] sm:$0xff] }
 0x112   :  { %2255 = vmatpush.msra.mxu2 %v1131_v58  ;;  %2275 = vmatpush.msra.mxu3 %v1531_v59  ;;  %v683_v54 = vld [vmem:[%s11040_s5 + $0xbe0] sm:$0xff]  ;;  %v1157_v59 = vld [vmem:[%s11040_s5 + $0x1ab0] sm:$0xff] }
 0x113   :  { %2283 = vmatpush.msrb.mxu0 %v632_v60  ;;  %2303 = vmatpush.msrb.mxu1 %v1032_v45  ;;  %v1083_v58 = vld [vmem:[%s11040_s5 + $0x1860] sm:$0xff]  ;;  %v1557_v60 = vld [vmem:[%s11040_s5 + $0x2730] sm:$0xff]  ;;  %v658_v45 = vld [vmem:[%s11040_s5 + $0xb18] sm:$0xff] }
 0x114   :  { %2256 = vmatpush.msra.mxu2 %v1106_v46  ;;  %2276 = vmatpush.msra.mxu3 %v1506_v61  ;;  %v1058_v46 = vld [vmem:[%s11040_s5 + $0x1798] sm:$0xff]  ;;  %v1132_v61 = vld [vmem:[%s11040_s5 + $0x19e8] sm:$0xff] }
 0x115   :  { %2257 = vmatmul.f32.vlgmr.msra.gmra.mxu2 %v5648_v50  ;;  %2277 = vmatmul.f32.vlgmr.msra.gmra.mxu3 %v5653_v52 }
 0x116   :  { %2284 = vmatpush.msrb.mxu0 %v607_v62  ;;  %2304 = vmatpush.msrb.mxu1 %v1007_v63  ;;  %v1532_v62 = vld [vmem:[%s11040_s5 + $0x2668] sm:$0xff]  ;;  %v633_v63 = vld [vmem:[%s11040_s5 + $0xa50] sm:$0xff] }
 0x117   :  { %2321 = vmatpush.msrb.mxu2 %v1482_v0  ;;  %2341 = vmatpush.msrb.mxu3 %v1882_v1  ;;  %v1033_v0 = vld [vmem:[%s11040_s5 + $0x16d0] sm:$0xff]  ;;  %v1107_v1 = vld [vmem:[%s11040_s5 + $0x1920] sm:$0xff] }
 0x118   :  { %2285 = vmatpush.msrb.mxu0 %v582_v2  ;;  %2305 = vmatpush.msrb.mxu1 %v982_v4  ;;  %v1507_v2 = vld [vmem:[%s11040_s5 + $0x25a0] sm:$0xff]  ;;  %v608_v4 = vld [vmem:[%s11040_s5 + $0x988] sm:$0xff] }
 0x119   :  { %2322 = vmatpush.msrb.mxu2 %v1457_v5  ;;  %2342 = vmatpush.msrb.mxu3 %v1857_v6  ;;  %v1008_v5 = vld [vmem:[%s11040_s5 + $0x1608] sm:$0xff]  ;;  %v1483_v6 = vld [vmem:[%s11040_s5 + $0x24e0] sm:$0xff] }
 0x11a   :  { %2286 = vmatpush.msrb.mxu0 %v557_v7  ;;  %2306 = vmatpush.msrb.mxu1 %v957_v8  ;;  %v1883_v7 = vld [vmem:[%s11040_s5 + $0x3160] sm:$0xff] }
 0x11b   :  { %2323 = vmatpush.msrb.mxu2 %v1432_v9  ;;  %2343 = vmatpush.msrb.mxu3 %v1832_v10  ;;  %v583_v8 = vld [vmem:[%s11040_s5 + $0x8c0] sm:$0xff]  ;;  %v1458_v10 = vld [vmem:[%s11040_s5 + $0x2418] sm:$0xff] }
 0x11c   :  { %2287 = vmatpush.msrb.mxu0 %v532_v57  ;;  %2307 = vmatpush.msrb.mxu1 %v932_v11  ;;  %v983_v9 = vld [vmem:[%s11040_s5 + $0x1540] sm:$0xff]  ;;  %v1858_v57 = vld [vmem:[%s11040_s5 + $0x3098] sm:$0xff] }
 0x11d   :  { %2324 = vmatpush.msrb.mxu2 %v1407_v12  ;;  %2344 = vmatpush.msrb.mxu3 %v1807_v13  ;;  %v558_v11 = vld [vmem:[%s11040_s5 + $0x7f8] sm:$0xff]  ;;  %v1433_v13 = vld [vmem:[%s11040_s5 + $0x2350] sm:$0xff] }
 0x11e   :  { %2288 = vmatpush.msrb.mxu0 %v507_v15  ;;  %2308 = vmatpush.msrb.mxu1 %v907_v17  ;;  %v958_v12 = vld [vmem:[%s11040_s5 + $0x1478] sm:$0xff]  ;;  %v1833_v15 = vld [vmem:[%s11040_s5 + $0x2fd0] sm:$0xff] }
 0x11f   :  { %2325 = vmatpush.msrb.mxu2 %v1382_v18  ;;  %2345 = vmatpush.msrb.mxu3 %v1782_v19  ;;  %v533_v17 = vld [vmem:[%s11040_s5 + $0x730] sm:$0xff]  ;;  %v1408_v19 = vld [vmem:[%s11040_s5 + $0x2288] sm:$0xff] }
 0x120   :  { %2289 = vmatpush.msrb.mxu0 %v482_v20  ;;  %2309 = vmatpush.msrb.mxu1 %v882_v21  ;;  %v933_v18 = vld [vmem:[%s11040_s5 + $0x13b0] sm:$0xff]  ;;  %v1808_v20 = vld [vmem:[%s11040_s5 + $0x2f08] sm:$0xff] }
 0x121   :  { %2326 = vmatpush.msrb.mxu2 %v1357_v22  ;;  %2346 = vmatpush.msrb.mxu3 %v1757_v23  ;;  %v508_v21 = vld [vmem:[%s11040_s5 + $0x668] sm:$0xff]  ;;  %v1383_v23 = vld [vmem:[%s11040_s5 + $0x21c0] sm:$0xff] }
 0x122   :  { %2290 = vmatpush.msrb.mxu0 %v457_v24  ;;  %2310 = vmatpush.msrb.mxu1 %v857_v25  ;;  %v908_v22 = vld [vmem:[%s11040_s5 + $0x12e8] sm:$0xff]  ;;  %v1783_v24 = vld [vmem:[%s11040_s5 + $0x2e40] sm:$0xff] }
 0x123   :  { %2327 = vmatpush.msrb.mxu2 %v1332_v28  ;;  %2347 = vmatpush.msrb.mxu3 %v1732_v29  ;;  %v483_v25 = vld [vmem:[%s11040_s5 + $0x5a0] sm:$0xff]  ;;  %v1358_v29 = vld [vmem:[%s11040_s5 + $0x20f8] sm:$0xff] }
 0x124   :  { %2291 = vmatpush.msrb.mxu0 %v432_v30  ;;  %2311 = vmatpush.msrb.mxu1 %v832_v31  ;;  %v883_v28 = vld [vmem:[%s11040_s5 + $0x1220] sm:$0xff]  ;;  %v1758_v30 = vld [vmem:[%s11040_s5 + $0x2d78] sm:$0xff] }
 0x125   :  { %2328 = vmatpush.msrb.mxu2 %v1307_v14  ;;  %2348 = vmatpush.msrb.mxu3 %v1707_v26  ;;  %v458_v31 = vld [vmem:[%s11040_s5 + $0x4d8] sm:$0xff]  ;;  %v1333_v26 = vld [vmem:[%s11040_s5 + $0x2030] sm:$0xff] }
 0x126   :  { %2292 = vmatpush.msrb.mxu0 %v407_v32  ;;  %2312 = vmatpush.msrb.mxu1 %v807_v27  ;;  %v858_v14 = vld [vmem:[%s11040_s5 + $0x1158] sm:$0xff]  ;;  %v1733_v32 = vld [vmem:[%s11040_s5 + $0x2cb0] sm:$0xff] }
 0x127   :  { %2329 = vmatpush.msrb.mxu2 %v1282_v33  ;;  %2349 = vmatpush.msrb.mxu3 %v1682_v35  ;;  %v433_v27 = vld [vmem:[%s11040_s5 + $0x410] sm:$0xff]  ;;  %v1308_v35 = vld [vmem:[%s11040_s5 + $0x1f68] sm:$0xff] }
 0x128   :  { %2293 = vmatpush.msrb.mxu0 %v382_v36  ;;  %2313 = vmatpush.msrb.mxu1 %v782_v37  ;;  %v833_v33 = vld [vmem:[%s11040_s5 + $0x1090] sm:$0xff]  ;;  %v1708_v36 = vld [vmem:[%s11040_s5 + $0x2be8] sm:$0xff] }
 0x129   :  { %2330 = vmatpush.msrb.mxu2 %v1257_v38  ;;  %2350 = vmatpush.msrb.mxu3 %v1657_v39  ;;  %v408_v37 = vld [vmem:[%s11040_s5 + $0x348] sm:$0xff]  ;;  %v1283_v39 = vld [vmem:[%s11040_s5 + $0x1ea0] sm:$0xff] }
 0x12a   :  { %2294 = vmatpush.msrb.mxu0 %v357_v40  ;;  %2314 = vmatpush.msrb.mxu1 %v757_v41  ;;  %v808_v38 = vld [vmem:[%s11040_s5 + $0xfc8] sm:$0xff]  ;;  %v1683_v40 = vld [vmem:[%s11040_s5 + $0x2b20] sm:$0xff] }
 0x12b   :  { %2331 = vmatpush.msrb.mxu2 %v1232_v42  ;;  %2351 = vmatpush.msrb.mxu3 %v1632_v55  ;;  %v383_v41 = vld [vmem:[%s11040_s5 + $0x280] sm:$0xff]  ;;  %v1258_v55 = vld [vmem:[%s11040_s5 + $0x1dd8] sm:$0xff] }
 0x12c   :  { %2295 = vmatpush.msrb.mxu0 %v332_v43  ;;  %2315 = vmatpush.msrb.mxu1 %v732_v56  ;;  %v783_v42 = vld [vmem:[%s11040_s5 + $0xf00] sm:$0xff]  ;;  %v1658_v43 = vld [vmem:[%s11040_s5 + $0x2a58] sm:$0xff] }
 0x12d   :  { %2332 = vmatpush.msrb.mxu2 %v1207_v44  ;;  %2352 = vmatpush.msrb.mxu3 %v1607_v47  ;;  %v358_v56 = vld [vmem:[%s11040_s5 + $0x1b8] sm:$0xff]  ;;  %v1233_v47 = vld [vmem:[%s11040_s5 + $0x1d10] sm:$0xff] }
 0x12e   :  { %2296 = vmatpush.msrb.mxu0 %v307_v48  ;;  %2316 = vmatpush.msrb.mxu1 %v707_v49  ;;  %v758_v44 = vld [vmem:[%s11040_s5 + $0xe38] sm:$0xff]  ;;  %v1633_v48 = vld [vmem:[%s11040_s5 + $0x2990] sm:$0xff] }
 0x12f   :  { %2333 = vmatpush.msrb.mxu2 %v1182_v51  ;;  %2353 = vmatpush.msrb.mxu3 %v1582_v53  ;;  %v333_v51 = vld [vmem:[%s11040_s5 + $0xf0] sm:$0xff] }
 0x130   :  { %2297 = vmatmul.f32.vlgmr.msrb.gmra.mxu0 %v5619_v16  ;;  %2317 = vmatmul.f32.vlgmr.msrb.gmra.mxu1 %v5624_v34  ;;  %v733_v53 = vld [vmem:[%s11040_s5 + $0xd70] sm:$0xff] }
 0x131   :  { %2361 = vmatpush.msra.mxu0 %v683_v54  ;;  %2381 = vmatpush.msra.mxu1 %v1083_v58  ;;  %v1208_v54 = vld [vmem:[%s11040_s5 + $0x1c48] sm:$0xff] }
 0x132   :  { %2334 = vmatpush.msrb.mxu2 %v1157_v59  ;;  %2354 = vmatpush.msrb.mxu3 %v1557_v60  ;;  %v1608_v58 = vld [vmem:[%s11040_s5 + $0x28c8] sm:$0xff] }
 0x133   :  { %2362 = vmatpush.msra.mxu0 %v658_v45  ;;  %2382 = vmatpush.msra.mxu1 %v1058_v46  ;;  %v308_v59 = vld [vmem:[%s11040_s5 + $0x28] sm:$0xff]  ;;  %v1183_v45 = vld [vmem:[%s11040_s5 + $0x1b80] sm:$0xff] }
 0x134   :  { %2335 = vmatpush.msrb.mxu2 %v1132_v61  ;;  %2355 = vmatpush.msrb.mxu3 %v1532_v62  ;;  %v708_v60 = vld [vmem:[%s11040_s5 + $0xca8] sm:$0xff]  ;;  %v1583_v46 = vld [vmem:[%s11040_s5 + $0x2800] sm:$0xff] }
 0x135   :  { %2363 = vmatpush.msra.mxu0 %v633_v63  ;;  %2383 = vmatpush.msra.mxu1 %v1033_v0  ;;  %v6402_v61 = vld [vmem:[%s11044_s6] sm:$0xff]  ;;  %v684_v62 = vld [vmem:[%s11040_s5 + $0xbe8] sm:$0xff] }
 0x136   :  { %2336 = vmatpush.msrb.mxu2 %v1107_v1  ;;  %2356 = vmatpush.msrb.mxu3 %v1507_v2  ;;  %v1084_v63 = vld [vmem:[%s11040_s5 + $0x1868] sm:$0xff]  ;;  %v1158_v1 = vld [vmem:[%s11040_s5 + $0x1ab8] sm:$0xff] }
 0x137   :  { %2337 = vmatmul.f32.vlgmr.msrb.gmra.mxu2 %v5648_v50  ;;  %2357 = vmatmul.f32.vlgmr.msrb.gmra.mxu3 %v5653_v52  ;;  %v1558_v2 = vld [vmem:[%s11040_s5 + $0x2738] sm:$0xff] }
 0x138   :  { %2364 = vmatpush.msra.mxu0 %v608_v4  ;;  %2384 = vmatpush.msra.mxu1 %v1008_v5  ;;  %v1911_v4 = vperm.slane %v6402_v61, 0  ;;  %v659_v5 = vld [vmem:[%s11040_s5 + $0xb20] sm:$0xff] }
 0x139   :  { %2401 = vmatpush.msra.mxu2 %v1483_v6  ;;  %2421 = vmatpush.msra.mxu3 %v1883_v7  ;;  %v1059_v6 = vld [vmem:[%s11040_s5 + $0x17a0] sm:$0xff] }
 0x13a   :  { %2365 = vmatpush.msra.mxu0 %v583_v8  ;;  %2385 = vmatpush.msra.mxu1 %v983_v9  ;;  %v1133_v8 = vld [vmem:[%s11040_s5 + $0x19f0] sm:$0xff] }
 0x13b   :  { %2402 = vmatpush.msra.mxu2 %v1458_v10  ;;  %2422 = vmatpush.msra.mxu3 %v1858_v57  ;;  %v1533_v9 = vld [vmem:[%s11040_s5 + $0x2670] sm:$0xff]  ;;  %v1912_v10 = vperm.slane %v6402_v61, 1  ;;  %v634_v57 = vld [vmem:[%s11040_s5 + $0xa58] sm:$0xff] }
 0x13c   :  { %2366 = vmatpush.msra.mxu0 %v558_v11  ;;  %2386 = vmatpush.msra.mxu1 %v958_v12  ;;  %v1034_v11 = vld [vmem:[%s11040_s5 + $0x16d8] sm:$0xff] }
 0x13d   :  { %2403 = vmatpush.msra.mxu2 %v1433_v13  ;;  %2423 = vmatpush.msra.mxu3 %v1833_v15  ;;  %v1108_v15 = vld [vmem:[%s11040_s5 + $0x1928] sm:$0xff] }
 0x13e   :  { %2367 = vmatpush.msra.mxu0 %v533_v17  ;;  %2387 = vmatpush.msra.mxu1 %v933_v18  ;;  %v1508_v17 = vld [vmem:[%s11040_s5 + $0x25a8] sm:$0xff] }
 0x13f   :  { %2404 = vmatpush.msra.mxu2 %v1408_v19  ;;  %2424 = vmatpush.msra.mxu3 %v1808_v20  ;;  %v609_v19 = vld [vmem:[%s11040_s5 + $0x990] sm:$0xff] }
 0x140   :  { %2368 = vmatpush.msra.mxu0 %v508_v21  ;;  %2388 = vmatpush.msra.mxu1 %v908_v22  ;;  %v1009_v20 = vld [vmem:[%s11040_s5 + $0x1610] sm:$0xff]  ;;  %v1484_v22 = vld [vmem:[%s11040_s5 + $0x24e8] sm:$0xff] }
 0x141   :  { %2405 = vmatpush.msra.mxu2 %v1383_v23  ;;  %2425 = vmatpush.msra.mxu3 %v1783_v24  ;;  %v1884_v23 = vld [vmem:[%s11040_s5 + $0x3168] sm:$0xff] }
 0x142   :  { %2369 = vmatpush.msra.mxu0 %v483_v25  ;;  %2389 = vmatpush.msra.mxu1 %v883_v28  ;;  %v584_v24 = vld [vmem:[%s11040_s5 + $0x8c8] sm:$0xff] }
 0x143   :  { %2406 = vmatpush.msra.mxu2 %v1358_v29  ;;  %2426 = vmatpush.msra.mxu3 %v1758_v30  ;;  %v984_v25 = vld [vmem:[%s11040_s5 + $0x1548] sm:$0xff]  ;;  %v1459_v29 = vld [vmem:[%s11040_s5 + $0x2420] sm:$0xff] }
 0x144   :  { %2370 = vmatpush.msra.mxu0 %v458_v31  ;;  %2390 = vmatpush.msra.mxu1 %v858_v14  ;;  %v1859_v30 = vld [vmem:[%s11040_s5 + $0x30a0] sm:$0xff] }
 0x145   :  { %2407 = vmatpush.msra.mxu2 %v1333_v26  ;;  %2427 = vmatpush.msra.mxu3 %v1733_v32  ;;  %v1978_v49 = vpop.f32.mrf.mxu0  ;;  %v559_v26 = vld [vmem:[%s11040_s5 + $0x800] sm:$0xff] }
 0x146   :  { %2371 = vmatpush.msra.mxu0 %v433_v27  ;;  %2391 = vmatpush.msra.mxu1 %v833_v33  ;;  %v1998_v0 = vpop.f32.mrf.mxu1  ;;  %v1979_v18 = vadd.f32 %v1978_v49, %v1911_v4  ;;  %v959_v32 = vld [vmem:[%s11040_s5 + $0x1480] sm:$0xff]  ;;  %v1434_v27 = vld [vmem:[%s11040_s5 + $0x2358] sm:$0xff]  ;;  %v484_v49 = vld [vmem:[%s11040_s5 + $0x5a8] sm:$0xff] }
 0x147   :  { %2408 = vmatpush.msra.mxu2 %v1308_v35  ;;  %2428 = vmatpush.msra.mxu3 %v1708_v36  ;;  %v1834_v33 = vld [vmem:[%s11040_s5 + $0x2fd8] sm:$0xff]  ;;  %v1709_v4 = vld [vmem:[%s11040_s5 + $0x2bf0] sm:$0xff] }
 0x148   :  { %2372 = vmatpush.msra.mxu0 %v408_v37  ;;  %2392 = vmatpush.msra.mxu1 %v808_v38  ;;  %v1999_v28 = vadd.f32 %v1998_v0, %v1979_v18  ;;  %v534_v37 = vld [vmem:[%s11040_s5 + $0x738] sm:$0xff]  ;;  %v359_v18 = vld [vmem:[%s11040_s5 + $0x1c0] sm:$0xff] }
 0x149   :  { %2409 = vmatpush.msra.mxu2 %v1283_v39  ;;  %2429 = vmatpush.msra.mxu3 %v1683_v40  ;;  %v934_v38 = vld [vmem:[%s11040_s5 + $0x13b8] sm:$0xff]  ;;  %v1409_v40 = vld [vmem:[%s11040_s5 + $0x2290] sm:$0xff] }
 0x14a   :  { %2373 = vmatpush.msra.mxu0 %v383_v41  ;;  %2393 = vmatpush.msra.mxu1 %v783_v42  ;;  %v1809_v41 = vld [vmem:[%s11040_s5 + $0x2f10] sm:$0xff]  ;;  %v434_v0 = vld [vmem:[%s11040_s5 + $0x418] sm:$0xff] }
 0x14b   :  { %2410 = vmatpush.msra.mxu2 %v1258_v55  ;;  %2430 = vmatpush.msra.mxu3 %v1658_v43  ;;  %v509_v55 = vld [vmem:[%s11040_s5 + $0x670] sm:$0xff] }
 0x14c   :  { %2374 = vmatpush.msra.mxu0 %v358_v56  ;;  %2394 = vmatpush.msra.mxu1 %v758_v44  ;;  %v909_v43 = vld [vmem:[%s11040_s5 + $0x12f0] sm:$0xff] }
 0x14d   :  { %2411 = vmatpush.msra.mxu2 %v1233_v47  ;;  %2431 = vmatpush.msra.mxu3 %v1633_v48  ;;  %v1384_v47 = vld [vmem:[%s11040_s5 + $0x21c8] sm:$0xff] }
 0x14e   :  { %2375 = vmatpush.msra.mxu0 %v333_v51  ;;  %2395 = vmatpush.msra.mxu1 %v733_v53  ;;  %v1784_v48 = vld [vmem:[%s11040_s5 + $0x2e48] sm:$0xff] }
 0x14f   :  { %2412 = vmatpush.msra.mxu2 %v1208_v54  ;;  %2432 = vmatpush.msra.mxu3 %v1608_v58  ;;  %v2058_v12 = vpop.f32.mrf.mxu0  ;;  %v2078_v31 = vpop.f32.mrf.mxu1  ;;  %v884_v51 = vld [vmem:[%s11040_s5 + $0x1228] sm:$0xff]  ;;  %v1359_v54 = vld [vmem:[%s11040_s5 + $0x2100] sm:$0xff] }
 0x150   :  { %2376 = vmatpush.msra.mxu0 %v308_v59  ;;  %2396 = vmatpush.msra.mxu1 %v708_v60  ;;  %v2059_v21 = vadd.f32 %v2058_v12, %v1912_v10  ;;  %v1759_v58 = vld [vmem:[%s11040_s5 + $0x2d80] sm:$0xff]  ;;  %v1684_v10 = vld [vmem:[%s11040_s5 + $0x2b28] sm:$0xff] }
 0x151   :  { %2413 = vmatpush.msra.mxu2 %v1183_v45  ;;  %2433 = vmatpush.msra.mxu3 %v1583_v46  ;;  %v459_v60 = vld [vmem:[%s11040_s5 + $0x4e0] sm:$0xff] }
 0x152   :  { %2377 = vmatmul.f32.vlgmr.msra.gmra.mxu0 %v5619_v16  ;;  %2397 = vmatmul.f32.vlgmr.msra.gmra.mxu1 %v5624_v34  ;;  %v2018_v7 = vpop.f32.mrf.mxu2  ;;  %v2079_v14 = vadd.f32 %v2078_v31, %v2059_v21  ;;  %v859_v45 = vld [vmem:[%s11040_s5 + $0x1160] sm:$0xff]  ;;  %v1634_v21 = vld [vmem:[%s11040_s5 + $0x2998] sm:$0xff] }
 0x153   :  { %2441 = vmatpush.msrb.mxu0 %v684_v62  ;;  %2461 = vmatpush.msrb.mxu1 %v1084_v63  ;;  %v2038_v13 = vpop.f32.mrf.mxu3  ;;  %v2019_v35 = vadd.f32 %v2018_v7, %v1999_v28  ;;  %v1334_v62 = vld [vmem:[%s11040_s5 + $0x2038] sm:$0xff]  ;;  %v409_v7 = vld [vmem:[%s11040_s5 + $0x350] sm:$0xff] }
 0x154   :  { %2414 = vmatpush.msra.mxu2 %v1158_v1  ;;  %2434 = vmatpush.msra.mxu3 %v1558_v2  ;;  %v1734_v63 = vld [vmem:[%s11040_s5 + $0x2cb8] sm:$0xff]  ;;  %v1309_v2 = vld [vmem:[%s11040_s5 + $0x1f70] sm:$0xff] }
 0x155   :  { %2442 = vmatpush.msrb.mxu0 %v659_v5  ;;  %2462 = vmatpush.msrb.mxu1 %v1059_v6  ;;  %v6502_v44 = vadd.f32 %v2038_v13, %v2019_v35  ;;  %v834_v1 = vld [vmem:[%s11040_s5 + $0x1098] sm:$0xff]  ;;  %v1259_v13 = vld [vmem:[%s11040_s5 + $0x1de0] sm:$0xff]  ;;  %v1209_v28 = vld [vmem:[%s11040_s5 + $0x1c50] sm:$0xff] }
 0x156   :  { %2415 = vmatpush.msra.mxu2 %v1133_v8  ;;  %2435 = vmatpush.msra.mxu3 %v1533_v9  ;;  %v809_v8 = vld [vmem:[%s11040_s5 + $0xfd0] sm:$0xff]  ;;  %v1284_v9 = vld [vmem:[%s11040_s5 + $0x1ea8] sm:$0xff] }
 0x157   :  { %2443 = vmatpush.msrb.mxu0 %v634_v57  ;;  %2463 = vmatpush.msrb.mxu1 %v1034_v11  ;;  %v3961_v46 = vsel %vm143_vm1, %v6502_v44, 0.0  ;;  %v384_v57 = vld [vmem:[%s11040_s5 + $0x288] sm:$0xff] }
 0x158   :  { %2416 = vmatpush.msra.mxu2 %v1108_v15  ;;  %2436 = vmatpush.msra.mxu3 %v1508_v17  ;;  %v3962_v6 = vrot.slane %v3961_v46, 4  ;;  %v784_v11 = vld [vmem:[%s11040_s5 + $0xf08] sm:$0xff]  ;;  %v1659_v15 = vld [vmem:[%s11040_s5 + $0x2a60] sm:$0xff] }
 0x159   :  { %2417 = vmatmul.f32.vlgmr.msra.gmra.mxu2 %v5648_v50  ;;  %2437 = vmatmul.f32.vlgmr.msra.gmra.mxu3 %v5653_v52 }
 0x15a   :  { %2444 = vmatpush.msrb.mxu0 %v609_v19  ;;  %2464 = vmatpush.msrb.mxu1 %v1009_v20  ;;  %v3963_v17 = vadd.f32 %v3962_v6, %v3961_v46  ;;  %v759_v19 = vld [vmem:[%s11040_s5 + $0xe40] sm:$0xff]  ;;  %v1234_v20 = vld [vmem:[%s11040_s5 + $0x1d18] sm:$0xff]  ;;  %v585_v6 = vld [vmem:[%s11040_s5 + $0x8d0] sm:$0xff] }
 0x15b   :  { %2481 = vmatpush.msrb.mxu2 %v1484_v22  ;;  %2501 = vmatpush.msrb.mxu3 %v1884_v23  ;;  %v334_v22 = vld [vmem:[%s11040_s5 + $0xf8] sm:$0xff] }
 0x15c   :  { %2445 = vmatpush.msrb.mxu0 %v584_v24  ;;  %2465 = vmatpush.msrb.mxu1 %v984_v25  ;;  %v2098_v36 = vpop.f32.mrf.mxu2  ;;  %v2118_v42 = vpop.f32.mrf.mxu3  ;;  %v734_v23 = vld [vmem:[%s11040_s5 + $0xd78] sm:$0xff]  ;;  %v1913_v24 = vperm.slane %v6402_v61, 2  ;;  %v3964_v31 = vrot.slane %v3963_v17, 2 }
 0x15d   :  { %2482 = vmatpush.msrb.mxu2 %v1459_v29  ;;  %2502 = vmatpush.msrb.mxu3 %v1859_v30  ;;  %v2099_v39 = vadd.f32 %v2098_v36, %v2079_v14  ;;  %v1609_v29 = vld [vmem:[%s11040_s5 + $0x28d0] sm:$0xff] }
 0x15e   :  { %2446 = vmatpush.msrb.mxu0 %v559_v26  ;;  %2466 = vmatpush.msrb.mxu1 %v959_v32  ;;  %v309_v14 = vld [vmem:[%s11040_s5 + $0x30] sm:$0xff]  ;;  %v1184_v32 = vld [vmem:[%s11040_s5 + $0x1b88] sm:$0xff] }
 0x15f   :  { %2483 = vmatpush.msrb.mxu2 %v1434_v27  ;;  %2503 = vmatpush.msrb.mxu3 %v1834_v33  ;;  %v6500_v56 = vadd.f32 %v2118_v42, %v2099_v39  ;;  %v709_v26 = vld [vmem:[%s11040_s5 + $0xcb0] sm:$0xff]  ;;  %v1584_v27 = vld [vmem:[%s11040_s5 + $0x2808] sm:$0xff]  ;;  %v1159_v39 = vld [vmem:[%s11040_s5 + $0x1ac0] sm:$0xff] }
 0x160   :  { %2447 = vmatpush.msrb.mxu0 %v534_v37  ;;  %2467 = vmatpush.msrb.mxu1 %v934_v38  ;;  %v685_v36 = vld [vmem:[%s11040_s5 + $0xbf0] sm:$0xff]  ;;  %v3965_v38 = vadd.f32 %v3964_v31, %v3963_v17  ;;  %v660_v42 = vld [vmem:[%s11040_s5 + $0xb28] sm:$0xff]  ;;  %v1835_v17 = vld [vmem:[%s11040_s5 + $0x2fe0] sm:$0xff] }
 0x161   :  { %2484 = vmatpush.msrb.mxu2 %v1409_v40  ;;  %2504 = vmatpush.msrb.mxu3 %v1809_v41  ;;  %v3968_v53 = vsel %vm143_vm1, %v6500_v56, 0.0  ;;  %v1085_v37 = vld [vmem:[%s11040_s5 + $0x1870] sm:$0xff]  ;;  %v1559_v40 = vld [vmem:[%s11040_s5 + $0x2740] sm:$0xff] }
 0x162   :  { %2448 = vmatpush.msrb.mxu0 %v509_v55  ;;  %2468 = vmatpush.msrb.mxu1 %v909_v43  ;;  %v3969_v59 = vrot.slane %v3968_v53, 4  ;;  %v1060_v55 = vld [vmem:[%s11040_s5 + $0x17a8] sm:$0xff]  ;;  %v1785_v31 = vld [vmem:[%s11040_s5 + $0x2e50] sm:$0xff] }
 0x163   :  { %2485 = vmatpush.msrb.mxu2 %v1384_v47  ;;  %2505 = vmatpush.msrb.mxu3 %v1784_v48  ;;  %v1134_v47 = vld [vmem:[%s11040_s5 + $0x19f8] sm:$0xff] }
 0x164   :  { %2449 = vmatpush.msrb.mxu0 %v484_v49  ;;  %2469 = vmatpush.msrb.mxu1 %v884_v51  ;;  %v3970_v5 = vadd.f32 %v3969_v59, %v3968_v53  ;;  %v1534_v48 = vld [vmem:[%s11040_s5 + $0x2678] sm:$0xff]  ;;  %v635_v51 = vld [vmem:[%s11040_s5 + $0xa60] sm:$0xff]  ;;  %v1109_v59 = vld [vmem:[%s11040_s5 + $0x1930] sm:$0xff] }
 0x165   :  { %2486 = vmatpush.msrb.mxu2 %v1359_v54  ;;  %2506 = vmatpush.msrb.mxu3 %v1759_v58  ;;  %v1035_v53 = vld [vmem:[%s11040_s5 + $0x16e0] sm:$0xff]  ;;  %v3966_v58 = vrot.slane %v3965_v38, 1 }
 0x166   :  { %2450 = vmatpush.msrb.mxu0 %v459_v60  ;;  %2470 = vmatpush.msrb.mxu1 %v859_v45  ;;  %v3971_v12 = vrot.slane %v3970_v5, 2  ;;  %v1509_v60 = vld [vmem:[%s11040_s5 + $0x25b0] sm:$0xff] }
 0x167   :  { %2487 = vmatpush.msrb.mxu2 %v1334_v62  ;;  %2507 = vmatpush.msrb.mxu3 %v1734_v63  ;;  %v610_v62 = vld [vmem:[%s11040_s5 + $0x998] sm:$0xff] }
 0x168   :  { %2451 = vmatpush.msrb.mxu0 %v434_v0  ;;  %2471 = vmatpush.msrb.mxu1 %v834_v1  ;;  %v3972_v25 = vadd.f32 %v3971_v12, %v3970_v5  ;;  %v1010_v63 = vld [vmem:[%s11040_s5 + $0x1618] sm:$0xff]  ;;  %v3967_v5 = vadd.f32 %v3966_v58, %v3965_v38  ;;  %v960_v12 = vld [vmem:[%s11040_s5 + $0x1488] sm:$0xff]  ;;  %v1285_v58 = vld [vmem:[%s11040_s5 + $0x1eb0] sm:$0xff] }
 0x169   :  { %2488 = vmatpush.msrb.mxu2 %v1309_v2  ;;  %2508 = vmatpush.msrb.mxu3 %v1709_v4  ;;  %v2138_v30 = vpop.f32.mrf.mxu0  ;;  %v2158_v41 = vpop.f32.mrf.mxu1  ;;  %v1485_v2 = vld [vmem:[%s11040_s5 + $0x24f0] sm:$0xff] }
 0x16a   :  { %2452 = vmatpush.msrb.mxu0 %v409_v7  ;;  %2472 = vmatpush.msrb.mxu1 %v809_v8  ;;  %v2139_v33 = vadd.f32 %v2138_v30, %v1913_v24  ;;  %v3973_v35 = vrot.slane %v3972_v25, 1  ;;  %v1885_v4 = vld [vmem:[%s11040_s5 + $0x3170] sm:$0xff]  ;;  %v510_v24 = vld [vmem:[%s11040_s5 + $0x678] sm:$0xff] }
 0x16b   :  { %2489 = vmatpush.msrb.mxu2 %v1284_v9  ;;  %2509 = vmatpush.msrb.mxu3 %v1684_v10  ;;  %v985_v7 = vld [vmem:[%s11040_s5 + $0x1550] sm:$0xff]  ;;  %v1460_v9 = vld [vmem:[%s11040_s5 + $0x2428] sm:$0xff] }
 0x16c   :  { %2453 = vmatpush.msrb.mxu0 %v384_v57  ;;  %2473 = vmatpush.msrb.mxu1 %v784_v11  ;;  %v2159_v43 = vadd.f32 %v2158_v41, %v2139_v33  ;;  %v3974_v49 = vadd.f32 %v3973_v35, %v3972_v25  ;;  %v1860_v10 = vld [vmem:[%s11040_s5 + $0x30a8] sm:$0xff]  ;;  %v910_v25 = vld [vmem:[%s11040_s5 + $0x12f8] sm:$0xff]  ;;  %v1385_v30 = vld [vmem:[%s11040_s5 + $0x21d0] sm:$0xff] }
 0x16d   :  { %2490 = vmatpush.msrb.mxu2 %v1259_v13  ;;  %2510 = vmatpush.msrb.mxu3 %v1659_v15  ;;  %v560_v11 = vld [vmem:[%s11040_s5 + $0x808] sm:$0xff]  ;;  %v1435_v15 = vld [vmem:[%s11040_s5 + $0x2360] sm:$0xff] }
 0x16e   :  { %2454 = vmatpush.msrb.mxu0 %v359_v18  ;;  %2474 = vmatpush.msrb.mxu1 %v759_v19  ;;  %v4138_v1 = vmul.f32 %v3974_v49, %v5427_v3  ;;  %v4137_v19 = vmul.f32 %v3967_v5, %v5427_v3  ;;  %v1360_v33 = vld [vmem:[%s11040_s5 + $0x2108] sm:$0xff] }
 0x16f   :  { %2491 = vmatpush.msrb.mxu2 %v1234_v20  ;;  %2511 = vmatpush.msrb.mxu3 %v1634_v21  ;;  %v935_v20 = vld [vmem:[%s11040_s5 + $0x13c0] sm:$0xff]  ;;  %v1410_v21 = vld [vmem:[%s11040_s5 + $0x2298] sm:$0xff]  ;;  %v460_v35 = vld [vmem:[%s11040_s5 + $0x4e8] sm:$0xff] }
 0x170   :  { %2455 = vmatpush.msrb.mxu0 %v334_v22  ;;  %2475 = vmatpush.msrb.mxu1 %v734_v23  ;;  %v6687_v13 = vsub.f32 %v6500_v56, %v4138_v1  ;;  %v535_v56 = vld [vmem:[%s11040_s5 + $0x740] sm:$0xff]  ;;  %v1810_v22 = vld [vmem:[%s11040_s5 + $0x2f18] sm:$0xff] }
 0x171   :  { %2492 = vmatpush.msrb.mxu2 %v1209_v28  ;;  %2512 = vmatpush.msrb.mxu3 %v1609_v29 }
 0x172   :  { %2456 = vmatpush.msrb.mxu0 %v309_v14  ;;  %2476 = vmatpush.msrb.mxu1 %v709_v26  ;;  %v4188_v28 = vmul.f32 %v6687_v13, %v6687_v13  ;;  %v6723_v14 = vsub.f32 %v6502_v44, %v4137_v19  ;;  %v485_v26 = vld [vmem:[%s11040_s5 + $0x5b0] sm:$0xff]  ;;  %v1760_v44 = vld [vmem:[%s11040_s5 + $0x2d88] sm:$0xff] }
 0x173   :  { %2493 = vmatpush.msrb.mxu2 %v1184_v32  ;;  %2513 = vmatpush.msrb.mxu3 %v1584_v27  ;;  %v885_v32 = vld [vmem:[%s11040_s5 + $0x1230] sm:$0xff] }
 0x174   :  { %2457 = vmatmul.f32.vlgmr.msrb.gmra.mxu0 %v5619_v16  ;;  %2477 = vmatmul.f32.vlgmr.msrb.gmra.mxu1 %v5624_v34  ;;  %v4187_v41 = vmul.f32 %v6723_v14, %v6723_v14 }
 0x175   :  { %2521 = vmatpush.msra.mxu0 %v685_v36  ;;  %2541 = vmatpush.msra.mxu1 %v1085_v37  ;;  %v860_v36 = vld [vmem:[%s11040_s5 + $0x1168] sm:$0xff]  ;;  %v4219_v37 = vsel %vm143_vm1, %v4188_v28, 0.0  ;;  %v1086_v28 = vld [vmem:[%s11040_s5 + $0x1878] sm:$0xff] }
 0x176   :  { %2494 = vmatpush.msrb.mxu2 %v1159_v39  ;;  %2514 = vmatpush.msrb.mxu3 %v1559_v40  ;;  %v2178_v54 = vpop.f32.mrf.mxu2  ;;  %v2198_v46 = vpop.f32.mrf.mxu3  ;;  %v1335_v39 = vld [vmem:[%s11040_s5 + $0x2040] sm:$0xff]  ;;  %v4220_v49 = vrot.slane %v4219_v37, 4 }
 0x177   :  { %2522 = vmatpush.msra.mxu0 %v660_v42  ;;  %2542 = vmatpush.msra.mxu1 %v1060_v55  ;;  %v2179_v45 = vadd.f32 %v2178_v54, %v2159_v43  ;;  %v1735_v40 = vld [vmem:[%s11040_s5 + $0x2cc0] sm:$0xff] }
 0x178   :  { %2495 = vmatpush.msrb.mxu2 %v1134_v47  ;;  %2515 = vmatpush.msrb.mxu3 %v1534_v48  ;;  %v435_v42 = vld [vmem:[%s11040_s5 + $0x420] sm:$0xff]  ;;  %v1310_v47 = vld [vmem:[%s11040_s5 + $0x1f78] sm:$0xff]  ;;  %v4221_v1 = vadd.f32 %v4220_v49, %v4219_v37 }
 0x179   :  { %2523 = vmatpush.msra.mxu0 %v635_v51  ;;  %2543 = vmatpush.msra.mxu1 %v1035_v53  ;;  %v6655_v0 = vadd.f32 %v2198_v46, %v2179_v45  ;;  %v835_v55 = vld [vmem:[%s11040_s5 + $0x10a0] sm:$0xff]  ;;  %v1710_v48 = vld [vmem:[%s11040_s5 + $0x2bf8] sm:$0xff]  ;;  %v385_v45 = vld [vmem:[%s11040_s5 + $0x290] sm:$0xff] }
 0x17a   :  { %2496 = vmatpush.msrb.mxu2 %v1109_v59  ;;  %2516 = vmatpush.msrb.mxu3 %v1509_v60  ;;  %v410_v51 = vld [vmem:[%s11040_s5 + $0x358] sm:$0xff]  ;;  %v1685_v59 = vld [vmem:[%s11040_s5 + $0x2b30] sm:$0xff]  ;;  %v4212_v60 = vsel %vm143_vm1, %v4187_v41, 0.0  ;;  %v1535_v37 = vld [vmem:[%s11040_s5 + $0x2680] sm:$0xff] }
 0x17b   :  { %2497 = vmatmul.f32.vlgmr.msrb.gmra.mxu2 %v5648_v50  ;;  %2517 = vmatmul.f32.vlgmr.msrb.gmra.mxu3 %v5653_v52  ;;  %v3975_v8 = vsel %vm143_vm1, %v6655_v0, 0.0  ;;  %v810_v53 = vld [vmem:[%s11040_s5 + $0xfd8] sm:$0xff]  ;;  %v785_v46 = vld [vmem:[%s11040_s5 + $0xf10] sm:$0xff]  ;;  %v4213_v5 = vrot.slane %v4212_v60, 4 }
 0x17c   :  { %2524 = vmatpush.msra.mxu0 %v610_v62  ;;  %2544 = vmatpush.msra.mxu1 %v1010_v63  ;;  %v3976_v57 = vrot.slane %v3975_v8, 4  ;;  %v1260_v63 = vld [vmem:[%s11040_s5 + $0x1de8] sm:$0xff] }
 0x17d   :  { %2561 = vmatpush.msra.mxu2 %v1485_v2  ;;  %2581 = vmatpush.msra.mxu3 %v1885_v4  ;;  %v360_v2 = vld [vmem:[%s11040_s5 + $0x1c8] sm:$0xff] }
 0x17e   :  { %2525 = vmatpush.msra.mxu0 %v585_v6  ;;  %2545 = vmatpush.msra.mxu1 %v985_v7  ;;  %v3977_v18 = vadd.f32 %v3976_v57, %v3975_v8  ;;  %v760_v4 = vld [vmem:[%s11040_s5 + $0xe48] sm:$0xff]  ;;  %v1235_v7 = vld [vmem:[%s11040_s5 + $0x1d20] sm:$0xff] }
 0x17f   :  { %2562 = vmatpush.msra.mxu2 %v1460_v9  ;;  %2582 = vmatpush.msra.mxu3 %v1860_v10  ;;  %v1635_v8 = vld [vmem:[%s11040_s5 + $0x29a0] sm:$0xff] }
 0x180   :  { %2526 = vmatpush.msra.mxu0 %v560_v11  ;;  %2546 = vmatpush.msra.mxu1 %v960_v12  ;;  %v3978_v23 = vrot.slane %v3977_v18, 2  ;;  %v335_v10 = vld [vmem:[%s11040_s5 + $0x100] sm:$0xff]  ;;  %v1914_v11 = vperm.slane %v6402_v61, 3  ;;  %v1210_v12 = vld [vmem:[%s11040_s5 + $0x1c58] sm:$0xff] }
 0x181   :  { %2563 = vmatpush.msra.mxu2 %v1435_v15  ;;  %2583 = vmatpush.msra.mxu3 %v1835_v17  ;;  %v735_v57 = vld [vmem:[%s11040_s5 + $0xd80] sm:$0xff]  ;;  %v1610_v15 = vld [vmem:[%s11040_s5 + $0x28d8] sm:$0xff] }
 0x182   :  { %2527 = vmatpush.msra.mxu0 %v535_v56  ;;  %2547 = vmatpush.msra.mxu1 %v935_v20  ;;  %v3979_v29 = vadd.f32 %v3978_v23, %v3977_v18  ;;  %v4222_v18 = vrot.slane %v4221_v1, 2  ;;  %v310_v56 = vld [vmem:[%s11040_s5 + $0x38] sm:$0xff]  ;;  %v4214_v20 = vadd.f32 %v4213_v5, %v4212_v60 }
 0x183   :  { %2564 = vmatpush.msra.mxu2 %v1410_v21  ;;  %2584 = vmatpush.msra.mxu3 %v1810_v22  ;;  %v710_v61 = vld [vmem:[%s11040_s5 + $0xcb8] sm:$0xff]  ;;  %v1185_v21 = vld [vmem:[%s11040_s5 + $0x1b90] sm:$0xff] }
 0x184   :  { %v3980_v27 = vrot.slane %v3979_v29, 1  ;;  %2528 = vmatpush.msra.mxu0 %v510_v24  ;;  %2548 = vmatpush.msra.mxu1 %v910_v25  ;;  %v1585_v22 = vld [vmem:[%s11040_s5 + $0x2810] sm:$0xff]  ;;  %v686_v25 = vld [vmem:[%s11040_s5 + $0xbf8] sm:$0xff] }
 0x185   :  { %2565 = vmatpush.msra.mxu2 %v1385_v30  ;;  %2585 = vmatpush.msra.mxu3 %v1785_v31  ;;  %v1160_v30 = vld [vmem:[%s11040_s5 + $0x1ac8] sm:$0xff]  ;;  %v1886_v60 = vld [vmem:[%s11040_s5 + $0x3178] sm:$0xff] }
 0x186   :  { %v3981_v38 = vadd.f32 %v3980_v27, %v3979_v29  ;;  %2529 = vmatpush.msra.mxu0 %v485_v26  ;;  %2549 = vmatpush.msra.mxu1 %v885_v32  ;;  %v4223_v29 = vadd.f32 %v4222_v18, %v4221_v1  ;;  %v1560_v31 = vld [vmem:[%s11040_s5 + $0x2748] sm:$0xff]  ;;  %v4215_v26 = vrot.slane %v4214_v20, 2  ;;  %v661_v27 = vld [vmem:[%s11040_s5 + $0xb30] sm:$0xff]  ;;  %v1811_v18 = vld [vmem:[%s11040_s5 + $0x2f20] sm:$0xff] }
 0x187   :  { %2566 = vmatpush.msra.mxu2 %v1360_v33  ;;  %2586 = vmatpush.msra.mxu3 %v1760_v44  ;;  %v1061_v33 = vld [vmem:[%s11040_s5 + $0x17b0] sm:$0xff] }
 0x188   :  { %v4139_v43 = vmul.f32 %v3981_v38, %v5427_v3  ;;  %2530 = vmatpush.msra.mxu0 %v460_v35  ;;  %2550 = vmatpush.msra.mxu1 %v860_v36  ;;  %v1135_v36 = vld [vmem:[%s11040_s5 + $0x1a00] sm:$0xff]  ;;  %v636_v38 = vld [vmem:[%s11040_s5 + $0xa68] sm:$0xff]  ;;  %v4224_v41 = vrot.slane %v4223_v29, 1  ;;  %v1461_v1 = vld [vmem:[%s11040_s5 + $0x2430] sm:$0xff] }
 0x189   :  { %2567 = vmatpush.msra.mxu2 %v1335_v39  ;;  %2587 = vmatpush.msra.mxu3 %v1735_v40  ;;  %v1036_v39 = vld [vmem:[%s11040_s5 + $0x16e8] sm:$0xff] }
 0x18a   :  { %v6772_v54 = vsub.f32 %v6655_v0, %v4139_v43  ;;  %2531 = vmatpush.msra.mxu0 %v435_v42  ;;  %2551 = vmatpush.msra.mxu1 %v835_v55  ;;  %v1660_v0 = vld [vmem:[%s11040_s5 + $0x2a68] sm:$0xff]  ;;  %v1110_v42 = vld [vmem:[%s11040_s5 + $0x1938] sm:$0xff] }
 0x18b   :  { %2568 = vmatpush.msra.mxu2 %v1310_v47  ;;  %2588 = vmatpush.msra.mxu3 %v1710_v48  ;;  %v2218_v17 = vpop.f32.mrf.mxu0  ;;  %v2238_v32 = vpop.f32.mrf.mxu1  ;;  %v1510_v55 = vld [vmem:[%s11040_s5 + $0x25b8] sm:$0xff]  ;;  %v4216_v47 = vadd.f32 %v4215_v26, %v4214_v20  ;;  %v911_v20 = vld [vmem:[%s11040_s5 + $0x1300] sm:$0xff]  ;;  %v1761_v26 = vld [vmem:[%s11040_s5 + $0x2d90] sm:$0xff] }
 0x18c   :  { %v4189_v62 = vmul.f32 %v6772_v54, %v6772_v54  ;;  %2532 = vmatpush.msra.mxu0 %v410_v51  ;;  %2552 = vmatpush.msra.mxu1 %v810_v53  ;;  %v2219_v24 = vadd.f32 %v2218_v17, %v1914_v11  ;;  %v611_v51 = vld [vmem:[%s11040_s5 + $0x9a0] sm:$0xff]  ;;  %v536_v11 = vld [vmem:[%s11040_s5 + $0x748] sm:$0xff] }
 0x18d   :  { %2569 = vmatpush.msra.mxu2 %v1285_v58  ;;  %2589 = vmatpush.msra.mxu3 %v1685_v59  ;;  %v1011_v53 = vld [vmem:[%s11040_s5 + $0x1620] sm:$0xff]  ;;  %v1486_v59 = vld [vmem:[%s11040_s5 + $0x24f8] sm:$0xff] }
 0x18e   :  { %v4226_v6 = vsel %vm143_vm1, %v4189_v62, 0.0  ;;  %2533 = vmatpush.msra.mxu0 %v385_v45  ;;  %2553 = vmatpush.msra.mxu1 %v785_v46  ;;  %v2239_v35 = vadd.f32 %v2238_v32, %v2219_v24  ;;  %v4225_v45 = vadd.f32 %v4224_v41, %v4223_v29  ;;  %v586_v46 = vld [vmem:[%s11040_s5 + $0x8d8] sm:$0xff]  ;;  %v1411_v17 = vld [vmem:[%s11040_s5 + $0x22a0] sm:$0xff] }
 0x18f   :  { %v4227_v9 = vrot.slane %v4226_v6, 4  ;;  %2570 = vmatpush.msra.mxu2 %v1260_v63  ;;  %2590 = vmatpush.msra.mxu3 %v1660_v0  ;;  %v986_v62 = vld [vmem:[%s11040_s5 + $0x1558] sm:$0xff]  ;;  %v4217_v0 = vrot.slane %v4216_v47, 1  ;;  %v1311_v41 = vld [vmem:[%s11040_s5 + $0x1f80] sm:$0xff] }
 0x190   :  { %2534 = vmatpush.msra.mxu0 %v360_v2  ;;  %2554 = vmatpush.msra.mxu1 %v760_v4  ;;  %v1861_v2 = vld [vmem:[%s11040_s5 + $0x30b0] sm:$0xff] }
 0x191   :  { %v4228_v19 = vadd.f32 %v4227_v9, %v4226_v6  ;;  %2571 = vmatpush.msra.mxu2 %v1235_v7  ;;  %2591 = vmatpush.msra.mxu3 %v1635_v8  ;;  %v561_v6 = vld [vmem:[%s11040_s5 + $0x810] sm:$0xff]  ;;  %v1436_v8 = vld [vmem:[%s11040_s5 + $0x2368] sm:$0xff] }
 0x192   :  { %2535 = vmatpush.msra.mxu0 %v335_v10  ;;  %2555 = vmatpush.msra.mxu1 %v735_v57  ;;  %v961_v7 = vld [vmem:[%s11040_s5 + $0x1490] sm:$0xff]  ;;  %v1836_v9 = vld [vmem:[%s11040_s5 + $0x2fe8] sm:$0xff]  ;;  %v4388_v57 = vmul.f32 %v4225_v45, %v5427_v3 }
 0x193   :  { %v4229_v23 = vrot.slane %v4228_v19, 2  ;;  %2572 = vmatpush.msra.mxu2 %v1210_v12  ;;  %2592 = vmatpush.msra.mxu3 %v1610_v15  ;;  %v936_v12 = vld [vmem:[%s11040_s5 + $0x13c8] sm:$0xff]  ;;  %v4218_v15 = vadd.f32 %v4217_v0, %v4216_v47 }
 0x194   :  { %2536 = vmatpush.msra.mxu0 %v310_v56  ;;  %2556 = vmatpush.msra.mxu1 %v710_v61  ;;  %v511_v61 = vld [vmem:[%s11040_s5 + $0x680] sm:$0xff]  ;;  %v6939_v24 = vadd.f32 1e-05, %v4388_v57  ;;  %v1236_v0 = vld [vmem:[%s11040_s5 + $0x1d28] sm:$0xff] }
 0x195   :  { %2573 = vmatpush.msra.mxu2 %v1185_v21  ;;  %2593 = vmatpush.msra.mxu3 %v1585_v22  ;;  %v4230_v44 = vadd.f32 %v4229_v23, %v4228_v19  ;;  %v1386_v22 = vld [vmem:[%s11040_s5 + $0x21d8] sm:$0xff]  ;;  %v4387_v29 = vmul.f32 %v4218_v15, %v5427_v3  ;;  %v311_v57 = vld [vmem:[%s11040_s5 + $0x40] sm:$0xff] }
 0x196   :  { %2537 = vmatmul.f32.vlgmr.msra.gmra.mxu0 %v5619_v16  ;;  %2557 = vmatmul.f32.vlgmr.msra.gmra.mxu1 %v5624_v34  ;;  %v1786_v23 = vld [vmem:[%s11040_s5 + $0x2e58] sm:$0xff]  ;;  %5000 = vrsqrt.f32 %v6939_v24  ;;  %vm4453_vm0 = vweird.f32 %v6939_v24 }
 0x197   :  { %2601 = vmatpush.msrb.mxu0 %v686_v25  ;;  %2621 = vmatpush.msrb.mxu1 %v1086_v28  ;;  %v4231_v49 = vrot.slane %v4230_v44, 1  ;;  %v486_v25 = vld [vmem:[%s11040_s5 + $0x5b8] sm:$0xff] }
 0x198   :  { %2574 = vmatpush.msra.mxu2 %v1160_v30  ;;  %2594 = vmatpush.msra.mxu3 %v1560_v31  ;;  %v2258_v40 = vpop.f32.mrf.mxu2  ;;  %v2278_v48 = vpop.f32.mrf.mxu3  ;;  %v886_v28 = vld [vmem:[%s11040_s5 + $0x1238] sm:$0xff]  ;;  %v1361_v31 = vld [vmem:[%s11040_s5 + $0x2110] sm:$0xff] }
 0x199   :  { %2602 = vmatpush.msrb.mxu0 %v661_v27  ;;  %2622 = vmatpush.msrb.mxu1 %v1061_v33  ;;  %v2259_v43 = vadd.f32 %v2258_v40, %v2239_v35  ;;  %v4232_v5 = vadd.f32 %v4231_v49, %v4230_v44  ;;  %v461_v27 = vld [vmem:[%s11040_s5 + $0x4f0] sm:$0xff]  ;;  %v1336_v35 = vld [vmem:[%s11040_s5 + $0x2048] sm:$0xff]  ;;  %v1686_v49 = vld [vmem:[%s11040_s5 + $0x2b38] sm:$0xff] }
 0x19a   :  { %2575 = vmatpush.msra.mxu2 %v1135_v36  ;;  %2595 = vmatpush.msra.mxu3 %v1535_v37  ;;  %v861_v33 = vld [vmem:[%s11040_s5 + $0x1170] sm:$0xff]  ;;  %v1736_v36 = vld [vmem:[%s11040_s5 + $0x2cc8] sm:$0xff] }
 0x19b   :  { %2603 = vmatpush.msrb.mxu0 %v636_v38  ;;  %2623 = vmatpush.msrb.mxu1 %v1036_v39  ;;  %v6877_v58 = vadd.f32 %v2278_v48, %v2259_v43  ;;  %v4389_v56 = vmul.f32 %v4232_v5, %v5427_v3  ;;  %v436_v37 = vld [vmem:[%s11040_s5 + $0x428] sm:$0xff]  ;;  %v6975_v39 = vadd.f32 1e-05, %v4387_v29  ;;  %v811_v43 = vld [vmem:[%s11040_s5 + $0xfe0] sm:$0xff]  ;;  %v1286_v48 = vld [vmem:[%s11040_s5 + $0x1eb8] sm:$0xff] }
 0x19c   :  { %2576 = vmatpush.msra.mxu2 %v1110_v42  ;;  %2596 = vmatpush.msra.mxu3 %v1510_v55  ;;  %v836_v38 = vld [vmem:[%s11040_s5 + $0x10a8] sm:$0xff]  ;;  %v1711_v42 = vld [vmem:[%s11040_s5 + $0x2c00] sm:$0xff]  ;;  %v7015_v45 = vpop.eup %5000  ;;  %v662_v29 = vld [vmem:[%s11040_s5 + $0xb38] sm:$0xff] }
 0x19d   :  { %2577 = vmatmul.f32.vlgmr.msra.gmra.mxu2 %v5648_v50  ;;  %2597 = vmatmul.f32.vlgmr.msra.gmra.mxu3 %v5653_v52  ;;  %v3982_v63 = vsel %vm143_vm1, %v6877_v58, 0.0  ;;  %v6954_v32 = vadd.f32 1e-05, %v4389_v56  ;;  %v411_v55 = vld [vmem:[%s11040_s5 + $0x360] sm:$0xff]  ;;  %v336_v5 = vld [vmem:[%s11040_s5 + $0x108] sm:$0xff]  ;;  %vm4454_vm15 = vweird.f32 %v7015_v45  ;;  %vm4443_vm7 = vweird.f32 %v6975_v39 }
 0x19e   :  { %2604 = vmatpush.msrb.mxu0 %v611_v51  ;;  %2624 = vmatpush.msrb.mxu1 %v1011_v53  ;;  %v3983_v4 = vrot.slane %v3982_v63, 4  ;;  %v386_v51 = vld [vmem:[%s11040_s5 + $0x298] sm:$0xff]  ;;  %vm7166_vm3 = vmor %vm4453_vm0, %vm4454_vm15 }
 0x19f   :  { %2641 = vmatpush.msrb.mxu2 %v1486_v59  ;;  %2661 = vmatpush.msrb.mxu3 %v1886_v60  ;;  %5002 = vrsqrt.f32 %v6954_v32  ;;  %v786_v53 = vld [vmem:[%s11040_s5 + $0xf18] sm:$0xff]  ;;  %v1261_v59 = vld [vmem:[%s11040_s5 + $0x1df0] sm:$0xff]  ;;  %vm4463_vm4 = vweird.f32 %v6954_v32 }
 0x1a0   :  { %2605 = vmatpush.msrb.mxu0 %v586_v46  ;;  %2625 = vmatpush.msrb.mxu1 %v986_v62  ;;  %v3984_v10 = vadd.f32 %v3983_v4, %v3982_v63  ;;  %5004 = vrsqrt.f32 %v6975_v39  ;;  %v1661_v60 = vld [vmem:[%s11040_s5 + $0x2a70] sm:$0xff] }
 0x1a1   :  { %2642 = vmatpush.msrb.mxu2 %v1461_v1  ;;  %2662 = vmatpush.msrb.mxu3 %v1861_v2  ;;  %v361_v46 = vld [vmem:[%s11040_s5 + $0x1d0] sm:$0xff]  ;;  %v1636_v1 = vld [vmem:[%s11040_s5 + $0x29a8] sm:$0xff] }
 0x1a2   :  { %2606 = vmatpush.msrb.mxu0 %v561_v6  ;;  %2626 = vmatpush.msrb.mxu1 %v961_v7  ;;  %v3985_v19 = vrot.slane %v3984_v10, 2  ;;  %v761_v62 = vld [vmem:[%s11040_s5 + $0xe50] sm:$0xff]  ;;  %v736_v6 = vld [vmem:[%s11040_s5 + $0xd88] sm:$0xff]  ;;  %v4448_v7 = vmul.f32 %v7015_v45, %v6939_v24 }
 0x1a3   :  { %2643 = vmatpush.msrb.mxu2 %v1436_v8  ;;  %2663 = vmatpush.msrb.mxu3 %v1836_v9  ;;  %v1211_v8 = vld [vmem:[%s11040_s5 + $0x1c60] sm:$0xff]  ;;  %v512_v24 = vld [vmem:[%s11040_s5 + $0x688] sm:$0xff] }
 0x1a4   :  { %2607 = vmatpush.msrb.mxu0 %v536_v11  ;;  %2627 = vmatpush.msrb.mxu1 %v936_v12  ;;  %v3986_v21 = vadd.f32 %v3985_v19, %v3984_v10  ;;  %v1611_v9 = vld [vmem:[%s11040_s5 + $0x28e0] sm:$0xff]  ;;  %v4449_v56 = vmul.f32 %v7015_v45, %v4448_v7 }
 0x1a5   :  { %2644 = vmatpush.msrb.mxu2 %v1411_v17  ;;  %2664 = vmatpush.msrb.mxu3 %v1811_v18  ;;  %v7030_v2 = vpop.eup %5002  ;;  %v711_v11 = vld [vmem:[%s11040_s5 + $0xcc0] sm:$0xff]  ;;  %v1186_v17 = vld [vmem:[%s11040_s5 + $0x1b98] sm:$0xff] }
 0x1a6   :  { %v3987_v30 = vrot.slane %v3986_v21, 1  ;;  %2608 = vmatpush.msrb.mxu0 %v511_v61  ;;  %2628 = vmatpush.msrb.mxu1 %v911_v20  ;;  %v7052_v12 = vpop.eup %5004  ;;  %v4458_v15 = vmul.f32 %v7030_v2, %v6954_v32  ;;  %v1586_v18 = vld [vmem:[%s11040_s5 + $0x2818] sm:$0xff]  ;;  %v687_v61 = vld [vmem:[%s11040_s5 + $0xc00] sm:$0xff]  ;;  %vm4464_vm2 = vweird.f32 %v7030_v2  ;;  %v1612_v32 = vld [vmem:[%s11040_s5 + $0x28e8] sm:$0xff] }
 0x1a7   :  { %2645 = vmatpush.msrb.mxu2 %v1386_v22  ;;  %2665 = vmatpush.msrb.mxu3 %v1786_v23  ;;  %v1087_v20 = vld [vmem:[%s11040_s5 + $0x1880] sm:$0xff]  ;;  %v1161_v23 = vld [vmem:[%s11040_s5 + $0x1ad0] sm:$0xff]  ;;  %vm4444_vm5 = vweird.f32 %v7052_v12  ;;  %vm7192_vm6 = vmor %vm4463_vm4, %vm4464_vm2 }
 0x1a8   :  { %v3988_v44 = vadd.f32 %v3987_v30, %v3986_v21  ;;  %2609 = vmatpush.msrb.mxu0 %v486_v25  ;;  %2629 = vmatpush.msrb.mxu1 %v886_v28  ;;  %v4438_v21 = vmul.f32 %v7052_v12, %v6975_v39  ;;  %v1561_v25 = vld [vmem:[%s11040_s5 + $0x2750] sm:$0xff]  ;;  %v4459_v28 = vmul.f32 %v7030_v2, %v4458_v15  ;;  %v1062_v30 = vld [vmem:[%s11040_s5 + $0x17b8] sm:$0xff]  ;;  %vm7229_vm8 = vmor %vm4443_vm7, %vm4444_vm5 }
 0x1a9   :  { %2646 = vmatpush.msrb.mxu2 %v1361_v31  ;;  %2666 = vmatpush.msrb.mxu3 %v1761_v26  ;;  %v1136_v26 = vld [vmem:[%s11040_s5 + $0x1a08] sm:$0xff]  ;;  %v1337_v39 = vld [vmem:[%s11040_s5 + $0x2050] sm:$0xff] }
 0x1aa   :  { %v4140_v40 = vmul.f32 %v3988_v44, %v5427_v3  ;;  %2610 = vmatpush.msrb.mxu0 %v461_v27  ;;  %2630 = vmatpush.msrb.mxu1 %v861_v33  ;;  %v1536_v27 = vld [vmem:[%s11040_s5 + $0x2688] sm:$0xff]  ;;  %v4450_v33 = vmul.f32 0.5, %v4449_v56  ;;  %v637_v44 = vld [vmem:[%s11040_s5 + $0xa70] sm:$0xff]  ;;  %v1787_v56 = vld [vmem:[%s11040_s5 + $0x2e60] sm:$0xff] }
 0x1ab   :  { %2647 = vmatpush.msrb.mxu2 %v1336_v35  ;;  %2667 = vmatpush.msrb.mxu3 %v1736_v36  ;;  %v1037_v35 = vld [vmem:[%s11040_s5 + $0x16f0] sm:$0xff]  ;;  %v4439_v36 = vmul.f32 %v7052_v12, %v4438_v21  ;;  %v887_v21 = vld [vmem:[%s11040_s5 + $0x1240] sm:$0xff] }
 0x1ac   :  { %v6992_v47 = vsub.f32 %v6877_v58, %v4140_v40  ;;  %2611 = vmatpush.msrb.mxu0 %v436_v37  ;;  %2631 = vmatpush.msrb.mxu1 %v836_v38  ;;  %v1111_v38 = vld [vmem:[%s11040_s5 + $0x1940] sm:$0xff]  ;;  %v1637_v15 = vld [vmem:[%s11040_s5 + $0x29b0] sm:$0xff] }
 0x1ad   :  { %2648 = vmatpush.msrb.mxu2 %v1311_v41  ;;  %2668 = vmatpush.msrb.mxu3 %v1711_v42  ;;  %v1511_v40 = vld [vmem:[%s11040_s5 + $0x25c0] sm:$0xff]  ;;  %v4460_v41 = vmul.f32 0.5, %v4459_v28  ;;  %v1362_v28 = vld [vmem:[%s11040_s5 + $0x2118] sm:$0xff] }
 0x1ae   :  { %v4190_v58 = vmul.f32 %v6992_v47, %v6992_v47  ;;  %2612 = vmatpush.msrb.mxu0 %v411_v55  ;;  %2632 = vmatpush.msrb.mxu1 %v811_v43  ;;  %v612_v55 = vld [vmem:[%s11040_s5 + $0x9a8] sm:$0xff] }
 0x1af   :  { %2649 = vmatpush.msrb.mxu2 %v1286_v48  ;;  %2669 = vmatpush.msrb.mxu3 %v1686_v49  ;;  %v1012_v43 = vld [vmem:[%s11040_s5 + $0x1628] sm:$0xff]  ;;  %v4451_v48 = vsub.f32 1.5, %v4450_v33  ;;  %v1487_v49 = vld [vmem:[%s11040_s5 + $0x2500] sm:$0xff]  ;;  %v1737_v33 = vld [vmem:[%s11040_s5 + $0x2cd0] sm:$0xff] }
 0x1b0   :  { %v4233_v63 = vsel %vm143_vm1, %v4190_v58, 0.0  ;;  %2613 = vmatpush.msrb.mxu0 %v386_v51  ;;  %2633 = vmatpush.msrb.mxu1 %v786_v53  ;;  %v1887_v51 = vld [vmem:[%s11040_s5 + $0x3180] sm:$0xff]  ;;  %v4440_v53 = vmul.f32 0.5, %v4439_v36 }
 0x1b1   :  { %v4234_v4 = vrot.slane %v4233_v63, 4  ;;  %2650 = vmatpush.msrb.mxu2 %v1261_v59  ;;  %2670 = vmatpush.msrb.mxu3 %v1661_v60  ;;  %v587_v59 = vld [vmem:[%s11040_s5 + $0x8e0] sm:$0xff] }
 0x1b2   :  { %2614 = vmatpush.msrb.mxu0 %v361_v46  ;;  %2634 = vmatpush.msrb.mxu1 %v761_v62  ;;  %v987_v60 = vld [vmem:[%s11040_s5 + $0x1560] sm:$0xff]  ;;  %v4461_v46 = vsub.f32 1.5, %v4460_v41  ;;  %v1462_v62 = vld [vmem:[%s11040_s5 + $0x2438] sm:$0xff]  ;;  %v4441_v7 = vsub.f32 1.5, %v4440_v53  ;;  %v1712_v41 = vld [vmem:[%s11040_s5 + $0x2c08] sm:$0xff] }
 0x1b3   :  { %v4235_v10 = vadd.f32 %v4234_v4, %v4233_v63  ;;  %2651 = vmatpush.msrb.mxu2 %v1236_v0  ;;  %2671 = vmatpush.msrb.mxu3 %v1636_v1  ;;  %v1862_v63 = vld [vmem:[%s11040_s5 + $0x30b8] sm:$0xff]  ;;  %v4452_v4 = vmul.f32 %v7015_v45, %v4451_v48  ;;  %v812_v48 = vld [vmem:[%s11040_s5 + $0xfe8] sm:$0xff] }
 0x1b4   :  { %2615 = vmatpush.msrb.mxu0 %v336_v5  ;;  %2635 = vmatpush.msrb.mxu1 %v736_v6  ;;  %v562_v0 = vld [vmem:[%s11040_s5 + $0x818] sm:$0xff]  ;;  %v1437_v5 = vld [vmem:[%s11040_s5 + $0x2370] sm:$0xff] }
 0x1b5   :  { %v4236_v19 = vrot.slane %v4235_v10, 2  ;;  %2652 = vmatpush.msrb.mxu2 %v1211_v8  ;;  %2672 = vmatpush.msrb.mxu3 %v1611_v9  ;;  %v962_v1 = vld [vmem:[%s11040_s5 + $0x1498] sm:$0xff]  ;;  %v1837_v6 = vld [vmem:[%s11040_s5 + $0x2ff0] sm:$0xff] }
 0x1b6   :  { %2616 = vmatpush.msrb.mxu0 %v311_v57  ;;  %2636 = vmatpush.msrb.mxu1 %v711_v11  ;;  %v537_v8 = vld [vmem:[%s11040_s5 + $0x750] sm:$0xff]  ;;  %v1412_v57 = vld [vmem:[%s11040_s5 + $0x22a8] sm:$0xff] }
 0x1b7   :  { %v4237_v22 = vadd.f32 %v4236_v19, %v4235_v10  ;;  %2653 = vmatpush.msrb.mxu2 %v1186_v17  ;;  %2673 = vmatpush.msrb.mxu3 %v1586_v18  ;;  %v937_v9 = vld [vmem:[%s11040_s5 + $0x13d0] sm:$0xff]  ;;  %v4462_v10 = vmul.f32 %v7030_v2, %v4461_v46  ;;  %v1812_v11 = vld [vmem:[%s11040_s5 + $0x2f28] sm:$0xff]  ;;  %v4456_v18 = vsel %vm7166_vm3, %v7015_v45, %v4452_v4  ;;  %v1387_v19 = vld [vmem:[%s11040_s5 + $0x21e0] sm:$0xff] }
 0x1b8   :  { %2617 = vmatmul.f32.vlgmr.msrb.gmra.mxu0 %v5619_v16  ;;  %2637 = vmatmul.f32.vlgmr.msrb.gmra.mxu1 %v5624_v34  ;;  %v912_v17 = vld [vmem:[%s11040_s5 + $0x1308] sm:$0xff]  ;;  %v487_v45 = vld [vmem:[%s11040_s5 + $0x5c0] sm:$0xff]  ;;  %v1262_v4 = vld [vmem:[%s11040_s5 + $0x1df8] sm:$0xff] }
 0x1b9   :  { %v4238_v31 = vrot.slane %v4237_v22, 1  ;;  %2681 = vmatpush.msra.mxu0 %v687_v61  ;;  %2701 = vmatpush.msra.mxu1 %v1087_v20  ;;  %v4442_v20 = vmul.f32 %v7052_v12, %v4441_v7  ;;  %v1687_v46 = vld [vmem:[%s11040_s5 + $0x2b40] sm:$0xff] }
 0x1ba   :  { %2654 = vmatpush.msrb.mxu2 %v1161_v23  ;;  %2674 = vmatpush.msrb.mxu3 %v1561_v25  ;;  %v4466_v23 = vsel %vm7192_vm6, %v7030_v2, %v4462_v10  ;;  %v462_v2 = vld [vmem:[%s11040_s5 + $0x4f8] sm:$0xff] }
 0x1bb   :  { %v4239_v37 = vadd.f32 %v4238_v31, %v4237_v22  ;;  %2682 = vmatpush.msra.mxu0 %v662_v29  ;;  %2702 = vmatpush.msra.mxu1 %v1062_v30  ;;  %v7205_v22 = vld [vmem:[%s11045_s7] sm:$0xff]  ;;  %v1762_v29 = vld [vmem:[%s11040_s5 + $0x2d98] sm:$0xff]  ;;  %v4688_v30 = vmul.f32 %v4456_v18, %v6687_v13 }
 0x1bc   :  { %2655 = vmatpush.msrb.mxu2 %v1136_v26  ;;  %2675 = vmatpush.msrb.mxu3 %v1536_v27  ;;  %v4721_v31 = vperm.slane %v7205_v22, 1  ;;  %v862_v26 = vld [vmem:[%s11040_s5 + $0x1178] sm:$0xff]  ;;  %v4722_v36 = vperm.slane %v7205_v22, 2  ;;  %v4723_v7 = vperm.slane %v7205_v22, 3 }
 0x1bd   :  { %v4390_v42 = vmul.f32 %v4239_v37, %v5427_v3  ;;  %2683 = vmatpush.msra.mxu0 %v637_v44  ;;  %2703 = vmatpush.msra.mxu1 %v1037_v35  ;;  %v4446_v44 = vsel %vm7229_vm8, %v7052_v12, %v4442_v20  ;;  %v4689_v35 = vmul.f32 %v4466_v23, %v6772_v54  ;;  %v437_v37 = vld [vmem:[%s11040_s5 + $0x430] sm:$0xff]  ;;  %v1312_v54 = vld [vmem:[%s11040_s5 + $0x1f88] sm:$0xff]  ;;  %v7322_v20 = vpop.f32.mrf.mxu2 }
 0x1be   :  { %2656 = vmatpush.msrb.mxu2 %v1111_v38  ;;  %2676 = vmatpush.msrb.mxu3 %v1511_v40  ;;  %v837_v38 = vld [vmem:[%s11040_s5 + $0x10b0] sm:$0xff]  ;;  %v7254_v40 = vld [vmem:[%s11046_s8] sm:$0xff]  ;;  %v712_v23 = vld [vmem:[%s11040_s5 + $0xcc8] sm:$0xff] }
 0x1bf   :  { %v7118_v58 = vadd.f32 1e-05, %v4390_v42  ;;  %2657 = vmatmul.f32.vlgmr.msrb.gmra.mxu2 %v5648_v50  ;;  %2677 = vmatmul.f32.vlgmr.msrb.gmra.mxu3 %v5653_v52  ;;  %v4771_v42 = vmul.f32 %v4721_v31, %v4688_v30  ;;  %v4803_v10 = vperm.slane %v7254_v40, 0  ;;  %v4806_v18 = vperm.slane %v7254_v40, 3  ;;  %v1187_v30 = vld [vmem:[%s11040_s5 + $0x1ba0] sm:$0xff] }
 0x1c0   :  { %2684 = vmatpush.msra.mxu0 %v612_v55  ;;  %2704 = vmatpush.msra.mxu1 %v1012_v43  ;;  %v4804_v55 = vperm.slane %v7254_v40, 1  ;;  %v412_v43 = vld [vmem:[%s11040_s5 + $0x368] sm:$0xff]  ;;  %v1587_v31 = vld [vmem:[%s11040_s5 + $0x2820] sm:$0xff] }
 0x1c1   :  { %5006 = vrsqrt.f32 %v7118_v58  ;;  %2721 = vmatpush.msra.mxu2 %v1487_v49  ;;  %2741 = vmatpush.msra.mxu3 %v1887_v51  ;;  %v4687_v49 = vmul.f32 %v4446_v44, %v6723_v14  ;;  %v4720_v51 = vperm.slane %v7205_v22, 0  ;;  %v4805_v14 = vperm.slane %v7254_v40, 2  ;;  %v312_v22 = vld [vmem:[%s11040_s5 + $0x48] sm:$0xff]  ;;  %v7360_v40 = vpop.f32.mrf.mxu3 }
 0x1c2   :  { %2685 = vmatpush.msra.mxu0 %v587_v59  ;;  %2705 = vmatpush.msra.mxu1 %v987_v60  ;;  %v7272_v59 = vpop.f32.mrf.mxu0  ;;  %v1287_v60 = vld [vmem:[%s11040_s5 + $0x1ec0] sm:$0xff]  ;;  %vm4473_vm10 = vweird.f32 %v7118_v58 }
 0x1c3   :  { %2722 = vmatpush.msra.mxu2 %v1462_v62  ;;  %2742 = vmatpush.msra.mxu3 %v1862_v63  ;;  %v4772_v62 = vmul.f32 %v4722_v36, %v4689_v35  ;;  %v387_v63 = vld [vmem:[%s11040_s5 + $0x2a0] sm:$0xff]  ;;  %v1162_v36 = vld [vmem:[%s11040_s5 + $0x1ad8] sm:$0xff] }
 0x1c4   :  { %2686 = vmatpush.msra.mxu0 %v562_v0  ;;  %2706 = vmatpush.msra.mxu1 %v962_v1  ;;  %v787_v0 = vld [vmem:[%s11040_s5 + $0xf20] sm:$0xff] }
 0x1c5   :  { %2723 = vmatpush.msra.mxu2 %v1437_v5  ;;  %2743 = vmatpush.msra.mxu3 %v1837_v6  ;;  %v1662_v5 = vld [vmem:[%s11040_s5 + $0x2a78] sm:$0xff]  ;;  %v4854_v6 = vadd.f32 %v4804_v55, %v4771_v42 }
 0x1c6   :  { %2687 = vmatpush.msra.mxu0 %v537_v8  ;;  %2707 = vmatpush.msra.mxu1 %v937_v9  ;;  %v762_v8 = vld [vmem:[%s11040_s5 + $0xe58] sm:$0xff]  ;;  %v4770_v9 = vmul.f32 %v4720_v51, %v4687_v49 }
 0x1c7   :  { %v7186_v61 = vpop.eup %5006  ;;  %2724 = vmatpush.msra.mxu2 %v1412_v57  ;;  %2744 = vmatpush.msra.mxu3 %v1812_v11  ;;  %v1237_v11 = vld [vmem:[%s11040_s5 + $0x1d30] sm:$0xff]  ;;  %v638_v51 = vld [vmem:[%s11040_s5 + $0xa78] sm:$0xff] }
 0x1c8   :  { %v4468_v25 = vmul.f32 %v7186_v61, %v7118_v58  ;;  %2688 = vmatpush.msra.mxu0 %v512_v24  ;;  %2708 = vmatpush.msra.mxu1 %v912_v17  ;;  %vm4474_vm9 = vweird.f32 %v7186_v61  ;;  %v362_v58 = vld [vmem:[%s11040_s5 + $0x1d8] sm:$0xff]  ;;  %v4855_v24 = vadd.f32 %v4805_v14, %v4772_v62 }
 0x1c9   :  { %2725 = vmatpush.msra.mxu2 %v1387_v19  ;;  %2745 = vmatpush.msra.mxu3 %v1787_v56  ;;  %vm4475_vm11 = vmor %vm4473_vm10, %vm4474_vm9  ;;  %v337_v19 = vld [vmem:[%s11040_s5 + $0x110] sm:$0xff] }
 0x1ca   :  { %v4469_v13 = vmul.f32 %v7186_v61, %v4468_v25  ;;  %2689 = vmatpush.msra.mxu0 %v487_v45  ;;  %2709 = vmatpush.msra.mxu1 %v887_v21  ;;  %v737_v56 = vld [vmem:[%s11040_s5 + $0xd90] sm:$0xff]  ;;  %v4879_v45 = vmax.f32 %v4854_v6, 0.0  ;;  %v7339_v25 = vld [vmem:[%s11044_s6] sm:$0xff] }
 0x1cb   :  { %2726 = vmatpush.msra.mxu2 %v1362_v28  ;;  %2746 = vmatpush.msra.mxu3 %v1762_v29  ;;  %v1916_v28 = vperm.slane %v7339_v25, 5  ;;  %v4853_v29 = vadd.f32 %v4803_v10, %v4770_v9  ;;  %v1915_v55 = vperm.slane %v7339_v25, 4  ;;  %v1013_v6 = vld [vmem:[%s11040_s5 + $0x1630] sm:$0xff]  ;;  %v988_v9 = vld [vmem:[%s11040_s5 + $0x1568] sm:$0xff]  ;;  %v1463_v10 = vld [vmem:[%s11040_s5 + $0x2440] sm:$0xff] }
 0x1cc   :  { %v4470_v12 = vmul.f32 0.5, %v4469_v13  ;;  %2690 = vmatpush.msra.mxu0 %v462_v2  ;;  %2710 = vmatpush.msra.mxu1 %v862_v26  ;;  %v4880_v26 = vmax.f32 %v4855_v24, 0.0  ;;  %v688_v13 = vld [vmem:[%s11040_s5 + $0xc08] sm:$0xff]  ;;  %v563_v24 = vld [vmem:[%s11040_s5 + $0x820] sm:$0xff] }
 0x1cd   :  { %2727 = vmatpush.msra.mxu2 %v1337_v39  ;;  %2747 = vmatpush.msra.mxu3 %v1737_v33  ;;  %v1088_v39 = vld [vmem:[%s11040_s5 + $0x1888] sm:$0xff]  ;;  %v4927_v33 = vrot.slane %v4879_v45, 6  ;;  %v1413_v45 = vld [vmem:[%s11040_s5 + $0x22b0] sm:$0xff] }
 0x1ce   :  { %v4471_v53 = vsub.f32 1.5, %v4470_v12  ;;  %2691 = vmatpush.msra.mxu0 %v437_v37  ;;  %2711 = vmatpush.msra.mxu1 %v837_v38  ;;  %v1562_v37 = vld [vmem:[%s11040_s5 + $0x2758] sm:$0xff]  ;;  %v4878_v38 = vmax.f32 %v4853_v29, 0.0  ;;  %v663_v12 = vld [vmem:[%s11040_s5 + $0xb40] sm:$0xff]  ;;  %v1788_v29 = vld [vmem:[%s11040_s5 + $0x2e68] sm:$0xff] }
 0x1cf   :  { %2728 = vmatpush.msra.mxu2 %v1312_v54  ;;  %2748 = vmatpush.msra.mxu3 %v1712_v41  ;;  %v2378_v2 = vpop.f32.mrf.mxu0  ;;  %v1063_v54 = vld [vmem:[%s11040_s5 + $0x17c0] sm:$0xff]  ;;  %v4928_v41 = vrot.slane %v4880_v26, 4 }
 0x1d0   :  { %v4472_v1 = vmul.f32 %v7186_v61, %v4471_v53  ;;  %2692 = vmatpush.msra.mxu0 %v412_v43  ;;  %2712 = vmatpush.msra.mxu1 %v812_v48  ;;  %v2379_v35 = vadd.f32 %v2378_v2, %v1916_v28  ;;  %v1137_v43 = vld [vmem:[%s11040_s5 + $0x1a10] sm:$0xff]  ;;  %v1038_v53 = vld [vmem:[%s11040_s5 + $0x16f8] sm:$0xff]  ;;  %v1388_v28 = vld [vmem:[%s11040_s5 + $0x21e8] sm:$0xff] }
 0x1d1   :  { %2729 = vmatpush.msra.mxu2 %v1287_v60  ;;  %2749 = vmatpush.msra.mxu3 %v1687_v46  ;;  %v1537_v48 = vld [vmem:[%s11040_s5 + $0x2690] sm:$0xff]  ;;  %v4945_v46 = vsel %vm143_vm1, %v4878_v38, %v4927_v33  ;;  %v888_v2 = vld [vmem:[%s11040_s5 + $0x1248] sm:$0xff]  ;;  %v863_v33 = vld [vmem:[%s11040_s5 + $0x1180] sm:$0xff] }
 0x1d2   :  { %v4476_v57 = vsel %vm4475_vm11, %v7186_v61, %v4472_v1  ;;  %2693 = vmatpush.msra.mxu0 %v387_v63  ;;  %2713 = vmatpush.msra.mxu1 %v787_v0  ;;  %v7320_v61 = vpop.f32.mrf.mxu1  ;;  %v1112_v63 = vld [vmem:[%s11040_s5 + $0x1948] sm:$0xff]  ;;  %v838_v38 = vld [vmem:[%s11040_s5 + $0x10b8] sm:$0xff] }
 0x1d3   :  { %v4690_v17 = vmul.f32 %v4476_v57, %v6992_v47  ;;  %2730 = vmatpush.msra.mxu2 %v1262_v4  ;;  %2750 = vmatpush.msra.mxu3 %v1662_v5  ;;  %v1212_v47 = vld [vmem:[%s11040_s5 + $0x1c68] sm:$0xff]  ;;  %v2299_v4 = vadd.f32 %v7272_v59, %v1915_v55  ;;  %v613_v5 = vld [vmem:[%s11040_s5 + $0x9b0] sm:$0xff]  ;;  %v1863_v57 = vld [vmem:[%s11040_s5 + $0x30c0] sm:$0xff] }
 0x1d4   :  { %2694 = vmatpush.msra.mxu0 %v362_v58  ;;  %2714 = vmatpush.msra.mxu1 %v762_v8  ;;  %v1512_v0 = vld [vmem:[%s11040_s5 + $0x25c8] sm:$0xff] }
 0x1d5   :  { %v4773_v21 = vmul.f32 %v4723_v7, %v4690_v17  ;;  %2731 = vmatpush.msra.mxu2 %v1237_v11  ;;  %2751 = vmatpush.msra.mxu3 %v1637_v15  ;;  %v1488_v58 = vld [vmem:[%s11040_s5 + $0x2508] sm:$0xff]  ;;  %v2319_v15 = vadd.f32 %v7320_v61, %v2299_v4  ;;  %v963_v17 = vld [vmem:[%s11040_s5 + $0x14a0] sm:$0xff]  ;;  %v338_v4 = vld [vmem:[%s11040_s5 + $0x118] sm:$0xff] }
 0x1d6   :  { %2695 = vmatpush.msra.mxu0 %v337_v19  ;;  %2715 = vmatpush.msra.mxu1 %v737_v56  ;;  %v1888_v59 = vld [vmem:[%s11040_s5 + $0x3188] sm:$0xff]  ;;  %v1438_v19 = vld [vmem:[%s11040_s5 + $0x2378] sm:$0xff] }
 0x1d7   :  { %v4856_v27 = vadd.f32 %v4806_v18, %v4773_v21  ;;  %2732 = vmatpush.msra.mxu2 %v1212_v47  ;;  %2752 = vmatpush.msra.mxu3 %v1612_v32  ;;  %v588_v8 = vld [vmem:[%s11040_s5 + $0x8e8] sm:$0xff]  ;;  %v1838_v56 = vld [vmem:[%s11040_s5 + $0x2ff8] sm:$0xff]  ;;  %v2339_v61 = vadd.f32 %v7322_v20, %v2319_v15  ;;  %v1813_v20 = vld [vmem:[%s11040_s5 + $0x2f30] sm:$0xff] }
 0x1d8   :  { %2696 = vmatpush.msra.mxu0 %v312_v22  ;;  %2716 = vmatpush.msra.mxu1 %v712_v23  ;;  %v538_v47 = vld [vmem:[%s11040_s5 + $0x758] sm:$0xff]  ;;  %v513_v22 = vld [vmem:[%s11040_s5 + $0x690] sm:$0xff]  ;;  %v1588_v15 = vld [vmem:[%s11040_s5 + $0x2828] sm:$0xff] }
 0x1d9   :  { %v4881_v44 = vmax.f32 %v4856_v27, 0.0  ;;  %2733 = vmatpush.msra.mxu2 %v1187_v30  ;;  %2753 = vmatpush.msra.mxu3 %v1587_v31  ;;  %v938_v32 = vld [vmem:[%s11040_s5 + $0x13d8] sm:$0xff]  ;;  %v913_v23 = vld [vmem:[%s11040_s5 + $0x1310] sm:$0xff]  ;;  %v7465_v30 = vadd.f32 %v7360_v40, %v2339_v61  ;;  %v488_v31 = vld [vmem:[%s11040_s5 + $0x5c8] sm:$0xff] }
 0x1da   :  { %2697 = vmatmul.f32.vlgmr.msra.gmra.mxu0 %v5619_v16  ;;  %2717 = vmatmul.f32.vlgmr.msra.gmra.mxu1 %v5624_v34  ;;  %v2398_v49 = vpop.f32.mrf.mxu1  ;;  %v1363_v27 = vld [vmem:[%s11040_s5 + $0x2120] sm:$0xff] }
 0x1db   :  { %v4929_v42 = vrot.slane %v4881_v44, 2  ;;  %2761 = vmatpush.msrb.mxu0 %v688_v13  ;;  %2781 = vmatpush.msrb.mxu1 %v1088_v39  ;;  %v2399_v14 = vadd.f32 %v2398_v49, %v2379_v35  ;;  %v1763_v13 = vld [vmem:[%s11040_s5 + $0x2da0] sm:$0xff]  ;;  %v1338_v44 = vld [vmem:[%s11040_s5 + $0x2058] sm:$0xff]  ;;  %v388_v49 = vld [vmem:[%s11040_s5 + $0x2a8] sm:$0xff] }
 0x1dc   :  { %2734 = vmatpush.msra.mxu2 %v1162_v36  ;;  %2754 = vmatpush.msra.mxu3 %v1562_v37  ;;  %v2418_v60 = vpop.f32.mrf.mxu2  ;;  %v2438_v11 = vpop.f32.mrf.mxu3  ;;  %v463_v39 = vld [vmem:[%s11040_s5 + $0x500] sm:$0xff]  ;;  %v1738_v35 = vld [vmem:[%s11040_s5 + $0x2cd8] sm:$0xff]  ;;  %v3989_v36 = vsel %vm143_vm1, %v7465_v30, 0.0 }
 0x1dd   :  { %v4947_v62 = vsel %vm4946_vm12, %v4928_v41, %v4929_v42  ;;  %2762 = vmatpush.msrb.mxu0 %v663_v12  ;;  %2782 = vmatpush.msrb.mxu1 %v1063_v54  ;;  %v2419_v7 = vadd.f32 %v2418_v60, %v2399_v14  ;;  %v438_v37 = vld [vmem:[%s11040_s5 + $0x438] sm:$0xff]  ;;  %v1313_v12 = vld [vmem:[%s11040_s5 + $0x1f90] sm:$0xff]  ;;  %v3990_v55 = vrot.slane %v3989_v36, 4  ;;  %v1263_v60 = vld [vmem:[%s11040_s5 + $0x1e00] sm:$0xff] }
 0x1de   :  { %v4949_v1 = vsel %vm4948_vm13, %v4945_v46, %v4947_v62  ;;  %2735 = vmatpush.msra.mxu2 %v1137_v43  ;;  %2755 = vmatpush.msra.mxu3 %v1537_v48  ;;  %v1713_v54 = vld [vmem:[%s11040_s5 + $0x2c10] sm:$0xff]  ;;  %v1288_v43 = vld [vmem:[%s11040_s5 + $0x1ec8] sm:$0xff]  ;;  %v1663_v46 = vld [vmem:[%s11040_s5 + $0x2a80] sm:$0xff] }
 0x1df   :  { %4971 = vst [vmem:[%s11047_s9] sm:$0xff] %v4949_v1  ;;  %2763 = vmatpush.msrb.mxu0 %v638_v51  ;;  %2783 = vmatpush.msrb.mxu1 %v1038_v53  ;;  %v7429_v18 = vadd.f32 %v2438_v11, %v2419_v7  ;;  %v413_v41 = vld [vmem:[%s11040_s5 + $0x370] sm:$0xff]  ;;  %v1688_v48 = vld [vmem:[%s11040_s5 + $0x2b48] sm:$0xff]  ;;  %v363_v62 = vld [vmem:[%s11040_s5 + $0x1e0] sm:$0xff] }
 0x1e0   :  { %2736 = vmatpush.msra.mxu2 %v1112_v63  ;;  %2756 = vmatpush.msra.mxu3 %v1512_v0  ;;  %v813_v42 = vld [vmem:[%s11040_s5 + $0xff0] sm:$0xff]  ;;  %v788_v51 = vld [vmem:[%s11040_s5 + $0xf28] sm:$0xff]  ;;  %v763_v14 = vld [vmem:[%s11040_s5 + $0xe60] sm:$0xff]  ;;  %v3991_v63 = vadd.f32 %v3990_v55, %v3989_v36 }
 0x1e1   :  { %2737 = vmatmul.f32.vlgmr.msra.gmra.mxu2 %v5648_v50  ;;  %2757 = vmatmul.f32.vlgmr.msra.gmra.mxu3 %v5653_v52  ;;  %v3996_v21 = vsel %vm143_vm1, %v7429_v18, 0.0  ;;  %v1238_v0 = vld [vmem:[%s11040_s5 + $0x1d38] sm:$0xff]  ;;  %v1188_v11 = vld [vmem:[%s11040_s5 + $0x1ba8] sm:$0xff]  ;;  %v1163_v61 = vld [vmem:[%s11040_s5 + $0x1ae0] sm:$0xff] }
 0x1e2   :  { %2764 = vmatpush.msrb.mxu0 %v613_v5  ;;  %2784 = vmatpush.msrb.mxu1 %v1013_v6  ;;  %v3997_v26 = vrot.slane %v3996_v21, 4  ;;  %v1638_v1 = vld [vmem:[%s11040_s5 + $0x29b8] sm:$0xff]  ;;  %v1917_v6 = vperm.slane %v7339_v25, 6 }
 0x1e3   :  { %2801 = vmatpush.msrb.mxu2 %v1488_v58  ;;  %2821 = vmatpush.msrb.mxu3 %v1888_v59  ;;  %v738_v5 = vld [vmem:[%s11040_s5 + $0xd98] sm:$0xff]  ;;  %v1213_v58 = vld [vmem:[%s11040_s5 + $0x1c70] sm:$0xff] }
 0x1e4   :  { %2765 = vmatpush.msrb.mxu0 %v588_v8  ;;  %2785 = vmatpush.msrb.mxu1 %v988_v9  ;;  %v3998_v40 = vadd.f32 %v3997_v26, %v3996_v21  ;;  %v1613_v59 = vld [vmem:[%s11040_s5 + $0x28f0] sm:$0xff]  ;;  %v1064_v21 = vld [vmem:[%s11040_s5 + $0x17c8] sm:$0xff]  ;;  %v1014_v36 = vld [vmem:[%s11040_s5 + $0x1638] sm:$0xff] }
 0x1e5   :  { %2802 = vmatpush.msrb.mxu2 %v1463_v10  ;;  %2822 = vmatpush.msrb.mxu3 %v1863_v57  ;;  %v313_v9 = vld [vmem:[%s11040_s5 + $0x50] sm:$0xff]  ;;  %v3992_v57 = vrot.slane %v3991_v63, 2 }
 0x1e6   :  { %2766 = vmatpush.msrb.mxu0 %v563_v24  ;;  %2786 = vmatpush.msrb.mxu1 %v963_v17  ;;  %v3999_v53 = vrot.slane %v3998_v40, 2  ;;  %v713_v10 = vld [vmem:[%s11040_s5 + $0xcd0] sm:$0xff] }
 0x1e7   :  { %2803 = vmatpush.msrb.mxu2 %v1438_v19  ;;  %2823 = vmatpush.msrb.mxu3 %v1838_v56  ;;  %v689_v19 = vld [vmem:[%s11040_s5 + $0xc10] sm:$0xff] }
 0x1e8   :  { %2767 = vmatpush.msrb.mxu0 %v538_v47  ;;  %2787 = vmatpush.msrb.mxu1 %v938_v32  ;;  %v4000_v7 = vadd.f32 %v3999_v53, %v3998_v40  ;;  %v1089_v56 = vld [vmem:[%s11040_s5 + $0x1890] sm:$0xff]  ;;  %v1563_v47 = vld [vmem:[%s11040_s5 + $0x2760] sm:$0xff]  ;;  %v3993_v32 = vadd.f32 %v3992_v57, %v3991_v63  ;;  %v964_v53 = vld [vmem:[%s11040_s5 + $0x14a8] sm:$0xff] }
 0x1e9   :  { %2804 = vmatpush.msrb.mxu2 %v1413_v45  ;;  %2824 = vmatpush.msrb.mxu3 %v1813_v20  ;;  %v664_v20 = vld [vmem:[%s11040_s5 + $0xb48] sm:$0xff]  ;;  %v1489_v40 = vld [vmem:[%s11040_s5 + $0x2510] sm:$0xff]  ;;  %v539_v63 = vld [vmem:[%s11040_s5 + $0x760] sm:$0xff] }
 0x1ea   :  { %2768 = vmatpush.msrb.mxu0 %v513_v22  ;;  %2788 = vmatpush.msrb.mxu1 %v913_v23  ;;  %v4001_v17 = vrot.slane %v4000_v7, 1  ;;  %v1138_v23 = vld [vmem:[%s11040_s5 + $0x1a18] sm:$0xff]  ;;  %v889_v57 = vld [vmem:[%s11040_s5 + $0x1250] sm:$0xff] }
 0x1eb   :  { %2805 = vmatpush.msrb.mxu2 %v1388_v28  ;;  %2825 = vmatpush.msrb.mxu3 %v1788_v29  ;;  %v1538_v28 = vld [vmem:[%s11040_s5 + $0x2698] sm:$0xff] }
 0x1ec   :  { %2769 = vmatpush.msrb.mxu0 %v488_v31  ;;  %2789 = vmatpush.msrb.mxu1 %v888_v2  ;;  %v4002_v29 = vadd.f32 %v4001_v17, %v4000_v7  ;;  %v639_v31 = vld [vmem:[%s11040_s5 + $0xa80] sm:$0xff]  ;;  %v914_v7 = vld [vmem:[%s11040_s5 + $0x1318] sm:$0xff]  ;;  %v1764_v17 = vld [vmem:[%s11040_s5 + $0x2da8] sm:$0xff] }
 0x1ed   :  { %2806 = vmatpush.msrb.mxu2 %v1363_v27  ;;  %2826 = vmatpush.msrb.mxu3 %v1763_v13  ;;  %v1039_v2 = vld [vmem:[%s11040_s5 + $0x1700] sm:$0xff]  ;;  %v1113_v27 = vld [vmem:[%s11040_s5 + $0x1950] sm:$0xff] }
 0x1ee   :  { %2770 = vmatpush.msrb.mxu0 %v463_v39  ;;  %2790 = vmatpush.msrb.mxu1 %v863_v33  ;;  %v1513_v13 = vld [vmem:[%s11040_s5 + $0x25d0] sm:$0xff]  ;;  %v3994_v33 = vrot.slane %v3993_v32, 1 }
 0x1ef   :  { %2807 = vmatpush.msrb.mxu2 %v1338_v44  ;;  %2827 = vmatpush.msrb.mxu3 %v1738_v35  ;;  %v614_v35 = vld [vmem:[%s11040_s5 + $0x9b8] sm:$0xff] }
 0x1f0   :  { %2771 = vmatpush.msrb.mxu0 %v438_v37  ;;  %2791 = vmatpush.msrb.mxu1 %v838_v38  ;;  %v4142_v38 = vmul.f32 %v4002_v29, %v5427_v3  ;;  %v3995_v55 = vadd.f32 %v3994_v33, %v3993_v32  ;;  %v1739_v32 = vld [vmem:[%s11040_s5 + $0x2ce0] sm:$0xff]  ;;  %v789_v33 = vld [vmem:[%s11040_s5 + $0xf30] sm:$0xff] }
 0x1f1   :  { %2808 = vmatpush.msrb.mxu2 %v1313_v12  ;;  %2828 = vmatpush.msrb.mxu3 %v1713_v54  ;;  %v2458_v8 = vpop.f32.mrf.mxu0  ;;  %v2478_v45 = vpop.f32.mrf.mxu1  ;;  %v1889_v12 = vld [vmem:[%s11040_s5 + $0x3190] sm:$0xff] }
 0x1f2   :  { %2772 = vmatpush.msrb.mxu0 %v413_v41  ;;  %2792 = vmatpush.msrb.mxu1 %v813_v42  ;;  %v2459_v24 = vadd.f32 %v2458_v8, %v1917_v6  ;;  %v589_v54 = vld [vmem:[%s11040_s5 + $0x8f0] sm:$0xff]  ;;  %v514_v6 = vld [vmem:[%s11040_s5 + $0x698] sm:$0xff] }
 0x1f3   :  { %2809 = vmatpush.msrb.mxu2 %v1288_v43  ;;  %2829 = vmatpush.msrb.mxu3 %v1688_v48  ;;  %v989_v41 = vld [vmem:[%s11040_s5 + $0x1570] sm:$0xff]  ;;  %v1464_v43 = vld [vmem:[%s11040_s5 + $0x2448] sm:$0xff] }
 0x1f4   :  { %2773 = vmatpush.msrb.mxu0 %v388_v49  ;;  %2793 = vmatpush.msrb.mxu1 %v788_v51  ;;  %v2479_v22 = vadd.f32 %v2478_v45, %v2459_v24  ;;  %v1864_v48 = vld [vmem:[%s11040_s5 + $0x30c8] sm:$0xff]  ;;  %v1389_v8 = vld [vmem:[%s11040_s5 + $0x21f0] sm:$0xff]  ;;  %v439_v45 = vld [vmem:[%s11040_s5 + $0x440] sm:$0xff] }
 0x1f5   :  { %2810 = vmatpush.msrb.mxu2 %v1263_v60  ;;  %2830 = vmatpush.msrb.mxu3 %v1663_v46  ;;  %v564_v51 = vld [vmem:[%s11040_s5 + $0x828] sm:$0xff]  ;;  %v7642_v60 = vsub.f32 %v7429_v18, %v4142_v38  ;;  %v1439_v46 = vld [vmem:[%s11040_s5 + $0x2380] sm:$0xff] }
 0x1f6   :  { %2774 = vmatpush.msrb.mxu0 %v363_v62  ;;  %2794 = vmatpush.msrb.mxu1 %v763_v14  ;;  %v1839_v62 = vld [vmem:[%s11040_s5 + $0x3000] sm:$0xff]  ;;  %v1364_v24 = vld [vmem:[%s11040_s5 + $0x2128] sm:$0xff] }
 0x1f7   :  { %2811 = vmatpush.msrb.mxu2 %v1238_v0  ;;  %2831 = vmatpush.msrb.mxu3 %v1638_v1  ;;  %v939_v18 = vld [vmem:[%s11040_s5 + $0x13e0] sm:$0xff]  ;;  %v4141_v0 = vmul.f32 %v3995_v55, %v5427_v3  ;;  %v1414_v1 = vld [vmem:[%s11040_s5 + $0x22b8] sm:$0xff] }
 0x1f8   :  { %2775 = vmatpush.msrb.mxu0 %v338_v4  ;;  %2795 = vmatpush.msrb.mxu1 %v738_v5  ;;  %v1814_v4 = vld [vmem:[%s11040_s5 + $0x2f38] sm:$0xff] }
 0x1f9   :  { %2812 = vmatpush.msrb.mxu2 %v1213_v58  ;;  %2832 = vmatpush.msrb.mxu3 %v1613_v59  ;;  %v4192_v58 = vmul.f32 %v7642_v60, %v7642_v60 }
 0x1fa   :  { %2776 = vmatpush.msrb.mxu0 %v313_v9  ;;  %2796 = vmatpush.msrb.mxu1 %v713_v10  ;;  %v1789_v9 = vld [vmem:[%s11040_s5 + $0x2e70] sm:$0xff] }
 0x1fb   :  { %2813 = vmatpush.msrb.mxu2 %v1188_v11  ;;  %2833 = vmatpush.msrb.mxu3 %v1588_v15  ;;  %v489_v10 = vld [vmem:[%s11040_s5 + $0x5d0] sm:$0xff]  ;;  %v7684_v11 = vsub.f32 %v7465_v30, %v4141_v0  ;;  %v864_v30 = vld [vmem:[%s11040_s5 + $0x1188] sm:$0xff] }
 0x1fc   :  { %2777 = vmatmul.f32.vlgmr.msrb.gmra.mxu0 %v5619_v16  ;;  %2797 = vmatmul.f32.vlgmr.msrb.gmra.mxu1 %v5624_v34  ;;  %v1189_v0 = vld [vmem:[%s11040_s5 + $0x1bb0] sm:$0xff] }
 0x1fd   :  { %2841 = vmatpush.msra.mxu0 %v689_v19  ;;  %2861 = vmatpush.msra.mxu1 %v1089_v56  ;;  %v464_v19 = vld [vmem:[%s11040_s5 + $0x508] sm:$0xff]  ;;  %v4247_v56 = vsel %vm143_vm1, %v4192_v58, 0.0  ;;  %v1090_v58 = vld [vmem:[%s11040_s5 + $0x1898] sm:$0xff] }
 0x1fe   :  { %2814 = vmatpush.msrb.mxu2 %v1163_v61  ;;  %2834 = vmatpush.msrb.mxu3 %v1563_v47  ;;  %v2498_v26 = vpop.f32.mrf.mxu2  ;;  %v2518_v44 = vpop.f32.mrf.mxu3  ;;  %v1339_v47 = vld [vmem:[%s11040_s5 + $0x2060] sm:$0xff]  ;;  %v4248_v29 = vrot.slane %v4247_v56, 4 }
 0x1ff   :  { %2842 = vmatpush.msra.mxu0 %v664_v20  ;;  %2862 = vmatpush.msra.mxu1 %v1064_v21  ;;  %v2499_v39 = vadd.f32 %v2498_v26, %v2479_v22  ;;  %v839_v20 = vld [vmem:[%s11040_s5 + $0x10c0] sm:$0xff]  ;;  %v4191_v21 = vmul.f32 %v7684_v11, %v7684_v11 }
 0x200   :  { %2815 = vmatpush.msrb.mxu2 %v1138_v23  ;;  %2835 = vmatpush.msrb.mxu3 %v1538_v28  ;;  %v1314_v23 = vld [vmem:[%s11040_s5 + $0x1f98] sm:$0xff]  ;;  %v4249_v38 = vadd.f32 %v4248_v29, %v4247_v56  ;;  %v1539_v56 = vld [vmem:[%s11040_s5 + $0x26a0] sm:$0xff] }
 0x201   :  { %2843 = vmatpush.msra.mxu0 %v639_v31  ;;  %2863 = vmatpush.msra.mxu1 %v1039_v2  ;;  %v7610_v37 = vadd.f32 %v2518_v44, %v2499_v39  ;;  %v1714_v28 = vld [vmem:[%s11040_s5 + $0x2c18] sm:$0xff]  ;;  %v389_v39 = vld [vmem:[%s11040_s5 + $0x2b0] sm:$0xff]  ;;  %v4240_v44 = vsel %vm143_vm1, %v4191_v21, 0.0 }
 0x202   :  { %2816 = vmatpush.msrb.mxu2 %v1113_v27  ;;  %2836 = vmatpush.msrb.mxu3 %v1513_v13  ;;  %v414_v31 = vld [vmem:[%s11040_s5 + $0x378] sm:$0xff]  ;;  %v1289_v27 = vld [vmem:[%s11040_s5 + $0x1ed0] sm:$0xff]  ;;  %v4241_v55 = vrot.slane %v4240_v44, 4 }
 0x203   :  { %2817 = vmatmul.f32.vlgmr.msrb.gmra.mxu2 %v5648_v50  ;;  %2837 = vmatmul.f32.vlgmr.msrb.gmra.mxu3 %v5653_v52  ;;  %v4003_v42 = vsel %vm143_vm1, %v7610_v37, 0.0  ;;  %v814_v2 = vld [vmem:[%s11040_s5 + $0xff8] sm:$0xff]  ;;  %v1689_v13 = vld [vmem:[%s11040_s5 + $0x2b50] sm:$0xff] }
 0x204   :  { %2844 = vmatpush.msra.mxu0 %v614_v35  ;;  %2864 = vmatpush.msra.mxu1 %v1014_v36  ;;  %v4004_v49 = vrot.slane %v4003_v42, 4  ;;  %v1264_v36 = vld [vmem:[%s11040_s5 + $0x1e08] sm:$0xff]  ;;  %v1514_v21 = vld [vmem:[%s11040_s5 + $0x25d8] sm:$0xff] }
 0x205   :  { %2881 = vmatpush.msra.mxu2 %v1489_v40  ;;  %2901 = vmatpush.msra.mxu3 %v1889_v12  ;;  %v364_v40 = vld [vmem:[%s11040_s5 + $0x1e8] sm:$0xff] }
 0x206   :  { %2845 = vmatpush.msra.mxu0 %v589_v54  ;;  %2865 = vmatpush.msra.mxu1 %v989_v41  ;;  %v4005_v14 = vadd.f32 %v4004_v49, %v4003_v42  ;;  %v764_v12 = vld [vmem:[%s11040_s5 + $0xe68] sm:$0xff]  ;;  %v1239_v41 = vld [vmem:[%s11040_s5 + $0x1d40] sm:$0xff] }
 0x207   :  { %2882 = vmatpush.msra.mxu2 %v1464_v43  ;;  %2902 = vmatpush.msra.mxu3 %v1864_v48  ;;  %v1639_v42 = vld [vmem:[%s11040_s5 + $0x29c0] sm:$0xff] }
 0x208   :  { %2846 = vmatpush.msra.mxu0 %v564_v51  ;;  %2866 = vmatpush.msra.mxu1 %v964_v53  ;;  %v4006_v5 = vrot.slane %v4005_v14, 2  ;;  %v339_v48 = vld [vmem:[%s11040_s5 + $0x120] sm:$0xff]  ;;  %v1918_v51 = vperm.slane %v7339_v25, 7  ;;  %v1214_v53 = vld [vmem:[%s11040_s5 + $0x1c78] sm:$0xff] }
 0x209   :  { %2883 = vmatpush.msra.mxu2 %v1439_v46  ;;  %2903 = vmatpush.msra.mxu3 %v1839_v62  ;;  %v739_v49 = vld [vmem:[%s11040_s5 + $0xda0] sm:$0xff]  ;;  %v1614_v46 = vld [vmem:[%s11040_s5 + $0x28f8] sm:$0xff] }
 0x20a   :  { %2847 = vmatpush.msra.mxu0 %v539_v63  ;;  %2867 = vmatpush.msra.mxu1 %v939_v18  ;;  %v4007_v59 = vadd.f32 %v4006_v5, %v4005_v14  ;;  %v4250_v14 = vrot.slane %v4249_v38, 2  ;;  %v314_v18 = vld [vmem:[%s11040_s5 + $0x58] sm:$0xff] }
 0x20b   :  { %2884 = vmatpush.msra.mxu2 %v1414_v1  ;;  %2904 = vmatpush.msra.mxu3 %v1814_v4  ;;  %v714_v25 = vld [vmem:[%s11040_s5 + $0xcd8] sm:$0xff]  ;;  %v1589_v1 = vld [vmem:[%s11040_s5 + $0x2830] sm:$0xff]  ;;  %v4242_v4 = vadd.f32 %v4241_v55, %v4240_v44  ;;  %v1440_v55 = vld [vmem:[%s11040_s5 + $0x2388] sm:$0xff] }
 0x20c   :  { %v4008_v15 = vrot.slane %v4007_v59, 1  ;;  %2848 = vmatpush.msra.mxu0 %v514_v6  ;;  %2868 = vmatpush.msra.mxu1 %v914_v7  ;;  %v690_v7 = vld [vmem:[%s11040_s5 + $0xc18] sm:$0xff] }
 0x20d   :  { %2885 = vmatpush.msra.mxu2 %v1389_v8  ;;  %2905 = vmatpush.msra.mxu3 %v1789_v9  ;;  %v1164_v8 = vld [vmem:[%s11040_s5 + $0x1ae8] sm:$0xff]  ;;  %v590_v44 = vld [vmem:[%s11040_s5 + $0x8f8] sm:$0xff] }
 0x20e   :  { %v4009_v61 = vadd.f32 %v4008_v15, %v4007_v59  ;;  %2849 = vmatpush.msra.mxu0 %v489_v10  ;;  %2869 = vmatpush.msra.mxu1 %v889_v57  ;;  %v4251_v59 = vadd.f32 %v4250_v14, %v4249_v38  ;;  %v1564_v9 = vld [vmem:[%s11040_s5 + $0x2768] sm:$0xff]  ;;  %v665_v57 = vld [vmem:[%s11040_s5 + $0xb50] sm:$0xff] }
 0x20f   :  { %2886 = vmatpush.msra.mxu2 %v1364_v24  ;;  %2906 = vmatpush.msra.mxu3 %v1764_v17  ;;  %v1065_v15 = vld [vmem:[%s11040_s5 + $0x17d0] sm:$0xff]  ;;  %v4243_v24 = vrot.slane %v4242_v4, 2 }
 0x210   :  { %v4143_v22 = vmul.f32 %v4009_v61, %v5427_v3  ;;  %2850 = vmatpush.msra.mxu0 %v464_v19  ;;  %2870 = vmatpush.msra.mxu1 %v864_v30  ;;  %v1139_v30 = vld [vmem:[%s11040_s5 + $0x1a20] sm:$0xff]  ;;  %v640_v61 = vld [vmem:[%s11040_s5 + $0xa88] sm:$0xff]  ;;  %v1865_v38 = vld [vmem:[%s11040_s5 + $0x30d0] sm:$0xff] }
 0x211   :  { %2887 = vmatpush.msra.mxu2 %v1339_v47  ;;  %2907 = vmatpush.msra.mxu3 %v1739_v32  ;;  %v1040_v47 = vld [vmem:[%s11040_s5 + $0x1708] sm:$0xff] }
 0x212   :  { %v7727_v26 = vsub.f32 %v7610_v37, %v4143_v22  ;;  %2851 = vmatpush.msra.mxu0 %v439_v45  ;;  %2871 = vmatpush.msra.mxu1 %v839_v20  ;;  %v1664_v37 = vld [vmem:[%s11040_s5 + $0x2a88] sm:$0xff]  ;;  %v4252_v45 = vrot.slane %v4251_v59, 1  ;;  %v1114_v20 = vld [vmem:[%s11040_s5 + $0x1958] sm:$0xff] }
 0x213   :  { %2888 = vmatpush.msra.mxu2 %v1314_v23  ;;  %2908 = vmatpush.msra.mxu3 %v1714_v28  ;;  %v2538_v62 = vpop.f32.mrf.mxu0  ;;  %v2558_v10 = vpop.f32.mrf.mxu1  ;;  %v4244_v28 = vadd.f32 %v4243_v24, %v4242_v4  ;;  %v1390_v4 = vld [vmem:[%s11040_s5 + $0x21f8] sm:$0xff]  ;;  %v865_v24 = vld [vmem:[%s11040_s5 + $0x1190] sm:$0xff] }
 0x214   :  { %v4193_v35 = vmul.f32 %v7727_v26, %v7727_v26  ;;  %2852 = vmatpush.msra.mxu0 %v414_v31  ;;  %2872 = vmatpush.msra.mxu1 %v814_v2  ;;  %v2539_v6 = vadd.f32 %v2538_v62, %v1918_v51  ;;  %v615_v31 = vld [vmem:[%s11040_s5 + $0x9c0] sm:$0xff]  ;;  %v540_v51 = vld [vmem:[%s11040_s5 + $0x768] sm:$0xff] }
 0x215   :  { %2889 = vmatpush.msra.mxu2 %v1289_v27  ;;  %2909 = vmatpush.msra.mxu3 %v1689_v13  ;;  %v1015_v2 = vld [vmem:[%s11040_s5 + $0x1640] sm:$0xff]  ;;  %v1490_v13 = vld [vmem:[%s11040_s5 + $0x2518] sm:$0xff] }
 0x216   :  { %v4254_v54 = vsel %vm143_vm1, %v4193_v35, 0.0  ;;  %2853 = vmatpush.msra.mxu0 %v389_v39  ;;  %2873 = vmatpush.msra.mxu1 %v789_v33  ;;  %v2559_v19 = vadd.f32 %v2558_v10, %v2539_v6  ;;  %v1890_v39 = vld [vmem:[%s11040_s5 + $0x3198] sm:$0xff]  ;;  %v4253_v33 = vadd.f32 %v4252_v45, %v4251_v59  ;;  %v1815_v62 = vld [vmem:[%s11040_s5 + $0x2f40] sm:$0xff] }
 0x217   :  { %v4255_v43 = vrot.slane %v4254_v54, 4  ;;  %2890 = vmatpush.msra.mxu2 %v1264_v36  ;;  %2910 = vmatpush.msra.mxu3 %v1664_v37  ;;  %v990_v35 = vld [vmem:[%s11040_s5 + $0x1578] sm:$0xff]  ;;  %v1465_v37 = vld [vmem:[%s11040_s5 + $0x2450] sm:$0xff]  ;;  %v1715_v45 = vld [vmem:[%s11040_s5 + $0x2c20] sm:$0xff] }
 0x218   :  { %2854 = vmatpush.msra.mxu0 %v364_v40  ;;  %2874 = vmatpush.msra.mxu1 %v764_v12  ;;  %v4245_v12 = vrot.slane %v4244_v28, 1 }
 0x219   :  { %v4256_v63 = vadd.f32 %v4255_v43, %v4254_v54  ;;  %2891 = vmatpush.msra.mxu2 %v1239_v41  ;;  %2911 = vmatpush.msra.mxu3 %v1639_v42  ;;  %v565_v41 = vld [vmem:[%s11040_s5 + $0x830] sm:$0xff]  ;;  %v1840_v43 = vld [vmem:[%s11040_s5 + $0x3008] sm:$0xff] }
 0x21a   :  { %2855 = vmatpush.msra.mxu0 %v339_v48  ;;  %2875 = vmatpush.msra.mxu1 %v739_v49  ;;  %v965_v42 = vld [vmem:[%s11040_s5 + $0x14b0] sm:$0xff]  ;;  %v4392_v49 = vmul.f32 %v4253_v33, %v5427_v3 }
 0x21b   :  { %v4257_v5 = vrot.slane %v4256_v63, 2  ;;  %2892 = vmatpush.msra.mxu2 %v1214_v53  ;;  %2912 = vmatpush.msra.mxu3 %v1614_v46  ;;  %v940_v53 = vld [vmem:[%s11040_s5 + $0x13e8] sm:$0xff]  ;;  %v1415_v46 = vld [vmem:[%s11040_s5 + $0x22c0] sm:$0xff] }
 0x21c   :  { %2856 = vmatpush.msra.mxu0 %v314_v18  ;;  %2876 = vmatpush.msra.mxu1 %v714_v25  ;;  %v515_v25 = vld [vmem:[%s11040_s5 + $0x6a0] sm:$0xff]  ;;  %v7894_v6 = vadd.f32 1e-05, %v4392_v49 }
 0x21d   :  { %2893 = vmatpush.msra.mxu2 %v1189_v0  ;;  %2913 = vmatpush.msra.mxu3 %v1589_v1  ;;  %v4258_v17 = vadd.f32 %v4257_v5, %v4256_v63  ;;  %v4246_v63 = vadd.f32 %v4245_v12, %v4244_v28  ;;  %v915_v0 = vld [vmem:[%s11040_s5 + $0x1320] sm:$0xff]  ;;  %v1790_v5 = vld [vmem:[%s11040_s5 + $0x2e78] sm:$0xff] }
 0x21e   :  { %2857 = vmatmul.f32.vlgmr.msra.gmra.mxu0 %v5619_v16  ;;  %2877 = vmatmul.f32.vlgmr.msra.gmra.mxu1 %v5624_v34  ;;  %5008 = vrsqrt.f32 %v7894_v6  ;;  %v1290_v28 = vld [vmem:[%s11040_s5 + $0x1ed8] sm:$0xff]  ;;  %v315_v49 = vld [vmem:[%s11040_s5 + $0x60] sm:$0xff]  ;;  %vm4493_vm15 = vweird.f32 %v7894_v6 }
 0x21f   :  { %2921 = vmatpush.msrb.mxu0 %v690_v7  ;;  %2941 = vmatpush.msrb.mxu1 %v1090_v58  ;;  %v4259_v29 = vrot.slane %v4258_v17, 1  ;;  %v490_v7 = vld [vmem:[%s11040_s5 + $0x5d8] sm:$0xff]  ;;  %v4391_v10 = vmul.f32 %v4246_v63, %v5427_v3 }
 0x220   :  { %2894 = vmatpush.msra.mxu2 %v1164_v8  ;;  %2914 = vmatpush.msra.mxu3 %v1564_v9  ;;  %v2578_v32 = vpop.f32.mrf.mxu2  ;;  %v2598_v23 = vpop.f32.mrf.mxu3  ;;  %v890_v58 = vld [vmem:[%s11040_s5 + $0x1258] sm:$0xff]  ;;  %v1365_v8 = vld [vmem:[%s11040_s5 + $0x2130] sm:$0xff] }
 0x221   :  { %2922 = vmatpush.msrb.mxu0 %v665_v57  ;;  %2942 = vmatpush.msrb.mxu1 %v1065_v15  ;;  %v2579_v22 = vadd.f32 %v2578_v32, %v2559_v19  ;;  %v4260_v54 = vadd.f32 %v4259_v29, %v4258_v17  ;;  %v1765_v9 = vld [vmem:[%s11040_s5 + $0x2db0] sm:$0xff]  ;;  %v1340_v19 = vld [vmem:[%s11040_s5 + $0x2068] sm:$0xff]  ;;  %v1315_v32 = vld [vmem:[%s11040_s5 + $0x1fa0] sm:$0xff] }
 0x222   :  { %2895 = vmatpush.msra.mxu2 %v1139_v30  ;;  %2915 = vmatpush.msra.mxu3 %v1539_v56  ;;  %v465_v15 = vld [vmem:[%s11040_s5 + $0x510] sm:$0xff]  ;;  %v1740_v30 = vld [vmem:[%s11040_s5 + $0x2ce8] sm:$0xff]  ;;  %v1690_v29 = vld [vmem:[%s11040_s5 + $0x2b58] sm:$0xff] }
 0x223   :  { %2923 = vmatpush.msrb.mxu0 %v640_v61  ;;  %2943 = vmatpush.msrb.mxu1 %v1040_v47  ;;  %v7832_v27 = vadd.f32 %v2598_v23, %v2579_v22  ;;  %v4393_v18 = vmul.f32 %v4260_v54, %v5427_v3  ;;  %v440_v56 = vld [vmem:[%s11040_s5 + $0x448] sm:$0xff]  ;;  %v815_v22 = vld [vmem:[%s11040_s5 + $0x1000] sm:$0xff] }
 0x224   :  { %2896 = vmatpush.msra.mxu2 %v1114_v20  ;;  %2916 = vmatpush.msra.mxu3 %v1514_v21  ;;  %v840_v61 = vld [vmem:[%s11040_s5 + $0x10c8] sm:$0xff]  ;;  %v7937_v20 = vadd.f32 1e-05, %v4391_v10  ;;  %v415_v21 = vld [vmem:[%s11040_s5 + $0x380] sm:$0xff]  ;;  %v7969_v33 = vpop.eup %5008 }
 0x225   :  { %2897 = vmatmul.f32.vlgmr.msra.gmra.mxu2 %v5648_v50  ;;  %2917 = vmatmul.f32.vlgmr.msra.gmra.mxu3 %v5653_v52  ;;  %v4010_v36 = vsel %vm143_vm1, %v7832_v27, 0.0  ;;  %v7909_v57 = vadd.f32 1e-05, %v4393_v18  ;;  %v340_v54 = vld [vmem:[%s11040_s5 + $0x128] sm:$0xff]  ;;  %vm4494_vm14 = vweird.f32 %v7969_v33 }
 0x226   :  { %2924 = vmatpush.msrb.mxu0 %v615_v31  ;;  %2944 = vmatpush.msrb.mxu1 %v1015_v2  ;;  %v4011_v40 = vrot.slane %v4010_v36, 4  ;;  %v390_v31 = vld [vmem:[%s11040_s5 + $0x2b8] sm:$0xff]  ;;  %v1140_v10 = vld [vmem:[%s11040_s5 + $0x1a28] sm:$0xff]  ;;  %vm8121_vm2 = vmor %vm4493_vm15, %vm4494_vm14  ;;  %vm4483_vm6 = vweird.f32 %v7937_v20 }
 0x227   :  { %2961 = vmatpush.msrb.mxu2 %v1490_v13  ;;  %2981 = vmatpush.msrb.mxu3 %v1890_v39  ;;  %5010 = vrsqrt.f32 %v7909_v57  ;;  %v790_v2 = vld [vmem:[%s11040_s5 + $0xf38] sm:$0xff]  ;;  %v1265_v13 = vld [vmem:[%s11040_s5 + $0x1e10] sm:$0xff]  ;;  %vm4503_vm3 = vweird.f32 %v7909_v57 }
 0x228   :  { %2925 = vmatpush.msrb.mxu0 %v590_v44  ;;  %2945 = vmatpush.msrb.mxu1 %v990_v35  ;;  %v4012_v48 = vadd.f32 %v4011_v40, %v4010_v36  ;;  %v1665_v39 = vld [vmem:[%s11040_s5 + $0x2a90] sm:$0xff]  ;;  %5012 = vrsqrt.f32 %v7937_v20 }
 0x229   :  { %2962 = vmatpush.msrb.mxu2 %v1465_v37  ;;  %2982 = vmatpush.msrb.mxu3 %v1865_v38  ;;  %v365_v44 = vld [vmem:[%s11040_s5 + $0x1f0] sm:$0xff]  ;;  %v1240_v37 = vld [vmem:[%s11040_s5 + $0x1d48] sm:$0xff] }
 0x22a   :  { %2926 = vmatpush.msrb.mxu0 %v565_v41  ;;  %2946 = vmatpush.msrb.mxu1 %v965_v42  ;;  %v4013_v14 = vrot.slane %v4012_v48, 2  ;;  %v765_v35 = vld [vmem:[%s11040_s5 + $0xe70] sm:$0xff]  ;;  %v1640_v38 = vld [vmem:[%s11040_s5 + $0x29c8] sm:$0xff]  ;;  %v4488_v42 = vmul.f32 %v7969_v33, %v7894_v6 }
 0x22b   :  { %2963 = vmatpush.msrb.mxu2 %v1440_v55  ;;  %2983 = vmatpush.msrb.mxu3 %v1840_v43  ;;  %v740_v41 = vld [vmem:[%s11040_s5 + $0xda8] sm:$0xff]  ;;  %v1215_v55 = vld [vmem:[%s11040_s5 + $0x1c80] sm:$0xff] }
 0x22c   :  { %2927 = vmatpush.msrb.mxu0 %v540_v51  ;;  %2947 = vmatpush.msrb.mxu1 %v940_v53  ;;  %v4014_v1 = vadd.f32 %v4013_v14, %v4012_v48  ;;  %v1615_v43 = vld [vmem:[%s11040_s5 + $0x2900] sm:$0xff]  ;;  %v4489_v18 = vmul.f32 %v7969_v33, %v4488_v42  ;;  %v541_v42 = vld [vmem:[%s11040_s5 + $0x770] sm:$0xff]  ;;  %v516_v6 = vld [vmem:[%s11040_s5 + $0x6a8] sm:$0xff] }
 0x22d   :  { %2964 = vmatpush.msrb.mxu2 %v1415_v46  ;;  %2984 = vmatpush.msrb.mxu3 %v1815_v62  ;;  %v7985_v40 = vpop.eup %5010  ;;  %v715_v51 = vld [vmem:[%s11040_s5 + $0xce0] sm:$0xff]  ;;  %v1190_v46 = vld [vmem:[%s11040_s5 + $0x1bb8] sm:$0xff] }
 0x22e   :  { %v4015_v59 = vrot.slane %v4014_v1, 1  ;;  %2928 = vmatpush.msrb.mxu0 %v515_v25  ;;  %2948 = vmatpush.msrb.mxu1 %v915_v0  ;;  %v4498_v53 = vmul.f32 %v7985_v40, %v7909_v57  ;;  %v1590_v62 = vld [vmem:[%s11040_s5 + $0x2838] sm:$0xff]  ;;  %v8015_v14 = vpop.eup %5012  ;;  %v691_v25 = vld [vmem:[%s11040_s5 + $0xc20] sm:$0xff]  ;;  %vm4504_vm0 = vweird.f32 %v7985_v40 }
 0x22f   :  { %2965 = vmatpush.msrb.mxu2 %v1390_v4  ;;  %2985 = vmatpush.msrb.mxu3 %v1790_v5  ;;  %v1091_v0 = vld [vmem:[%s11040_s5 + $0x18a0] sm:$0xff]  ;;  %v1165_v4 = vld [vmem:[%s11040_s5 + $0x1af0] sm:$0xff]  ;;  %vm8145_vm4 = vmor %vm4503_vm3, %vm4504_vm0  ;;  %vm4484_vm5 = vweird.f32 %v8015_v14 }
 0x230   :  { %v4016_v17 = vadd.f32 %v4015_v59, %v4014_v1  ;;  %2929 = vmatpush.msrb.mxu0 %v490_v7  ;;  %2949 = vmatpush.msrb.mxu1 %v890_v58  ;;  %v1565_v5 = vld [vmem:[%s11040_s5 + $0x2770] sm:$0xff]  ;;  %v4478_v7 = vmul.f32 %v8015_v14, %v7937_v20  ;;  %v4499_v58 = vmul.f32 %v7985_v40, %v4498_v53  ;;  %v666_v59 = vld [vmem:[%s11040_s5 + $0xb58] sm:$0xff]  ;;  %v491_v57 = vld [vmem:[%s11040_s5 + $0x5e0] sm:$0xff] }
 0x231   :  { %2966 = vmatpush.msrb.mxu2 %v1365_v8  ;;  %2986 = vmatpush.msrb.mxu3 %v1765_v9  ;;  %v1066_v8 = vld [vmem:[%s11040_s5 + $0x17d8] sm:$0xff]  ;;  %vm8191_vm7 = vmor %vm4483_vm6, %vm4484_vm5 }
 0x232   :  { %v4144_v47 = vmul.f32 %v4016_v17, %v5427_v3  ;;  %2930 = vmatpush.msrb.mxu0 %v465_v15  ;;  %2950 = vmatpush.msrb.mxu1 %v865_v24  ;;  %v1540_v15 = vld [vmem:[%s11040_s5 + $0x26a8] sm:$0xff]  ;;  %v4490_v24 = vmul.f32 0.5, %v4489_v18  ;;  %v641_v17 = vld [vmem:[%s11040_s5 + $0xa90] sm:$0xff]  ;;  %v1791_v18 = vld [vmem:[%s11040_s5 + $0x2e80] sm:$0xff] }
 0x233   :  { %2967 = vmatpush.msrb.mxu2 %v1340_v19  ;;  %2987 = vmatpush.msrb.mxu3 %v1740_v30  ;;  %v1041_v19 = vld [vmem:[%s11040_s5 + $0x1710] sm:$0xff] }
 0x234   :  { %v7947_v23 = vsub.f32 %v7832_v27, %v4144_v47  ;;  %2931 = vmatpush.msrb.mxu0 %v440_v56  ;;  %2951 = vmatpush.msrb.mxu1 %v840_v61  ;;  %v1115_v56 = vld [vmem:[%s11040_s5 + $0x1960] sm:$0xff]  ;;  %v4479_v47 = vmul.f32 %v8015_v14, %v4478_v7  ;;  %v1366_v7 = vld [vmem:[%s11040_s5 + $0x2138] sm:$0xff] }
 0x235   :  { %2968 = vmatpush.msrb.mxu2 %v1315_v32  ;;  %2988 = vmatpush.msrb.mxu3 %v1715_v45  ;;  %v1515_v61 = vld [vmem:[%s11040_s5 + $0x25e0] sm:$0xff]  ;;  %v4500_v32 = vmul.f32 0.5, %v4499_v58  ;;  %v1766_v58 = vld [vmem:[%s11040_s5 + $0x2db8] sm:$0xff] }
 0x236   :  { %v4194_v27 = vmul.f32 %v7947_v23, %v7947_v23  ;;  %2932 = vmatpush.msrb.mxu0 %v415_v21  ;;  %2952 = vmatpush.msrb.mxu1 %v815_v22  ;;  %v616_v21 = vld [vmem:[%s11040_s5 + $0x9c8] sm:$0xff] }
 0x237   :  { %2969 = vmatpush.msrb.mxu2 %v1290_v28  ;;  %2989 = vmatpush.msrb.mxu3 %v1690_v29  ;;  %v1016_v22 = vld [vmem:[%s11040_s5 + $0x1648] sm:$0xff]  ;;  %v4491_v28 = vsub.f32 1.5, %v4490_v24  ;;  %v1491_v29 = vld [vmem:[%s11040_s5 + $0x2520] sm:$0xff]  ;;  %v1741_v24 = vld [vmem:[%s11040_s5 + $0x2cf0] sm:$0xff] }
 0x238   :  { %v4261_v36 = vsel %vm143_vm1, %v4194_v27, 0.0  ;;  %2933 = vmatpush.msrb.mxu0 %v390_v31  ;;  %2953 = vmatpush.msrb.mxu1 %v790_v2  ;;  %v1891_v31 = vld [vmem:[%s11040_s5 + $0x31a0] sm:$0xff] }
 0x239   :  { %v4262_v12 = vrot.slane %v4261_v36, 4  ;;  %2970 = vmatpush.msrb.mxu2 %v1265_v13  ;;  %2990 = vmatpush.msrb.mxu3 %v1665_v39  ;;  %v591_v27 = vld [vmem:[%s11040_s5 + $0x900] sm:$0xff]  ;;  %v4480_v39 = vmul.f32 0.5, %v4479_v47 }
 0x23a   :  { %2934 = vmatpush.msrb.mxu0 %v365_v44  ;;  %2954 = vmatpush.msrb.mxu1 %v765_v35  ;;  %v991_v13 = vld [vmem:[%s11040_s5 + $0x1580] sm:$0xff]  ;;  %v4501_v44 = vsub.f32 1.5, %v4500_v32  ;;  %v1466_v35 = vld [vmem:[%s11040_s5 + $0x2458] sm:$0xff]  ;;  %v1716_v32 = vld [vmem:[%s11040_s5 + $0x2c28] sm:$0xff] }
 0x23b   :  { %v4263_v48 = vadd.f32 %v4262_v12, %v4261_v36  ;;  %2971 = vmatpush.msrb.mxu2 %v1240_v37  ;;  %2991 = vmatpush.msrb.mxu3 %v1640_v38  ;;  %v1866_v36 = vld [vmem:[%s11040_s5 + $0x30d8] sm:$0xff]  ;;  %v4492_v12 = vmul.f32 %v7969_v33, %v4491_v28  ;;  %v816_v28 = vld [vmem:[%s11040_s5 + $0x1008] sm:$0xff] }
 0x23c   :  { %2935 = vmatpush.msrb.mxu0 %v340_v54  ;;  %2955 = vmatpush.msrb.mxu1 %v740_v41  ;;  %v566_v37 = vld [vmem:[%s11040_s5 + $0x838] sm:$0xff]  ;;  %v1441_v54 = vld [vmem:[%s11040_s5 + $0x2390] sm:$0xff] }
 0x23d   :  { %v4264_v63 = vrot.slane %v4263_v48, 2  ;;  %2972 = vmatpush.msrb.mxu2 %v1215_v55  ;;  %2992 = vmatpush.msrb.mxu3 %v1615_v43  ;;  %v966_v38 = vld [vmem:[%s11040_s5 + $0x14b8] sm:$0xff]  ;;  %v1841_v41 = vld [vmem:[%s11040_s5 + $0x3010] sm:$0xff]  ;;  %v4481_v43 = vsub.f32 1.5, %v4480_v39 }
 0x23e   :  { %2936 = vmatpush.msrb.mxu0 %v315_v49  ;;  %2956 = vmatpush.msrb.mxu1 %v715_v51  ;;  %v941_v55 = vld [vmem:[%s11040_s5 + $0x13f0] sm:$0xff]  ;;  %v1416_v49 = vld [vmem:[%s11040_s5 + $0x22c8] sm:$0xff] }
 0x23f   :  { %v4265_v1 = vadd.f32 %v4264_v63, %v4263_v48  ;;  %2973 = vmatpush.msrb.mxu2 %v1190_v46  ;;  %2993 = vmatpush.msrb.mxu3 %v1590_v62  ;;  %v4502_v48 = vmul.f32 %v7985_v40, %v4501_v44  ;;  %v1816_v51 = vld [vmem:[%s11040_s5 + $0x2f48] sm:$0xff]  ;;  %v4496_v62 = vsel %vm8121_vm2, %v7969_v33, %v4492_v12  ;;  %v1391_v63 = vld [vmem:[%s11040_s5 + $0x2200] sm:$0xff] }
 0x240   :  { %2937 = vmatmul.f32.vlgmr.msrb.gmra.mxu0 %v5619_v16  ;;  %2957 = vmatmul.f32.vlgmr.msrb.gmra.mxu1 %v5624_v34  ;;  %v916_v46 = vld [vmem:[%s11040_s5 + $0x1328] sm:$0xff]  ;;  %v891_v33 = vld [vmem:[%s11040_s5 + $0x1260] sm:$0xff] }
 0x241   :  { %v4266_v9 = vrot.slane %v4265_v1, 1  ;;  %3001 = vmatpush.msra.mxu0 %v691_v25  ;;  %3021 = vmatpush.msra.mxu1 %v1091_v0  ;;  %v8280_v0 = vpop.f32.mrf.mxu1 }
 0x242   :  { %2974 = vmatpush.msrb.mxu2 %v1165_v4  ;;  %2994 = vmatpush.msrb.mxu3 %v1565_v5  ;;  %v4506_v4 = vsel %vm8145_vm4, %v7985_v40, %v4502_v48 }
 0x243   :  { %v4267_v30 = vadd.f32 %v4266_v9, %v4265_v1  ;;  %3002 = vmatpush.msra.mxu0 %v666_v59  ;;  %3022 = vmatpush.msra.mxu1 %v1066_v8  ;;  %v4482_v1 = vmul.f32 %v8015_v14, %v4481_v43  ;;  %v4692_v59 = vmul.f32 %v4496_v62, %v7642_v60  ;;  %v8172_v8 = vld [vmem:[%s11045_s7] sm:$0xff]  ;;  %v466_v9 = vld [vmem:[%s11040_s5 + $0x518] sm:$0xff] }
 0x244   :  { %2975 = vmatpush.msrb.mxu2 %v1140_v10  ;;  %2995 = vmatpush.msrb.mxu3 %v1540_v15  ;;  %v4725_v40 = vperm.slane %v8172_v8, 5  ;;  %v866_v10 = vld [vmem:[%s11040_s5 + $0x1198] sm:$0xff]  ;;  %v1341_v15 = vld [vmem:[%s11040_s5 + $0x2070] sm:$0xff]  ;;  %v4693_v20 = vmul.f32 %v4506_v4, %v7727_v26  ;;  %v1316_v26 = vld [vmem:[%s11040_s5 + $0x1fa8] sm:$0xff]  ;;  %v4724_v44 = vperm.slane %v8172_v8, 4 }
 0x245   :  { %v4394_v45 = vmul.f32 %v4267_v30, %v5427_v3  ;;  %3003 = vmatpush.msra.mxu0 %v641_v17  ;;  %3023 = vmatpush.msra.mxu1 %v1041_v19  ;;  %v4726_v19 = vperm.slane %v8172_v8, 6  ;;  %v441_v30 = vld [vmem:[%s11040_s5 + $0x450] sm:$0xff] }
 0x246   :  { %2976 = vmatpush.msrb.mxu2 %v1115_v56  ;;  %2996 = vmatpush.msrb.mxu3 %v1515_v61  ;;  %v841_v56 = vld [vmem:[%s11040_s5 + $0x10d0] sm:$0xff]  ;;  %v4486_v61 = vsel %vm8191_vm7, %v8015_v14, %v4482_v1  ;;  %v416_v14 = vld [vmem:[%s11040_s5 + $0x388] sm:$0xff] }
 0x247   :  { %v8073_v2 = vadd.f32 1e-05, %v4394_v45  ;;  %2977 = vmatmul.f32.vlgmr.msrb.gmra.mxu2 %v5648_v50  ;;  %2997 = vmatmul.f32.vlgmr.msrb.gmra.mxu3 %v5653_v52  ;;  %v4775_v45 = vmul.f32 %v4725_v40, %v4692_v59  ;;  %v4691_v39 = vmul.f32 %v4486_v61, %v7684_v11  ;;  %v1266_v11 = vld [vmem:[%s11040_s5 + $0x1e18] sm:$0xff]  ;;  %v1191_v59 = vld [vmem:[%s11040_s5 + $0x1bc0] sm:$0xff]  ;;  %v8315_v61 = vpop.f32.mrf.mxu3 }
 0x248   :  { %3004 = vmatpush.msra.mxu0 %v616_v21  ;;  %3024 = vmatpush.msra.mxu1 %v1016_v22  ;;  %v8215_v21 = vld [vmem:[%s11046_s8] sm:$0xff] }
 0x249   :  { %5014 = vrsqrt.f32 %v8073_v2  ;;  %3041 = vmatpush.msra.mxu2 %v1491_v29  ;;  %3061 = vmatpush.msra.mxu3 %v1891_v31  ;;  %v4808_v22 = vperm.slane %v8215_v21, 5  ;;  %v8225_v31 = vpop.f32.mrf.mxu0  ;;  %vm4513_vm9 = vweird.f32 %v8073_v2  ;;  %v4807_v43 = vperm.slane %v8215_v21, 4 }
 0x24a   :  { %3005 = vmatpush.msra.mxu0 %v591_v27  ;;  %3025 = vmatpush.msra.mxu1 %v991_v13  ;;  %v1291_v27 = vld [vmem:[%s11040_s5 + $0x1ee0] sm:$0xff]  ;;  %v4774_v53 = vmul.f32 %v4724_v44, %v4691_v39  ;;  %v4810_v62 = vperm.slane %v8215_v21, 7 }
 0x24b   :  { %3042 = vmatpush.msra.mxu2 %v1466_v35  ;;  %3062 = vmatpush.msra.mxu3 %v1866_v36  ;;  %v1691_v13 = vld [vmem:[%s11040_s5 + $0x2b60] sm:$0xff]  ;;  %v4776_v35 = vmul.f32 %v4726_v19, %v4693_v20  ;;  %v4809_v36 = vperm.slane %v8215_v21, 6 }
 0x24c   :  { %3006 = vmatpush.msra.mxu0 %v566_v37  ;;  %3026 = vmatpush.msra.mxu1 %v966_v38  ;;  %v391_v37 = vld [vmem:[%s11040_s5 + $0x2c0] sm:$0xff] }
 0x24d   :  { %3043 = vmatpush.msra.mxu2 %v1441_v54  ;;  %3063 = vmatpush.msra.mxu3 %v1841_v41  ;;  %v791_v38 = vld [vmem:[%s11040_s5 + $0xf40] sm:$0xff]  ;;  %v1666_v54 = vld [vmem:[%s11040_s5 + $0x2a98] sm:$0xff]  ;;  %v4858_v41 = vadd.f32 %v4808_v22, %v4775_v45 }
 0x24e   :  { %3007 = vmatpush.msra.mxu0 %v541_v42  ;;  %3027 = vmatpush.msra.mxu1 %v941_v55  ;;  %v4727_v42 = vperm.slane %v8172_v8, 7  ;;  %v766_v55 = vld [vmem:[%s11040_s5 + $0xe78] sm:$0xff]  ;;  %v1591_v8 = vld [vmem:[%s11040_s5 + $0x2840] sm:$0xff] }
 0x24f   :  { %v8141_v25 = vpop.eup %5014  ;;  %3044 = vmatpush.msra.mxu2 %v1416_v49  ;;  %3064 = vmatpush.msra.mxu3 %v1816_v51  ;;  %v1241_v49 = vld [vmem:[%s11040_s5 + $0x1d50] sm:$0xff]  ;;  %v4883_v1 = vmax.f32 %v4858_v41, 0.0 }
 0x250   :  { %v4508_v5 = vmul.f32 %v8141_v25, %v8073_v2  ;;  %3008 = vmatpush.msra.mxu0 %v516_v6  ;;  %3028 = vmatpush.msra.mxu1 %v916_v46  ;;  %vm4514_vm8 = vweird.f32 %v8141_v25  ;;  %v366_v2 = vld [vmem:[%s11040_s5 + $0x1f8] sm:$0xff]  ;;  %v1641_v51 = vld [vmem:[%s11040_s5 + $0x29d0] sm:$0xff]  ;;  %v4859_v6 = vadd.f32 %v4809_v36, %v4776_v35 }
 0x251   :  { %3045 = vmatpush.msra.mxu2 %v1391_v63  ;;  %3065 = vmatpush.msra.mxu3 %v1791_v18  ;;  %vm4515_vm10 = vmor %vm4513_vm9, %vm4514_vm8  ;;  %v341_v63 = vld [vmem:[%s11040_s5 + $0x130] sm:$0xff]  ;;  %v4930_v17 = vrot.slane %v4883_v1, 6 }
 0x252   :  { %v4509_v60 = vmul.f32 %v8141_v25, %v4508_v5  ;;  %3009 = vmatpush.msra.mxu0 %v491_v57  ;;  %3029 = vmatpush.msra.mxu1 %v891_v33  ;;  %v741_v18 = vld [vmem:[%s11040_s5 + $0xdb0] sm:$0xff]  ;;  %v1216_v57 = vld [vmem:[%s11040_s5 + $0x1c88] sm:$0xff] }
 0x253   :  { %3046 = vmatpush.msra.mxu2 %v1366_v7  ;;  %3066 = vmatpush.msra.mxu3 %v1766_v58  ;;  %v1616_v33 = vld [vmem:[%s11040_s5 + $0x2908] sm:$0xff]  ;;  %v1017_v41 = vld [vmem:[%s11040_s5 + $0x1650] sm:$0xff] }
 0x254   :  { %v4510_v47 = vmul.f32 0.5, %v4509_v60  ;;  %3010 = vmatpush.msra.mxu0 %v466_v9  ;;  %3030 = vmatpush.msra.mxu1 %v866_v10  ;;  %v316_v5 = vld [vmem:[%s11040_s5 + $0x68] sm:$0xff]  ;;  %v4857_v9 = vadd.f32 %v4807_v43, %v4774_v53  ;;  %v4884_v10 = vmax.f32 %v4859_v6, 0.0  ;;  %v567_v6 = vld [vmem:[%s11040_s5 + $0x840] sm:$0xff]  ;;  %v1417_v1 = vld [vmem:[%s11040_s5 + $0x22d0] sm:$0xff] }
 0x255   :  { %3047 = vmatpush.msra.mxu2 %v1341_v15  ;;  %3067 = vmatpush.msra.mxu3 %v1741_v24  ;;  %v716_v7 = vld [vmem:[%s11040_s5 + $0xce8] sm:$0xff] }
 0x256   :  { %v4511_v29 = vsub.f32 1.5, %v4510_v47  ;;  %3011 = vmatpush.msra.mxu0 %v441_v30  ;;  %3031 = vmatpush.msra.mxu1 %v841_v56  ;;  %v692_v15 = vld [vmem:[%s11040_s5 + $0xc28] sm:$0xff]  ;;  %v1166_v30 = vld [vmem:[%s11040_s5 + $0x1af8] sm:$0xff]  ;;  %v667_v47 = vld [vmem:[%s11040_s5 + $0xb60] sm:$0xff]  ;;  %v4931_v45 = vrot.slane %v4884_v10, 4 }
 0x257   :  { %3048 = vmatpush.msra.mxu2 %v1316_v26  ;;  %3068 = vmatpush.msra.mxu3 %v1716_v32  ;;  %v2698_v40 = vpop.f32.mrf.mxu0  ;;  %v1092_v24 = vld [vmem:[%s11040_s5 + $0x18a8] sm:$0xff]  ;;  %v1566_v56 = vld [vmem:[%s11040_s5 + $0x2778] sm:$0xff]  ;;  %v1067_v26 = vld [vmem:[%s11040_s5 + $0x17e0] sm:$0xff]  ;;  %v4882_v32 = vmax.f32 %v4857_v9, 0.0 }
 0x258   :  { %v4512_v12 = vmul.f32 %v8141_v25, %v4511_v29  ;;  %3012 = vmatpush.msra.mxu0 %v416_v14  ;;  %3032 = vmatpush.msra.mxu1 %v816_v28  ;;  %v1141_v14 = vld [vmem:[%s11040_s5 + $0x1a30] sm:$0xff]  ;;  %v2718_v29 = vpop.f32.mrf.mxu1  ;;  %v992_v43 = vld [vmem:[%s11040_s5 + $0x1588] sm:$0xff] }
 0x259   :  { %3049 = vmatpush.msra.mxu2 %v1291_v27  ;;  %3069 = vmatpush.msra.mxu3 %v1691_v13  ;;  %v1541_v28 = vld [vmem:[%s11040_s5 + $0x26b0] sm:$0xff]  ;;  %v642_v27 = vld [vmem:[%s11040_s5 + $0xa98] sm:$0xff]  ;;  %v4950_v44 = vsel %vm143_vm1, %v4882_v32, %v4930_v17  ;;  %v892_v9 = vld [vmem:[%s11040_s5 + $0x1268] sm:$0xff] }
 0x25a   :  { %v4516_v48 = vsel %vm4515_vm10, %v8141_v25, %v4512_v12  ;;  %3013 = vmatpush.msra.mxu0 %v391_v37  ;;  %3033 = vmatpush.msra.mxu1 %v791_v38  ;;  %v8278_v25 = vld [vmem:[%s11044_s6 + $0x8] sm:$0xff]  ;;  %v1042_v13 = vld [vmem:[%s11040_s5 + $0x1718] sm:$0xff]  ;;  %v867_v17 = vld [vmem:[%s11040_s5 + $0x11a0] sm:$0xff] }
 0x25b   :  { %v4694_v46 = vmul.f32 %v4516_v48, %v7947_v23  ;;  %3050 = vmatpush.msra.mxu2 %v1266_v11  ;;  %3070 = vmatpush.msra.mxu3 %v1666_v54  ;;  %v8282_v23 = vpop.f32.mrf.mxu2  ;;  %v1920_v58 = vperm.slane %v8278_v25, 1  ;;  %v1919_v22 = vperm.slane %v8278_v25, 0  ;;  %v1116_v37 = vld [vmem:[%s11040_s5 + $0x1968] sm:$0xff]  ;;  %v617_v54 = vld [vmem:[%s11040_s5 + $0x9d0] sm:$0xff]  ;;  %v1467_v48 = vld [vmem:[%s11040_s5 + $0x2460] sm:$0xff] }
 0x25c   :  { %3014 = vmatpush.msra.mxu0 %v366_v2  ;;  %3034 = vmatpush.msra.mxu1 %v766_v55  ;;  %v1516_v38 = vld [vmem:[%s11040_s5 + $0x25e8] sm:$0xff]  ;;  %v1717_v32 = vld [vmem:[%s11040_s5 + $0x2c30] sm:$0xff] }
 0x25d   :  { %v4777_v4 = vmul.f32 %v4727_v42, %v4694_v46  ;;  %3051 = vmatpush.msra.mxu2 %v1241_v49  ;;  %3071 = vmatpush.msra.mxu3 %v1641_v51  ;;  %v2699_v19 = vadd.f32 %v2698_v40, %v1920_v58  ;;  %v2619_v11 = vadd.f32 %v8225_v31, %v1919_v22  ;;  %v1492_v2 = vld [vmem:[%s11040_s5 + $0x2528] sm:$0xff]  ;;  %v1867_v49 = vld [vmem:[%s11040_s5 + $0x30e0] sm:$0xff] }
 0x25e   :  { %3015 = vmatpush.msra.mxu0 %v341_v63  ;;  %3035 = vmatpush.msra.mxu1 %v741_v18  ;;  %v1892_v31 = vld [vmem:[%s11040_s5 + $0x31a8] sm:$0xff]  ;;  %v967_v46 = vld [vmem:[%s11040_s5 + $0x14c0] sm:$0xff]  ;;  %v1442_v63 = vld [vmem:[%s11040_s5 + $0x2398] sm:$0xff] }
 0x25f   :  { %v4860_v60 = vadd.f32 %v4810_v62, %v4777_v4  ;;  %3052 = vmatpush.msra.mxu2 %v1216_v57  ;;  %3072 = vmatpush.msra.mxu3 %v1616_v33  ;;  %v2719_v36 = vadd.f32 %v2718_v29, %v2699_v19  ;;  %v592_v55 = vld [vmem:[%s11040_s5 + $0x908] sm:$0xff]  ;;  %v2639_v53 = vadd.f32 %v8280_v0, %v2619_v11  ;;  %v1842_v18 = vld [vmem:[%s11040_s5 + $0x3018] sm:$0xff] }
 0x260   :  { %3016 = vmatpush.msra.mxu0 %v316_v5  ;;  %3036 = vmatpush.msra.mxu1 %v716_v7  ;;  %v542_v57 = vld [vmem:[%s11040_s5 + $0x778] sm:$0xff]  ;;  %v517_v5 = vld [vmem:[%s11040_s5 + $0x6b0] sm:$0xff]  ;;  %v1392_v58 = vld [vmem:[%s11040_s5 + $0x2208] sm:$0xff] }
 0x261   :  { %v4885_v20 = vmax.f32 %v4860_v60, 0.0  ;;  %3053 = vmatpush.msra.mxu2 %v1191_v59  ;;  %3073 = vmatpush.msra.mxu3 %v1591_v8  ;;  %v2659_v0 = vadd.f32 %v8282_v23, %v2639_v53  ;;  %v942_v33 = vld [vmem:[%s11040_s5 + $0x13f8] sm:$0xff]  ;;  %v1817_v23 = vld [vmem:[%s11040_s5 + $0x2f50] sm:$0xff]  ;;  %v1792_v59 = vld [vmem:[%s11040_s5 + $0x2e88] sm:$0xff] }
 0x262   :  { %3017 = vmatmul.f32.vlgmr.msra.gmra.mxu0 %v5619_v16  ;;  %3037 = vmatmul.f32.vlgmr.msra.gmra.mxu1 %v5624_v34  ;;  %v917_v7 = vld [vmem:[%s11040_s5 + $0x1330] sm:$0xff]  ;;  %v492_v40 = vld [vmem:[%s11040_s5 + $0x5e8] sm:$0xff]  ;;  %v1367_v60 = vld [vmem:[%s11040_s5 + $0x2140] sm:$0xff] }
 0x263   :  { %v4932_v21 = vrot.slane %v4885_v20, 2  ;;  %3081 = vmatpush.msrb.mxu0 %v692_v15  ;;  %3101 = vmatpush.msrb.mxu1 %v1092_v24  ;;  %v8420_v8 = vadd.f32 %v8315_v61, %v2659_v0  ;;  %v1767_v15 = vld [vmem:[%s11040_s5 + $0x2dc0] sm:$0xff]  ;;  %v1342_v20 = vld [vmem:[%s11040_s5 + $0x2078] sm:$0xff]  ;;  %v392_v29 = vld [vmem:[%s11040_s5 + $0x2c8] sm:$0xff] }
 0x264   :  { %3054 = vmatpush.msra.mxu2 %v1166_v30  ;;  %3074 = vmatpush.msra.mxu3 %v1566_v56  ;;  %v2738_v39 = vpop.f32.mrf.mxu2  ;;  %v2758_v51 = vpop.f32.mrf.mxu3  ;;  %v467_v24 = vld [vmem:[%s11040_s5 + $0x520] sm:$0xff]  ;;  %v1742_v19 = vld [vmem:[%s11040_s5 + $0x2cf8] sm:$0xff]  ;;  %v1592_v53 = vld [vmem:[%s11040_s5 + $0x2848] sm:$0xff] }
 0x265   :  { %v4951_v35 = vsel %vm4946_vm12, %v4931_v45, %v4932_v21  ;;  %3082 = vmatpush.msrb.mxu0 %v667_v47  ;;  %3102 = vmatpush.msrb.mxu1 %v1067_v26  ;;  %v2739_v42 = vadd.f32 %v2738_v39, %v2719_v36  ;;  %v4017_v30 = vsel %vm143_vm1, %v8420_v8, 0.0  ;;  %v442_v56 = vld [vmem:[%s11040_s5 + $0x458] sm:$0xff]  ;;  %v1317_v26 = vld [vmem:[%s11040_s5 + $0x1fb0] sm:$0xff]  ;;  %v1267_v39 = vld [vmem:[%s11040_s5 + $0x1e20] sm:$0xff] }
 0x266   :  { %v4952_v12 = vsel %vm4948_vm13, %v4950_v44, %v4951_v35  ;;  %3055 = vmatpush.msra.mxu2 %v1141_v14  ;;  %3075 = vmatpush.msra.mxu3 %v1541_v28  ;;  %v842_v61 = vld [vmem:[%s11040_s5 + $0x10d8] sm:$0xff]  ;;  %v417_v45 = vld [vmem:[%s11040_s5 + $0x390] sm:$0xff]  ;;  %v4018_v22 = vrot.slane %v4017_v30, 4  ;;  %v1292_v14 = vld [vmem:[%s11040_s5 + $0x1ee8] sm:$0xff] }
 0x267   :  { %4972 = vst [vmem:[%s11047_s9 + $0x8] sm:$0xff] %v4952_v12  ;;  %3083 = vmatpush.msrb.mxu0 %v642_v27  ;;  %3103 = vmatpush.msrb.mxu1 %v1042_v13  ;;  %v8384_v62 = vadd.f32 %v2758_v51, %v2739_v42  ;;  %v817_v21 = vld [vmem:[%s11040_s5 + $0x1010] sm:$0xff]  ;;  %v1692_v28 = vld [vmem:[%s11040_s5 + $0x2b68] sm:$0xff]  ;;  %v1667_v44 = vld [vmem:[%s11040_s5 + $0x2aa0] sm:$0xff] }
 0x268   :  { %3056 = vmatpush.msra.mxu2 %v1116_v37  ;;  %3076 = vmatpush.msra.mxu3 %v1516_v38  ;;  %v792_v27 = vld [vmem:[%s11040_s5 + $0xf48] sm:$0xff]  ;;  %v367_v35 = vld [vmem:[%s11040_s5 + $0x200] sm:$0xff]  ;;  %v4019_v37 = vadd.f32 %v4018_v22, %v4017_v30  ;;  %v1242_v38 = vld [vmem:[%s11040_s5 + $0x1d58] sm:$0xff] }
 0x269   :  { %3057 = vmatmul.f32.vlgmr.msra.gmra.mxu2 %v5648_v50  ;;  %3077 = vmatmul.f32.vlgmr.msra.gmra.mxu3 %v5653_v52  ;;  %v4024_v4 = vsel %vm143_vm1, %v8384_v62, 0.0  ;;  %v767_v36 = vld [vmem:[%s11040_s5 + $0xe80] sm:$0xff]  ;;  %v1642_v12 = vld [vmem:[%s11040_s5 + $0x29d8] sm:$0xff]  ;;  %v1192_v51 = vld [vmem:[%s11040_s5 + $0x1bc8] sm:$0xff] }
 0x26a   :  { %3084 = vmatpush.msrb.mxu0 %v617_v54  ;;  %3104 = vmatpush.msrb.mxu1 %v1017_v41  ;;  %v4025_v10 = vrot.slane %v4024_v4, 4  ;;  %v342_v11 = vld [vmem:[%s11040_s5 + $0x138] sm:$0xff]  ;;  %v1921_v41 = vperm.slane %v8278_v25, 2  ;;  %v1167_v0 = vld [vmem:[%s11040_s5 + $0x1b00] sm:$0xff] }
 0x26b   :  { %3121 = vmatpush.msrb.mxu2 %v1492_v2  ;;  %3141 = vmatpush.msrb.mxu3 %v1892_v31  ;;  %v742_v54 = vld [vmem:[%s11040_s5 + $0xdb8] sm:$0xff]  ;;  %v1217_v2 = vld [vmem:[%s11040_s5 + $0x1c90] sm:$0xff] }
 0x26c   :  { %3085 = vmatpush.msrb.mxu0 %v592_v55  ;;  %3105 = vmatpush.msrb.mxu1 %v992_v43  ;;  %v4026_v47 = vadd.f32 %v4025_v10, %v4024_v4  ;;  %v1617_v31 = vld [vmem:[%s11040_s5 + $0x2910] sm:$0xff]  ;;  %v1068_v4 = vld [vmem:[%s11040_s5 + $0x17e8] sm:$0xff]  ;;  %v1018_v30 = vld [vmem:[%s11040_s5 + $0x1658] sm:$0xff] }
 0x26d   :  { %3122 = vmatpush.msrb.mxu2 %v1467_v48  ;;  %3142 = vmatpush.msrb.mxu3 %v1867_v49  ;;  %v317_v43 = vld [vmem:[%s11040_s5 + $0x70] sm:$0xff]  ;;  %v4020_v49 = vrot.slane %v4019_v37, 2 }
 0x26e   :  { %3086 = vmatpush.msrb.mxu0 %v567_v6  ;;  %3106 = vmatpush.msrb.mxu1 %v967_v46  ;;  %v4027_v13 = vrot.slane %v4026_v47, 2  ;;  %v717_v48 = vld [vmem:[%s11040_s5 + $0xcf0] sm:$0xff] }
 0x26f   :  { %3123 = vmatpush.msrb.mxu2 %v1442_v63  ;;  %3143 = vmatpush.msrb.mxu3 %v1842_v18  ;;  %v693_v63 = vld [vmem:[%s11040_s5 + $0xc30] sm:$0xff] }
 0x270   :  { %3087 = vmatpush.msrb.mxu0 %v542_v57  ;;  %3107 = vmatpush.msrb.mxu1 %v942_v33  ;;  %v4028_v42 = vadd.f32 %v4027_v13, %v4026_v47  ;;  %v1093_v18 = vld [vmem:[%s11040_s5 + $0x18b0] sm:$0xff]  ;;  %v1567_v57 = vld [vmem:[%s11040_s5 + $0x2780] sm:$0xff]  ;;  %v4021_v33 = vadd.f32 %v4020_v49, %v4019_v37  ;;  %v968_v13 = vld [vmem:[%s11040_s5 + $0x14c8] sm:$0xff] }
 0x271   :  { %3124 = vmatpush.msrb.mxu2 %v1417_v1  ;;  %3144 = vmatpush.msrb.mxu3 %v1817_v23  ;;  %v668_v23 = vld [vmem:[%s11040_s5 + $0xb68] sm:$0xff]  ;;  %v1493_v47 = vld [vmem:[%s11040_s5 + $0x2530] sm:$0xff]  ;;  %v543_v37 = vld [vmem:[%s11040_s5 + $0x780] sm:$0xff] }
 0x272   :  { %3088 = vmatpush.msrb.mxu0 %v517_v5  ;;  %3108 = vmatpush.msrb.mxu1 %v917_v7  ;;  %v4029_v46 = vrot.slane %v4028_v42, 1  ;;  %v1142_v7 = vld [vmem:[%s11040_s5 + $0x1a38] sm:$0xff]  ;;  %v893_v49 = vld [vmem:[%s11040_s5 + $0x1270] sm:$0xff] }
 0x273   :  { %3125 = vmatpush.msrb.mxu2 %v1392_v58  ;;  %3145 = vmatpush.msrb.mxu3 %v1792_v59  ;;  %v1542_v58 = vld [vmem:[%s11040_s5 + $0x26b8] sm:$0xff] }
 0x274   :  { %3089 = vmatpush.msrb.mxu0 %v492_v40  ;;  %3109 = vmatpush.msrb.mxu1 %v892_v9  ;;  %v4030_v59 = vadd.f32 %v4029_v46, %v4028_v42  ;;  %v643_v40 = vld [vmem:[%s11040_s5 + $0xaa0] sm:$0xff]  ;;  %v918_v42 = vld [vmem:[%s11040_s5 + $0x1338] sm:$0xff]  ;;  %v1768_v46 = vld [vmem:[%s11040_s5 + $0x2dc8] sm:$0xff] }
 0x275   :  { %3126 = vmatpush.msrb.mxu2 %v1367_v60  ;;  %3146 = vmatpush.msrb.mxu3 %v1767_v15  ;;  %v1043_v9 = vld [vmem:[%s11040_s5 + $0x1720] sm:$0xff]  ;;  %v1117_v60 = vld [vmem:[%s11040_s5 + $0x1970] sm:$0xff] }
 0x276   :  { %3090 = vmatpush.msrb.mxu0 %v467_v24  ;;  %3110 = vmatpush.msrb.mxu1 %v867_v17  ;;  %v1517_v15 = vld [vmem:[%s11040_s5 + $0x25f0] sm:$0xff]  ;;  %v4022_v17 = vrot.slane %v4021_v33, 1 }
 0x277   :  { %3127 = vmatpush.msrb.mxu2 %v1342_v20  ;;  %3147 = vmatpush.msrb.mxu3 %v1742_v19  ;;  %v618_v19 = vld [vmem:[%s11040_s5 + $0x9d8] sm:$0xff] }
 0x278   :  { %3091 = vmatpush.msrb.mxu0 %v442_v56  ;;  %3111 = vmatpush.msrb.mxu1 %v842_v61  ;;  %v4146_v61 = vmul.f32 %v4030_v59, %v5427_v3  ;;  %v4023_v22 = vadd.f32 %v4022_v17, %v4021_v33  ;;  %v1743_v33 = vld [vmem:[%s11040_s5 + $0x2d00] sm:$0xff]  ;;  %v793_v17 = vld [vmem:[%s11040_s5 + $0xf50] sm:$0xff] }
 0x279   :  { %3128 = vmatpush.msrb.mxu2 %v1317_v26  ;;  %3148 = vmatpush.msrb.mxu3 %v1717_v32  ;;  %v2778_v55 = vpop.f32.mrf.mxu0  ;;  %v2798_v1 = vpop.f32.mrf.mxu1  ;;  %v1893_v26 = vld [vmem:[%s11040_s5 + $0x31b0] sm:$0xff] }
 0x27a   :  { %3092 = vmatpush.msrb.mxu0 %v417_v45  ;;  %3112 = vmatpush.msrb.mxu1 %v817_v21  ;;  %v2779_v6 = vadd.f32 %v2778_v55, %v1921_v41  ;;  %v593_v32 = vld [vmem:[%s11040_s5 + $0x910] sm:$0xff]  ;;  %v518_v41 = vld [vmem:[%s11040_s5 + $0x6b8] sm:$0xff] }
 0x27b   :  { %3129 = vmatpush.msrb.mxu2 %v1292_v14  ;;  %3149 = vmatpush.msrb.mxu3 %v1692_v28  ;;  %v993_v45 = vld [vmem:[%s11040_s5 + $0x1590] sm:$0xff]  ;;  %v1468_v14 = vld [vmem:[%s11040_s5 + $0x2468] sm:$0xff] }
 0x27c   :  { %3093 = vmatpush.msrb.mxu0 %v392_v29  ;;  %3113 = vmatpush.msrb.mxu1 %v792_v27  ;;  %v2799_v5 = vadd.f32 %v2798_v1, %v2779_v6  ;;  %v1868_v28 = vld [vmem:[%s11040_s5 + $0x30e8] sm:$0xff]  ;;  %v1393_v55 = vld [vmem:[%s11040_s5 + $0x2210] sm:$0xff]  ;;  %v443_v1 = vld [vmem:[%s11040_s5 + $0x460] sm:$0xff] }
 0x27d   :  { %3130 = vmatpush.msrb.mxu2 %v1267_v39  ;;  %3150 = vmatpush.msrb.mxu3 %v1667_v44  ;;  %v568_v27 = vld [vmem:[%s11040_s5 + $0x848] sm:$0xff]  ;;  %v8597_v39 = vsub.f32 %v8384_v62, %v4146_v61  ;;  %v1443_v44 = vld [vmem:[%s11040_s5 + $0x23a0] sm:$0xff] }
 0x27e   :  { %3094 = vmatpush.msrb.mxu0 %v367_v35  ;;  %3114 = vmatpush.msrb.mxu1 %v767_v36  ;;  %v1843_v35 = vld [vmem:[%s11040_s5 + $0x3020] sm:$0xff]  ;;  %v1368_v6 = vld [vmem:[%s11040_s5 + $0x2148] sm:$0xff] }
 0x27f   :  { %3131 = vmatpush.msrb.mxu2 %v1242_v38  ;;  %3151 = vmatpush.msrb.mxu3 %v1642_v12  ;;  %v943_v62 = vld [vmem:[%s11040_s5 + $0x1400] sm:$0xff]  ;;  %v4145_v38 = vmul.f32 %v4023_v22, %v5427_v3  ;;  %v1418_v12 = vld [vmem:[%s11040_s5 + $0x22d8] sm:$0xff] }
 0x280   :  { %3095 = vmatpush.msrb.mxu0 %v342_v11  ;;  %3115 = vmatpush.msrb.mxu1 %v742_v54  ;;  %v1818_v11 = vld [vmem:[%s11040_s5 + $0x2f58] sm:$0xff] }
 0x281   :  { %3132 = vmatpush.msrb.mxu2 %v1217_v2  ;;  %3152 = vmatpush.msrb.mxu3 %v1617_v31  ;;  %v4196_v2 = vmul.f32 %v8597_v39, %v8597_v39 }
 0x282   :  { %3096 = vmatpush.msrb.mxu0 %v317_v43  ;;  %3116 = vmatpush.msrb.mxu1 %v717_v48  ;;  %v1793_v43 = vld [vmem:[%s11040_s5 + $0x2e90] sm:$0xff] }
 0x283   :  { %3133 = vmatpush.msrb.mxu2 %v1192_v51  ;;  %3153 = vmatpush.msrb.mxu3 %v1592_v53  ;;  %v493_v48 = vld [vmem:[%s11040_s5 + $0x5f0] sm:$0xff]  ;;  %v8639_v51 = vsub.f32 %v8420_v8, %v4145_v38  ;;  %v868_v8 = vld [vmem:[%s11040_s5 + $0x11a8] sm:$0xff] }
 0x284   :  { %3097 = vmatmul.f32.vlgmr.msrb.gmra.mxu0 %v5619_v16  ;;  %3117 = vmatmul.f32.vlgmr.msrb.gmra.mxu1 %v5624_v34  ;;  %v1193_v38 = vld [vmem:[%s11040_s5 + $0x1bd0] sm:$0xff] }
 0x285   :  { %3161 = vmatpush.msra.mxu0 %v693_v63  ;;  %3181 = vmatpush.msra.mxu1 %v1093_v18  ;;  %v468_v63 = vld [vmem:[%s11040_s5 + $0x528] sm:$0xff]  ;;  %v4275_v18 = vsel %vm143_vm1, %v4196_v2, 0.0  ;;  %v1094_v2 = vld [vmem:[%s11040_s5 + $0x18b8] sm:$0xff] }
 0x286   :  { %3134 = vmatpush.msrb.mxu2 %v1167_v0  ;;  %3154 = vmatpush.msrb.mxu3 %v1567_v57  ;;  %v2818_v10 = vpop.f32.mrf.mxu2  ;;  %v2838_v20 = vpop.f32.mrf.mxu3  ;;  %v1343_v57 = vld [vmem:[%s11040_s5 + $0x2080] sm:$0xff]  ;;  %v4276_v59 = vrot.slane %v4275_v18, 4 }
 0x287   :  { %3162 = vmatpush.msra.mxu0 %v668_v23  ;;  %3182 = vmatpush.msra.mxu1 %v1068_v4  ;;  %v2819_v24 = vadd.f32 %v2818_v10, %v2799_v5  ;;  %v843_v23 = vld [vmem:[%s11040_s5 + $0x10e0] sm:$0xff]  ;;  %v4195_v4 = vmul.f32 %v8639_v51, %v8639_v51 }
 0x288   :  { %3135 = vmatpush.msrb.mxu2 %v1142_v7  ;;  %3155 = vmatpush.msrb.mxu3 %v1542_v58  ;;  %v1318_v7 = vld [vmem:[%s11040_s5 + $0x1fb8] sm:$0xff]  ;;  %v4277_v61 = vadd.f32 %v4276_v59, %v4275_v18  ;;  %v1543_v18 = vld [vmem:[%s11040_s5 + $0x26c0] sm:$0xff] }
 0x289   :  { %3163 = vmatpush.msra.mxu0 %v643_v40  ;;  %3183 = vmatpush.msra.mxu1 %v1043_v9  ;;  %v8565_v56 = vadd.f32 %v2838_v20, %v2819_v24  ;;  %v1718_v58 = vld [vmem:[%s11040_s5 + $0x2c38] sm:$0xff]  ;;  %v393_v24 = vld [vmem:[%s11040_s5 + $0x2d0] sm:$0xff]  ;;  %v4268_v20 = vsel %vm143_vm1, %v4195_v4, 0.0 }
 0x28a   :  { %3136 = vmatpush.msrb.mxu2 %v1117_v60  ;;  %3156 = vmatpush.msrb.mxu3 %v1517_v15  ;;  %v418_v40 = vld [vmem:[%s11040_s5 + $0x398] sm:$0xff]  ;;  %v1293_v60 = vld [vmem:[%s11040_s5 + $0x1ef0] sm:$0xff]  ;;  %v4269_v22 = vrot.slane %v4268_v20, 4 }
 0x28b   :  { %3137 = vmatmul.f32.vlgmr.msrb.gmra.mxu2 %v5648_v50  ;;  %3157 = vmatmul.f32.vlgmr.msrb.gmra.mxu3 %v5653_v52  ;;  %v4031_v21 = vsel %vm143_vm1, %v8565_v56, 0.0  ;;  %v818_v9 = vld [vmem:[%s11040_s5 + $0x1018] sm:$0xff]  ;;  %v1693_v15 = vld [vmem:[%s11040_s5 + $0x2b70] sm:$0xff] }
 0x28c   :  { %3164 = vmatpush.msra.mxu0 %v618_v19  ;;  %3184 = vmatpush.msra.mxu1 %v1018_v30  ;;  %v4032_v29 = vrot.slane %v4031_v21, 4  ;;  %v1268_v30 = vld [vmem:[%s11040_s5 + $0x1e28] sm:$0xff]  ;;  %v1518_v4 = vld [vmem:[%s11040_s5 + $0x25f8] sm:$0xff] }
 0x28d   :  { %3201 = vmatpush.msra.mxu2 %v1493_v47  ;;  %3221 = vmatpush.msra.mxu3 %v1893_v26  ;;  %v368_v47 = vld [vmem:[%s11040_s5 + $0x208] sm:$0xff] }
 0x28e   :  { %3165 = vmatpush.msra.mxu0 %v593_v32  ;;  %3185 = vmatpush.msra.mxu1 %v993_v45  ;;  %v4033_v36 = vadd.f32 %v4032_v29, %v4031_v21  ;;  %v768_v26 = vld [vmem:[%s11040_s5 + $0xe88] sm:$0xff]  ;;  %v1243_v45 = vld [vmem:[%s11040_s5 + $0x1d60] sm:$0xff] }
 0x28f   :  { %3202 = vmatpush.msra.mxu2 %v1468_v14  ;;  %3222 = vmatpush.msra.mxu3 %v1868_v28  ;;  %v1643_v21 = vld [vmem:[%s11040_s5 + $0x29e0] sm:$0xff] }
 0x290   :  { %3166 = vmatpush.msra.mxu0 %v568_v27  ;;  %3186 = vmatpush.msra.mxu1 %v968_v13  ;;  %v4034_v54 = vrot.slane %v4033_v36, 2  ;;  %v343_v28 = vld [vmem:[%s11040_s5 + $0x140] sm:$0xff]  ;;  %v1922_v27 = vperm.slane %v8278_v25, 3  ;;  %v1218_v13 = vld [vmem:[%s11040_s5 + $0x1c98] sm:$0xff] }
 0x291   :  { %3203 = vmatpush.msra.mxu2 %v1443_v44  ;;  %3223 = vmatpush.msra.mxu3 %v1843_v35  ;;  %v743_v29 = vld [vmem:[%s11040_s5 + $0xdc0] sm:$0xff]  ;;  %v1618_v44 = vld [vmem:[%s11040_s5 + $0x2918] sm:$0xff] }
 0x292   :  { %3167 = vmatpush.msra.mxu0 %v543_v37  ;;  %3187 = vmatpush.msra.mxu1 %v943_v62  ;;  %v4035_v31 = vadd.f32 %v4034_v54, %v4033_v36  ;;  %v4278_v36 = vrot.slane %v4277_v61, 2  ;;  %v318_v62 = vld [vmem:[%s11040_s5 + $0x78] sm:$0xff] }
 0x293   :  { %3204 = vmatpush.msra.mxu2 %v1418_v12  ;;  %3224 = vmatpush.msra.mxu3 %v1818_v11  ;;  %v718_v25 = vld [vmem:[%s11040_s5 + $0xcf8] sm:$0xff]  ;;  %v1593_v12 = vld [vmem:[%s11040_s5 + $0x2850] sm:$0xff]  ;;  %v4270_v11 = vadd.f32 %v4269_v22, %v4268_v20  ;;  %v1444_v22 = vld [vmem:[%s11040_s5 + $0x23a8] sm:$0xff] }
 0x294   :  { %v4036_v53 = vrot.slane %v4035_v31, 1  ;;  %3168 = vmatpush.msra.mxu0 %v518_v41  ;;  %3188 = vmatpush.msra.mxu1 %v918_v42  ;;  %v694_v42 = vld [vmem:[%s11040_s5 + $0xc38] sm:$0xff] }
 0x295   :  { %3205 = vmatpush.msra.mxu2 %v1393_v55  ;;  %3225 = vmatpush.msra.mxu3 %v1793_v43  ;;  %v1168_v55 = vld [vmem:[%s11040_s5 + $0x1b08] sm:$0xff]  ;;  %v594_v20 = vld [vmem:[%s11040_s5 + $0x918] sm:$0xff] }
 0x296   :  { %v4037_v0 = vadd.f32 %v4036_v53, %v4035_v31  ;;  %3169 = vmatpush.msra.mxu0 %v493_v48  ;;  %3189 = vmatpush.msra.mxu1 %v893_v49  ;;  %v4279_v31 = vadd.f32 %v4278_v36, %v4277_v61  ;;  %v1568_v43 = vld [vmem:[%s11040_s5 + $0x2788] sm:$0xff]  ;;  %v669_v49 = vld [vmem:[%s11040_s5 + $0xb70] sm:$0xff] }
 0x297   :  { %3206 = vmatpush.msra.mxu2 %v1368_v6  ;;  %3226 = vmatpush.msra.mxu3 %v1768_v46  ;;  %v1069_v53 = vld [vmem:[%s11040_s5 + $0x17f0] sm:$0xff]  ;;  %v4271_v6 = vrot.slane %v4270_v11, 2 }
 0x298   :  { %v4147_v5 = vmul.f32 %v4037_v0, %v5427_v3  ;;  %3170 = vmatpush.msra.mxu0 %v468_v63  ;;  %3190 = vmatpush.msra.mxu1 %v868_v8  ;;  %v1143_v8 = vld [vmem:[%s11040_s5 + $0x1a40] sm:$0xff]  ;;  %v644_v0 = vld [vmem:[%s11040_s5 + $0xaa8] sm:$0xff]  ;;  %v1869_v61 = vld [vmem:[%s11040_s5 + $0x30f0] sm:$0xff] }
 0x299   :  { %3207 = vmatpush.msra.mxu2 %v1343_v57  ;;  %3227 = vmatpush.msra.mxu3 %v1743_v33  ;;  %v1044_v57 = vld [vmem:[%s11040_s5 + $0x1728] sm:$0xff] }
 0x29a   :  { %v8682_v10 = vsub.f32 %v8565_v56, %v4147_v5  ;;  %3171 = vmatpush.msra.mxu0 %v443_v1  ;;  %3191 = vmatpush.msra.mxu1 %v843_v23  ;;  %v1668_v56 = vld [vmem:[%s11040_s5 + $0x2aa8] sm:$0xff]  ;;  %v4280_v1 = vrot.slane %v4279_v31, 1  ;;  %v1118_v23 = vld [vmem:[%s11040_s5 + $0x1978] sm:$0xff] }
 0x29b   :  { %3208 = vmatpush.msra.mxu2 %v1318_v7  ;;  %3228 = vmatpush.msra.mxu3 %v1718_v58  ;;  %v2858_v35 = vpop.f32.mrf.mxu0  ;;  %v2878_v48 = vpop.f32.mrf.mxu1  ;;  %v4272_v58 = vadd.f32 %v4271_v6, %v4270_v11  ;;  %v1394_v11 = vld [vmem:[%s11040_s5 + $0x2218] sm:$0xff]  ;;  %v869_v6 = vld [vmem:[%s11040_s5 + $0x11b0] sm:$0xff] }
 0x29c   :  { %v4197_v19 = vmul.f32 %v8682_v10, %v8682_v10  ;;  %3172 = vmatpush.msra.mxu0 %v418_v40  ;;  %3192 = vmatpush.msra.mxu1 %v818_v9  ;;  %v2859_v41 = vadd.f32 %v2858_v35, %v1922_v27  ;;  %v619_v40 = vld [vmem:[%s11040_s5 + $0x9e0] sm:$0xff]  ;;  %v544_v27 = vld [vmem:[%s11040_s5 + $0x788] sm:$0xff] }
 0x29d   :  { %3209 = vmatpush.msra.mxu2 %v1293_v60  ;;  %3229 = vmatpush.msra.mxu3 %v1693_v15  ;;  %v1019_v9 = vld [vmem:[%s11040_s5 + $0x1660] sm:$0xff]  ;;  %v1494_v15 = vld [vmem:[%s11040_s5 + $0x2538] sm:$0xff] }
 0x29e   :  { %v4282_v32 = vsel %vm143_vm1, %v4197_v19, 0.0  ;;  %3173 = vmatpush.msra.mxu0 %v393_v24  ;;  %3193 = vmatpush.msra.mxu1 %v793_v17  ;;  %v2879_v63 = vadd.f32 %v2878_v48, %v2859_v41  ;;  %v1894_v24 = vld [vmem:[%s11040_s5 + $0x31b8] sm:$0xff]  ;;  %v4281_v17 = vadd.f32 %v4280_v1, %v4279_v31  ;;  %v1819_v35 = vld [vmem:[%s11040_s5 + $0x2f60] sm:$0xff] }
 0x29f   :  { %v4283_v14 = vrot.slane %v4282_v32, 4  ;;  %3210 = vmatpush.msra.mxu2 %v1268_v30  ;;  %3230 = vmatpush.msra.mxu3 %v1668_v56  ;;  %v994_v19 = vld [vmem:[%s11040_s5 + $0x1598] sm:$0xff]  ;;  %v1469_v56 = vld [vmem:[%s11040_s5 + $0x2470] sm:$0xff]  ;;  %v1719_v1 = vld [vmem:[%s11040_s5 + $0x2c40] sm:$0xff] }
 0x2a0   :  { %3174 = vmatpush.msra.mxu0 %v368_v47  ;;  %3194 = vmatpush.msra.mxu1 %v768_v26  ;;  %v4273_v26 = vrot.slane %v4272_v58, 1 }
 0x2a1   :  { %v4284_v37 = vadd.f32 %v4283_v14, %v4282_v32  ;;  %3211 = vmatpush.msra.mxu2 %v1243_v45  ;;  %3231 = vmatpush.msra.mxu3 %v1643_v21  ;;  %v569_v45 = vld [vmem:[%s11040_s5 + $0x850] sm:$0xff]  ;;  %v1844_v14 = vld [vmem:[%s11040_s5 + $0x3028] sm:$0xff] }
 0x2a2   :  { %3175 = vmatpush.msra.mxu0 %v343_v28  ;;  %3195 = vmatpush.msra.mxu1 %v743_v29  ;;  %v969_v21 = vld [vmem:[%s11040_s5 + $0x14d0] sm:$0xff]  ;;  %v4396_v29 = vmul.f32 %v4281_v17, %v5427_v3 }
 0x2a3   :  { %v4285_v54 = vrot.slane %v4284_v37, 2  ;;  %3212 = vmatpush.msra.mxu2 %v1218_v13  ;;  %3232 = vmatpush.msra.mxu3 %v1618_v44  ;;  %v944_v13 = vld [vmem:[%s11040_s5 + $0x1408] sm:$0xff]  ;;  %v1419_v44 = vld [vmem:[%s11040_s5 + $0x22e0] sm:$0xff] }
 0x2a4   :  { %3176 = vmatpush.msra.mxu0 %v318_v62  ;;  %3196 = vmatpush.msra.mxu1 %v718_v25  ;;  %v519_v25 = vld [vmem:[%s11040_s5 + $0x6c0] sm:$0xff]  ;;  %v8849_v41 = vadd.f32 1e-05, %v4396_v29 }
 0x2a5   :  { %3213 = vmatpush.msra.mxu2 %v1193_v38  ;;  %3233 = vmatpush.msra.mxu3 %v1593_v12  ;;  %v4286_v46 = vadd.f32 %v4285_v54, %v4284_v37  ;;  %v4274_v37 = vadd.f32 %v4273_v26, %v4272_v58  ;;  %v919_v38 = vld [vmem:[%s11040_s5 + $0x1340] sm:$0xff]  ;;  %v1794_v54 = vld [vmem:[%s11040_s5 + $0x2e98] sm:$0xff] }
 0x2a6   :  { %3177 = vmatmul.f32.vlgmr.msra.gmra.mxu0 %v5619_v16  ;;  %3197 = vmatmul.f32.vlgmr.msra.gmra.mxu1 %v5624_v34  ;;  %5016 = vrsqrt.f32 %v8849_v41  ;;  %v1294_v58 = vld [vmem:[%s11040_s5 + $0x1ef8] sm:$0xff]  ;;  %v319_v29 = vld [vmem:[%s11040_s5 + $0x80] sm:$0xff]  ;;  %vm4533_vm14 = vweird.f32 %v8849_v41 }
 0x2a7   :  { %3241 = vmatpush.msrb.mxu0 %v694_v42  ;;  %3261 = vmatpush.msrb.mxu1 %v1094_v2  ;;  %v4287_v59 = vrot.slane %v4286_v46, 1  ;;  %v494_v42 = vld [vmem:[%s11040_s5 + $0x5f8] sm:$0xff]  ;;  %v4395_v48 = vmul.f32 %v4274_v37, %v5427_v3 }
 0x2a8   :  { %3214 = vmatpush.msra.mxu2 %v1168_v55  ;;  %3234 = vmatpush.msra.mxu3 %v1568_v43  ;;  %v2898_v33 = vpop.f32.mrf.mxu2  ;;  %v2918_v7 = vpop.f32.mrf.mxu3  ;;  %v894_v2 = vld [vmem:[%s11040_s5 + $0x1278] sm:$0xff]  ;;  %v1369_v55 = vld [vmem:[%s11040_s5 + $0x2150] sm:$0xff] }
 0x2a9   :  { %3242 = vmatpush.msrb.mxu0 %v669_v49  ;;  %3262 = vmatpush.msrb.mxu1 %v1069_v53  ;;  %v2899_v5 = vadd.f32 %v2898_v33, %v2879_v63  ;;  %v4288_v32 = vadd.f32 %v4287_v59, %v4286_v46  ;;  %v1769_v43 = vld [vmem:[%s11040_s5 + $0x2dd0] sm:$0xff]  ;;  %v1344_v63 = vld [vmem:[%s11040_s5 + $0x2088] sm:$0xff]  ;;  %v1319_v33 = vld [vmem:[%s11040_s5 + $0x1fc0] sm:$0xff] }
 0x2aa   :  { %3215 = vmatpush.msra.mxu2 %v1143_v8  ;;  %3235 = vmatpush.msra.mxu3 %v1543_v18  ;;  %v469_v53 = vld [vmem:[%s11040_s5 + $0x530] sm:$0xff]  ;;  %v1744_v8 = vld [vmem:[%s11040_s5 + $0x2d08] sm:$0xff]  ;;  %v1694_v59 = vld [vmem:[%s11040_s5 + $0x2b78] sm:$0xff] }
 0x2ab   :  { %3243 = vmatpush.msrb.mxu0 %v644_v0  ;;  %3263 = vmatpush.msrb.mxu1 %v1044_v57  ;;  %v8787_v60 = vadd.f32 %v2918_v7, %v2899_v5  ;;  %v4397_v62 = vmul.f32 %v4288_v32, %v5427_v3  ;;  %v444_v18 = vld [vmem:[%s11040_s5 + $0x468] sm:$0xff]  ;;  %v819_v5 = vld [vmem:[%s11040_s5 + $0x1020] sm:$0xff] }
 0x2ac   :  { %3216 = vmatpush.msra.mxu2 %v1118_v23  ;;  %3236 = vmatpush.msra.mxu3 %v1518_v4  ;;  %v844_v0 = vld [vmem:[%s11040_s5 + $0x10e8] sm:$0xff]  ;;  %v8892_v23 = vadd.f32 1e-05, %v4395_v48  ;;  %v419_v4 = vld [vmem:[%s11040_s5 + $0x3a0] sm:$0xff]  ;;  %v8924_v17 = vpop.eup %5016 }
 0x2ad   :  { %3217 = vmatmul.f32.vlgmr.msra.gmra.mxu2 %v5648_v50  ;;  %3237 = vmatmul.f32.vlgmr.msra.gmra.mxu3 %v5653_v52  ;;  %v4038_v30 = vsel %vm143_vm1, %v8787_v60, 0.0  ;;  %v8864_v49 = vadd.f32 1e-05, %v4397_v62  ;;  %v344_v32 = vld [vmem:[%s11040_s5 + $0x148] sm:$0xff]  ;;  %vm4534_vm11 = vweird.f32 %v8924_v17 }
 0x2ae   :  { %3244 = vmatpush.msrb.mxu0 %v619_v40  ;;  %3264 = vmatpush.msrb.mxu1 %v1019_v9  ;;  %v4039_v47 = vrot.slane %v4038_v30, 4  ;;  %v394_v40 = vld [vmem:[%s11040_s5 + $0x2d8] sm:$0xff]  ;;  %v1144_v48 = vld [vmem:[%s11040_s5 + $0x1a48] sm:$0xff]  ;;  %vm9076_vm0 = vmor %vm4533_vm14, %vm4534_vm11  ;;  %vm4523_vm5 = vweird.f32 %v8892_v23 }
 0x2af   :  { %3281 = vmatpush.msrb.mxu2 %v1494_v15  ;;  %3301 = vmatpush.msrb.mxu3 %v1894_v24  ;;  %5018 = vrsqrt.f32 %v8864_v49  ;;  %v794_v9 = vld [vmem:[%s11040_s5 + $0xf58] sm:$0xff]  ;;  %v1269_v15 = vld [vmem:[%s11040_s5 + $0x1e30] sm:$0xff]  ;;  %vm4543_vm2 = vweird.f32 %v8864_v49 }
 0x2b0   :  { %3245 = vmatpush.msrb.mxu0 %v594_v20  ;;  %3265 = vmatpush.msrb.mxu1 %v994_v19  ;;  %v4040_v28 = vadd.f32 %v4039_v47, %v4038_v30  ;;  %v1669_v24 = vld [vmem:[%s11040_s5 + $0x2ab0] sm:$0xff]  ;;  %5020 = vrsqrt.f32 %v8892_v23 }
 0x2b1   :  { %3282 = vmatpush.msrb.mxu2 %v1469_v56  ;;  %3302 = vmatpush.msrb.mxu3 %v1869_v61  ;;  %v369_v20 = vld [vmem:[%s11040_s5 + $0x210] sm:$0xff]  ;;  %v1244_v56 = vld [vmem:[%s11040_s5 + $0x1d68] sm:$0xff] }
 0x2b2   :  { %3246 = vmatpush.msrb.mxu0 %v569_v45  ;;  %3266 = vmatpush.msrb.mxu1 %v969_v21  ;;  %v4041_v36 = vrot.slane %v4040_v28, 2  ;;  %v769_v19 = vld [vmem:[%s11040_s5 + $0xe90] sm:$0xff]  ;;  %v1644_v61 = vld [vmem:[%s11040_s5 + $0x29e8] sm:$0xff]  ;;  %v4528_v21 = vmul.f32 %v8924_v17, %v8849_v41 }
 0x2b3   :  { %3283 = vmatpush.msrb.mxu2 %v1444_v22  ;;  %3303 = vmatpush.msrb.mxu3 %v1844_v14  ;;  %v744_v45 = vld [vmem:[%s11040_s5 + $0xdc8] sm:$0xff]  ;;  %v1219_v22 = vld [vmem:[%s11040_s5 + $0x1ca0] sm:$0xff] }
 0x2b4   :  { %3247 = vmatpush.msrb.mxu0 %v544_v27  ;;  %3267 = vmatpush.msrb.mxu1 %v944_v13  ;;  %v4042_v12 = vadd.f32 %v4041_v36, %v4040_v28  ;;  %v1619_v14 = vld [vmem:[%s11040_s5 + $0x2920] sm:$0xff]  ;;  %v4529_v62 = vmul.f32 %v8924_v17, %v4528_v21  ;;  %v545_v21 = vld [vmem:[%s11040_s5 + $0x790] sm:$0xff]  ;;  %v520_v41 = vld [vmem:[%s11040_s5 + $0x6c8] sm:$0xff] }
 0x2b5   :  { %3284 = vmatpush.msrb.mxu2 %v1419_v44  ;;  %3304 = vmatpush.msrb.mxu3 %v1819_v35  ;;  %v8940_v47 = vpop.eup %5018  ;;  %v719_v27 = vld [vmem:[%s11040_s5 + $0xd00] sm:$0xff]  ;;  %v1194_v44 = vld [vmem:[%s11040_s5 + $0x1bd8] sm:$0xff] }
 0x2b6   :  { %v4043_v31 = vrot.slane %v4042_v12, 1  ;;  %3248 = vmatpush.msrb.mxu0 %v519_v25  ;;  %3268 = vmatpush.msrb.mxu1 %v919_v38  ;;  %v4538_v13 = vmul.f32 %v8940_v47, %v8864_v49  ;;  %v1594_v35 = vld [vmem:[%s11040_s5 + $0x2858] sm:$0xff]  ;;  %v8970_v36 = vpop.eup %5020  ;;  %v695_v25 = vld [vmem:[%s11040_s5 + $0xc40] sm:$0xff]  ;;  %vm4544_vm15 = vweird.f32 %v8940_v47 }
 0x2b7   :  { %3285 = vmatpush.msrb.mxu2 %v1394_v11  ;;  %3305 = vmatpush.msrb.mxu3 %v1794_v54  ;;  %v1095_v38 = vld [vmem:[%s11040_s5 + $0x18c0] sm:$0xff]  ;;  %v1169_v11 = vld [vmem:[%s11040_s5 + $0x1b10] sm:$0xff]  ;;  %vm9100_vm3 = vmor %vm4543_vm2, %vm4544_vm15  ;;  %vm4524_vm4 = vweird.f32 %v8970_v36 }
 0x2b8   :  { %v4044_v46 = vadd.f32 %v4043_v31, %v4042_v12  ;;  %3249 = vmatpush.msrb.mxu0 %v494_v42  ;;  %3269 = vmatpush.msrb.mxu1 %v894_v2  ;;  %v1569_v54 = vld [vmem:[%s11040_s5 + $0x2790] sm:$0xff]  ;;  %v4518_v42 = vmul.f32 %v8970_v36, %v8892_v23  ;;  %v4539_v2 = vmul.f32 %v8940_v47, %v4538_v13  ;;  %v670_v31 = vld [vmem:[%s11040_s5 + $0xb78] sm:$0xff]  ;;  %v495_v49 = vld [vmem:[%s11040_s5 + $0x600] sm:$0xff] }
 0x2b9   :  { %3286 = vmatpush.msrb.mxu2 %v1369_v55  ;;  %3306 = vmatpush.msrb.mxu3 %v1769_v43  ;;  %v1070_v55 = vld [vmem:[%s11040_s5 + $0x17f8] sm:$0xff]  ;;  %vm9146_vm6 = vmor %vm4523_vm5, %vm4524_vm4 }
 0x2ba   :  { %v4148_v57 = vmul.f32 %v4044_v46, %v5427_v3  ;;  %3250 = vmatpush.msrb.mxu0 %v469_v53  ;;  %3270 = vmatpush.msrb.mxu1 %v869_v6  ;;  %v1544_v53 = vld [vmem:[%s11040_s5 + $0x26c8] sm:$0xff]  ;;  %v4530_v6 = vmul.f32 0.5, %v4529_v62  ;;  %v645_v46 = vld [vmem:[%s11040_s5 + $0xab0] sm:$0xff]  ;;  %v1795_v62 = vld [vmem:[%s11040_s5 + $0x2ea0] sm:$0xff] }
 0x2bb   :  { %3287 = vmatpush.msrb.mxu2 %v1344_v63  ;;  %3307 = vmatpush.msrb.mxu3 %v1744_v8  ;;  %v1045_v63 = vld [vmem:[%s11040_s5 + $0x1730] sm:$0xff] }
 0x2bc   :  { %v8902_v7 = vsub.f32 %v8787_v60, %v4148_v57  ;;  %3251 = vmatpush.msrb.mxu0 %v444_v18  ;;  %3271 = vmatpush.msrb.mxu1 %v844_v0  ;;  %v1119_v18 = vld [vmem:[%s11040_s5 + $0x1980] sm:$0xff]  ;;  %v4519_v57 = vmul.f32 %v8970_v36, %v4518_v42 }
 0x2bd   :  { %3288 = vmatpush.msrb.mxu2 %v1319_v33  ;;  %3308 = vmatpush.msrb.mxu3 %v1719_v1  ;;  %v1519_v0 = vld [vmem:[%s11040_s5 + $0x2600] sm:$0xff]  ;;  %v4540_v33 = vmul.f32 0.5, %v4539_v2  ;;  %v1370_v2 = vld [vmem:[%s11040_s5 + $0x2158] sm:$0xff] }
 0x2be   :  { %v4198_v60 = vmul.f32 %v8902_v7, %v8902_v7  ;;  %3252 = vmatpush.msrb.mxu0 %v419_v4  ;;  %3272 = vmatpush.msrb.mxu1 %v819_v5  ;;  %v620_v4 = vld [vmem:[%s11040_s5 + $0x9e8] sm:$0xff] }
 0x2bf   :  { %3289 = vmatpush.msrb.mxu2 %v1294_v58  ;;  %3309 = vmatpush.msrb.mxu3 %v1694_v59  ;;  %v1020_v5 = vld [vmem:[%s11040_s5 + $0x1668] sm:$0xff]  ;;  %v4531_v58 = vsub.f32 1.5, %v4530_v6  ;;  %v1495_v59 = vld [vmem:[%s11040_s5 + $0x2540] sm:$0xff]  ;;  %v1745_v6 = vld [vmem:[%s11040_s5 + $0x2d10] sm:$0xff] }
 0x2c0   :  { %v4289_v30 = vsel %vm143_vm1, %v4198_v60, 0.0  ;;  %3253 = vmatpush.msrb.mxu0 %v394_v40  ;;  %3273 = vmatpush.msrb.mxu1 %v794_v9  ;;  %v1895_v40 = vld [vmem:[%s11040_s5 + $0x31c0] sm:$0xff] }
 0x2c1   :  { %v4290_v26 = vrot.slane %v4289_v30, 4  ;;  %3290 = vmatpush.msrb.mxu2 %v1269_v15  ;;  %3310 = vmatpush.msrb.mxu3 %v1669_v24  ;;  %v595_v60 = vld [vmem:[%s11040_s5 + $0x920] sm:$0xff]  ;;  %v4520_v24 = vmul.f32 0.5, %v4519_v57 }
 0x2c2   :  { %3254 = vmatpush.msrb.mxu0 %v369_v20  ;;  %3274 = vmatpush.msrb.mxu1 %v769_v19  ;;  %v995_v15 = vld [vmem:[%s11040_s5 + $0x15a0] sm:$0xff]  ;;  %v4541_v20 = vsub.f32 1.5, %v4540_v33  ;;  %v1470_v19 = vld [vmem:[%s11040_s5 + $0x2478] sm:$0xff]  ;;  %v1320_v33 = vld [vmem:[%s11040_s5 + $0x1fc8] sm:$0xff] }
 0x2c3   :  { %v4291_v28 = vadd.f32 %v4290_v26, %v4289_v30  ;;  %3291 = vmatpush.msrb.mxu2 %v1244_v56  ;;  %3311 = vmatpush.msrb.mxu3 %v1644_v61  ;;  %v1870_v30 = vld [vmem:[%s11040_s5 + $0x30f8] sm:$0xff]  ;;  %v4532_v26 = vmul.f32 %v8924_v17, %v4531_v58  ;;  %v820_v58 = vld [vmem:[%s11040_s5 + $0x1028] sm:$0xff] }
 0x2c4   :  { %3255 = vmatpush.msrb.mxu0 %v344_v32  ;;  %3275 = vmatpush.msrb.mxu1 %v744_v45  ;;  %v570_v56 = vld [vmem:[%s11040_s5 + $0x858] sm:$0xff]  ;;  %v1445_v32 = vld [vmem:[%s11040_s5 + $0x23b0] sm:$0xff] }
 0x2c5   :  { %v4292_v37 = vrot.slane %v4291_v28, 2  ;;  %3292 = vmatpush.msrb.mxu2 %v1219_v22  ;;  %3312 = vmatpush.msrb.mxu3 %v1619_v14  ;;  %v970_v61 = vld [vmem:[%s11040_s5 + $0x14d8] sm:$0xff]  ;;  %v1845_v45 = vld [vmem:[%s11040_s5 + $0x3030] sm:$0xff]  ;;  %v4521_v14 = vsub.f32 1.5, %v4520_v24 }
 0x2c6   :  { %3256 = vmatpush.msrb.mxu0 %v319_v29  ;;  %3276 = vmatpush.msrb.mxu1 %v719_v27  ;;  %v945_v22 = vld [vmem:[%s11040_s5 + $0x1410] sm:$0xff]  ;;  %v1420_v29 = vld [vmem:[%s11040_s5 + $0x22e8] sm:$0xff] }
 0x2c7   :  { %v4293_v12 = vadd.f32 %v4292_v37, %v4291_v28  ;;  %3293 = vmatpush.msrb.mxu2 %v1194_v44  ;;  %3313 = vmatpush.msrb.mxu3 %v1594_v35  ;;  %v4542_v28 = vmul.f32 %v8940_v47, %v4541_v20  ;;  %v1820_v27 = vld [vmem:[%s11040_s5 + $0x2f68] sm:$0xff]  ;;  %v4536_v35 = vsel %vm9076_vm0, %v8924_v17, %v4532_v26  ;;  %v1395_v37 = vld [vmem:[%s11040_s5 + $0x2220] sm:$0xff] }
 0x2c8   :  { %3257 = vmatmul.f32.vlgmr.msrb.gmra.mxu0 %v5619_v16  ;;  %3277 = vmatmul.f32.vlgmr.msrb.gmra.mxu1 %v5624_v34  ;;  %v920_v44 = vld [vmem:[%s11040_s5 + $0x1348] sm:$0xff]  ;;  %v895_v17 = vld [vmem:[%s11040_s5 + $0x1280] sm:$0xff] }
 0x2c9   :  { %v4294_v43 = vrot.slane %v4293_v12, 1  ;;  %3321 = vmatpush.msra.mxu0 %v695_v25  ;;  %3341 = vmatpush.msra.mxu1 %v1095_v38 }
 0x2ca   :  { %3294 = vmatpush.msrb.mxu2 %v1169_v11  ;;  %3314 = vmatpush.msrb.mxu3 %v1569_v54  ;;  %v9115_v11 = vld [vmem:[%s11045_s7 + $0x8] sm:$0xff]  ;;  %v4546_v54 = vsel %vm9100_vm3, %v8940_v47, %v4542_v28  ;;  %v470_v47 = vld [vmem:[%s11040_s5 + $0x538] sm:$0xff]  ;;  %v9232_v38 = vpop.f32.mrf.mxu2 }
 0x2cb   :  { %v4295_v8 = vadd.f32 %v4294_v43, %v4293_v12  ;;  %3322 = vmatpush.msra.mxu0 %v670_v31  ;;  %3342 = vmatpush.msra.mxu1 %v1070_v55  ;;  %v4522_v12 = vmul.f32 %v8970_v36, %v4521_v14  ;;  %v1770_v31 = vld [vmem:[%s11040_s5 + $0x2dd8] sm:$0xff]  ;;  %v4696_v55 = vmul.f32 %v4536_v35, %v8597_v39  ;;  %v4729_v43 = vperm.slane %v9115_v11, 1  ;;  %v1345_v39 = vld [vmem:[%s11040_s5 + $0x2090] sm:$0xff] }
 0x2cc   :  { %3295 = vmatpush.msrb.mxu2 %v1144_v48  ;;  %3315 = vmatpush.msrb.mxu3 %v1544_v53  ;;  %v870_v48 = vld [vmem:[%s11040_s5 + $0x11b8] sm:$0xff]  ;;  %v4697_v23 = vmul.f32 %v4546_v54, %v8682_v10  ;;  %v9164_v10 = vld [vmem:[%s11046_s8 + $0x8] sm:$0xff]  ;;  %v4728_v20 = vperm.slane %v9115_v11, 0 }
 0x2cd   :  { %v4398_v1 = vmul.f32 %v4295_v8, %v5427_v3  ;;  %3323 = vmatpush.msra.mxu0 %v645_v46  ;;  %3343 = vmatpush.msra.mxu1 %v1045_v63  ;;  %v4730_v63 = vperm.slane %v9115_v11, 2  ;;  %v445_v8 = vld [vmem:[%s11040_s5 + $0x470] sm:$0xff]  ;;  %v4811_v14 = vperm.slane %v9164_v10, 0  ;;  %v4814_v35 = vperm.slane %v9164_v10, 3  ;;  %v720_v54 = vld [vmem:[%s11040_s5 + $0xd08] sm:$0xff] }
 0x2ce   :  { %3296 = vmatpush.msrb.mxu2 %v1119_v18  ;;  %3316 = vmatpush.msrb.mxu3 %v1519_v0  ;;  %v845_v18 = vld [vmem:[%s11040_s5 + $0x10f0] sm:$0xff]  ;;  %v4526_v0 = vsel %vm9146_vm6, %v8970_v36, %v4522_v12  ;;  %v420_v36 = vld [vmem:[%s11040_s5 + $0x3a8] sm:$0xff] }
 0x2cf   :  { %v9028_v9 = vadd.f32 1e-05, %v4398_v1  ;;  %3297 = vmatmul.f32.vlgmr.msrb.gmra.mxu2 %v5648_v50  ;;  %3317 = vmatmul.f32.vlgmr.msrb.gmra.mxu3 %v5653_v52  ;;  %v1720_v1 = vld [vmem:[%s11040_s5 + $0x2c48] sm:$0xff]  ;;  %v4695_v24 = vmul.f32 %v4526_v0, %v8639_v51  ;;  %v1270_v51 = vld [vmem:[%s11040_s5 + $0x1e38] sm:$0xff]  ;;  %v9270_v0 = vpop.f32.mrf.mxu3 }
 0x2d0   :  { %3324 = vmatpush.msra.mxu0 %v620_v4  ;;  %3344 = vmatpush.msra.mxu1 %v1020_v5  ;;  %v4779_v4 = vmul.f32 %v4729_v43, %v4696_v55  ;;  %v4812_v5 = vperm.slane %v9164_v10, 1  ;;  %v1595_v55 = vld [vmem:[%s11040_s5 + $0x2860] sm:$0xff] }
 0x2d1   :  { %5022 = vrsqrt.f32 %v9028_v9  ;;  %3361 = vmatpush.msra.mxu2 %v1495_v59  ;;  %3381 = vmatpush.msra.mxu3 %v1895_v40  ;;  %v9180_v40 = vpop.f32.mrf.mxu0  ;;  %vm4553_vm8 = vweird.f32 %v9028_v9  ;;  %v4778_v13 = vmul.f32 %v4728_v20, %v4695_v24 }
 0x2d2   :  { %3325 = vmatpush.msra.mxu0 %v595_v60  ;;  %3345 = vmatpush.msra.mxu1 %v995_v15  ;;  %v1295_v60 = vld [vmem:[%s11040_s5 + $0x1f00] sm:$0xff] }
 0x2d3   :  { %3362 = vmatpush.msra.mxu2 %v1470_v19  ;;  %3382 = vmatpush.msra.mxu3 %v1870_v30  ;;  %v1695_v15 = vld [vmem:[%s11040_s5 + $0x2b80] sm:$0xff]  ;;  %v4780_v19 = vmul.f32 %v4730_v63, %v4697_v23  ;;  %v4813_v30 = vperm.slane %v9164_v10, 2 }
 0x2d4   :  { %3326 = vmatpush.msra.mxu0 %v570_v56  ;;  %3346 = vmatpush.msra.mxu1 %v970_v61  ;;  %v395_v56 = vld [vmem:[%s11040_s5 + $0x2e0] sm:$0xff] }
 0x2d5   :  { %3363 = vmatpush.msra.mxu2 %v1445_v32  ;;  %3383 = vmatpush.msra.mxu3 %v1845_v45  ;;  %v795_v61 = vld [vmem:[%s11040_s5 + $0xf60] sm:$0xff]  ;;  %v1670_v32 = vld [vmem:[%s11040_s5 + $0x2ab8] sm:$0xff]  ;;  %v4862_v45 = vadd.f32 %v4812_v5, %v4779_v4 }
 0x2d6   :  { %3327 = vmatpush.msra.mxu0 %v545_v21  ;;  %3347 = vmatpush.msra.mxu1 %v945_v22  ;;  %v4731_v21 = vperm.slane %v9115_v11, 3  ;;  %v770_v22 = vld [vmem:[%s11040_s5 + $0xe98] sm:$0xff]  ;;  %v320_v11 = vld [vmem:[%s11040_s5 + $0x88] sm:$0xff]  ;;  %v671_v10 = vld [vmem:[%s11040_s5 + $0xb80] sm:$0xff] }
 0x2d7   :  { %v9096_v25 = vpop.eup %5022  ;;  %3364 = vmatpush.msra.mxu2 %v1420_v29  ;;  %3384 = vmatpush.msra.mxu3 %v1820_v27  ;;  %v1245_v29 = vld [vmem:[%s11040_s5 + $0x1d70] sm:$0xff] }
 0x2d8   :  { %v4548_v42 = vmul.f32 %v9096_v25, %v9028_v9  ;;  %3328 = vmatpush.msra.mxu0 %v520_v41  ;;  %3348 = vmatpush.msra.mxu1 %v920_v44  ;;  %vm4554_vm7 = vweird.f32 %v9096_v25  ;;  %v370_v9 = vld [vmem:[%s11040_s5 + $0x218] sm:$0xff]  ;;  %v1645_v27 = vld [vmem:[%s11040_s5 + $0x29f0] sm:$0xff]  ;;  %v4863_v41 = vadd.f32 %v4813_v30, %v4780_v19 }
 0x2d9   :  { %3365 = vmatpush.msra.mxu2 %v1395_v37  ;;  %3385 = vmatpush.msra.mxu3 %v1795_v62  ;;  %vm4555_vm9 = vmor %vm4553_vm8, %vm4554_vm7  ;;  %v345_v37 = vld [vmem:[%s11040_s5 + $0x150] sm:$0xff] }
 0x2da   :  { %v4549_v53 = vmul.f32 %v9096_v25, %v4548_v42  ;;  %3329 = vmatpush.msra.mxu0 %v495_v49  ;;  %3349 = vmatpush.msra.mxu1 %v895_v17  ;;  %v745_v62 = vld [vmem:[%s11040_s5 + $0xdd0] sm:$0xff]  ;;  %v1620_v49 = vld [vmem:[%s11040_s5 + $0x2928] sm:$0xff]  ;;  %v4887_v17 = vmax.f32 %v4862_v45, 0.0 }
 0x2db   :  { %3366 = vmatpush.msra.mxu2 %v1370_v2  ;;  %3386 = vmatpush.msra.mxu3 %v1770_v31  ;;  %v9249_v42 = vld [vmem:[%s11044_s6 + $0x8] sm:$0xff]  ;;  %v1195_v31 = vld [vmem:[%s11040_s5 + $0x1be0] sm:$0xff]  ;;  %v1021_v45 = vld [vmem:[%s11040_s5 + $0x1670] sm:$0xff] }
 0x2dc   :  { %v4550_v57 = vmul.f32 0.5, %v4549_v53  ;;  %3330 = vmatpush.msra.mxu0 %v470_v47  ;;  %3350 = vmatpush.msra.mxu1 %v870_v48  ;;  %v1924_v2 = vperm.slane %v9249_v42, 5  ;;  %v4861_v47 = vadd.f32 %v4811_v14, %v4778_v13  ;;  %v4888_v48 = vmax.f32 %v4863_v41, 0.0  ;;  %v996_v14 = vld [vmem:[%s11040_s5 + $0x15a8] sm:$0xff]  ;;  %v571_v41 = vld [vmem:[%s11040_s5 + $0x860] sm:$0xff] }
 0x2dd   :  { %3367 = vmatpush.msra.mxu2 %v1345_v39  ;;  %3387 = vmatpush.msra.mxu3 %v1745_v6  ;;  %v696_v39 = vld [vmem:[%s11040_s5 + $0xc48] sm:$0xff]  ;;  %v4933_v46 = vrot.slane %v4887_v17, 6  ;;  %v1923_v5 = vperm.slane %v9249_v42, 4  ;;  %v1421_v17 = vld [vmem:[%s11040_s5 + $0x22f0] sm:$0xff] }
 0x2de   :  { %v4551_v59 = vsub.f32 1.5, %v4550_v57  ;;  %3331 = vmatpush.msra.mxu0 %v445_v8  ;;  %3351 = vmatpush.msra.mxu1 %v845_v18  ;;  %v1096_v6 = vld [vmem:[%s11040_s5 + $0x18c8] sm:$0xff]  ;;  %v1170_v8 = vld [vmem:[%s11040_s5 + $0x1b18] sm:$0xff]  ;;  %v1071_v57 = vld [vmem:[%s11040_s5 + $0x1800] sm:$0xff] }
 0x2df   :  { %3368 = vmatpush.msra.mxu2 %v1320_v33  ;;  %3388 = vmatpush.msra.mxu3 %v1720_v1  ;;  %v3018_v43 = vpop.f32.mrf.mxu0  ;;  %v1570_v18 = vld [vmem:[%s11040_s5 + $0x2798] sm:$0xff]  ;;  %v4886_v33 = vmax.f32 %v4861_v47, 0.0  ;;  %v4934_v1 = vrot.slane %v4888_v48, 4  ;;  %v896_v47 = vld [vmem:[%s11040_s5 + $0x1288] sm:$0xff] }
 0x2e0   :  { %v4552_v26 = vmul.f32 %v9096_v25, %v4551_v59  ;;  %3332 = vmatpush.msra.mxu0 %v420_v36  ;;  %3352 = vmatpush.msra.mxu1 %v820_v58  ;;  %v3019_v63 = vadd.f32 %v3018_v43, %v1924_v2  ;;  %v1145_v36 = vld [vmem:[%s11040_s5 + $0x1a50] sm:$0xff]  ;;  %v1396_v2 = vld [vmem:[%s11040_s5 + $0x2228] sm:$0xff] }
 0x2e1   :  { %3369 = vmatpush.msra.mxu2 %v1295_v60  ;;  %3389 = vmatpush.msra.mxu3 %v1695_v15  ;;  %v1545_v58 = vld [vmem:[%s11040_s5 + $0x26d0] sm:$0xff]  ;;  %v646_v60 = vld [vmem:[%s11040_s5 + $0xab8] sm:$0xff]  ;;  %v4953_v20 = vsel %vm143_vm1, %v4886_v33, %v4933_v46  ;;  %v496_v43 = vld [vmem:[%s11040_s5 + $0x608] sm:$0xff] }
 0x2e2   :  { %v4556_v28 = vsel %vm4555_vm9, %v9096_v25, %v4552_v26  ;;  %3333 = vmatpush.msra.mxu0 %v395_v56  ;;  %3353 = vmatpush.msra.mxu1 %v795_v61  ;;  %v9230_v25 = vpop.f32.mrf.mxu1  ;;  %v1046_v15 = vld [vmem:[%s11040_s5 + $0x1738] sm:$0xff]  ;;  %v1120_v56 = vld [vmem:[%s11040_s5 + $0x1988] sm:$0xff]  ;;  %v871_v46 = vld [vmem:[%s11040_s5 + $0x11c0] sm:$0xff] }
 0x2e3   :  { %v4698_v44 = vmul.f32 %v4556_v28, %v8902_v7  ;;  %3370 = vmatpush.msra.mxu2 %v1270_v51  ;;  %3390 = vmatpush.msra.mxu3 %v1670_v32  ;;  %v1220_v7 = vld [vmem:[%s11040_s5 + $0x1ca8] sm:$0xff]  ;;  %v2939_v51 = vadd.f32 %v9180_v40, %v1923_v5  ;;  %v621_v32 = vld [vmem:[%s11040_s5 + $0x9f0] sm:$0xff]  ;;  %v1471_v28 = vld [vmem:[%s11040_s5 + $0x2480] sm:$0xff] }
 0x2e4   :  { %3334 = vmatpush.msra.mxu0 %v370_v9  ;;  %3354 = vmatpush.msra.mxu1 %v770_v22  ;;  %v1520_v61 = vld [vmem:[%s11040_s5 + $0x2608] sm:$0xff]  ;;  %v1721_v33 = vld [vmem:[%s11040_s5 + $0x2c50] sm:$0xff] }
 0x2e5   :  { %v4781_v12 = vmul.f32 %v4731_v21, %v4698_v44  ;;  %3371 = vmatpush.msra.mxu2 %v1245_v29  ;;  %3391 = vmatpush.msra.mxu3 %v1645_v27  ;;  %v1496_v9 = vld [vmem:[%s11040_s5 + $0x2548] sm:$0xff]  ;;  %v1871_v29 = vld [vmem:[%s11040_s5 + $0x3100] sm:$0xff]  ;;  %v2959_v13 = vadd.f32 %v9230_v25, %v2939_v51  ;;  %v346_v51 = vld [vmem:[%s11040_s5 + $0x158] sm:$0xff] }
 0x2e6   :  { %3335 = vmatpush.msra.mxu0 %v345_v37  ;;  %3355 = vmatpush.msra.mxu1 %v745_v62  ;;  %v1896_v40 = vld [vmem:[%s11040_s5 + $0x31c8] sm:$0xff]  ;;  %v971_v44 = vld [vmem:[%s11040_s5 + $0x14e0] sm:$0xff]  ;;  %v1446_v37 = vld [vmem:[%s11040_s5 + $0x23b8] sm:$0xff] }
 0x2e7   :  { %v4864_v53 = vadd.f32 %v4814_v35, %v4781_v12  ;;  %3372 = vmatpush.msra.mxu2 %v1220_v7  ;;  %3392 = vmatpush.msra.mxu3 %v1620_v49  ;;  %v596_v22 = vld [vmem:[%s11040_s5 + $0x928] sm:$0xff]  ;;  %v1846_v62 = vld [vmem:[%s11040_s5 + $0x3038] sm:$0xff]  ;;  %v2979_v25 = vadd.f32 %v9232_v38, %v2959_v13  ;;  %v1821_v38 = vld [vmem:[%s11040_s5 + $0x2f70] sm:$0xff] }
 0x2e8   :  { %3336 = vmatpush.msra.mxu0 %v320_v11  ;;  %3356 = vmatpush.msra.mxu1 %v720_v54  ;;  %v546_v7 = vld [vmem:[%s11040_s5 + $0x798] sm:$0xff]  ;;  %v521_v11 = vld [vmem:[%s11040_s5 + $0x6d0] sm:$0xff]  ;;  %v1596_v13 = vld [vmem:[%s11040_s5 + $0x2868] sm:$0xff] }
 0x2e9   :  { %v4889_v23 = vmax.f32 %v4864_v53, 0.0  ;;  %3373 = vmatpush.msra.mxu2 %v1195_v31  ;;  %3393 = vmatpush.msra.mxu3 %v1595_v55  ;;  %v946_v49 = vld [vmem:[%s11040_s5 + $0x1418] sm:$0xff]  ;;  %v921_v54 = vld [vmem:[%s11040_s5 + $0x1350] sm:$0xff]  ;;  %v1796_v31 = vld [vmem:[%s11040_s5 + $0x2ea8] sm:$0xff]  ;;  %v9375_v55 = vadd.f32 %v9270_v0, %v2979_v25 }
 0x2ea   :  { %3337 = vmatmul.f32.vlgmr.msra.gmra.mxu0 %v5619_v16  ;;  %3357 = vmatmul.f32.vlgmr.msra.gmra.mxu1 %v5624_v34  ;;  %v3038_v59 = vpop.f32.mrf.mxu1  ;;  %v1371_v53 = vld [vmem:[%s11040_s5 + $0x2160] sm:$0xff]  ;;  %v846_v0 = vld [vmem:[%s11040_s5 + $0x10f8] sm:$0xff] }
 0x2eb   :  { %v4935_v4 = vrot.slane %v4889_v23, 2  ;;  %3401 = vmatpush.msrb.mxu0 %v696_v39  ;;  %3421 = vmatpush.msrb.mxu1 %v1096_v6  ;;  %v3039_v30 = vadd.f32 %v3038_v59, %v3019_v63  ;;  %v1771_v39 = vld [vmem:[%s11040_s5 + $0x2de0] sm:$0xff]  ;;  %v1346_v23 = vld [vmem:[%s11040_s5 + $0x2098] sm:$0xff]  ;;  %v396_v59 = vld [vmem:[%s11040_s5 + $0x2e8] sm:$0xff] }
 0x2ec   :  { %3374 = vmatpush.msra.mxu2 %v1170_v8  ;;  %3394 = vmatpush.msra.mxu3 %v1570_v18  ;;  %v3058_v24 = vpop.f32.mrf.mxu2  ;;  %v3078_v27 = vpop.f32.mrf.mxu3  ;;  %v471_v6 = vld [vmem:[%s11040_s5 + $0x540] sm:$0xff]  ;;  %v1746_v63 = vld [vmem:[%s11040_s5 + $0x2d18] sm:$0xff]  ;;  %v4045_v8 = vsel %vm143_vm1, %v9375_v55, 0.0 }
 0x2ed   :  { %v4954_v19 = vsel %vm4946_vm12, %v4934_v1, %v4935_v4  ;;  %3402 = vmatpush.msrb.mxu0 %v671_v10  ;;  %3422 = vmatpush.msrb.mxu1 %v1071_v57  ;;  %v3059_v21 = vadd.f32 %v3058_v24, %v3039_v30  ;;  %v446_v18 = vld [vmem:[%s11040_s5 + $0x478] sm:$0xff]  ;;  %v1321_v57 = vld [vmem:[%s11040_s5 + $0x1fd0] sm:$0xff]  ;;  %v4046_v5 = vrot.slane %v4045_v8, 4  ;;  %v1271_v24 = vld [vmem:[%s11040_s5 + $0x1e40] sm:$0xff] }
 0x2ee   :  { %v4955_v26 = vsel %vm4948_vm13, %v4953_v20, %v4954_v19  ;;  %3375 = vmatpush.msra.mxu2 %v1145_v36  ;;  %3395 = vmatpush.msra.mxu3 %v1545_v58  ;;  %v421_v1 = vld [vmem:[%s11040_s5 + $0x3b0] sm:$0xff]  ;;  %v1296_v36 = vld [vmem:[%s11040_s5 + $0x1f08] sm:$0xff]  ;;  %v1671_v20 = vld [vmem:[%s11040_s5 + $0x2ac0] sm:$0xff] }
 0x2ef   :  { %4973 = vst [vmem:[%s11047_s9 + $0x10] sm:$0xff] %v4955_v26  ;;  %3403 = vmatpush.msrb.mxu0 %v646_v60  ;;  %3423 = vmatpush.msrb.mxu1 %v1046_v15  ;;  %v9339_v35 = vadd.f32 %v3078_v27, %v3059_v21  ;;  %v821_v4 = vld [vmem:[%s11040_s5 + $0x1030] sm:$0xff]  ;;  %v1696_v58 = vld [vmem:[%s11040_s5 + $0x2b88] sm:$0xff]  ;;  %v371_v19 = vld [vmem:[%s11040_s5 + $0x220] sm:$0xff] }
 0x2f0   :  { %3376 = vmatpush.msra.mxu2 %v1120_v56  ;;  %3396 = vmatpush.msra.mxu3 %v1520_v61  ;;  %v796_v60 = vld [vmem:[%s11040_s5 + $0xf68] sm:$0xff]  ;;  %v771_v30 = vld [vmem:[%s11040_s5 + $0xea0] sm:$0xff]  ;;  %v4047_v56 = vadd.f32 %v4046_v5, %v4045_v8  ;;  %v1246_v61 = vld [vmem:[%s11040_s5 + $0x1d78] sm:$0xff] }
 0x2f1   :  { %3377 = vmatmul.f32.vlgmr.msra.gmra.mxu2 %v5648_v50  ;;  %3397 = vmatmul.f32.vlgmr.msra.gmra.mxu3 %v5653_v52  ;;  %v4052_v12 = vsel %vm143_vm1, %v9339_v35, 0.0  ;;  %v1646_v26 = vld [vmem:[%s11040_s5 + $0x29f8] sm:$0xff]  ;;  %v1196_v27 = vld [vmem:[%s11040_s5 + $0x1be8] sm:$0xff]  ;;  %v1171_v25 = vld [vmem:[%s11040_s5 + $0x1b20] sm:$0xff] }
 0x2f2   :  { %3404 = vmatpush.msrb.mxu0 %v621_v32  ;;  %3424 = vmatpush.msrb.mxu1 %v1021_v45  ;;  %v4053_v48 = vrot.slane %v4052_v12, 4  ;;  %v746_v32 = vld [vmem:[%s11040_s5 + $0xdd8] sm:$0xff]  ;;  %v1925_v45 = vperm.slane %v9249_v42, 6 }
 0x2f3   :  { %3441 = vmatpush.msrb.mxu2 %v1496_v9  ;;  %3461 = vmatpush.msrb.mxu3 %v1896_v40  ;;  %v1221_v9 = vld [vmem:[%s11040_s5 + $0x1cb0] sm:$0xff]  ;;  %v1022_v8 = vld [vmem:[%s11040_s5 + $0x1678] sm:$0xff] }
 0x2f4   :  { %3405 = vmatpush.msrb.mxu0 %v596_v22  ;;  %3425 = vmatpush.msrb.mxu1 %v996_v14  ;;  %v4054_v10 = vadd.f32 %v4053_v48, %v4052_v12  ;;  %v1621_v40 = vld [vmem:[%s11040_s5 + $0x2930] sm:$0xff]  ;;  %v1072_v12 = vld [vmem:[%s11040_s5 + $0x1808] sm:$0xff] }
 0x2f5   :  { %3442 = vmatpush.msrb.mxu2 %v1471_v28  ;;  %3462 = vmatpush.msrb.mxu3 %v1871_v29  ;;  %v321_v14 = vld [vmem:[%s11040_s5 + $0x90] sm:$0xff]  ;;  %v4048_v29 = vrot.slane %v4047_v56, 2 }
 0x2f6   :  { %3406 = vmatpush.msrb.mxu0 %v571_v41  ;;  %3426 = vmatpush.msrb.mxu1 %v971_v44  ;;  %v4055_v15 = vrot.slane %v4054_v10, 2  ;;  %v721_v28 = vld [vmem:[%s11040_s5 + $0xd10] sm:$0xff] }
 0x2f7   :  { %3443 = vmatpush.msrb.mxu2 %v1446_v37  ;;  %3463 = vmatpush.msrb.mxu3 %v1846_v62  ;;  %v697_v37 = vld [vmem:[%s11040_s5 + $0xc50] sm:$0xff] }
 0x2f8   :  { %3407 = vmatpush.msrb.mxu0 %v546_v7  ;;  %3427 = vmatpush.msrb.mxu1 %v946_v49  ;;  %v4056_v21 = vadd.f32 %v4055_v15, %v4054_v10  ;;  %v1097_v62 = vld [vmem:[%s11040_s5 + $0x18d0] sm:$0xff]  ;;  %v1571_v7 = vld [vmem:[%s11040_s5 + $0x27a0] sm:$0xff]  ;;  %v4049_v49 = vadd.f32 %v4048_v29, %v4047_v56  ;;  %v972_v15 = vld [vmem:[%s11040_s5 + $0x14e8] sm:$0xff] }
 0x2f9   :  { %3444 = vmatpush.msrb.mxu2 %v1421_v17  ;;  %3464 = vmatpush.msrb.mxu3 %v1821_v38  ;;  %v672_v38 = vld [vmem:[%s11040_s5 + $0xb88] sm:$0xff]  ;;  %v1497_v10 = vld [vmem:[%s11040_s5 + $0x2550] sm:$0xff]  ;;  %v547_v56 = vld [vmem:[%s11040_s5 + $0x7a0] sm:$0xff] }
 0x2fa   :  { %3408 = vmatpush.msrb.mxu0 %v521_v11  ;;  %3428 = vmatpush.msrb.mxu1 %v921_v54  ;;  %v4057_v44 = vrot.slane %v4056_v21, 1  ;;  %v1146_v54 = vld [vmem:[%s11040_s5 + $0x1a58] sm:$0xff]  ;;  %v897_v29 = vld [vmem:[%s11040_s5 + $0x1290] sm:$0xff] }
 0x2fb   :  { %3445 = vmatpush.msrb.mxu2 %v1396_v2  ;;  %3465 = vmatpush.msrb.mxu3 %v1796_v31  ;;  %v1546_v2 = vld [vmem:[%s11040_s5 + $0x26d8] sm:$0xff] }
 0x2fc   :  { %3409 = vmatpush.msrb.mxu0 %v496_v43  ;;  %3429 = vmatpush.msrb.mxu1 %v896_v47  ;;  %v4058_v31 = vadd.f32 %v4057_v44, %v4056_v21  ;;  %v647_v43 = vld [vmem:[%s11040_s5 + $0xac0] sm:$0xff]  ;;  %v922_v21 = vld [vmem:[%s11040_s5 + $0x1358] sm:$0xff]  ;;  %v1772_v44 = vld [vmem:[%s11040_s5 + $0x2de8] sm:$0xff] }
 0x2fd   :  { %3446 = vmatpush.msrb.mxu2 %v1371_v53  ;;  %3466 = vmatpush.msrb.mxu3 %v1771_v39  ;;  %v1047_v47 = vld [vmem:[%s11040_s5 + $0x1740] sm:$0xff]  ;;  %v1121_v53 = vld [vmem:[%s11040_s5 + $0x1990] sm:$0xff] }
 0x2fe   :  { %3410 = vmatpush.msrb.mxu0 %v471_v6  ;;  %3430 = vmatpush.msrb.mxu1 %v871_v46  ;;  %v1521_v39 = vld [vmem:[%s11040_s5 + $0x2610] sm:$0xff]  ;;  %v4050_v46 = vrot.slane %v4049_v49, 1 }
 0x2ff   :  { %3447 = vmatpush.msrb.mxu2 %v1346_v23  ;;  %3467 = vmatpush.msrb.mxu3 %v1746_v63  ;;  %v622_v63 = vld [vmem:[%s11040_s5 + $0x9f8] sm:$0xff] }
 0x300   :  { %3411 = vmatpush.msrb.mxu0 %v446_v18  ;;  %3431 = vmatpush.msrb.mxu1 %v846_v0  ;;  %v4150_v0 = vmul.f32 %v4058_v31, %v5427_v3  ;;  %v4051_v5 = vadd.f32 %v4050_v46, %v4049_v49  ;;  %v1747_v49 = vld [vmem:[%s11040_s5 + $0x2d20] sm:$0xff]  ;;  %v797_v46 = vld [vmem:[%s11040_s5 + $0xf70] sm:$0xff] }
 0x301   :  { %3448 = vmatpush.msrb.mxu2 %v1321_v57  ;;  %3468 = vmatpush.msrb.mxu3 %v1721_v33  ;;  %v3098_v22 = vpop.f32.mrf.mxu0  ;;  %v3118_v17 = vpop.f32.mrf.mxu1  ;;  %v1897_v57 = vld [vmem:[%s11040_s5 + $0x31d0] sm:$0xff] }
 0x302   :  { %3412 = vmatpush.msrb.mxu0 %v421_v1  ;;  %3432 = vmatpush.msrb.mxu1 %v821_v4  ;;  %v3099_v41 = vadd.f32 %v3098_v22, %v1925_v45  ;;  %v597_v33 = vld [vmem:[%s11040_s5 + $0x930] sm:$0xff]  ;;  %v522_v45 = vld [vmem:[%s11040_s5 + $0x6d8] sm:$0xff] }
 0x303   :  { %3449 = vmatpush.msrb.mxu2 %v1296_v36  ;;  %3469 = vmatpush.msrb.mxu3 %v1696_v58  ;;  %v997_v1 = vld [vmem:[%s11040_s5 + $0x15b0] sm:$0xff]  ;;  %v1472_v36 = vld [vmem:[%s11040_s5 + $0x2488] sm:$0xff] }
 0x304   :  { %3413 = vmatpush.msrb.mxu0 %v396_v59  ;;  %3433 = vmatpush.msrb.mxu1 %v796_v60  ;;  %v3119_v11 = vadd.f32 %v3118_v17, %v3099_v41  ;;  %v1872_v58 = vld [vmem:[%s11040_s5 + $0x3108] sm:$0xff]  ;;  %v1397_v22 = vld [vmem:[%s11040_s5 + $0x2230] sm:$0xff]  ;;  %v447_v17 = vld [vmem:[%s11040_s5 + $0x480] sm:$0xff] }
 0x305   :  { %3450 = vmatpush.msrb.mxu2 %v1271_v24  ;;  %3470 = vmatpush.msrb.mxu3 %v1671_v20  ;;  %v572_v60 = vld [vmem:[%s11040_s5 + $0x868] sm:$0xff]  ;;  %v9552_v24 = vsub.f32 %v9339_v35, %v4150_v0  ;;  %v1447_v20 = vld [vmem:[%s11040_s5 + $0x23c0] sm:$0xff] }
 0x306   :  { %3414 = vmatpush.msrb.mxu0 %v371_v19  ;;  %3434 = vmatpush.msrb.mxu1 %v771_v30  ;;  %v1847_v19 = vld [vmem:[%s11040_s5 + $0x3040] sm:$0xff]  ;;  %v1372_v41 = vld [vmem:[%s11040_s5 + $0x2168] sm:$0xff] }
 0x307   :  { %3451 = vmatpush.msrb.mxu2 %v1246_v61  ;;  %3471 = vmatpush.msrb.mxu3 %v1646_v26  ;;  %v947_v35 = vld [vmem:[%s11040_s5 + $0x1420] sm:$0xff]  ;;  %v4149_v61 = vmul.f32 %v4051_v5, %v5427_v3  ;;  %v1422_v26 = vld [vmem:[%s11040_s5 + $0x22f8] sm:$0xff] }
 0x308   :  { %3415 = vmatpush.msrb.mxu0 %v346_v51  ;;  %3435 = vmatpush.msrb.mxu1 %v746_v32  ;;  %v1822_v51 = vld [vmem:[%s11040_s5 + $0x2f78] sm:$0xff] }
 0x309   :  { %3452 = vmatpush.msrb.mxu2 %v1221_v9  ;;  %3472 = vmatpush.msrb.mxu3 %v1621_v40  ;;  %v4200_v9 = vmul.f32 %v9552_v24, %v9552_v24 }
 0x30a   :  { %3416 = vmatpush.msrb.mxu0 %v321_v14  ;;  %3436 = vmatpush.msrb.mxu1 %v721_v28  ;;  %v1797_v14 = vld [vmem:[%s11040_s5 + $0x2eb0] sm:$0xff] }
 0x30b   :  { %3453 = vmatpush.msrb.mxu2 %v1196_v27  ;;  %3473 = vmatpush.msrb.mxu3 %v1596_v13  ;;  %v497_v28 = vld [vmem:[%s11040_s5 + $0x610] sm:$0xff]  ;;  %v9594_v27 = vsub.f32 %v9375_v55, %v4149_v61  ;;  %v872_v55 = vld [vmem:[%s11040_s5 + $0x11c8] sm:$0xff] }
 0x30c   :  { %3417 = vmatmul.f32.vlgmr.msrb.gmra.mxu0 %v5619_v16  ;;  %3437 = vmatmul.f32.vlgmr.msrb.gmra.mxu1 %v5624_v34  ;;  %v1197_v61 = vld [vmem:[%s11040_s5 + $0x1bf0] sm:$0xff] }
 0x30d   :  { %3481 = vmatpush.msra.mxu0 %v697_v37  ;;  %3501 = vmatpush.msra.mxu1 %v1097_v62  ;;  %v472_v37 = vld [vmem:[%s11040_s5 + $0x548] sm:$0xff]  ;;  %v4303_v62 = vsel %vm143_vm1, %v4200_v9, 0.0  ;;  %v1098_v9 = vld [vmem:[%s11040_s5 + $0x18d8] sm:$0xff] }
 0x30e   :  { %3454 = vmatpush.msrb.mxu2 %v1171_v25  ;;  %3474 = vmatpush.msrb.mxu3 %v1571_v7  ;;  %v3138_v48 = vpop.f32.mrf.mxu2  ;;  %v3158_v23 = vpop.f32.mrf.mxu3  ;;  %v1347_v7 = vld [vmem:[%s11040_s5 + $0x20a0] sm:$0xff]  ;;  %v4304_v31 = vrot.slane %v4303_v62, 4 }
 0x30f   :  { %3482 = vmatpush.msra.mxu0 %v672_v38  ;;  %3502 = vmatpush.msra.mxu1 %v1072_v12  ;;  %v3139_v6 = vadd.f32 %v3138_v48, %v3119_v11  ;;  %v847_v38 = vld [vmem:[%s11040_s5 + $0x1100] sm:$0xff]  ;;  %v4199_v12 = vmul.f32 %v9594_v27, %v9594_v27 }
 0x310   :  { %3455 = vmatpush.msrb.mxu2 %v1146_v54  ;;  %3475 = vmatpush.msrb.mxu3 %v1546_v2  ;;  %v1322_v54 = vld [vmem:[%s11040_s5 + $0x1fd8] sm:$0xff]  ;;  %v4305_v0 = vadd.f32 %v4304_v31, %v4303_v62  ;;  %v1547_v62 = vld [vmem:[%s11040_s5 + $0x26e0] sm:$0xff] }
 0x311   :  { %3483 = vmatpush.msra.mxu0 %v647_v43  ;;  %3503 = vmatpush.msra.mxu1 %v1047_v47  ;;  %v9520_v18 = vadd.f32 %v3158_v23, %v3139_v6  ;;  %v1722_v2 = vld [vmem:[%s11040_s5 + $0x2c58] sm:$0xff]  ;;  %v397_v6 = vld [vmem:[%s11040_s5 + $0x2f0] sm:$0xff]  ;;  %v4296_v23 = vsel %vm143_vm1, %v4199_v12, 0.0 }
 0x312   :  { %3456 = vmatpush.msrb.mxu2 %v1121_v53  ;;  %3476 = vmatpush.msrb.mxu3 %v1521_v39  ;;  %v422_v43 = vld [vmem:[%s11040_s5 + $0x3b8] sm:$0xff]  ;;  %v1297_v53 = vld [vmem:[%s11040_s5 + $0x1f10] sm:$0xff]  ;;  %v4297_v5 = vrot.slane %v4296_v23, 4 }
 0x313   :  { %3457 = vmatmul.f32.vlgmr.msrb.gmra.mxu2 %v5648_v50  ;;  %3477 = vmatmul.f32.vlgmr.msrb.gmra.mxu3 %v5653_v52  ;;  %v4059_v4 = vsel %vm143_vm1, %v9520_v18, 0.0  ;;  %v822_v47 = vld [vmem:[%s11040_s5 + $0x1038] sm:$0xff]  ;;  %v1697_v39 = vld [vmem:[%s11040_s5 + $0x2b90] sm:$0xff] }
 0x314   :  { %3484 = vmatpush.msra.mxu0 %v622_v63  ;;  %3504 = vmatpush.msra.mxu1 %v1022_v8  ;;  %v4060_v59 = vrot.slane %v4059_v4, 4  ;;  %v1272_v8 = vld [vmem:[%s11040_s5 + $0x1e48] sm:$0xff]  ;;  %v1522_v12 = vld [vmem:[%s11040_s5 + $0x2618] sm:$0xff] }
 0x315   :  { %3521 = vmatpush.msra.mxu2 %v1497_v10  ;;  %3541 = vmatpush.msra.mxu3 %v1897_v57  ;;  %v372_v10 = vld [vmem:[%s11040_s5 + $0x228] sm:$0xff] }
 0x316   :  { %3485 = vmatpush.msra.mxu0 %v597_v33  ;;  %3505 = vmatpush.msra.mxu1 %v997_v1  ;;  %v4061_v30 = vadd.f32 %v4060_v59, %v4059_v4  ;;  %v772_v57 = vld [vmem:[%s11040_s5 + $0xea8] sm:$0xff]  ;;  %v1247_v1 = vld [vmem:[%s11040_s5 + $0x1d80] sm:$0xff] }
 0x317   :  { %3522 = vmatpush.msra.mxu2 %v1472_v36  ;;  %3542 = vmatpush.msra.mxu3 %v1872_v58  ;;  %v1647_v4 = vld [vmem:[%s11040_s5 + $0x2a00] sm:$0xff] }
 0x318   :  { %3486 = vmatpush.msra.mxu0 %v572_v60  ;;  %3506 = vmatpush.msra.mxu1 %v972_v15  ;;  %v4062_v32 = vrot.slane %v4061_v30, 2  ;;  %v347_v58 = vld [vmem:[%s11040_s5 + $0x160] sm:$0xff]  ;;  %v1926_v60 = vperm.slane %v9249_v42, 7  ;;  %v1222_v15 = vld [vmem:[%s11040_s5 + $0x1cb8] sm:$0xff] }
 0x319   :  { %3523 = vmatpush.msra.mxu2 %v1447_v20  ;;  %3543 = vmatpush.msra.mxu3 %v1847_v19  ;;  %v747_v59 = vld [vmem:[%s11040_s5 + $0xde0] sm:$0xff]  ;;  %v1622_v20 = vld [vmem:[%s11040_s5 + $0x2938] sm:$0xff] }
 0x31a   :  { %3487 = vmatpush.msra.mxu0 %v547_v56  ;;  %3507 = vmatpush.msra.mxu1 %v947_v35  ;;  %v4063_v40 = vadd.f32 %v4062_v32, %v4061_v30  ;;  %v4306_v30 = vrot.slane %v4305_v0, 2  ;;  %v322_v35 = vld [vmem:[%s11040_s5 + $0x98] sm:$0xff] }
 0x31b   :  { %3524 = vmatpush.msra.mxu2 %v1422_v26  ;;  %3544 = vmatpush.msra.mxu3 %v1822_v51  ;;  %v722_v42 = vld [vmem:[%s11040_s5 + $0xd18] sm:$0xff]  ;;  %v1597_v26 = vld [vmem:[%s11040_s5 + $0x2870] sm:$0xff]  ;;  %v4298_v51 = vadd.f32 %v4297_v5, %v4296_v23  ;;  %v1448_v5 = vld [vmem:[%s11040_s5 + $0x23c8] sm:$0xff] }
 0x31c   :  { %v4064_v13 = vrot.slane %v4063_v40, 1  ;;  %3488 = vmatpush.msra.mxu0 %v522_v45  ;;  %3508 = vmatpush.msra.mxu1 %v922_v21  ;;  %v698_v21 = vld [vmem:[%s11040_s5 + $0xc58] sm:$0xff] }
 0x31d   :  { %3525 = vmatpush.msra.mxu2 %v1397_v22  ;;  %3545 = vmatpush.msra.mxu3 %v1797_v14  ;;  %v1172_v22 = vld [vmem:[%s11040_s5 + $0x1b28] sm:$0xff]  ;;  %v598_v23 = vld [vmem:[%s11040_s5 + $0x938] sm:$0xff] }
 0x31e   :  { %v4065_v25 = vadd.f32 %v4064_v13, %v4063_v40  ;;  %3489 = vmatpush.msra.mxu0 %v497_v28  ;;  %3509 = vmatpush.msra.mxu1 %v897_v29  ;;  %v4307_v40 = vadd.f32 %v4306_v30, %v4305_v0  ;;  %v1572_v14 = vld [vmem:[%s11040_s5 + $0x27a8] sm:$0xff]  ;;  %v673_v29 = vld [vmem:[%s11040_s5 + $0xb90] sm:$0xff] }
 0x31f   :  { %3526 = vmatpush.msra.mxu2 %v1372_v41  ;;  %3546 = vmatpush.msra.mxu3 %v1772_v44  ;;  %v1073_v13 = vld [vmem:[%s11040_s5 + $0x1810] sm:$0xff]  ;;  %v4299_v41 = vrot.slane %v4298_v51, 2 }
 0x320   :  { %v4151_v11 = vmul.f32 %v4065_v25, %v5427_v3  ;;  %3490 = vmatpush.msra.mxu0 %v472_v37  ;;  %3510 = vmatpush.msra.mxu1 %v872_v55  ;;  %v1147_v55 = vld [vmem:[%s11040_s5 + $0x1a60] sm:$0xff]  ;;  %v648_v25 = vld [vmem:[%s11040_s5 + $0xac8] sm:$0xff]  ;;  %v1873_v0 = vld [vmem:[%s11040_s5 + $0x3110] sm:$0xff] }
 0x321   :  { %3527 = vmatpush.msra.mxu2 %v1347_v7  ;;  %3547 = vmatpush.msra.mxu3 %v1747_v49  ;;  %v1048_v7 = vld [vmem:[%s11040_s5 + $0x1748] sm:$0xff] }
 0x322   :  { %v9637_v48 = vsub.f32 %v9520_v18, %v4151_v11  ;;  %3491 = vmatpush.msra.mxu0 %v447_v17  ;;  %3511 = vmatpush.msra.mxu1 %v847_v38  ;;  %v1672_v18 = vld [vmem:[%s11040_s5 + $0x2ac8] sm:$0xff]  ;;  %v4308_v17 = vrot.slane %v4307_v40, 1  ;;  %v1122_v38 = vld [vmem:[%s11040_s5 + $0x1998] sm:$0xff] }
 0x323   :  { %3528 = vmatpush.msra.mxu2 %v1322_v54  ;;  %3548 = vmatpush.msra.mxu3 %v1722_v2  ;;  %v3178_v19 = vpop.f32.mrf.mxu0  ;;  %v3198_v28 = vpop.f32.mrf.mxu1  ;;  %v4300_v2 = vadd.f32 %v4299_v41, %v4298_v51  ;;  %v1398_v51 = vld [vmem:[%s11040_s5 + $0x2238] sm:$0xff]  ;;  %v873_v41 = vld [vmem:[%s11040_s5 + $0x11d0] sm:$0xff] }
 0x324   :  { %v4201_v63 = vmul.f32 %v9637_v48, %v9637_v48  ;;  %3492 = vmatpush.msra.mxu0 %v422_v43  ;;  %3512 = vmatpush.msra.mxu1 %v822_v47  ;;  %v3179_v45 = vadd.f32 %v3178_v19, %v1926_v60  ;;  %v623_v43 = vld [vmem:[%s11040_s5 + $0xa00] sm:$0xff]  ;;  %v548_v60 = vld [vmem:[%s11040_s5 + $0x7a8] sm:$0xff] }
 0x325   :  { %3529 = vmatpush.msra.mxu2 %v1297_v53  ;;  %3549 = vmatpush.msra.mxu3 %v1697_v39  ;;  %v1023_v47 = vld [vmem:[%s11040_s5 + $0x1680] sm:$0xff]  ;;  %v1498_v39 = vld [vmem:[%s11040_s5 + $0x2558] sm:$0xff] }
 0x326   :  { %v4310_v33 = vsel %vm143_vm1, %v4201_v63, 0.0  ;;  %3493 = vmatpush.msra.mxu0 %v397_v6  ;;  %3513 = vmatpush.msra.mxu1 %v797_v46  ;;  %v3199_v37 = vadd.f32 %v3198_v28, %v3179_v45  ;;  %v1898_v6 = vld [vmem:[%s11040_s5 + $0x31d8] sm:$0xff]  ;;  %v4309_v46 = vadd.f32 %v4308_v17, %v4307_v40  ;;  %v1823_v19 = vld [vmem:[%s11040_s5 + $0x2f80] sm:$0xff] }
 0x327   :  { %v4311_v36 = vrot.slane %v4310_v33, 4  ;;  %3530 = vmatpush.msra.mxu2 %v1272_v8  ;;  %3550 = vmatpush.msra.mxu3 %v1672_v18  ;;  %v998_v63 = vld [vmem:[%s11040_s5 + $0x15b8] sm:$0xff]  ;;  %v1473_v18 = vld [vmem:[%s11040_s5 + $0x2490] sm:$0xff]  ;;  %v1723_v17 = vld [vmem:[%s11040_s5 + $0x2c60] sm:$0xff] }
 0x328   :  { %3494 = vmatpush.msra.mxu0 %v372_v10  ;;  %3514 = vmatpush.msra.mxu1 %v772_v57  ;;  %v4301_v57 = vrot.slane %v4300_v2, 1 }
 0x329   :  { %v4312_v56 = vadd.f32 %v4311_v36, %v4310_v33  ;;  %3531 = vmatpush.msra.mxu2 %v1247_v1  ;;  %3551 = vmatpush.msra.mxu3 %v1647_v4  ;;  %v573_v1 = vld [vmem:[%s11040_s5 + $0x870] sm:$0xff]  ;;  %v1848_v36 = vld [vmem:[%s11040_s5 + $0x3048] sm:$0xff] }
 0x32a   :  { %3495 = vmatpush.msra.mxu0 %v347_v58  ;;  %3515 = vmatpush.msra.mxu1 %v747_v59  ;;  %v973_v4 = vld [vmem:[%s11040_s5 + $0x14f0] sm:$0xff]  ;;  %v4400_v59 = vmul.f32 %v4309_v46, %v5427_v3 }
 0x32b   :  { %v4313_v32 = vrot.slane %v4312_v56, 2  ;;  %3532 = vmatpush.msra.mxu2 %v1222_v15  ;;  %3552 = vmatpush.msra.mxu3 %v1622_v20  ;;  %v948_v15 = vld [vmem:[%s11040_s5 + $0x1428] sm:$0xff]  ;;  %v1423_v20 = vld [vmem:[%s11040_s5 + $0x2300] sm:$0xff] }
 0x32c   :  { %3496 = vmatpush.msra.mxu0 %v322_v35  ;;  %3516 = vmatpush.msra.mxu1 %v722_v42  ;;  %v523_v42 = vld [vmem:[%s11040_s5 + $0x6e0] sm:$0xff]  ;;  %v9804_v45 = vadd.f32 1e-05, %v4400_v59 }
 0x32d   :  { %3533 = vmatpush.msra.mxu2 %v1197_v61  ;;  %3553 = vmatpush.msra.mxu3 %v1597_v26  ;;  %v4314_v44 = vadd.f32 %v4313_v32, %v4312_v56  ;;  %v4302_v56 = vadd.f32 %v4301_v57, %v4300_v2  ;;  %v923_v61 = vld [vmem:[%s11040_s5 + $0x1360] sm:$0xff]  ;;  %v1798_v32 = vld [vmem:[%s11040_s5 + $0x2eb8] sm:$0xff] }
 0x32e   :  { %3497 = vmatmul.f32.vlgmr.msra.gmra.mxu0 %v5619_v16  ;;  %3517 = vmatmul.f32.vlgmr.msra.gmra.mxu1 %v5624_v34  ;;  %5024 = vrsqrt.f32 %v9804_v45  ;;  %v1298_v2 = vld [vmem:[%s11040_s5 + $0x1f18] sm:$0xff]  ;;  %v323_v59 = vld [vmem:[%s11040_s5 + $0xa0] sm:$0xff]  ;;  %vm4573_vm11 = vweird.f32 %v9804_v45 }
 0x32f   :  { %3561 = vmatpush.msrb.mxu0 %v698_v21  ;;  %3581 = vmatpush.msrb.mxu1 %v1098_v9  ;;  %v4315_v31 = vrot.slane %v4314_v44, 1  ;;  %v498_v21 = vld [vmem:[%s11040_s5 + $0x618] sm:$0xff]  ;;  %v4399_v28 = vmul.f32 %v4302_v56, %v5427_v3 }
 0x330   :  { %3534 = vmatpush.msra.mxu2 %v1172_v22  ;;  %3554 = vmatpush.msra.mxu3 %v1572_v14  ;;  %v3218_v49 = vpop.f32.mrf.mxu2  ;;  %v3238_v54 = vpop.f32.mrf.mxu3  ;;  %v898_v9 = vld [vmem:[%s11040_s5 + $0x1298] sm:$0xff]  ;;  %v1373_v22 = vld [vmem:[%s11040_s5 + $0x2170] sm:$0xff] }
 0x331   :  { %3562 = vmatpush.msrb.mxu0 %v673_v29  ;;  %3582 = vmatpush.msrb.mxu1 %v1073_v13  ;;  %v3219_v11 = vadd.f32 %v3218_v49, %v3199_v37  ;;  %v4316_v33 = vadd.f32 %v4315_v31, %v4314_v44  ;;  %v1773_v14 = vld [vmem:[%s11040_s5 + $0x2df0] sm:$0xff]  ;;  %v1348_v37 = vld [vmem:[%s11040_s5 + $0x20a8] sm:$0xff]  ;;  %v1323_v49 = vld [vmem:[%s11040_s5 + $0x1fe0] sm:$0xff] }
 0x332   :  { %3535 = vmatpush.msra.mxu2 %v1147_v55  ;;  %3555 = vmatpush.msra.mxu3 %v1547_v62  ;;  %v473_v13 = vld [vmem:[%s11040_s5 + $0x550] sm:$0xff]  ;;  %v1748_v55 = vld [vmem:[%s11040_s5 + $0x2d28] sm:$0xff]  ;;  %v1698_v31 = vld [vmem:[%s11040_s5 + $0x2b98] sm:$0xff] }
 0x333   :  { %3563 = vmatpush.msrb.mxu0 %v648_v25  ;;  %3583 = vmatpush.msrb.mxu1 %v1048_v7  ;;  %v9742_v53 = vadd.f32 %v3238_v54, %v3219_v11  ;;  %v4401_v35 = vmul.f32 %v4316_v33, %v5427_v3  ;;  %v448_v62 = vld [vmem:[%s11040_s5 + $0x488] sm:$0xff]  ;;  %v823_v11 = vld [vmem:[%s11040_s5 + $0x1040] sm:$0xff] }
 0x334   :  { %3536 = vmatpush.msra.mxu2 %v1122_v38  ;;  %3556 = vmatpush.msra.mxu3 %v1522_v12  ;;  %v848_v25 = vld [vmem:[%s11040_s5 + $0x1108] sm:$0xff]  ;;  %v9847_v38 = vadd.f32 1e-05, %v4399_v28  ;;  %v423_v12 = vld [vmem:[%s11040_s5 + $0x3c0] sm:$0xff]  ;;  %v9879_v46 = vpop.eup %5024 }
 0x335   :  { %3537 = vmatmul.f32.vlgmr.msra.gmra.mxu2 %v5648_v50  ;;  %3557 = vmatmul.f32.vlgmr.msra.gmra.mxu3 %v5653_v52  ;;  %v4066_v8 = vsel %vm143_vm1, %v9742_v53, 0.0  ;;  %v9819_v29 = vadd.f32 1e-05, %v4401_v35  ;;  %v348_v33 = vld [vmem:[%s11040_s5 + $0x168] sm:$0xff]  ;;  %vm4574_vm10 = vweird.f32 %v9879_v46 }
 0x336   :  { %3564 = vmatpush.msrb.mxu0 %v623_v43  ;;  %3584 = vmatpush.msrb.mxu1 %v1023_v47  ;;  %v4067_v10 = vrot.slane %v4066_v8, 4  ;;  %v398_v43 = vld [vmem:[%s11040_s5 + $0x2f8] sm:$0xff]  ;;  %v1148_v28 = vld [vmem:[%s11040_s5 + $0x1a68] sm:$0xff]  ;;  %vm10031_vm15 = vmor %vm4573_vm11, %vm4574_vm10  ;;  %vm4563_vm4 = vweird.f32 %v9847_v38 }
 0x337   :  { %3601 = vmatpush.msrb.mxu2 %v1498_v39  ;;  %3621 = vmatpush.msrb.mxu3 %v1898_v6  ;;  %5026 = vrsqrt.f32 %v9819_v29  ;;  %v798_v47 = vld [vmem:[%s11040_s5 + $0xf78] sm:$0xff]  ;;  %v1273_v39 = vld [vmem:[%s11040_s5 + $0x1e50] sm:$0xff]  ;;  %vm4583_vm0 = vweird.f32 %v9819_v29 }
 0x338   :  { %3565 = vmatpush.msrb.mxu0 %v598_v23  ;;  %3585 = vmatpush.msrb.mxu1 %v998_v63  ;;  %v4068_v58 = vadd.f32 %v4067_v10, %v4066_v8  ;;  %v1673_v6 = vld [vmem:[%s11040_s5 + $0x2ad0] sm:$0xff]  ;;  %5028 = vrsqrt.f32 %v9847_v38 }
 0x339   :  { %3602 = vmatpush.msrb.mxu2 %v1473_v18  ;;  %3622 = vmatpush.msrb.mxu3 %v1873_v0  ;;  %v373_v23 = vld [vmem:[%s11040_s5 + $0x230] sm:$0xff]  ;;  %v1248_v18 = vld [vmem:[%s11040_s5 + $0x1d88] sm:$0xff] }
 0x33a   :  { %3566 = vmatpush.msrb.mxu0 %v573_v1  ;;  %3586 = vmatpush.msrb.mxu1 %v973_v4  ;;  %v4069_v30 = vrot.slane %v4068_v58, 2  ;;  %v773_v63 = vld [vmem:[%s11040_s5 + $0xeb0] sm:$0xff]  ;;  %v1648_v0 = vld [vmem:[%s11040_s5 + $0x2a08] sm:$0xff]  ;;  %v4568_v4 = vmul.f32 %v9879_v46, %v9804_v45 }
 0x33b   :  { %3603 = vmatpush.msrb.mxu2 %v1448_v5  ;;  %3623 = vmatpush.msrb.mxu3 %v1848_v36  ;;  %v748_v1 = vld [vmem:[%s11040_s5 + $0xde8] sm:$0xff]  ;;  %v1223_v5 = vld [vmem:[%s11040_s5 + $0x1cc0] sm:$0xff] }
 0x33c   :  { %3567 = vmatpush.msrb.mxu0 %v548_v60  ;;  %3587 = vmatpush.msrb.mxu1 %v948_v15  ;;  %v4070_v26 = vadd.f32 %v4069_v30, %v4068_v58  ;;  %v1623_v36 = vld [vmem:[%s11040_s5 + $0x2940] sm:$0xff]  ;;  %v4569_v35 = vmul.f32 %v9879_v46, %v4568_v4  ;;  %v549_v4 = vld [vmem:[%s11040_s5 + $0x7b0] sm:$0xff]  ;;  %v524_v45 = vld [vmem:[%s11040_s5 + $0x6e8] sm:$0xff] }
 0x33d   :  { %3604 = vmatpush.msrb.mxu2 %v1423_v20  ;;  %3624 = vmatpush.msrb.mxu3 %v1823_v19  ;;  %v9895_v10 = vpop.eup %5026  ;;  %v723_v60 = vld [vmem:[%s11040_s5 + $0xd20] sm:$0xff]  ;;  %v1198_v20 = vld [vmem:[%s11040_s5 + $0x1bf8] sm:$0xff] }
 0x33e   :  { %v4071_v40 = vrot.slane %v4070_v26, 1  ;;  %3568 = vmatpush.msrb.mxu0 %v523_v42  ;;  %3588 = vmatpush.msrb.mxu1 %v923_v61  ;;  %v4578_v15 = vmul.f32 %v9895_v10, %v9819_v29  ;;  %v1598_v19 = vld [vmem:[%s11040_s5 + $0x2878] sm:$0xff]  ;;  %v9925_v30 = vpop.eup %5028  ;;  %v699_v42 = vld [vmem:[%s11040_s5 + $0xc60] sm:$0xff]  ;;  %vm4584_vm14 = vweird.f32 %v9895_v10 }
 0x33f   :  { %3605 = vmatpush.msrb.mxu2 %v1398_v51  ;;  %3625 = vmatpush.msrb.mxu3 %v1798_v32  ;;  %v1099_v61 = vld [vmem:[%s11040_s5 + $0x18e0] sm:$0xff]  ;;  %v1173_v51 = vld [vmem:[%s11040_s5 + $0x1b30] sm:$0xff]  ;;  %vm10055_vm2 = vmor %vm4583_vm0, %vm4584_vm14  ;;  %vm4564_vm3 = vweird.f32 %v9925_v30 }
 0x340   :  { %v4072_v44 = vadd.f32 %v4071_v40, %v4070_v26  ;;  %3569 = vmatpush.msrb.mxu0 %v498_v21  ;;  %3589 = vmatpush.msrb.mxu1 %v898_v9  ;;  %v1573_v32 = vld [vmem:[%s11040_s5 + $0x27b0] sm:$0xff]  ;;  %v4558_v21 = vmul.f32 %v9925_v30, %v9847_v38  ;;  %v4579_v9 = vmul.f32 %v9895_v10, %v4578_v15  ;;  %v674_v40 = vld [vmem:[%s11040_s5 + $0xb98] sm:$0xff]  ;;  %v499_v29 = vld [vmem:[%s11040_s5 + $0x620] sm:$0xff] }
 0x341   :  { %3606 = vmatpush.msrb.mxu2 %v1373_v22  ;;  %3626 = vmatpush.msrb.mxu3 %v1773_v14  ;;  %v1074_v22 = vld [vmem:[%s11040_s5 + $0x1818] sm:$0xff]  ;;  %vm10101_vm5 = vmor %vm4563_vm4, %vm4564_vm3 }
 0x342   :  { %v4152_v7 = vmul.f32 %v4072_v44, %v5427_v3  ;;  %3570 = vmatpush.msrb.mxu0 %v473_v13  ;;  %3590 = vmatpush.msrb.mxu1 %v873_v41  ;;  %v1548_v13 = vld [vmem:[%s11040_s5 + $0x26e8] sm:$0xff]  ;;  %v4570_v41 = vmul.f32 0.5, %v4569_v35  ;;  %v649_v44 = vld [vmem:[%s11040_s5 + $0xad0] sm:$0xff]  ;;  %v1799_v35 = vld [vmem:[%s11040_s5 + $0x2ec0] sm:$0xff] }
 0x343   :  { %3607 = vmatpush.msrb.mxu2 %v1348_v37  ;;  %3627 = vmatpush.msrb.mxu3 %v1748_v55  ;;  %v1049_v37 = vld [vmem:[%s11040_s5 + $0x1750] sm:$0xff] }
 0x344   :  { %v9857_v54 = vsub.f32 %v9742_v53, %v4152_v7  ;;  %3571 = vmatpush.msrb.mxu0 %v448_v62  ;;  %3591 = vmatpush.msrb.mxu1 %v848_v25  ;;  %v1123_v62 = vld [vmem:[%s11040_s5 + $0x19a0] sm:$0xff]  ;;  %v4559_v7 = vmul.f32 %v9925_v30, %v4558_v21  ;;  %v1374_v21 = vld [vmem:[%s11040_s5 + $0x2178] sm:$0xff] }
 0x345   :  { %3608 = vmatpush.msrb.mxu2 %v1323_v49  ;;  %3628 = vmatpush.msrb.mxu3 %v1723_v17  ;;  %v1523_v25 = vld [vmem:[%s11040_s5 + $0x2620] sm:$0xff]  ;;  %v4580_v49 = vmul.f32 0.5, %v4579_v9  ;;  %v1774_v9 = vld [vmem:[%s11040_s5 + $0x2df8] sm:$0xff] }
 0x346   :  { %v4202_v53 = vmul.f32 %v9857_v54, %v9857_v54  ;;  %3572 = vmatpush.msrb.mxu0 %v423_v12  ;;  %3592 = vmatpush.msrb.mxu1 %v823_v11  ;;  %v624_v12 = vld [vmem:[%s11040_s5 + $0xa08] sm:$0xff] }
 0x347   :  { %3609 = vmatpush.msrb.mxu2 %v1298_v2  ;;  %3629 = vmatpush.msrb.mxu3 %v1698_v31  ;;  %v1024_v11 = vld [vmem:[%s11040_s5 + $0x1688] sm:$0xff]  ;;  %v4571_v2 = vsub.f32 1.5, %v4570_v41  ;;  %v1499_v31 = vld [vmem:[%s11040_s5 + $0x2560] sm:$0xff]  ;;  %v1749_v41 = vld [vmem:[%s11040_s5 + $0x2d30] sm:$0xff] }
 0x348   :  { %v4317_v8 = vsel %vm143_vm1, %v4202_v53, 0.0  ;;  %3573 = vmatpush.msrb.mxu0 %v398_v43  ;;  %3593 = vmatpush.msrb.mxu1 %v798_v47  ;;  %v1899_v43 = vld [vmem:[%s11040_s5 + $0x31e0] sm:$0xff] }
 0x349   :  { %v4318_v57 = vrot.slane %v4317_v8, 4  ;;  %3610 = vmatpush.msrb.mxu2 %v1273_v39  ;;  %3630 = vmatpush.msrb.mxu3 %v1673_v6  ;;  %v599_v53 = vld [vmem:[%s11040_s5 + $0x940] sm:$0xff]  ;;  %v4560_v6 = vmul.f32 0.5, %v4559_v7 }
 0x34a   :  { %3574 = vmatpush.msrb.mxu0 %v373_v23  ;;  %3594 = vmatpush.msrb.mxu1 %v773_v63  ;;  %v999_v39 = vld [vmem:[%s11040_s5 + $0x15c0] sm:$0xff]  ;;  %v4581_v23 = vsub.f32 1.5, %v4580_v49  ;;  %v1474_v63 = vld [vmem:[%s11040_s5 + $0x2498] sm:$0xff]  ;;  %v1724_v49 = vld [vmem:[%s11040_s5 + $0x2c68] sm:$0xff] }
 0x34b   :  { %v4319_v58 = vadd.f32 %v4318_v57, %v4317_v8  ;;  %3611 = vmatpush.msrb.mxu2 %v1248_v18  ;;  %3631 = vmatpush.msrb.mxu3 %v1648_v0  ;;  %v1874_v8 = vld [vmem:[%s11040_s5 + $0x3118] sm:$0xff]  ;;  %v4572_v57 = vmul.f32 %v9879_v46, %v4571_v2  ;;  %v824_v2 = vld [vmem:[%s11040_s5 + $0x1048] sm:$0xff] }
 0x34c   :  { %3575 = vmatpush.msrb.mxu0 %v348_v33  ;;  %3595 = vmatpush.msrb.mxu1 %v748_v1  ;;  %v574_v18 = vld [vmem:[%s11040_s5 + $0x878] sm:$0xff]  ;;  %v1449_v33 = vld [vmem:[%s11040_s5 + $0x23d0] sm:$0xff] }
 0x34d   :  { %v4320_v56 = vrot.slane %v4319_v58, 2  ;;  %3612 = vmatpush.msrb.mxu2 %v1223_v5  ;;  %3632 = vmatpush.msrb.mxu3 %v1623_v36  ;;  %v974_v0 = vld [vmem:[%s11040_s5 + $0x14f8] sm:$0xff]  ;;  %v1849_v1 = vld [vmem:[%s11040_s5 + $0x3050] sm:$0xff]  ;;  %v4561_v36 = vsub.f32 1.5, %v4560_v6 }
 0x34e   :  { %3576 = vmatpush.msrb.mxu0 %v323_v59  ;;  %3596 = vmatpush.msrb.mxu1 %v723_v60  ;;  %v949_v5 = vld [vmem:[%s11040_s5 + $0x1430] sm:$0xff]  ;;  %v1424_v59 = vld [vmem:[%s11040_s5 + $0x2308] sm:$0xff] }
 0x34f   :  { %v4321_v26 = vadd.f32 %v4320_v56, %v4319_v58  ;;  %3613 = vmatpush.msrb.mxu2 %v1198_v20  ;;  %3633 = vmatpush.msrb.mxu3 %v1598_v19  ;;  %v4582_v58 = vmul.f32 %v9895_v10, %v4581_v23  ;;  %v1824_v60 = vld [vmem:[%s11040_s5 + $0x2f88] sm:$0xff]  ;;  %v4576_v19 = vsel %vm10031_vm15, %v9879_v46, %v4572_v57  ;;  %v1399_v56 = vld [vmem:[%s11040_s5 + $0x2240] sm:$0xff] }
 0x350   :  { %3577 = vmatmul.f32.vlgmr.msrb.gmra.mxu0 %v5619_v16  ;;  %3597 = vmatmul.f32.vlgmr.msrb.gmra.mxu1 %v5624_v34  ;;  %v924_v20 = vld [vmem:[%s11040_s5 + $0x1368] sm:$0xff]  ;;  %v899_v46 = vld [vmem:[%s11040_s5 + $0x12a0] sm:$0xff] }
 0x351   :  { %v4322_v14 = vrot.slane %v4321_v26, 1  ;;  %3641 = vmatpush.msra.mxu0 %v699_v42  ;;  %3661 = vmatpush.msra.mxu1 %v1099_v61  ;;  %v10190_v61 = vpop.f32.mrf.mxu1 }
 0x352   :  { %3614 = vmatpush.msrb.mxu2 %v1173_v51  ;;  %3634 = vmatpush.msrb.mxu3 %v1573_v32  ;;  %v4586_v51 = vsel %vm10055_vm2, %v9895_v10, %v4582_v58 }
 0x353   :  { %v4323_v55 = vadd.f32 %v4322_v14, %v4321_v26  ;;  %3642 = vmatpush.msra.mxu0 %v674_v40  ;;  %3662 = vmatpush.msra.mxu1 %v1074_v22  ;;  %v4562_v26 = vmul.f32 %v9925_v30, %v4561_v36  ;;  %v4700_v40 = vmul.f32 %v4576_v19, %v9552_v24  ;;  %v10082_v22 = vld [vmem:[%s11045_s7 + $0x8] sm:$0xff]  ;;  %v474_v14 = vld [vmem:[%s11040_s5 + $0x558] sm:$0xff] }
 0x354   :  { %3615 = vmatpush.msrb.mxu2 %v1148_v28  ;;  %3635 = vmatpush.msrb.mxu3 %v1548_v13  ;;  %v4733_v10 = vperm.slane %v10082_v22, 5  ;;  %v874_v28 = vld [vmem:[%s11040_s5 + $0x11d8] sm:$0xff]  ;;  %v1349_v13 = vld [vmem:[%s11040_s5 + $0x20b0] sm:$0xff]  ;;  %v4701_v38 = vmul.f32 %v4586_v51, %v9637_v48  ;;  %v1324_v48 = vld [vmem:[%s11040_s5 + $0x1fe8] sm:$0xff]  ;;  %v4732_v23 = vperm.slane %v10082_v22, 4 }
 0x355   :  { %v4402_v17 = vmul.f32 %v4323_v55, %v5427_v3  ;;  %3643 = vmatpush.msra.mxu0 %v649_v44  ;;  %3663 = vmatpush.msra.mxu1 %v1049_v37  ;;  %v4734_v37 = vperm.slane %v10082_v22, 6  ;;  %v449_v55 = vld [vmem:[%s11040_s5 + $0x490] sm:$0xff] }
 0x356   :  { %3616 = vmatpush.msrb.mxu2 %v1123_v62  ;;  %3636 = vmatpush.msrb.mxu3 %v1523_v25  ;;  %v849_v62 = vld [vmem:[%s11040_s5 + $0x1110] sm:$0xff]  ;;  %v4566_v25 = vsel %vm10101_vm5, %v9925_v30, %v4562_v26  ;;  %v424_v30 = vld [vmem:[%s11040_s5 + $0x3c8] sm:$0xff] }
 0x357   :  { %v9983_v47 = vadd.f32 1e-05, %v4402_v17  ;;  %3617 = vmatmul.f32.vlgmr.msrb.gmra.mxu2 %v5648_v50  ;;  %3637 = vmatmul.f32.vlgmr.msrb.gmra.mxu3 %v5653_v52  ;;  %v4783_v17 = vmul.f32 %v4733_v10, %v4700_v40  ;;  %v4699_v6 = vmul.f32 %v4566_v25, %v9594_v27  ;;  %v1274_v27 = vld [vmem:[%s11040_s5 + $0x1e58] sm:$0xff]  ;;  %v1199_v40 = vld [vmem:[%s11040_s5 + $0x1c00] sm:$0xff]  ;;  %v10225_v25 = vpop.f32.mrf.mxu3 }
 0x358   :  { %3644 = vmatpush.msra.mxu0 %v624_v12  ;;  %3664 = vmatpush.msra.mxu1 %v1024_v11  ;;  %v10125_v12 = vld [vmem:[%s11046_s8 + $0x8] sm:$0xff] }
 0x359   :  { %5030 = vrsqrt.f32 %v9983_v47  ;;  %3681 = vmatpush.msra.mxu2 %v1499_v31  ;;  %3701 = vmatpush.msra.mxu3 %v1899_v43  ;;  %v4816_v11 = vperm.slane %v10125_v12, 5  ;;  %v10135_v43 = vpop.f32.mrf.mxu0  ;;  %vm4593_vm7 = vweird.f32 %v9983_v47  ;;  %v4815_v36 = vperm.slane %v10125_v12, 4 }
 0x35a   :  { %3645 = vmatpush.msra.mxu0 %v599_v53  ;;  %3665 = vmatpush.msra.mxu1 %v999_v39  ;;  %v1299_v53 = vld [vmem:[%s11040_s5 + $0x1f20] sm:$0xff]  ;;  %v4782_v15 = vmul.f32 %v4732_v23, %v4699_v6  ;;  %v4818_v19 = vperm.slane %v10125_v12, 7 }
 0x35b   :  { %3682 = vmatpush.msra.mxu2 %v1474_v63  ;;  %3702 = vmatpush.msra.mxu3 %v1874_v8  ;;  %v1699_v39 = vld [vmem:[%s11040_s5 + $0x2ba0] sm:$0xff]  ;;  %v4784_v63 = vmul.f32 %v4734_v37, %v4701_v38  ;;  %v4817_v8 = vperm.slane %v10125_v12, 6 }
 0x35c   :  { %3646 = vmatpush.msra.mxu0 %v574_v18  ;;  %3666 = vmatpush.msra.mxu1 %v974_v0  ;;  %v399_v18 = vld [vmem:[%s11040_s5 + $0x300] sm:$0xff] }
 0x35d   :  { %3683 = vmatpush.msra.mxu2 %v1449_v33  ;;  %3703 = vmatpush.msra.mxu3 %v1849_v1  ;;  %v799_v0 = vld [vmem:[%s11040_s5 + $0xf80] sm:$0xff]  ;;  %v1674_v33 = vld [vmem:[%s11040_s5 + $0x2ad8] sm:$0xff]  ;;  %v4866_v1 = vadd.f32 %v4816_v11, %v4783_v17 }
 0x35e   :  { %3647 = vmatpush.msra.mxu0 %v549_v4  ;;  %3667 = vmatpush.msra.mxu1 %v949_v5  ;;  %v4735_v4 = vperm.slane %v10082_v22, 7  ;;  %v774_v5 = vld [vmem:[%s11040_s5 + $0xeb8] sm:$0xff]  ;;  %v1599_v22 = vld [vmem:[%s11040_s5 + $0x2880] sm:$0xff] }
 0x35f   :  { %v10051_v42 = vpop.eup %5030  ;;  %3684 = vmatpush.msra.mxu2 %v1424_v59  ;;  %3704 = vmatpush.msra.mxu3 %v1824_v60  ;;  %v1249_v59 = vld [vmem:[%s11040_s5 + $0x1d90] sm:$0xff]  ;;  %v4891_v26 = vmax.f32 %v4866_v1, 0.0 }
 0x360   :  { %v4588_v32 = vmul.f32 %v10051_v42, %v9983_v47  ;;  %3648 = vmatpush.msra.mxu0 %v524_v45  ;;  %3668 = vmatpush.msra.mxu1 %v924_v20  ;;  %vm4594_vm6 = vweird.f32 %v10051_v42  ;;  %v374_v47 = vld [vmem:[%s11040_s5 + $0x238] sm:$0xff]  ;;  %v1649_v60 = vld [vmem:[%s11040_s5 + $0x2a10] sm:$0xff]  ;;  %v4867_v45 = vadd.f32 %v4817_v8, %v4784_v63 }
 0x361   :  { %3685 = vmatpush.msra.mxu2 %v1399_v56  ;;  %3705 = vmatpush.msra.mxu3 %v1799_v35  ;;  %vm4595_vm8 = vmor %vm4593_vm7, %vm4594_vm6  ;;  %v349_v56 = vld [vmem:[%s11040_s5 + $0x170] sm:$0xff]  ;;  %v4936_v44 = vrot.slane %v4891_v26, 6 }
 0x362   :  { %v4589_v24 = vmul.f32 %v10051_v42, %v4588_v32  ;;  %3649 = vmatpush.msra.mxu0 %v499_v29  ;;  %3669 = vmatpush.msra.mxu1 %v899_v46  ;;  %v749_v35 = vld [vmem:[%s11040_s5 + $0xdf0] sm:$0xff]  ;;  %v1224_v29 = vld [vmem:[%s11040_s5 + $0x1cc8] sm:$0xff] }
 0x363   :  { %3686 = vmatpush.msra.mxu2 %v1374_v21  ;;  %3706 = vmatpush.msra.mxu3 %v1774_v9  ;;  %v1624_v46 = vld [vmem:[%s11040_s5 + $0x2948] sm:$0xff]  ;;  %v1025_v1 = vld [vmem:[%s11040_s5 + $0x1690] sm:$0xff] }
 0x364   :  { %v4590_v7 = vmul.f32 0.5, %v4589_v24  ;;  %3650 = vmatpush.msra.mxu0 %v474_v14  ;;  %3670 = vmatpush.msra.mxu1 %v874_v28  ;;  %v324_v32 = vld [vmem:[%s11040_s5 + $0xa8] sm:$0xff]  ;;  %v4865_v14 = vadd.f32 %v4815_v36, %v4782_v15  ;;  %v4892_v28 = vmax.f32 %v4867_v45, 0.0  ;;  %v575_v45 = vld [vmem:[%s11040_s5 + $0x880] sm:$0xff]  ;;  %v1425_v26 = vld [vmem:[%s11040_s5 + $0x2310] sm:$0xff] }
 0x365   :  { %3687 = vmatpush.msra.mxu2 %v1349_v13  ;;  %3707 = vmatpush.msra.mxu3 %v1749_v41  ;;  %v724_v21 = vld [vmem:[%s11040_s5 + $0xd28] sm:$0xff] }
 0x366   :  { %v4591_v31 = vsub.f32 1.5, %v4590_v7  ;;  %3651 = vmatpush.msra.mxu0 %v449_v55  ;;  %3671 = vmatpush.msra.mxu1 %v849_v62  ;;  %v700_v13 = vld [vmem:[%s11040_s5 + $0xc68] sm:$0xff]  ;;  %v1174_v55 = vld [vmem:[%s11040_s5 + $0x1b38] sm:$0xff]  ;;  %v675_v7 = vld [vmem:[%s11040_s5 + $0xba0] sm:$0xff]  ;;  %v4937_v17 = vrot.slane %v4892_v28, 4 }
 0x367   :  { %3688 = vmatpush.msra.mxu2 %v1324_v48  ;;  %3708 = vmatpush.msra.mxu3 %v1724_v49  ;;  %v3338_v10 = vpop.f32.mrf.mxu0  ;;  %v1100_v41 = vld [vmem:[%s11040_s5 + $0x18e8] sm:$0xff]  ;;  %v1574_v62 = vld [vmem:[%s11040_s5 + $0x27b8] sm:$0xff]  ;;  %v1075_v48 = vld [vmem:[%s11040_s5 + $0x1820] sm:$0xff]  ;;  %v4890_v49 = vmax.f32 %v4865_v14, 0.0 }
 0x368   :  { %v4592_v57 = vmul.f32 %v10051_v42, %v4591_v31  ;;  %3652 = vmatpush.msra.mxu0 %v424_v30  ;;  %3672 = vmatpush.msra.mxu1 %v824_v2  ;;  %v1149_v30 = vld [vmem:[%s11040_s5 + $0x1a70] sm:$0xff]  ;;  %v3358_v31 = vpop.f32.mrf.mxu1  ;;  %v1000_v36 = vld [vmem:[%s11040_s5 + $0x15c8] sm:$0xff] }
 0x369   :  { %3689 = vmatpush.msra.mxu2 %v1299_v53  ;;  %3709 = vmatpush.msra.mxu3 %v1699_v39  ;;  %v1549_v2 = vld [vmem:[%s11040_s5 + $0x26f0] sm:$0xff]  ;;  %v650_v53 = vld [vmem:[%s11040_s5 + $0xad8] sm:$0xff]  ;;  %v4956_v23 = vsel %vm143_vm1, %v4890_v49, %v4936_v44  ;;  %v900_v14 = vld [vmem:[%s11040_s5 + $0x12a8] sm:$0xff] }
 0x36a   :  { %v4596_v58 = vsel %vm4595_vm8, %v10051_v42, %v4592_v57  ;;  %3653 = vmatpush.msra.mxu0 %v399_v18  ;;  %3673 = vmatpush.msra.mxu1 %v799_v0  ;;  %v10188_v42 = vld [vmem:[%s11044_s6 + $0x10] sm:$0xff]  ;;  %v1050_v39 = vld [vmem:[%s11040_s5 + $0x1758] sm:$0xff]  ;;  %v1124_v18 = vld [vmem:[%s11040_s5 + $0x19a8] sm:$0xff]  ;;  %vm4129_vm8 = vcmask 517120  }
 0x36b   :  { %v4702_v20 = vmul.f32 %v4596_v58, %v9857_v54  ;;  %3690 = vmatpush.msra.mxu2 %v1274_v27  ;;  %3710 = vmatpush.msra.mxu3 %v1674_v33  ;;  %v10192_v54 = vpop.f32.mrf.mxu2  ;;  %v1928_v9 = vperm.slane %v10188_v42, 1  ;;  %v1927_v11 = vperm.slane %v10188_v42, 0  ;;  %v1524_v0 = vld [vmem:[%s11040_s5 + $0x2628] sm:$0xff]  ;;  %v625_v33 = vld [vmem:[%s11040_s5 + $0xa10] sm:$0xff]  ;;  %v1475_v58 = vld [vmem:[%s11040_s5 + $0x24a0] sm:$0xff] }
 0x36c   :  { %3654 = vmatpush.msra.mxu0 %v374_v47  ;;  %3674 = vmatpush.msra.mxu1 %v774_v5  ;;  %v1500_v47 = vld [vmem:[%s11040_s5 + $0x2568] sm:$0xff]  ;;  %v875_v44 = vld [vmem:[%s11040_s5 + $0x11e0] sm:$0xff]  ;;  %v1725_v49 = vld [vmem:[%s11040_s5 + $0x2c70] sm:$0xff] }
 0x36d   :  { %v4785_v51 = vmul.f32 %v4735_v4, %v4702_v20  ;;  %3691 = vmatpush.msra.mxu2 %v1249_v59  ;;  %3711 = vmatpush.msra.mxu3 %v1649_v60  ;;  %v3339_v37 = vadd.f32 %v3338_v10, %v1928_v9  ;;  %v3259_v27 = vadd.f32 %v10135_v43, %v1927_v11  ;;  %v1900_v43 = vld [vmem:[%s11040_s5 + $0x31e8] sm:$0xff]  ;;  %v1875_v59 = vld [vmem:[%s11040_s5 + $0x3120] sm:$0xff] }
 0x36e   :  { %3655 = vmatpush.msra.mxu0 %v349_v56  ;;  %3675 = vmatpush.msra.mxu1 %v749_v35  ;;  %v600_v5 = vld [vmem:[%s11040_s5 + $0x948] sm:$0xff]  ;;  %v975_v20 = vld [vmem:[%s11040_s5 + $0x1500] sm:$0xff]  ;;  %v1450_v56 = vld [vmem:[%s11040_s5 + $0x23d8] sm:$0xff] }
 0x36f   :  { %v4868_v24 = vadd.f32 %v4818_v19, %v4785_v51  ;;  %3692 = vmatpush.msra.mxu2 %v1224_v29  ;;  %3712 = vmatpush.msra.mxu3 %v1624_v46  ;;  %v3359_v8 = vadd.f32 %v3358_v31, %v3339_v37  ;;  %v3279_v15 = vadd.f32 %v10190_v61, %v3259_v27  ;;  %v1850_v35 = vld [vmem:[%s11040_s5 + $0x3058] sm:$0xff]  ;;  %v1400_v9 = vld [vmem:[%s11040_s5 + $0x2248] sm:$0xff] }
 0x370   :  { %3656 = vmatpush.msra.mxu0 %v324_v32  ;;  %3676 = vmatpush.msra.mxu1 %v724_v21  ;;  %v550_v29 = vld [vmem:[%s11040_s5 + $0x7b8] sm:$0xff]  ;;  %v525_v32 = vld [vmem:[%s11040_s5 + $0x6f0] sm:$0xff]  ;;  %v500_v10 = vld [vmem:[%s11040_s5 + $0x628] sm:$0xff] }
 0x371   :  { %v4893_v38 = vmax.f32 %v4868_v24, 0.0  ;;  %3693 = vmatpush.msra.mxu2 %v1199_v40  ;;  %3713 = vmatpush.msra.mxu3 %v1599_v22  ;;  %v3299_v61 = vadd.f32 %v10192_v54, %v3279_v15  ;;  %v950_v46 = vld [vmem:[%s11040_s5 + $0x1438] sm:$0xff]  ;;  %v1825_v54 = vld [vmem:[%s11040_s5 + $0x2f90] sm:$0xff]  ;;  %v1800_v40 = vld [vmem:[%s11040_s5 + $0x2ec8] sm:$0xff] }
 0x372   :  { %3657 = vmatmul.f32.vlgmr.msra.gmra.mxu0 %v5619_v16  ;;  %3677 = vmatmul.f32.vlgmr.msra.gmra.mxu1 %v5624_v34  ;;  %v925_v21 = vld [vmem:[%s11040_s5 + $0x1370] sm:$0xff]  ;;  %v1375_v24 = vld [vmem:[%s11040_s5 + $0x2180] sm:$0xff]  ;;  %v1750_v37 = vld [vmem:[%s11040_s5 + $0x2d38] sm:$0xff] }
 0x373   :  { %v4938_v12 = vrot.slane %v4893_v38, 2  ;;  %3721 = vmatpush.msrb.mxu0 %v700_v13  ;;  %3741 = vmatpush.msrb.mxu1 %v1100_v41  ;;  %v10330_v22 = vadd.f32 %v10225_v25, %v3299_v61  ;;  %v1775_v13 = vld [vmem:[%s11040_s5 + $0x2e00] sm:$0xff]  ;;  %v1350_v38 = vld [vmem:[%s11040_s5 + $0x20b8] sm:$0xff]  ;;  %v400_v31 = vld [vmem:[%s11040_s5 + $0x308] sm:$0xff] }
 0x374   :  { %3694 = vmatpush.msra.mxu2 %v1174_v55  ;;  %3714 = vmatpush.msra.mxu3 %v1574_v62  ;;  %v3378_v6 = vpop.f32.mrf.mxu2  ;;  %v3398_v60 = vpop.f32.mrf.mxu3  ;;  %v475_v41 = vld [vmem:[%s11040_s5 + $0x560] sm:$0xff]  ;;  %v450_v62 = vld [vmem:[%s11040_s5 + $0x498] sm:$0xff]  ;;  %v1600_v15 = vld [vmem:[%s11040_s5 + $0x2888] sm:$0xff] }
 0x375   :  { %v4957_v63 = vsel %vm4946_vm12, %v4937_v17, %v4938_v12  ;;  %3722 = vmatpush.msrb.mxu0 %v675_v7  ;;  %3742 = vmatpush.msrb.mxu1 %v1075_v48  ;;  %v3379_v4 = vadd.f32 %v3378_v6, %v3359_v8  ;;  %v4073_v55 = vsel %vm143_vm1, %v10330_v22, 0.0  ;;  %v850_v25 = vld [vmem:[%s11040_s5 + $0x1118] sm:$0xff]  ;;  %v1325_v48 = vld [vmem:[%s11040_s5 + $0x1ff0] sm:$0xff]  ;;  %v1275_v6 = vld [vmem:[%s11040_s5 + $0x1e60] sm:$0xff] }
 0x376   :  { %v4958_v57 = vsel %vm4948_vm13, %v4956_v23, %v4957_v63  ;;  %3695 = vmatpush.msra.mxu2 %v1149_v30  ;;  %3715 = vmatpush.msra.mxu3 %v1549_v2  ;;  %v425_v17 = vld [vmem:[%s11040_s5 + $0x3d0] sm:$0xff]  ;;  %v4074_v11 = vrot.slane %v4073_v55, 4  ;;  %v1300_v30 = vld [vmem:[%s11040_s5 + $0x1f28] sm:$0xff]  ;;  %v1675_v23 = vld [vmem:[%s11040_s5 + $0x2ae0] sm:$0xff] }
 0x377   :  { %4974 = vst [vmem:[%s11047_s9 + $0x18] sm:$0xff] %v4958_v57  ;;  %3723 = vmatpush.msrb.mxu0 %v650_v53  ;;  %3743 = vmatpush.msrb.mxu1 %v1050_v39  ;;  %v10294_v19 = vadd.f32 %v3398_v60, %v3379_v4  ;;  %v825_v12 = vld [vmem:[%s11040_s5 + $0x1050] sm:$0xff]  ;;  %v1700_v2 = vld [vmem:[%s11040_s5 + $0x2ba8] sm:$0xff]  ;;  %v375_v63 = vld [vmem:[%s11040_s5 + $0x240] sm:$0xff] }
 0x378   :  { %3696 = vmatpush.msra.mxu2 %v1124_v18  ;;  %3716 = vmatpush.msra.mxu3 %v1524_v0  ;;  %v800_v53 = vld [vmem:[%s11040_s5 + $0xf88] sm:$0xff]  ;;  %v775_v8 = vld [vmem:[%s11040_s5 + $0xec0] sm:$0xff]  ;;  %v4075_v18 = vadd.f32 %v4074_v11, %v4073_v55  ;;  %v1250_v0 = vld [vmem:[%s11040_s5 + $0x1d98] sm:$0xff] }
 0x379   :  { %3697 = vmatmul.f32.vlgmr.msra.gmra.mxu2 %v5648_v50  ;;  %3717 = vmatmul.f32.vlgmr.msra.gmra.mxu3 %v5653_v52  ;;  %v4080_v51 = vsel %vm143_vm1, %v10294_v19, 0.0  ;;  %v1650_v57 = vld [vmem:[%s11040_s5 + $0x2a18] sm:$0xff]  ;;  %v1200_v60 = vld [vmem:[%s11040_s5 + $0x1c08] sm:$0xff]  ;;  %v1175_v61 = vld [vmem:[%s11040_s5 + $0x1b40] sm:$0xff] }
 0x37a   :  { %3724 = vmatpush.msrb.mxu0 %v625_v33  ;;  %3744 = vmatpush.msrb.mxu1 %v1025_v1  ;;  %v4081_v28 = vrot.slane %v4080_v51, 4  ;;  %v350_v27 = vld [vmem:[%s11040_s5 + $0x178] sm:$0xff]  ;;  %v1929_v1 = vperm.slane %v10188_v42, 2 }
 0x37b   :  { %3761 = vmatpush.msrb.mxu2 %v1500_v47  ;;  %3781 = vmatpush.msrb.mxu3 %v1900_v43  ;;  %v750_v33 = vld [vmem:[%s11040_s5 + $0xdf8] sm:$0xff]  ;;  %v1225_v47 = vld [vmem:[%s11040_s5 + $0x1cd0] sm:$0xff] }
 0x37c   :  { %3725 = vmatpush.msrb.mxu0 %v600_v5  ;;  %3745 = vmatpush.msrb.mxu1 %v1000_v36  ;;  %v4082_v7 = vadd.f32 %v4081_v28, %v4080_v51  ;;  %v1625_v43 = vld [vmem:[%s11040_s5 + $0x2950] sm:$0xff]  ;;  %v1076_v51 = vld [vmem:[%s11040_s5 + $0x1828] sm:$0xff]  ;;  %v1026_v55 = vld [vmem:[%s11040_s5 + $0x1698] sm:$0xff] }
 0x37d   :  { %3762 = vmatpush.msrb.mxu2 %v1475_v58  ;;  %3782 = vmatpush.msrb.mxu3 %v1875_v59  ;;  %v325_v36 = vld [vmem:[%s11040_s5 + $0xb0] sm:$0xff]  ;;  %v4076_v59 = vrot.slane %v4075_v18, 2 }
 0x37e   :  { %3726 = vmatpush.msrb.mxu0 %v575_v45  ;;  %3746 = vmatpush.msrb.mxu1 %v975_v20  ;;  %v4083_v39 = vrot.slane %v4082_v7, 2  ;;  %v725_v58 = vld [vmem:[%s11040_s5 + $0xd30] sm:$0xff] }
 0x37f   :  { %3763 = vmatpush.msrb.mxu2 %v1450_v56  ;;  %3783 = vmatpush.msrb.mxu3 %v1850_v35  ;;  %v701_v56 = vld [vmem:[%s11040_s5 + $0xc70] sm:$0xff] }
 0x380   :  { %3727 = vmatpush.msrb.mxu0 %v550_v29  ;;  %3747 = vmatpush.msrb.mxu1 %v950_v46  ;;  %v4084_v4 = vadd.f32 %v4083_v39, %v4082_v7  ;;  %v1101_v35 = vld [vmem:[%s11040_s5 + $0x18f0] sm:$0xff]  ;;  %v1575_v29 = vld [vmem:[%s11040_s5 + $0x27c0] sm:$0xff]  ;;  %v4077_v46 = vadd.f32 %v4076_v59, %v4075_v18  ;;  %v976_v39 = vld [vmem:[%s11040_s5 + $0x1508] sm:$0xff] }
 0x381   :  { %3764 = vmatpush.msrb.mxu2 %v1425_v26  ;;  %3784 = vmatpush.msrb.mxu3 %v1825_v54  ;;  %v676_v54 = vld [vmem:[%s11040_s5 + $0xba8] sm:$0xff]  ;;  %v1501_v7 = vld [vmem:[%s11040_s5 + $0x2570] sm:$0xff]  ;;  %v551_v18 = vld [vmem:[%s11040_s5 + $0x7c0] sm:$0xff] }
 0x382   :  { %3728 = vmatpush.msrb.mxu0 %v525_v32  ;;  %3748 = vmatpush.msrb.mxu1 %v925_v21  ;;  %v4085_v20 = vrot.slane %v4084_v4, 1  ;;  %v1150_v21 = vld [vmem:[%s11040_s5 + $0x1a78] sm:$0xff]  ;;  %v901_v59 = vld [vmem:[%s11040_s5 + $0x12b0] sm:$0xff] }
 0x383   :  { %3765 = vmatpush.msrb.mxu2 %v1400_v9  ;;  %3785 = vmatpush.msrb.mxu3 %v1800_v40  ;;  %v1550_v9 = vld [vmem:[%s11040_s5 + $0x26f8] sm:$0xff] }
 0x384   :  { %3729 = vmatpush.msrb.mxu0 %v500_v10  ;;  %3749 = vmatpush.msrb.mxu1 %v900_v14  ;;  %v4086_v40 = vadd.f32 %v4085_v20, %v4084_v4  ;;  %v651_v10 = vld [vmem:[%s11040_s5 + $0xae0] sm:$0xff]  ;;  %v926_v4 = vld [vmem:[%s11040_s5 + $0x1378] sm:$0xff]  ;;  %v1776_v20 = vld [vmem:[%s11040_s5 + $0x2e08] sm:$0xff] }
 0x385   :  { %3766 = vmatpush.msrb.mxu2 %v1375_v24  ;;  %3786 = vmatpush.msrb.mxu3 %v1775_v13  ;;  %v1051_v14 = vld [vmem:[%s11040_s5 + $0x1760] sm:$0xff]  ;;  %v1125_v24 = vld [vmem:[%s11040_s5 + $0x19b0] sm:$0xff] }
 0x386   :  { %3730 = vmatpush.msrb.mxu0 %v475_v41  ;;  %3750 = vmatpush.msrb.mxu1 %v875_v44  ;;  %v1525_v13 = vld [vmem:[%s11040_s5 + $0x2630] sm:$0xff]  ;;  %v4078_v44 = vrot.slane %v4077_v46, 1 }
 0x387   :  { %3767 = vmatpush.msrb.mxu2 %v1350_v38  ;;  %3787 = vmatpush.msrb.mxu3 %v1750_v37  ;;  %v626_v37 = vld [vmem:[%s11040_s5 + $0xa18] sm:$0xff] }
 0x388   :  { %3731 = vmatpush.msrb.mxu0 %v450_v62  ;;  %3751 = vmatpush.msrb.mxu1 %v850_v25  ;;  %v4154_v25 = vmul.f32 %v4086_v40, %v5427_v3  ;;  %v4079_v11 = vadd.f32 %v4078_v44, %v4077_v46  ;;  %v1751_v46 = vld [vmem:[%s11040_s5 + $0x2d40] sm:$0xff]  ;;  %v801_v44 = vld [vmem:[%s11040_s5 + $0xf90] sm:$0xff] }
 0x389   :  { %3768 = vmatpush.msrb.mxu2 %v1325_v48  ;;  %3788 = vmatpush.msrb.mxu3 %v1725_v49  ;;  %v3418_v5 = vpop.f32.mrf.mxu0  ;;  %v3438_v26 = vpop.f32.mrf.mxu1  ;;  %v1901_v48 = vld [vmem:[%s11040_s5 + $0x31f0] sm:$0xff] }
 0x38a   :  { %3732 = vmatpush.msrb.mxu0 %v425_v17  ;;  %3752 = vmatpush.msrb.mxu1 %v825_v12  ;;  %v3419_v45 = vadd.f32 %v3418_v5, %v1929_v1  ;;  %v601_v49 = vld [vmem:[%s11040_s5 + $0x950] sm:$0xff]  ;;  %v526_v1 = vld [vmem:[%s11040_s5 + $0x6f8] sm:$0xff] }
 0x38b   :  { %3769 = vmatpush.msrb.mxu2 %v1300_v30  ;;  %3789 = vmatpush.msrb.mxu3 %v1700_v2  ;;  %v1001_v17 = vld [vmem:[%s11040_s5 + $0x15d0] sm:$0xff]  ;;  %v1476_v30 = vld [vmem:[%s11040_s5 + $0x24a8] sm:$0xff] }
 0x38c   :  { %3733 = vmatpush.msrb.mxu0 %v400_v31  ;;  %3753 = vmatpush.msrb.mxu1 %v800_v53  ;;  %v3439_v32 = vadd.f32 %v3438_v26, %v3419_v45  ;;  %v1876_v2 = vld [vmem:[%s11040_s5 + $0x3128] sm:$0xff]  ;;  %v1401_v5 = vld [vmem:[%s11040_s5 + $0x2250] sm:$0xff]  ;;  %v451_v26 = vld [vmem:[%s11040_s5 + $0x4a0] sm:$0xff] }
 0x38d   :  { %3770 = vmatpush.msrb.mxu2 %v1275_v6  ;;  %3790 = vmatpush.msrb.mxu3 %v1675_v23  ;;  %v576_v53 = vld [vmem:[%s11040_s5 + $0x888] sm:$0xff]  ;;  %v10507_v6 = vsub.f32 %v10294_v19, %v4154_v25  ;;  %v1451_v23 = vld [vmem:[%s11040_s5 + $0x23e0] sm:$0xff] }
 0x38e   :  { %3734 = vmatpush.msrb.mxu0 %v375_v63  ;;  %3754 = vmatpush.msrb.mxu1 %v775_v8  ;;  %v1851_v63 = vld [vmem:[%s11040_s5 + $0x3060] sm:$0xff]  ;;  %v1376_v45 = vld [vmem:[%s11040_s5 + $0x2188] sm:$0xff] }
 0x38f   :  { %3771 = vmatpush.msrb.mxu2 %v1250_v0  ;;  %3791 = vmatpush.msrb.mxu3 %v1650_v57  ;;  %v951_v19 = vld [vmem:[%s11040_s5 + $0x1440] sm:$0xff]  ;;  %v4153_v0 = vmul.f32 %v4079_v11, %v5427_v3  ;;  %v1426_v57 = vld [vmem:[%s11040_s5 + $0x2318] sm:$0xff] }
 0x390   :  { %3735 = vmatpush.msrb.mxu0 %v350_v27  ;;  %3755 = vmatpush.msrb.mxu1 %v750_v33  ;;  %v1826_v27 = vld [vmem:[%s11040_s5 + $0x2f98] sm:$0xff] }
 0x391   :  { %3772 = vmatpush.msrb.mxu2 %v1225_v47  ;;  %3792 = vmatpush.msrb.mxu3 %v1625_v43  ;;  %v4204_v47 = vmul.f32 %v10507_v6, %v10507_v6 }
 0x392   :  { %3736 = vmatpush.msrb.mxu0 %v325_v36  ;;  %3756 = vmatpush.msrb.mxu1 %v725_v58  ;;  %v1801_v36 = vld [vmem:[%s11040_s5 + $0x2ed0] sm:$0xff] }
 0x393   :  { %3773 = vmatpush.msrb.mxu2 %v1200_v60  ;;  %3793 = vmatpush.msrb.mxu3 %v1600_v15  ;;  %v501_v58 = vld [vmem:[%s11040_s5 + $0x630] sm:$0xff]  ;;  %v10549_v60 = vsub.f32 %v10330_v22, %v4153_v0  ;;  %v876_v22 = vld [vmem:[%s11040_s5 + $0x11e8] sm:$0xff] }
 0x394   :  { %3737 = vmatmul.f32.vlgmr.msrb.gmra.mxu0 %v5619_v16  ;;  %3757 = vmatmul.f32.vlgmr.msrb.gmra.mxu1 %v5624_v34  ;;  %v1201_v0 = vld [vmem:[%s11040_s5 + $0x1c10] sm:$0xff] }
 0x395   :  { %3801 = vmatpush.msra.mxu0 %v701_v56  ;;  %3821 = vmatpush.msra.mxu1 %v1101_v35  ;;  %v476_v56 = vld [vmem:[%s11040_s5 + $0x568] sm:$0xff]  ;;  %v4331_v35 = vsel %vm143_vm1, %v4204_v47, 0.0  ;;  %v1102_v47 = vld [vmem:[%s11040_s5 + $0x18f8] sm:$0xff] }
 0x396   :  { %3774 = vmatpush.msrb.mxu2 %v1175_v61  ;;  %3794 = vmatpush.msrb.mxu3 %v1575_v29  ;;  %v3458_v28 = vpop.f32.mrf.mxu2  ;;  %v3478_v38 = vpop.f32.mrf.mxu3  ;;  %v1351_v29 = vld [vmem:[%s11040_s5 + $0x20c0] sm:$0xff]  ;;  %v4332_v40 = vrot.slane %v4331_v35, 4 }
 0x397   :  { %3802 = vmatpush.msra.mxu0 %v676_v54  ;;  %3822 = vmatpush.msra.mxu1 %v1076_v51  ;;  %v3459_v41 = vadd.f32 %v3458_v28, %v3439_v32  ;;  %v851_v54 = vld [vmem:[%s11040_s5 + $0x1120] sm:$0xff]  ;;  %v4203_v51 = vmul.f32 %v10549_v60, %v10549_v60 }
 0x398   :  { %3775 = vmatpush.msrb.mxu2 %v1150_v21  ;;  %3795 = vmatpush.msrb.mxu3 %v1550_v9  ;;  %v1326_v21 = vld [vmem:[%s11040_s5 + $0x1ff8] sm:$0xff]  ;;  %v4333_v25 = vadd.f32 %v4332_v40, %v4331_v35  ;;  %v1551_v35 = vld [vmem:[%s11040_s5 + $0x2700] sm:$0xff] }
 0x399   :  { %3803 = vmatpush.msra.mxu0 %v651_v10  ;;  %3823 = vmatpush.msra.mxu1 %v1051_v14  ;;  %v10475_v62 = vadd.f32 %v3478_v38, %v3459_v41  ;;  %v1726_v9 = vld [vmem:[%s11040_s5 + $0x2c78] sm:$0xff]  ;;  %v401_v41 = vld [vmem:[%s11040_s5 + $0x310] sm:$0xff]  ;;  %v4324_v38 = vsel %vm143_vm1, %v4203_v51, 0.0 }
 0x39a   :  { %3776 = vmatpush.msrb.mxu2 %v1125_v24  ;;  %3796 = vmatpush.msrb.mxu3 %v1525_v13  ;;  %v426_v10 = vld [vmem:[%s11040_s5 + $0x3d8] sm:$0xff]  ;;  %v1301_v24 = vld [vmem:[%s11040_s5 + $0x1f30] sm:$0xff]  ;;  %v4325_v11 = vrot.slane %v4324_v38, 4 }
 0x39b   :  { %3777 = vmatmul.f32.vlgmr.msrb.gmra.mxu2 %v5648_v50  ;;  %3797 = vmatmul.f32.vlgmr.msrb.gmra.mxu3 %v5653_v52  ;;  %v4087_v12 = vsel %vm143_vm1, %v10475_v62, 0.0  ;;  %v826_v14 = vld [vmem:[%s11040_s5 + $0x1058] sm:$0xff]  ;;  %v1701_v13 = vld [vmem:[%s11040_s5 + $0x2bb0] sm:$0xff] }
 0x39c   :  { %3804 = vmatpush.msra.mxu0 %v626_v37  ;;  %3824 = vmatpush.msra.mxu1 %v1026_v55  ;;  %v4088_v31 = vrot.slane %v4087_v12, 4  ;;  %v1276_v55 = vld [vmem:[%s11040_s5 + $0x1e68] sm:$0xff]  ;;  %v1526_v51 = vld [vmem:[%s11040_s5 + $0x2638] sm:$0xff] }
 0x39d   :  { %3841 = vmatpush.msra.mxu2 %v1501_v7  ;;  %3861 = vmatpush.msra.mxu3 %v1901_v48  ;;  %v376_v7 = vld [vmem:[%s11040_s5 + $0x248] sm:$0xff] }
 0x39e   :  { %3805 = vmatpush.msra.mxu0 %v601_v49  ;;  %3825 = vmatpush.msra.mxu1 %v1001_v17  ;;  %v4089_v8 = vadd.f32 %v4088_v31, %v4087_v12  ;;  %v776_v48 = vld [vmem:[%s11040_s5 + $0xec8] sm:$0xff]  ;;  %v1251_v17 = vld [vmem:[%s11040_s5 + $0x1da0] sm:$0xff] }
 0x39f   :  { %3842 = vmatpush.msra.mxu2 %v1476_v30  ;;  %3862 = vmatpush.msra.mxu3 %v1876_v2  ;;  %v1651_v12 = vld [vmem:[%s11040_s5 + $0x2a20] sm:$0xff] }
 0x3a0   :  { %3806 = vmatpush.msra.mxu0 %v576_v53  ;;  %3826 = vmatpush.msra.mxu1 %v976_v39  ;;  %v4090_v33 = vrot.slane %v4089_v8, 2  ;;  %v351_v2 = vld [vmem:[%s11040_s5 + $0x180] sm:$0xff]  ;;  %v1930_v53 = vperm.slane %v10188_v42, 3  ;;  %v1226_v39 = vld [vmem:[%s11040_s5 + $0x1cd8] sm:$0xff] }
 0x3a1   :  { %3843 = vmatpush.msra.mxu2 %v1451_v23  ;;  %3863 = vmatpush.msra.mxu3 %v1851_v63  ;;  %v751_v31 = vld [vmem:[%s11040_s5 + $0xe00] sm:$0xff]  ;;  %v1626_v23 = vld [vmem:[%s11040_s5 + $0x2958] sm:$0xff] }
 0x3a2   :  { %3807 = vmatpush.msra.mxu0 %v551_v18  ;;  %3827 = vmatpush.msra.mxu1 %v951_v19  ;;  %v4091_v43 = vadd.f32 %v4090_v33, %v4089_v8  ;;  %v4334_v8 = vrot.slane %v4333_v25, 2  ;;  %v326_v19 = vld [vmem:[%s11040_s5 + $0xb8] sm:$0xff] }
 0x3a3   :  { %3844 = vmatpush.msra.mxu2 %v1426_v57  ;;  %3864 = vmatpush.msra.mxu3 %v1826_v27  ;;  %v726_v42 = vld [vmem:[%s11040_s5 + $0xd38] sm:$0xff]  ;;  %v1601_v57 = vld [vmem:[%s11040_s5 + $0x2890] sm:$0xff]  ;;  %v4326_v27 = vadd.f32 %v4325_v11, %v4324_v38  ;;  %v1452_v11 = vld [vmem:[%s11040_s5 + $0x23e8] sm:$0xff] }
 0x3a4   :  { %v4092_v15 = vrot.slane %v4091_v43, 1  ;;  %3808 = vmatpush.msra.mxu0 %v526_v1  ;;  %3828 = vmatpush.msra.mxu1 %v926_v4  ;;  %v702_v4 = vld [vmem:[%s11040_s5 + $0xc78] sm:$0xff] }
 0x3a5   :  { %3845 = vmatpush.msra.mxu2 %v1401_v5  ;;  %3865 = vmatpush.msra.mxu3 %v1801_v36  ;;  %v1176_v5 = vld [vmem:[%s11040_s5 + $0x1b48] sm:$0xff]  ;;  %v602_v38 = vld [vmem:[%s11040_s5 + $0x958] sm:$0xff] }
 0x3a6   :  { %v4093_v61 = vadd.f32 %v4092_v15, %v4091_v43  ;;  %3809 = vmatpush.msra.mxu0 %v501_v58  ;;  %3829 = vmatpush.msra.mxu1 %v901_v59  ;;  %v4335_v43 = vadd.f32 %v4334_v8, %v4333_v25  ;;  %v1576_v36 = vld [vmem:[%s11040_s5 + $0x27c8] sm:$0xff]  ;;  %v677_v59 = vld [vmem:[%s11040_s5 + $0xbb0] sm:$0xff] }
 0x3a7   :  { %3846 = vmatpush.msra.mxu2 %v1376_v45  ;;  %3866 = vmatpush.msra.mxu3 %v1776_v20  ;;  %v1077_v15 = vld [vmem:[%s11040_s5 + $0x1830] sm:$0xff]  ;;  %v4327_v45 = vrot.slane %v4326_v27, 2 }
 0x3a8   :  { %v4155_v32 = vmul.f32 %v4093_v61, %v5427_v3  ;;  %3810 = vmatpush.msra.mxu0 %v476_v56  ;;  %3830 = vmatpush.msra.mxu1 %v876_v22  ;;  %v1151_v22 = vld [vmem:[%s11040_s5 + $0x1a80] sm:$0xff]  ;;  %v652_v61 = vld [vmem:[%s11040_s5 + $0xae8] sm:$0xff]  ;;  %v1877_v25 = vld [vmem:[%s11040_s5 + $0x3130] sm:$0xff] }
 0x3a9   :  { %3847 = vmatpush.msra.mxu2 %v1351_v29  ;;  %3867 = vmatpush.msra.mxu3 %v1751_v46  ;;  %v1052_v29 = vld [vmem:[%s11040_s5 + $0x1768] sm:$0xff] }
 0x3aa   :  { %v10592_v28 = vsub.f32 %v10475_v62, %v4155_v32  ;;  %3811 = vmatpush.msra.mxu0 %v451_v26  ;;  %3831 = vmatpush.msra.mxu1 %v851_v54  ;;  %v1676_v62 = vld [vmem:[%s11040_s5 + $0x2ae8] sm:$0xff]  ;;  %v4336_v26 = vrot.slane %v4335_v43, 1  ;;  %v1126_v54 = vld [vmem:[%s11040_s5 + $0x19b8] sm:$0xff] }
 0x3ab   :  { %3848 = vmatpush.msra.mxu2 %v1326_v21  ;;  %3868 = vmatpush.msra.mxu3 %v1726_v9  ;;  %v3498_v63 = vpop.f32.mrf.mxu0  ;;  %v3518_v58 = vpop.f32.mrf.mxu1  ;;  %v4328_v9 = vadd.f32 %v4327_v45, %v4326_v27  ;;  %v1402_v27 = vld [vmem:[%s11040_s5 + $0x2258] sm:$0xff]  ;;  %v877_v45 = vld [vmem:[%s11040_s5 + $0x11f0] sm:$0xff] }
 0x3ac   :  { %v4205_v37 = vmul.f32 %v10592_v28, %v10592_v28  ;;  %3812 = vmatpush.msra.mxu0 %v426_v10  ;;  %3832 = vmatpush.msra.mxu1 %v826_v14  ;;  %v3499_v1 = vadd.f32 %v3498_v63, %v1930_v53  ;;  %v627_v10 = vld [vmem:[%s11040_s5 + $0xa20] sm:$0xff]  ;;  %v552_v53 = vld [vmem:[%s11040_s5 + $0x7c8] sm:$0xff] }
 0x3ad   :  { %3849 = vmatpush.msra.mxu2 %v1301_v24  ;;  %3869 = vmatpush.msra.mxu3 %v1701_v13  ;;  %v1027_v14 = vld [vmem:[%s11040_s5 + $0x16a0] sm:$0xff]  ;;  %v1502_v13 = vld [vmem:[%s11040_s5 + $0x2578] sm:$0xff] }
 0x3ae   :  { %v4338_v49 = vsel %vm143_vm1, %v4205_v37, 0.0  ;;  %3813 = vmatpush.msra.mxu0 %v401_v41  ;;  %3833 = vmatpush.msra.mxu1 %v801_v44  ;;  %v3519_v56 = vadd.f32 %v3518_v58, %v3499_v1  ;;  %v1902_v41 = vld [vmem:[%s11040_s5 + $0x31f8] sm:$0xff]  ;;  %v4337_v44 = vadd.f32 %v4336_v26, %v4335_v43  ;;  %v1827_v63 = vld [vmem:[%s11040_s5 + $0x2fa0] sm:$0xff] }
 0x3af   :  { %v4339_v30 = vrot.slane %v4338_v49, 4  ;;  %3850 = vmatpush.msra.mxu2 %v1276_v55  ;;  %3870 = vmatpush.msra.mxu3 %v1676_v62  ;;  %v1002_v37 = vld [vmem:[%s11040_s5 + $0x15d8] sm:$0xff]  ;;  %v1477_v62 = vld [vmem:[%s11040_s5 + $0x24b0] sm:$0xff]  ;;  %v1727_v26 = vld [vmem:[%s11040_s5 + $0x2c80] sm:$0xff] }
 0x3b0   :  { %3814 = vmatpush.msra.mxu0 %v376_v7  ;;  %3834 = vmatpush.msra.mxu1 %v776_v48  ;;  %v4329_v48 = vrot.slane %v4328_v9, 1 }
 0x3b1   :  { %v4340_v18 = vadd.f32 %v4339_v30, %v4338_v49  ;;  %3851 = vmatpush.msra.mxu2 %v1251_v17  ;;  %3871 = vmatpush.msra.mxu3 %v1651_v12  ;;  %v577_v17 = vld [vmem:[%s11040_s5 + $0x890] sm:$0xff]  ;;  %v1852_v30 = vld [vmem:[%s11040_s5 + $0x3068] sm:$0xff] }
 0x3b2   :  { %3815 = vmatpush.msra.mxu0 %v351_v2  ;;  %3835 = vmatpush.msra.mxu1 %v751_v31  ;;  %v977_v12 = vld [vmem:[%s11040_s5 + $0x1510] sm:$0xff]  ;;  %v4404_v31 = vmul.f32 %v4337_v44, %v5427_v3 }
 0x3b3   :  { %v4341_v33 = vrot.slane %v4340_v18, 2  ;;  %3852 = vmatpush.msra.mxu2 %v1226_v39  ;;  %3872 = vmatpush.msra.mxu3 %v1626_v23  ;;  %v952_v39 = vld [vmem:[%s11040_s5 + $0x1448] sm:$0xff]  ;;  %v1427_v23 = vld [vmem:[%s11040_s5 + $0x2320] sm:$0xff] }
 0x3b4   :  { %3816 = vmatpush.msra.mxu0 %v326_v19  ;;  %3836 = vmatpush.msra.mxu1 %v726_v42  ;;  %v527_v42 = vld [vmem:[%s11040_s5 + $0x700] sm:$0xff]  ;;  %v10759_v1 = vadd.f32 1e-05, %v4404_v31 }
 0x3b5   :  { %3853 = vmatpush.msra.mxu2 %v1201_v0  ;;  %3873 = vmatpush.msra.mxu3 %v1601_v57  ;;  %v4342_v20 = vadd.f32 %v4341_v33, %v4340_v18  ;;  %v4330_v18 = vadd.f32 %v4329_v48, %v4328_v9  ;;  %v927_v0 = vld [vmem:[%s11040_s5 + $0x1380] sm:$0xff]  ;;  %v1802_v33 = vld [vmem:[%s11040_s5 + $0x2ed8] sm:$0xff] }
 0x3b6   :  { %3817 = vmatmul.f32.vlgmr.msra.gmra.mxu0 %v5619_v16  ;;  %3837 = vmatmul.f32.vlgmr.msra.gmra.mxu1 %v5624_v34  ;;  %5032 = vrsqrt.f32 %v10759_v1  ;;  %v1302_v9 = vld [vmem:[%s11040_s5 + $0x1f38] sm:$0xff]  ;;  %v327_v31 = vld [vmem:[%s11040_s5 + $0xc0] sm:$0xff]  ;;  %vm4613_vm10 = vweird.f32 %v10759_v1 }
 0x3b7   :  { %3881 = vmatpush.msrb.mxu0 %v702_v4  ;;  %3901 = vmatpush.msrb.mxu1 %v1102_v47  ;;  %v4343_v40 = vrot.slane %v4342_v20, 1  ;;  %v502_v4 = vld [vmem:[%s11040_s5 + $0x638] sm:$0xff]  ;;  %v4403_v58 = vmul.f32 %v4330_v18, %v5427_v3 }
 0x3b8   :  { %3854 = vmatpush.msra.mxu2 %v1176_v5  ;;  %3874 = vmatpush.msra.mxu3 %v1576_v36  ;;  %v3538_v46 = vpop.f32.mrf.mxu2  ;;  %v3558_v21 = vpop.f32.mrf.mxu3  ;;  %v902_v47 = vld [vmem:[%s11040_s5 + $0x12b8] sm:$0xff]  ;;  %v1377_v5 = vld [vmem:[%s11040_s5 + $0x2190] sm:$0xff] }
 0x3b9   :  { %3882 = vmatpush.msrb.mxu0 %v677_v59  ;;  %3902 = vmatpush.msrb.mxu1 %v1077_v15  ;;  %v3539_v32 = vadd.f32 %v3538_v46, %v3519_v56  ;;  %v4344_v49 = vadd.f32 %v4343_v40, %v4342_v20  ;;  %v1777_v36 = vld [vmem:[%s11040_s5 + $0x2e10] sm:$0xff]  ;;  %v1352_v56 = vld [vmem:[%s11040_s5 + $0x20c8] sm:$0xff]  ;;  %v1327_v46 = vld [vmem:[%s11040_s5 + $0x2000] sm:$0xff] }
 0x3ba   :  { %3855 = vmatpush.msra.mxu2 %v1151_v22  ;;  %3875 = vmatpush.msra.mxu3 %v1551_v35  ;;  %v477_v15 = vld [vmem:[%s11040_s5 + $0x570] sm:$0xff]  ;;  %v1752_v22 = vld [vmem:[%s11040_s5 + $0x2d48] sm:$0xff]  ;;  %v1702_v40 = vld [vmem:[%s11040_s5 + $0x2bb8] sm:$0xff] }
 0x3bb   :  { %3883 = vmatpush.msrb.mxu0 %v652_v61  ;;  %3903 = vmatpush.msrb.mxu1 %v1052_v29  ;;  %v10697_v24 = vadd.f32 %v3558_v21, %v3539_v32  ;;  %v4405_v19 = vmul.f32 %v4344_v49, %v5427_v3  ;;  %v452_v35 = vld [vmem:[%s11040_s5 + $0x4a8] sm:$0xff]  ;;  %v827_v32 = vld [vmem:[%s11040_s5 + $0x1060] sm:$0xff] }
 0x3bc   :  { %3856 = vmatpush.msra.mxu2 %v1126_v54  ;;  %3876 = vmatpush.msra.mxu3 %v1526_v51  ;;  %v852_v61 = vld [vmem:[%s11040_s5 + $0x1128] sm:$0xff]  ;;  %v10802_v54 = vadd.f32 1e-05, %v4403_v58  ;;  %v427_v51 = vld [vmem:[%s11040_s5 + $0x3e0] sm:$0xff]  ;;  %v10834_v44 = vpop.eup %5032 }
 0x3bd   :  { %3857 = vmatmul.f32.vlgmr.msra.gmra.mxu2 %v5648_v50  ;;  %3877 = vmatmul.f32.vlgmr.msra.gmra.mxu3 %v5653_v52  ;;  %v4094_v55 = vsel %vm143_vm1, %v10697_v24, 0.0  ;;  %v10774_v59 = vadd.f32 1e-05, %v4405_v19  ;;  %v352_v49 = vld [vmem:[%s11040_s5 + $0x188] sm:$0xff]  ;;  %vm4614_vm9 = vweird.f32 %v10834_v44 }
 0x3be   :  { %3884 = vmatpush.msrb.mxu0 %v627_v10  ;;  %3904 = vmatpush.msrb.mxu1 %v1027_v14  ;;  %v4095_v7 = vrot.slane %v4094_v55, 4  ;;  %v402_v10 = vld [vmem:[%s11040_s5 + $0x318] sm:$0xff]  ;;  %vm4615_vm14 = vmor %vm4613_vm10, %vm4614_vm9  ;;  %vm4603_vm3 = vweird.f32 %v10802_v54 }
 0x3bf   :  { %3921 = vmatpush.msrb.mxu2 %v1502_v13  ;;  %3941 = vmatpush.msrb.mxu3 %v1902_v41  ;;  %5034 = vrsqrt.f32 %v10774_v59  ;;  %v802_v14 = vld [vmem:[%s11040_s5 + $0xf98] sm:$0xff]  ;;  %v1277_v13 = vld [vmem:[%s11040_s5 + $0x1e70] sm:$0xff]  ;;  %vm4623_vm15 = vweird.f32 %v10774_v59 }
 0x3c0   :  { %3885 = vmatpush.msrb.mxu0 %v602_v38  ;;  %3905 = vmatpush.msrb.mxu1 %v1002_v37  ;;  %v4096_v2 = vadd.f32 %v4095_v7, %v4094_v55  ;;  %v1677_v41 = vld [vmem:[%s11040_s5 + $0x2af0] sm:$0xff]  ;;  %5036 = vrsqrt.f32 %v10802_v54 }
 0x3c1   :  { %3922 = vmatpush.msrb.mxu2 %v1477_v62  ;;  %3942 = vmatpush.msrb.mxu3 %v1877_v25  ;;  %v377_v38 = vld [vmem:[%s11040_s5 + $0x250] sm:$0xff]  ;;  %v1252_v62 = vld [vmem:[%s11040_s5 + $0x1da8] sm:$0xff] }
 0x3c2   :  { %3886 = vmatpush.msrb.mxu0 %v577_v17  ;;  %3906 = vmatpush.msrb.mxu1 %v977_v12  ;;  %v4097_v8 = vrot.slane %v4096_v2, 2  ;;  %v777_v37 = vld [vmem:[%s11040_s5 + $0xed0] sm:$0xff]  ;;  %v1652_v25 = vld [vmem:[%s11040_s5 + $0x2a28] sm:$0xff]  ;;  %v4608_v12 = vmul.f32 %v10834_v44, %v10759_v1 }
 0x3c3   :  { %3923 = vmatpush.msrb.mxu2 %v1452_v11  ;;  %3943 = vmatpush.msrb.mxu3 %v1852_v30  ;;  %v752_v17 = vld [vmem:[%s11040_s5 + $0xe08] sm:$0xff]  ;;  %v1227_v11 = vld [vmem:[%s11040_s5 + $0x1ce0] sm:$0xff] }
 0x3c4   :  { %3887 = vmatpush.msrb.mxu0 %v552_v53  ;;  %3907 = vmatpush.msrb.mxu1 %v952_v39  ;;  %v4098_v57 = vadd.f32 %v4097_v8, %v4096_v2  ;;  %v1627_v30 = vld [vmem:[%s11040_s5 + $0x2960] sm:$0xff]  ;;  %v4609_v19 = vmul.f32 %v10834_v44, %v4608_v12 }
 0x3c5   :  { %3924 = vmatpush.msrb.mxu2 %v1427_v23  ;;  %3944 = vmatpush.msrb.mxu3 %v1827_v63  ;;  %v10850_v7 = vpop.eup %5034  ;;  %v727_v53 = vld [vmem:[%s11040_s5 + $0xd40] sm:$0xff]  ;;  %v1202_v23 = vld [vmem:[%s11040_s5 + $0x1c18] sm:$0xff] }
 0x3c6   :  { %v4099_v43 = vrot.slane %v4098_v57, 1  ;;  %3888 = vmatpush.msrb.mxu0 %v527_v42  ;;  %3908 = vmatpush.msrb.mxu1 %v927_v0  ;;  %v4618_v39 = vmul.f32 %v10850_v7, %v10774_v59  ;;  %v1602_v63 = vld [vmem:[%s11040_s5 + $0x2898] sm:$0xff]  ;;  %v10880_v8 = vpop.eup %5036  ;;  %v1177_v42 = vld [vmem:[%s11040_s5 + $0x1b50] sm:$0xff]  ;;  %vm4624_vm11 = vweird.f32 %v10850_v7 }
 0x3c7   :  { %3925 = vmatpush.msrb.mxu2 %v1402_v27  ;;  %3945 = vmatpush.msrb.mxu3 %v1802_v33  ;;  %v1577_v0 = vld [vmem:[%s11040_s5 + $0x27d0] sm:$0xff]  ;;  %v4598_v27 = vmul.f32 %v10880_v8, %v10802_v54  ;;  %vm4625_vm0 = vmor %vm4623_vm15, %vm4624_vm11  ;;  %vm4604_vm2 = vweird.f32 %v10880_v8 }
 0x3c8   :  { %v4100_v20 = vadd.f32 %v4099_v43, %v4098_v57  ;;  %3889 = vmatpush.msrb.mxu0 %v502_v4  ;;  %3909 = vmatpush.msrb.mxu1 %v902_v47  ;;  %v4619_v33 = vmul.f32 %v10850_v7, %v4618_v39  ;;  %v1152_v4 = vld [vmem:[%s11040_s5 + $0x1a88] sm:$0xff]  ;;  %vm4605_vm4 = vmor %vm4603_vm3, %vm4604_vm2 }
 0x3c9   :  { %3926 = vmatpush.msrb.mxu2 %v1377_v5  ;;  %3946 = vmatpush.msrb.mxu3 %v1777_v36  ;;  %v1552_v47 = vld [vmem:[%s11040_s5 + $0x2708] sm:$0xff]  ;;  %v4610_v5 = vmul.f32 0.5, %v4609_v19  ;;  %v1127_v36 = vld [vmem:[%s11040_s5 + $0x19c0] sm:$0xff]  ;;  %v4599_v58 = vmul.f32 %v10880_v8, %v4598_v27 }
 0x3ca   :  { %v4156_v29 = vmul.f32 %v4100_v20, %v5427_v3  ;;  %3890 = vmatpush.msrb.mxu0 %v477_v15  ;;  %3910 = vmatpush.msrb.mxu1 %v877_v45  ;;  %v4620_v15 = vmul.f32 0.5, %v4619_v33 }
 0x3cb   :  { %3927 = vmatpush.msrb.mxu2 %v1352_v56  ;;  %3947 = vmatpush.msrb.mxu3 %v1752_v22  ;;  %v4611_v20 = vsub.f32 1.5, %v4610_v5  ;;  %v4600_v22 = vmul.f32 0.5, %v4599_v58 }
 0x3cc   :  { %v10812_v21 = vsub.f32 %v10697_v24, %v4156_v29  ;;  %3891 = vmatpush.msrb.mxu0 %v452_v35  ;;  %3911 = vmatpush.msrb.mxu1 %v852_v61  ;;  %v4621_v35 = vsub.f32 1.5, %v4620_v15 }
 0x3cd   :  { %3928 = vmatpush.msrb.mxu2 %v1327_v46  ;;  %3948 = vmatpush.msrb.mxu3 %v1727_v26  ;;  %v4612_v61 = vmul.f32 %v10834_v44, %v4611_v20  ;;  %v4601_v29 = vsub.f32 1.5, %v4600_v22  ;;  %v3578_v54 = vpop.f32.mrf.mxu0 }
 0x3ce   :  { %v4206_v24 = vmul.f32 %v10812_v21, %v10812_v21  ;;  %3892 = vmatpush.msrb.mxu0 %v427_v51  ;;  %3912 = vmatpush.msrb.mxu1 %v827_v32  ;;  %v4622_v46 = vmul.f32 %v10850_v7, %v4621_v35  ;;  %v10922_v51 = vld [vmem:[%s11045_s7 + $0x10] sm:$0xff] }
 0x3cf   :  { %3929 = vmatpush.msrb.mxu2 %v1302_v9  ;;  %3949 = vmatpush.msrb.mxu3 %v1702_v40  ;;  %v4602_v26 = vmul.f32 %v10880_v8, %v4601_v29  ;;  %v4737_v40 = vperm.slane %v10922_v51, 1 }
 0x3d0   :  { %v4345_v55 = vsel %vm143_vm1, %v4206_v24, 0.0  ;;  %3893 = vmatpush.msrb.mxu0 %v402_v10  ;;  %3913 = vmatpush.msrb.mxu1 %v802_v14  ;;  %v4626_v1 = vsel %vm4625_vm0, %v10850_v7, %v4622_v46  ;;  %v4738_v14 = vperm.slane %v10922_v51, 2 }
 0x3d1   :  { %v4346_v48 = vrot.slane %v4345_v55, 4  ;;  %3930 = vmatpush.msrb.mxu2 %v1277_v13  ;;  %3950 = vmatpush.msrb.mxu3 %v1677_v41  ;;  %v4705_v10 = vmul.f32 %v4626_v1, %v10592_v28  ;;  %v4606_v24 = vsel %vm4605_vm4, %v10880_v8, %v4602_v26  ;;  %v10934_v13 = vld [vmem:[%s11046_s8 + $0x10] sm:$0xff]  ;;  %v4736_v28 = vperm.slane %v10922_v51, 0 }
 0x3d2   :  { %3894 = vmatpush.msrb.mxu0 %v377_v38  ;;  %3914 = vmatpush.msrb.mxu1 %v777_v37  ;;  %v4703_v37 = vmul.f32 %v4606_v24, %v10549_v60  ;;  %v4822_v60 = vperm.slane %v10934_v13, 3 }
 0x3d3   :  { %v4347_v2 = vadd.f32 %v4346_v48, %v4345_v55  ;;  %3931 = vmatpush.msrb.mxu2 %v1252_v62  ;;  %3951 = vmatpush.msrb.mxu3 %v1652_v25  ;;  %v4788_v55 = vmul.f32 %v4738_v14, %v4705_v10  ;;  %v4821_v62 = vperm.slane %v10934_v13, 2  ;;  %v4739_v48 = vperm.slane %v10922_v51, 3 }
 0x3d4   :  { %3895 = vmatpush.msrb.mxu0 %v352_v49  ;;  %3915 = vmatpush.msrb.mxu1 %v752_v17  ;;  %v4819_v49 = vperm.slane %v10934_v13, 0  ;;  %v4786_v12 = vmul.f32 %v4736_v28, %v4703_v37 }
 0x3d5   :  { %v4348_v18 = vrot.slane %v4347_v2, 2  ;;  %3932 = vmatpush.msrb.mxu2 %v1227_v11  ;;  %3952 = vmatpush.msrb.mxu3 %v1627_v30  ;;  %v4871_v11 = vadd.f32 %v4821_v62, %v4788_v55 }
 0x3d6   :  { %3896 = vmatpush.msrb.mxu0 %v327_v31  ;;  %3916 = vmatpush.msrb.mxu1 %v727_v53 }
 0x3d7   :  { %v4349_v57 = vadd.f32 %v4348_v18, %v4347_v2  ;;  %3933 = vmatpush.msrb.mxu2 %v1202_v23  ;;  %3953 = vmatpush.msrb.mxu3 %v1602_v63  ;;  %v3598_v2 = vpop.f32.mrf.mxu1  ;;  %v10947_v23 = vld [vmem:[%s11044_s6 + $0x10] sm:$0xff]  ;;  %v4869_v18 = vadd.f32 %v4819_v49, %v4786_v12  ;;  %v4896_v19 = vmax.f32 %v4871_v11, 0.0 }
 0x3d8   :  { %3897 = vmatmul.f32.vlgmr.msrb.gmra.mxu0 %v5619_v16  ;;  %3917 = vmatmul.f32.vlgmr.msrb.gmra.mxu1 %v5624_v34  ;;  %v1527_v16 = vld [vmem:[%s11040_s5 + $0x2640] sm:$0xff]  ;;  %v1932_v63 = vperm.slane %v10947_v23, 5 }
 0x3d9   :  { %v4350_v43 = vrot.slane %v4349_v57, 1  ;;  %3934 = vmatpush.msrb.mxu2 %v1177_v42  ;;  %3954 = vmatpush.msrb.mxu3 %v1577_v0  ;;  %v4894_v33 = vmax.f32 %v4869_v18, 0.0 }
 0x3da   :  { %v3618_v31 = vpop.f32.mrf.mxu2  ;;  %v3638_v27 = vpop.f32.mrf.mxu3 }
 0x3db   :  { %v4351_v34 = vadd.f32 %v4350_v43, %v4349_v57  ;;  %3935 = vmatpush.msrb.mxu2 %v1152_v4  ;;  %3955 = vmatpush.msrb.mxu3 %v1552_v47  ;;  %v4940_v4 = vrot.slane %v4896_v19, 4  ;;  %v1931_v43 = vperm.slane %v10947_v23, 4 }
 0x3dd   :  { %v4406_v45 = vmul.f32 %v4351_v34, %v5427_v3  ;;  %3936 = vmatpush.msrb.mxu2 %v1127_v36  ;;  %3956 = vmatpush.msrb.mxu3 %v1527_v16 }
 0x3de   :  { %3937 = vmatmul.f32.vlgmr.msrb.gmra.mxu2 %v5648_v50  ;;  %3957 = vmatmul.f32.vlgmr.msrb.gmra.mxu3 %v5653_v52  ;;  %v4616_v50 = vsel %vm4615_vm14, %v10834_v44, %v4612_v61 }
 0x3df   :  { %v4431_v56 = vadd.f32 1e-05, %v4406_v45  ;;  %v4704_v9 = vmul.f32 %v4616_v50, %v10507_v6  ;;  %v4820_v6 = vperm.slane %v10934_v13, 1  ;;  %v3579_v45 = vadd.f32 %v3578_v54, %v1931_v43 }
 0x3e0   :  { %v1934_v43 = vperm.slane %v10947_v23, 7 }
 0x3e1   :  { %5038 = vrsqrt.f32 %v4431_v56  ;;  %v4787_v44 = vmul.f32 %v4737_v40, %v4704_v9  ;;  %vm4633_vm6 = vweird.f32 %v4431_v56  ;;  %v3599_v22 = vadd.f32 %v3598_v2, %v3579_v45 }
 0x3e2   :  { %v1933_v40 = vperm.slane %v10947_v23, 6 }
 0x3e3   :  { %v4870_v7 = vadd.f32 %v4820_v6, %v4787_v44  ;;  %v3619_v61 = vadd.f32 %v3618_v31, %v3599_v22 }
 0x3e5   :  { %v4895_v53 = vmax.f32 %v4870_v7, 0.0  ;;  %v3639_v46 = vadd.f32 %v3638_v27, %v3619_v61 }
 0x3e7   :  { %v5039_v52 = vpop.eup %5038  ;;  %v4939_v0 = vrot.slane %v4895_v53, 6 }
 0x3e8   :  { %v4628_v32 = vmul.f32 %v5039_v52, %v4431_v56  ;;  %vm4634_vm5 = vweird.f32 %v5039_v52 }
 0x3e9   :  { %vm4635_vm7 = vmor %vm4633_vm6, %vm4634_vm5  ;;  %v4959_v16 = vsel %vm143_vm1, %v4894_v33, %v4939_v0 }
 0x3ea   :  { %v4629_v59 = vmul.f32 %v5039_v52, %v4628_v32 }
 0x3ec   :  { %v4630_v41 = vmul.f32 0.5, %v4629_v59 }
 0x3ee   :  { %v4631_v38 = vsub.f32 1.5, %v4630_v41 }
 0x3ef   :  { %v3658_v8 = vpop.f32.mrf.mxu0  ;;  %v3678_v5 = vpop.f32.mrf.mxu1 }
 0x3f0   :  { %v4632_v25 = vmul.f32 %v5039_v52, %v4631_v38 }
 0x3f2   :  { %v4636_v17 = vsel %vm4635_vm7, %v5039_v52, %v4632_v25  ;;  %v4101_v52 = vsel %vm143_vm1, %v3639_v46, 0.0 }
 0x3f3   :  { %v4706_v30 = vmul.f32 %v4636_v17, %v10812_v21  ;;  %v3659_v21 = vadd.f32 %v3658_v8, %v1932_v63  ;;  %v4102_v1 = vrot.slane %v4101_v52, 4 }
 0x3f5   :  { %v4789_v39 = vmul.f32 %v4739_v48, %v4706_v30  ;;  %v3679_v58 = vadd.f32 %v3678_v5, %v3659_v21  ;;  %v4103_v9 = vadd.f32 %v4102_v1, %v4101_v52 }
 0x3f7   :  { %v4872_v42 = vadd.f32 %v4822_v60, %v4789_v39  ;;  %v4104_v14 = vrot.slane %v4103_v9, 2 }
 0x3f9   :  { %v4897_v57 = vmax.f32 %v4872_v42, 0.0  ;;  %v4105_v44 = vadd.f32 %v4104_v14, %v4103_v9 }
 0x3fb   :  { %v4941_v47 = vrot.slane %v4897_v57, 2  ;;  %v4106_v55 = vrot.slane %v4105_v44, 1 }
 0x3fc   :  { %v3698_v36 = vpop.f32.mrf.mxu2  ;;  %v3718_v56 = vpop.f32.mrf.mxu3 }
 0x3fd   :  { %v4960_v34 = vsel %vm4946_vm12, %v4940_v4, %v4941_v47  ;;  %v3699_v20 = vadd.f32 %v3698_v36, %v3679_v58  ;;  %v4107_v49 = vadd.f32 %v4106_v55, %v4105_v44 }
 0x3fe   :  { %v4961_v15 = vsel %vm4948_vm13, %v4959_v16, %v4960_v34 }
 0x3ff   :  { %4975 = vst [vmem:[%s11047_s9 + $0x20] sm:$0xff] %v4961_v15  ;;  %v3719_v35 = vadd.f32 %v3718_v56, %v3699_v20  ;;  %v4157_v30 = vmul.f32 %v4107_v49, %v5427_v3 }
 0x401   :  { %v4108_v29 = vsel %vm143_vm1, %v3719_v35, 0.0  ;;  %v10967_v53 = vsub.f32 %v3639_v46, %v4157_v30 }
 0x402   :  { %v4109_v50 = vrot.slane %v4108_v29, 4 }
 0x403   :  { %v4207_v18 = vmul.f32 %v10967_v53, %v10967_v53 }
 0x404   :  { %v4110_v26 = vadd.f32 %v4109_v50, %v4108_v29 }
 0x405   :  { %v4352_v57 = vsel %vm143_vm1, %v4207_v18, 0.0 }
 0x406   :  { %v4111_v32 = vrot.slane %v4110_v26, 2  ;;  %v4353_v4 = vrot.slane %v4352_v57, 4 }
 0x408   :  { %v4112_v59 = vadd.f32 %v4111_v32, %v4110_v26  ;;  %v4354_v34 = vadd.f32 %v4353_v4, %v4352_v57 }
 0x40a   :  { %v4113_v41 = vrot.slane %v4112_v59, 1  ;;  %v4355_v56 = vrot.slane %v4354_v34, 2 }
 0x40c   :  { %v4114_v54 = vadd.f32 %v4113_v41, %v4112_v59  ;;  %v4356_v52 = vadd.f32 %v4355_v56, %v4354_v34 }
 0x40e   :  { %v4158_v7 = vmul.f32 %v4114_v54, %v5427_v3 }
 0x410   :  { %v10962_v12 = vsub.f32 %v3719_v35, %v4158_v7 }
 0x411   :  { %v3738_v10 = vpop.f32.mrf.mxu0  ;;  %v3758_v6 = vpop.f32.mrf.mxu1 }
 0x412   :  { %v3739_v24 = vadd.f32 %v3738_v10, %v1933_v40  ;;  %v4208_v2 = vmul.f32 %v10962_v12, %v10962_v12  ;;  %v4357_v40 = vrot.slane %v4356_v52, 1 }
 0x414   :  { %v3759_v38 = vadd.f32 %v3758_v6, %v3739_v24  ;;  %v4359_v63 = vsel %vm143_vm1, %v4208_v2, 0.0  ;;  %v4358_v41 = vadd.f32 %v4357_v40, %v4356_v52 }
 0x415   :  { %v4360_v42 = vrot.slane %v4359_v63, 4 }
 0x417   :  { %v4361_v27 = vadd.f32 %v4360_v42, %v4359_v63 }
 0x419   :  { %v4362_v36 = vrot.slane %v4361_v27, 2 }
 0x41b   :  { %v4363_v45 = vadd.f32 %v4362_v36, %v4361_v27 }
 0x41d   :  { %v4364_v29 = vrot.slane %v4363_v45, 1 }
 0x41e   :  { %v3778_v37 = vpop.f32.mrf.mxu2  ;;  %v3798_v62 = vpop.f32.mrf.mxu3 }
 0x41f   :  { %v3779_v28 = vadd.f32 %v3778_v37, %v3759_v38  ;;  %v4365_v32 = vadd.f32 %v4364_v29, %v4363_v45  ;;  %v4407_v37 = vmul.f32 %v4358_v41, %v5427_v3 }
 0x421   :  { %v3799_v25 = vadd.f32 %v3798_v62, %v3779_v28  ;;  %v4408_v14 = vmul.f32 %v4365_v32, %v5427_v3 }
 0x423   :  { %v4115_v48 = vsel %vm143_vm1, %v3799_v25, 0.0  ;;  %v4433_v38 = vadd.f32 1e-05, %v4408_v14 }
 0x424   :  { %v4116_v17 = vrot.slane %v4115_v48, 4 }
 0x425   :  { %5040 = vrsqrt.f32 %v4433_v38  ;;  %vm4653_vm10 = vweird.f32 %v4433_v38 }
 0x426   :  { %v4117_v11 = vadd.f32 %v4116_v17, %v4115_v48 }
 0x428   :  { %v4118_v60 = vrot.slane %v4117_v11, 2 }
 0x42a   :  { %v4119_v31 = vadd.f32 %v4118_v60, %v4117_v11  ;;  %v4987_v11 = vld [vmem:[%s11044_s6 + $0x18] ss:$0 sm:$0xff] }
 0x42b   :  { %v5041_v49 = vpop.eup %5040 }
 0x42c   :  { %v4120_v39 = vrot.slane %v4119_v31, 1  ;;  %vm4654_vm9 = vweird.f32 %v5041_v49 }
 0x42d   :  { %vm4655_vm14 = vmor %vm4653_vm10, %vm4654_vm9 }
 0x42e   :  { %v4121_v8 = vadd.f32 %v4120_v39, %v4119_v31  ;;  %v4648_v31 = vmul.f32 %v5041_v49, %v4433_v38 }
 0x430   :  { %v4159_v19 = vmul.f32 %v4121_v8, %v5427_v3  ;;  %v4649_v42 = vmul.f32 %v5041_v49, %v4648_v31 }
 0x432   :  { %v10973_v0 = vsub.f32 %v3799_v25, %v4159_v19  ;;  %v10985_v25 = vadd.f32 1e-05, %v4407_v37  ;;  %v4742_v37 = vperm.slane %v10922_v51, 6 }
 0x433   :  { %v3818_v5 = vpop.f32.mrf.mxu0  ;;  %v3838_v20 = vpop.f32.mrf.mxu1 }
 0x434   :  { %v4209_v21 = vmul.f32 %v10973_v0, %v10973_v0  ;;  %v3819_v15 = vadd.f32 %v3818_v5, %v1934_v43  ;;  %v4650_v5 = vmul.f32 0.5, %v4649_v42  ;;  %vm4643_vm3 = vweird.f32 %v10985_v25 }
 0x436   :  { %v4366_v33 = vsel %vm143_vm1, %v4209_v21, 0.0  ;;  %v3839_v35 = vadd.f32 %v3838_v20, %v3819_v15  ;;  %v4651_v56 = vsub.f32 1.5, %v4650_v5 }
 0x437   :  { %v4367_v47 = vrot.slane %v4366_v33, 4 }
 0x438   :  { %v4652_v52 = vmul.f32 %v5041_v49, %v4651_v56 }
 0x439   :  { %v4368_v16 = vadd.f32 %v4367_v47, %v4366_v33 }
 0x43b   :  { %v4369_v58 = vrot.slane %v4368_v16, 2 }
 0x43d   :  { %v4370_v22 = vadd.f32 %v4369_v58, %v4368_v16 }
 0x43f   :  { %v4371_v26 = vrot.slane %v4370_v22, 1 }
 0x440   :  { %v3858_v61 = vpop.f32.mrf.mxu2  ;;  %v3878_v50 = vpop.f32.mrf.mxu3 }
 0x441   :  { %v3859_v46 = vadd.f32 %v3858_v61, %v3839_v35  ;;  %v4372_v59 = vadd.f32 %v4371_v26, %v4370_v22 }
 0x443   :  { %v3879_v1 = vadd.f32 %v3878_v50, %v3859_v46  ;;  %v4409_v44 = vmul.f32 %v4372_v59, %v5427_v3 }
 0x445   :  { %v4122_v23 = vsel %vm143_vm1, %v3879_v1, 0.0  ;;  %v4434_v28 = vadd.f32 1e-05, %v4409_v44  ;;  %v4741_v44 = vperm.slane %v10922_v51, 5 }
 0x446   :  { %v4123_v9 = vrot.slane %v4122_v23, 4 }
 0x447   :  { %5042 = vrsqrt.f32 %v4434_v28  ;;  %vm4663_vm15 = vweird.f32 %v4434_v28 }
 0x448   :  { %v4124_v10 = vadd.f32 %v4123_v9, %v4122_v23  ;;  %5044 = vrsqrt.f32 %v10985_v25  ;;  %v4656_v9 = vsel %vm4655_vm14, %v5041_v49, %v4652_v52  ;;  %v4824_v49 = vperm.slane %v10934_v13, 5 }
 0x449   :  { %v4708_v41 = vmul.f32 %v4656_v9, %v10962_v12  ;;  %v4989_v9 = vld [vmem:[%s11046_s8 + $0x18] ss:$0 sm:$0xff] }
 0x44a   :  { %v4125_v24 = vrot.slane %v4124_v10, 2 }
 0x44c   :  { %v4126_v6 = vadd.f32 %v4125_v24, %v4124_v10 }
 0x44d   :  { %v5043_v30 = vpop.eup %5042 }
 0x44e   :  { %v4127_v54 = vrot.slane %v4126_v6, 1  ;;  %v4658_v63 = vmul.f32 %v5043_v30, %v4434_v28  ;;  %v10996_v18 = vpop.eup %5044  ;;  %vm4664_vm11 = vweird.f32 %v5043_v30 }
 0x44f   :  { %v4638_v27 = vmul.f32 %v10996_v18, %v10985_v25  ;;  %vm4665_vm0 = vmor %vm4663_vm15, %vm4664_vm11  ;;  %vm4644_vm2 = vweird.f32 %v10996_v18 }
 0x450   :  { %v4128_v55 = vadd.f32 %v4127_v54, %v4126_v6  ;;  %v4659_v33 = vmul.f32 %v5043_v30, %v4658_v63  ;;  %vm4645_vm4 = vmor %vm4643_vm3, %vm4644_vm2 }
 0x451   :  { %v4639_v58 = vmul.f32 %v10996_v18, %v4638_v27 }
 0x452   :  { %v4160_v62 = vmul.f32 %v4128_v55, %v5427_v3  ;;  %v4660_v15 = vmul.f32 0.5, %v4659_v33 }
 0x453   :  { %v4640_v29 = vmul.f32 0.5, %v4639_v58 }
 0x454   :  { %v10987_v7 = vsub.f32 %v3879_v1, %v4160_v62  ;;  %v4661_v46 = vsub.f32 1.5, %v4660_v15 }
 0x455   :  { %v3898_v2 = vpop.f32.mrf.mxu0  ;;  %v3918_v21 = vpop.f32.mrf.mxu1  ;;  %v4641_v1 = vsub.f32 1.5, %v4640_v29 }
 0x456   :  { %v4210_v48 = vmul.f32 %v10987_v7, %v10987_v7  ;;  %v3899_v8 = vadd.f32 %v4987_v11, %v3898_v2  ;;  %v4662_v32 = vmul.f32 %v5043_v30, %v4661_v46 }
 0x457   :  { %v4642_v10 = vmul.f32 %v10996_v18, %v4641_v1 }
 0x458   :  { %v4373_v17 = vsel %vm143_vm1, %v4210_v48, 0.0  ;;  %v3919_v4 = vadd.f32 %v3918_v21, %v3899_v8  ;;  %v4666_v14 = vsel %vm4665_vm0, %v5043_v30, %v4662_v32  ;;  %v4791_v48 = vmul.f32 %v4741_v44, %v4708_v41  ;;  %v4988_v32 = vld [vmem:[%s11045_s7 + $0x18] ss:$0 sm:$0xff] }
 0x459   :  { %v4374_v60 = vrot.slane %v4373_v17, 4  ;;  %v4709_v54 = vmul.f32 %v4666_v14, %v10973_v0  ;;  %v4646_v55 = vsel %vm4645_vm4, %v10996_v18, %v4642_v10  ;;  %v4825_v0 = vperm.slane %v10934_v13, 6 }
 0x45a   :  { %v4707_v25 = vmul.f32 %v4646_v55, %v10967_v53  ;;  %v4874_v31 = vadd.f32 %v4824_v49, %v4791_v48  ;;  %v4823_v8 = vperm.slane %v10934_v13, 4  ;;  %v4826_v21 = vperm.slane %v10934_v13, 7 }
 0x45b   :  { %v4375_v39 = vadd.f32 %v4374_v60, %v4373_v17  ;;  %v4740_v17 = vperm.slane %v10922_v51, 4  ;;  %v4792_v30 = vmul.f32 %v4742_v37, %v4709_v54 }
 0x45c   :  { %v4899_v33 = vmax.f32 %v4874_v31, 0.0 }
 0x45d   :  { %v4376_v19 = vrot.slane %v4375_v39, 2  ;;  %v4790_v42 = vmul.f32 %v4740_v17, %v4707_v25 }
 0x45f   :  { %v4377_v57 = vadd.f32 %v4376_v19, %v4375_v39  ;;  %v4743_v39 = vperm.slane %v10922_v51, 7 }
 0x461   :  { %v4378_v47 = vrot.slane %v4377_v57, 1  ;;  %v3938_v43 = vpop.f32.mrf.mxu2  ;;  %v3958_v34 = vpop.f32.mrf.mxu3 }
 0x462   :  { %v3939_v36 = vadd.f32 %v3938_v43, %v3919_v4  ;;  %v4873_v43 = vadd.f32 %v4823_v8, %v4790_v42 }
 0x463   :  { %v4379_v16 = vadd.f32 %v4378_v47, %v4377_v57  ;;  %v4875_v57 = vadd.f32 %v4825_v0, %v4792_v30 }
 0x464   :  { %v3959_v45 = vadd.f32 %v3958_v34, %v3939_v36  ;;  %v4898_v15 = vmax.f32 %v4873_v43, 0.0 }
 0x465   :  { %v4410_v20 = vmul.f32 %v4379_v16, %v5427_v3  ;;  %v4900_v5 = vmax.f32 %v4875_v57, 0.0  ;;  %v4942_v16 = vrot.slane %v4899_v33, 6 }
 0x466   :  { %v4130_v22 = vsel %vm4129_vm8, %v3959_v45, 0.0 }
 0x467   :  { %v4435_v35 = vadd.f32 1e-05, %v4410_v20  ;;  %v4131_v61 = vrot.slane %v4130_v22, 4 }
 0x469   :  { %5046 = vrsqrt.f32 %v4435_v35  ;;  %v4132_v50 = vadd.f32 %v4131_v61, %v4130_v22  ;;  %vm4673_vm6 = vweird.f32 %v4435_v35  ;;  %v4962_v22 = vsel %vm143_vm1, %v4898_v15, %v4942_v16 }
 0x46b   :  { %v4133_v26 = vrot.slane %v4132_v50, 2 }
 0x46d   :  { %v4134_v23 = vadd.f32 %v4133_v26, %v4132_v50 }
 0x46f   :  { %v5047_v40 = vpop.eup %5046  ;;  %v4135_v59 = vrot.slane %v4134_v23, 1 }
 0x470   :  { %v4668_v24 = vmul.f32 %v5047_v40, %v4435_v35  ;;  %vm4674_vm5 = vweird.f32 %v5047_v40 }
 0x471   :  { %v4136_v6 = vadd.f32 %v4135_v59, %v4134_v23  ;;  %vm4675_vm7 = vmor %vm4673_vm6, %vm4674_vm5 }
 0x472   :  { %v4669_v38 = vmul.f32 %v5047_v40, %v4668_v24 }
 0x473   :  { %v4161_v28 = vmul.f32 %v4136_v6, %v5427_v3 }
 0x474   :  { %v4670_v62 = vmul.f32 0.5, %v4669_v38 }
 0x475   :  { %v4186_v12 = vsub.f32 %v3959_v45, %v4161_v28  ;;  %v4943_v45 = vrot.slane %v4900_v5, 4 }
 0x476   :  { %v4671_v11 = vsub.f32 1.5, %v4670_v62 }
 0x477   :  { %v4211_v60 = vmul.f32 %v4186_v12, %v4186_v12 }
 0x478   :  { %v4672_v2 = vmul.f32 %v5047_v40, %v4671_v11 }
 0x479   :  { %v4380_v63 = vsel %vm4129_vm8, %v4211_v60, 0.0 }
 0x47a   :  { %v4676_v18 = vsel %vm4675_vm7, %v5047_v40, %v4672_v2  ;;  %v4381_v19 = vrot.slane %v4380_v63, 4 }
 0x47b   :  { %v4710_v53 = vmul.f32 %v4676_v18, %v10987_v7 }
 0x47c   :  { %v4382_v27 = vadd.f32 %v4381_v19, %v4380_v63 }
 0x47d   :  { %v4793_v4 = vmul.f32 %v4743_v39, %v4710_v53 }
 0x47e   :  { %v4383_v47 = vrot.slane %v4382_v27, 2 }
 0x47f   :  { %v4876_v36 = vadd.f32 %v4826_v21, %v4793_v4 }
 0x480   :  { %v4384_v51 = vadd.f32 %v4383_v47, %v4382_v27 }
 0x481   :  { %v4901_v34 = vmax.f32 %v4876_v36, 0.0 }
 0x482   :  { %v4385_v58 = vrot.slane %v4384_v51, 1 }
 0x483   :  { %v4944_v20 = vrot.slane %v4901_v34, 2 }
 0x484   :  { %v4386_v56 = vadd.f32 %v4385_v58, %v4384_v51 }
 0x485   :  { %v4963_v7 = vsel %vm4946_vm12, %v4943_v45, %v4944_v20 }
 0x486   :  { %v4964_v13 = vsel %vm4948_vm13, %v4962_v22, %v4963_v7  ;;  %v4411_v35 = vmul.f32 %v4386_v56, %v5427_v3 }
 0x487   :  { %4976 = vst [vmem:[%s11047_s9 + $0x28] sm:$0xff] %v4964_v13 }
 0x488   :  { %v4436_v61 = vadd.f32 1e-05, %v4411_v35 }
 0x48a   :  { %5048 = vrsqrt.f32 %v4436_v61  ;;  %vm4683_vm1 = vweird.f32 %v4436_v61 }
 0x490   :  { %v5049_v29 = vpop.eup %5048 }
 0x491   :  { %v4678_v46 = vmul.f32 %v5049_v29, %v4436_v61  ;;  %vm4684_vm9 = vweird.f32 %v5049_v29 }
 0x492   :  { %vm4685_vm10 = vmor %vm4683_vm1, %vm4684_vm9 }
 0x493   :  { %v4679_v50 = vmul.f32 %v5049_v29, %v4678_v46 }
 0x495   :  { %v4680_v52 = vmul.f32 0.5, %v4679_v50 }
 0x497   :  { %v4681_v26 = vsub.f32 1.5, %v4680_v52 }
 0x499   :  { %v4682_v1 = vmul.f32 %v5049_v29, %v4681_v26 }
 0x49b   :  { %v4686_v3 = vsel %vm4685_vm10, %v5049_v29, %v4682_v1 }
 0x49c   :  { %v4711_v23 = vmul.f32 %v4686_v3, %v4186_v12 }
 0x49e   :  { %v4794_v40 = vmul.f32 %v4988_v32, %v4711_v23 }
 0x4a0   :  { %v4877_v59 = vadd.f32 %v4989_v9, %v4794_v40 }
 0x4a2   :  { %v4902_v10 = vmax.f32 %v4877_v59, 0.0 }
 0x4a4   :  { %4977 = vst.msk [vmem:[%s11047_s9 + $0x30] sm:$0x3] %vm4129_vm8, %v4902_v10 }

// kernel: generator_forward.5
= control target key start
LH: loop header
LB: loop body
LE: loop exit
PB: predicated region body
PF: predicated region fallthrough
CT: control target
= control target key end

     0   :  { %vm331_vm0 = vcmask 523264   ;;  %vm744_vm1 = vcmask 1043456   ;;  %vm750_vm2 = vcmask 64516   ;;  %s1712_s1 = inlined_call_operand.vmem [shape: f32[576,392], index: 1, kind: input, shape index: {}]   ;;  %s1713_s2 = inlined_call_operand.<no memory space> [shape: f32[1,1], index: 2, kind: input, shape index: {}]   ;;  %s1714_s0 = inlined_call_operand.vmem [shape: f32[4,576], index: 0, kind: input, shape index: {}]   ;;  %s1715_s3 = inlined_call_operand.vmem [shape: f32[4,392], index: 3, kind: output, shape index: {}]  }
   0x1   :  { %v79_v0 = vld [vmem:[%s1712_s1 + $0x1e0] sm:$0xff]  ;;  %v8_v50 = vstv %s1713_s2  ;;  %vm751_vm3 = vmor %vm750_vm2, %vm744_vm1 }
   0x2   :  { %v207_v1 = vld [vmem:[%s1712_s1 + $0x5e0] sm:$0xff]  ;;  %334 = vmatpush.msra.mxu0 %v79_v0  ;;  %9 = vst [vmem:[#allocation2] sm:$0x1] %v8_v50  ;;  %v144_v0 = vld [vmem:[%s1712_s1 + $0x3e8] sm:$0xff] }
   0x3   :  { %v75_v2 = vld [vmem:[%s1712_s1 + $0x1c0] sm:$0xff]  ;;  %374 = vmatpush.msra.mxu2 %v207_v1  ;;  %v260_v50 = vld [vmem:[%s1712_s1 + $0x788] sm:$0xff] }
   0x4   :  { %v143_v3 = vld [vmem:[%s1712_s1 + $0x3e0] sm:$0xff]  ;;  %335 = vmatpush.msra.mxu0 %v75_v2 }
   0x5   :  { %v203_v4 = vld [vmem:[%s1712_s1 + $0x5c0] sm:$0xff]  ;;  %354 = vmatpush.msra.mxu1 %v143_v3 }
   0x6   :  { %v271_v5 = vld [vmem:[%s1712_s1 + $0x7e0] sm:$0xff]  ;;  %375 = vmatpush.msra.mxu2 %v203_v4  ;;  %v80_v4 = vld [vmem:[%s1712_s1 + $0x1e8] sm:$0xff] }
   0x7   :  { %394 = vmatpush.msra.mxu3 %v271_v5  ;;  %v71_v6 = vld [vmem:[%s1712_s1 + $0x1a0] sm:$0xff] }
   0x8   :  { %v139_v7 = vld [vmem:[%s1712_s1 + $0x3c0] sm:$0xff]  ;;  %336 = vmatpush.msra.mxu0 %v71_v6  ;;  %v17_v6 = vld [vmem:[%s1714_s0 + $0x8] sm:$0xff] }
   0x9   :  { %v199_v8 = vld [vmem:[%s1712_s1 + $0x5a0] sm:$0xff]  ;;  %355 = vmatpush.msra.mxu1 %v139_v7  ;;  %v140_v7 = vld [vmem:[%s1712_s1 + $0x3c8] sm:$0xff]  ;;  %319 = vst [vmem:[#allocation1 + $0x10] ss:$2 sm:$0xff] %v17_v6 }
   0xa   :  { %v267_v9 = vld [vmem:[%s1712_s1 + $0x7c0] sm:$0xff]  ;;  %376 = vmatpush.msra.mxu2 %v199_v8  ;;  %v208_v8 = vld [vmem:[%s1712_s1 + $0x5e8] sm:$0xff] }
   0xb   :  { %v135_v10 = vld [vmem:[%s1712_s1 + $0x3a0] sm:$0xff]  ;;  %395 = vmatpush.msra.mxu3 %v267_v9  ;;  %v24_v6 = vld [vmem:[%s1712_s1 + $0x28] sm:$0xff] }
   0xc   :  { %v67_v11 = vld [vmem:[%s1712_s1 + $0x180] sm:$0xff]  ;;  %356 = vmatpush.msra.mxu1 %v135_v10  ;;  %v76_v10 = vld [vmem:[%s1712_s1 + $0x1c8] sm:$0xff] }
   0xd   :  { %v195_v12 = vld [vmem:[%s1712_s1 + $0x580] sm:$0xff]  ;;  %337 = vmatpush.msra.mxu0 %v67_v11  ;;  %v136_v11 = vld [vmem:[%s1712_s1 + $0x3a8] sm:$0xff] }
   0xe   :  { %v263_v13 = vld [vmem:[%s1712_s1 + $0x7a0] sm:$0xff]  ;;  %377 = vmatpush.msra.mxu2 %v195_v12  ;;  %v204_v12 = vld [vmem:[%s1712_s1 + $0x5c8] sm:$0xff] }
   0xf   :  { %v131_v14 = vld [vmem:[%s1712_s1 + $0x380] sm:$0xff]  ;;  %396 = vmatpush.msra.mxu3 %v263_v13 }
  0x10   :  { %v259_v15 = vld [vmem:[%s1712_s1 + $0x780] sm:$0xff]  ;;  %357 = vmatpush.msra.mxu1 %v131_v14  ;;  %v72_v14 = vld [vmem:[%s1712_s1 + $0x1a8] sm:$0xff] }
  0x11   :  { %v63_v16 = vld [vmem:[%s1712_s1 + $0x160] sm:$0xff]  ;;  %397 = vmatpush.msra.mxu3 %v259_v15  ;;  %v132_v15 = vld [vmem:[%s1712_s1 + $0x388] sm:$0xff] }
  0x12   :  { %v191_v17 = vld [vmem:[%s1712_s1 + $0x560] sm:$0xff]  ;;  %338 = vmatpush.msra.mxu0 %v63_v16  ;;  %v200_v16 = vld [vmem:[%s1712_s1 + $0x5a8] sm:$0xff] }
  0x13   :  { %v127_v18 = vld [vmem:[%s1712_s1 + $0x360] sm:$0xff]  ;;  %378 = vmatpush.msra.mxu2 %v191_v17 }
  0x14   :  { %v255_v19 = vld [vmem:[%s1712_s1 + $0x760] sm:$0xff]  ;;  %358 = vmatpush.msra.mxu1 %v127_v18  ;;  %v68_v18 = vld [vmem:[%s1712_s1 + $0x188] sm:$0xff] }
  0x15   :  { %v59_v20 = vld [vmem:[%s1712_s1 + $0x140] sm:$0xff]  ;;  %398 = vmatpush.msra.mxu3 %v255_v19  ;;  %v128_v19 = vld [vmem:[%s1712_s1 + $0x368] sm:$0xff] }
  0x16   :  { %v187_v21 = vld [vmem:[%s1712_s1 + $0x540] sm:$0xff]  ;;  %339 = vmatpush.msra.mxu0 %v59_v20  ;;  %v196_v20 = vld [vmem:[%s1712_s1 + $0x588] sm:$0xff] }
  0x17   :  { %v123_v22 = vld [vmem:[%s1712_s1 + $0x340] sm:$0xff]  ;;  %379 = vmatpush.msra.mxu2 %v187_v21  ;;  %v18_v21 = vld [vmem:[%s1714_s0 + $0x10] sm:$0xf] }
  0x18   :  { %v251_v23 = vld [vmem:[%s1712_s1 + $0x740] sm:$0xff]  ;;  %359 = vmatpush.msra.mxu1 %v123_v22  ;;  %321 = vst [vmem:[#allocation1 + $0x20] ss:$2 sm:$0xff] %v18_v21  ;;  %v228_v21 = vld [vmem:[%s1712_s1 + $0x688] sm:$0xff] }
  0x19   :  { %v55_v24 = vld [vmem:[%s1712_s1 + $0x120] sm:$0xff]  ;;  %399 = vmatpush.msra.mxu3 %v251_v23  ;;  %v64_v23 = vld [vmem:[%s1712_s1 + $0x168] sm:$0xff] }
  0x1a   :  { %v183_v25 = vld [vmem:[%s1712_s1 + $0x520] sm:$0xff]  ;;  %340 = vmatpush.msra.mxu0 %v55_v24  ;;  %v124_v24 = vld [vmem:[%s1712_s1 + $0x348] sm:$0xff] }
  0x1b   :  { %v119_v26 = vld [vmem:[%s1712_s1 + $0x320] sm:$0xff]  ;;  %380 = vmatpush.msra.mxu2 %v183_v25  ;;  %v192_v25 = vld [vmem:[%s1712_s1 + $0x568] sm:$0xff] }
  0x1c   :  { %v247_v27 = vld [vmem:[%s1712_s1 + $0x720] sm:$0xff]  ;;  %360 = vmatpush.msra.mxu1 %v119_v26 }
  0x1d   :  { %v51_v28 = vld [vmem:[%s1712_s1 + $0x100] sm:$0xff]  ;;  %400 = vmatpush.msra.mxu3 %v247_v27  ;;  %v60_v27 = vld [vmem:[%s1712_s1 + $0x148] sm:$0xff] }
  0x1e   :  { %v179_v29 = vld [vmem:[%s1712_s1 + $0x500] sm:$0xff]  ;;  %341 = vmatpush.msra.mxu0 %v51_v28  ;;  %v120_v28 = vld [vmem:[%s1712_s1 + $0x328] sm:$0xff] }
  0x1f   :  { %v115_v30 = vld [vmem:[%s1712_s1 + $0x300] sm:$0xff]  ;;  %381 = vmatpush.msra.mxu2 %v179_v29  ;;  %v188_v29 = vld [vmem:[%s1712_s1 + $0x548] sm:$0xff] }
  0x20   :  { %v243_v31 = vld [vmem:[%s1712_s1 + $0x700] sm:$0xff]  ;;  %361 = vmatpush.msra.mxu1 %v115_v30 }
  0x21   :  { %v47_v32 = vld [vmem:[%s1712_s1 + $0xe0] sm:$0xff]  ;;  %401 = vmatpush.msra.mxu3 %v243_v31  ;;  %v56_v31 = vld [vmem:[%s1712_s1 + $0x128] sm:$0xff] }
  0x22   :  { %v175_v33 = vld [vmem:[%s1712_s1 + $0x4e0] sm:$0xff]  ;;  %342 = vmatpush.msra.mxu0 %v47_v32  ;;  %v116_v32 = vld [vmem:[%s1712_s1 + $0x308] sm:$0xff] }
  0x23   :  { %v111_v34 = vld [vmem:[%s1712_s1 + $0x2e0] sm:$0xff]  ;;  %382 = vmatpush.msra.mxu2 %v175_v33  ;;  %v184_v33 = vld [vmem:[%s1712_s1 + $0x528] sm:$0xff] }
  0x24   :  { %v239_v35 = vld [vmem:[%s1712_s1 + $0x6e0] sm:$0xff]  ;;  %362 = vmatpush.msra.mxu1 %v111_v34 }
  0x25   :  { %v43_v36 = vld [vmem:[%s1712_s1 + $0xc0] sm:$0xff]  ;;  %402 = vmatpush.msra.mxu3 %v239_v35  ;;  %v1089_v35 = vld.sshfl [vmem:[#allocation1 + $0x10] sm:$0xff pattern:$0x75316420] }
  0x26   :  { %v171_v37 = vld [vmem:[%s1712_s1 + $0x4c0] sm:$0xff]  ;;  %343 = vmatpush.msra.mxu0 %v43_v36  ;;  %v272_v36 = vld [vmem:[%s1712_s1 + $0x7e8] sm:$0xff] }
  0x27   :  { %v107_v38 = vld [vmem:[%s1712_s1 + $0x2c0] sm:$0xff]  ;;  %383 = vmatpush.msra.mxu2 %v171_v37  ;;  %v52_v37 = vld [vmem:[%s1712_s1 + $0x108] sm:$0xff] }
  0x28   :  { %v235_v39 = vld [vmem:[%s1712_s1 + $0x6c0] sm:$0xff]  ;;  %363 = vmatpush.msra.mxu1 %v107_v38  ;;  %v112_v38 = vld [vmem:[%s1712_s1 + $0x2e8] sm:$0xff] }
  0x29   :  { %v39_v40 = vld [vmem:[%s1712_s1 + $0xa0] sm:$0xff]  ;;  %403 = vmatpush.msra.mxu3 %v235_v39  ;;  %v180_v39 = vld [vmem:[%s1712_s1 + $0x508] sm:$0xff] }
  0x2a   :  { %v167_v41 = vld [vmem:[%s1712_s1 + $0x4a0] sm:$0xff]  ;;  %344 = vmatpush.msra.mxu0 %v39_v40  ;;  %v1105_v40 = vld.sshfl [vmem:[#allocation1 + $0x18] sm:$0xff pattern:$0x75316420] }
  0x2b   :  { %v103_v42 = vld [vmem:[%s1712_s1 + $0x2a0] sm:$0xff]  ;;  %384 = vmatpush.msra.mxu2 %v167_v41  ;;  %v268_v41 = vld [vmem:[%s1712_s1 + $0x7c8] sm:$0xff] }
  0x2c   :  { %v231_v43 = vld [vmem:[%s1712_s1 + $0x6a0] sm:$0xff]  ;;  %364 = vmatpush.msra.mxu1 %v103_v42  ;;  %v48_v42 = vld [vmem:[%s1712_s1 + $0xe8] sm:$0xff] }
  0x2d   :  { %v35_v44 = vld [vmem:[%s1712_s1 + $0x80] sm:$0xff]  ;;  %404 = vmatpush.msra.mxu3 %v231_v43  ;;  %v108_v43 = vld [vmem:[%s1712_s1 + $0x2c8] sm:$0xff] }
  0x2e   :  { %v163_v45 = vld [vmem:[%s1712_s1 + $0x480] sm:$0xff]  ;;  %345 = vmatpush.msra.mxu0 %v35_v44  ;;  %v176_v44 = vld [vmem:[%s1712_s1 + $0x4e8] sm:$0xff] }
  0x2f   :  { %v99_v46 = vld [vmem:[%s1712_s1 + $0x280] sm:$0xff]  ;;  %385 = vmatpush.msra.mxu2 %v163_v45 }
  0x30   :  { %v227_v47 = vld [vmem:[%s1712_s1 + $0x680] sm:$0xff]  ;;  %365 = vmatpush.msra.mxu1 %v99_v46  ;;  %v264_v46 = vld [vmem:[%s1712_s1 + $0x7a8] sm:$0xff] }
  0x31   :  { %v31_v48 = vld [vmem:[%s1712_s1 + $0x60] sm:$0xff]  ;;  %405 = vmatpush.msra.mxu3 %v227_v47  ;;  %v44_v47 = vld [vmem:[%s1712_s1 + $0xc8] sm:$0xff] }
  0x32   :  { %v159_v49 = vld [vmem:[%s1712_s1 + $0x460] sm:$0xff]  ;;  %346 = vmatpush.msra.mxu0 %v31_v48  ;;  %v104_v48 = vld [vmem:[%s1712_s1 + $0x2a8] sm:$0xff] }
  0x33   :  { %v95_v51 = vld [vmem:[%s1712_s1 + $0x260] sm:$0xff]  ;;  %386 = vmatpush.msra.mxu2 %v159_v49  ;;  %v172_v49 = vld [vmem:[%s1712_s1 + $0x4c8] sm:$0xff] }
  0x34   :  { %v223_v52 = vld [vmem:[%s1712_s1 + $0x660] sm:$0xff]  ;;  %366 = vmatpush.msra.mxu1 %v95_v51  ;;  %v40_v51 = vld [vmem:[%s1712_s1 + $0xa8] sm:$0xff] }
  0x35   :  { %v27_v53 = vld [vmem:[%s1712_s1 + $0x40] sm:$0xff]  ;;  %406 = vmatpush.msra.mxu3 %v223_v52  ;;  %v100_v52 = vld [vmem:[%s1712_s1 + $0x288] sm:$0xff] }
  0x36   :  { %v155_v54 = vld [vmem:[%s1712_s1 + $0x440] sm:$0xff]  ;;  %347 = vmatpush.msra.mxu0 %v27_v53  ;;  %v168_v53 = vld [vmem:[%s1712_s1 + $0x4a8] sm:$0xff] }
  0x37   :  { %v91_v55 = vld [vmem:[%s1712_s1 + $0x240] sm:$0xff]  ;;  %387 = vmatpush.msra.mxu2 %v155_v54  ;;  %v256_v54 = vld [vmem:[%s1712_s1 + $0x768] sm:$0xff] }
  0x38   :  { %v219_v56 = vld [vmem:[%s1712_s1 + $0x640] sm:$0xff]  ;;  %367 = vmatpush.msra.mxu1 %v91_v55  ;;  %v36_v55 = vld [vmem:[%s1712_s1 + $0x88] sm:$0xff] }
  0x39   :  { %v23_v57 = vld [vmem:[%s1712_s1 + $0x20] sm:$0xff]  ;;  %407 = vmatpush.msra.mxu3 %v219_v56  ;;  %v96_v56 = vld [vmem:[%s1712_s1 + $0x268] sm:$0xff] }
  0x3a   :  { %v151_v58 = vld [vmem:[%s1712_s1 + $0x420] sm:$0xff]  ;;  %348 = vmatpush.msra.mxu0 %v23_v57  ;;  %v164_v57 = vld [vmem:[%s1712_s1 + $0x488] sm:$0xff] }
  0x3b   :  { %v87_v59 = vld [vmem:[%s1712_s1 + $0x220] sm:$0xff]  ;;  %388 = vmatpush.msra.mxu2 %v151_v58 }
  0x3c   :  { %v215_v60 = vld [vmem:[%s1712_s1 + $0x620] sm:$0xff]  ;;  %368 = vmatpush.msra.mxu1 %v87_v59  ;;  %v32_v59 = vld [vmem:[%s1712_s1 + $0x68] sm:$0xff] }
  0x3d   :  { %v19_v61 = vld [vmem:[%s1712_s1] sm:$0xff]  ;;  %408 = vmatpush.msra.mxu3 %v215_v60  ;;  %v252_v60 = vld [vmem:[%s1712_s1 + $0x748] sm:$0xff] }
  0x3e   :  { %v147_v62 = vld [vmem:[%s1712_s1 + $0x400] sm:$0xff]  ;;  %349 = vmatpush.msra.mxu0 %v19_v61  ;;  %v92_v61 = vld [vmem:[%s1712_s1 + $0x248] sm:$0xff] }
  0x3f   :  { %v303_v63 = vld [vmem:[%s1712_s1 + $0x8e0] sm:$0xff]  ;;  %389 = vmatpush.msra.mxu2 %v147_v62  ;;  %v160_v62 = vld [vmem:[%s1712_s1 + $0x468] sm:$0xff] }
  0x40   :  { %v83_v1 = vld [vmem:[%s1712_s1 + $0x200] sm:$0xff]  ;;  %422 = vmatpush.msrb.mxu0 %v303_v63  ;;  %390 = vmatmul.f32.vlgmr.msra.gmra.mxu2 %v1089_v35  ;;  %v763_v63 = vld [vmem:[#allocation2] ss:$0 sm:$0xff] }
  0x41   :  { %v211_v2 = vld [vmem:[%s1712_s1 + $0x600] sm:$0xff]  ;;  %454 = vmatpush.msrb.mxu2 %v144_v0  ;;  %369 = vmatpush.msra.mxu1 %v83_v1  ;;  %v248_v0 = vld [vmem:[%s1712_s1 + $0x728] sm:$0xff] }
  0x42   :  { %v299_v3 = vld [vmem:[%s1712_s1 + $0x8c0] sm:$0xff]  ;;  %409 = vmatpush.msra.mxu3 %v211_v2  ;;  %v28_v1 = vld [vmem:[%s1712_s1 + $0x48] sm:$0xff] }
  0x43   :  { %v16_v5 = vld [vmem:[%s1714_s0] sm:$0xff]  ;;  %423 = vmatpush.msrb.mxu0 %v299_v3  ;;  %434 = vmatpush.msrb.mxu1 %v80_v4  ;;  %v88_v2 = vld [vmem:[%s1712_s1 + $0x228] sm:$0xff]  ;;  %v772_v3 = vmov 0  }
  0x44   :  { %317 = vst [vmem:[#allocation1] ss:$2 sm:$0xff] %v16_v5  ;;  %v295_v9 = vld [vmem:[%s1712_s1 + $0x8a0] sm:$0xff]  ;;  %455 = vmatpush.msrb.mxu2 %v140_v7  ;;  %474 = vmatpush.msrb.mxu3 %v208_v8  ;;  %v156_v4 = vld [vmem:[%s1712_s1 + $0x448] sm:$0xff] }
  0x45   :  { %v291_v13 = vld [vmem:[%s1712_s1 + $0x880] sm:$0xff]  ;;  %424 = vmatpush.msrb.mxu0 %v295_v9  ;;  %435 = vmatpush.msrb.mxu1 %v76_v10  ;;  %v244_v5 = vld [vmem:[%s1712_s1 + $0x708] sm:$0xff]  ;;  %v81_v10 = vld [vmem:[%s1712_s1 + $0x1f0] sm:$0xff] }
  0x46   :  { %456 = vmatpush.msrb.mxu2 %v136_v11  ;;  %475 = vmatpush.msrb.mxu3 %v204_v12  ;;  %v287_v17 = vld [vmem:[%s1712_s1 + $0x860] sm:$0xff]  ;;  %v84_v7 = vld [vmem:[%s1712_s1 + $0x208] sm:$0xff] }
  0x47   :  { %425 = vmatpush.msrb.mxu0 %v291_v13  ;;  %436 = vmatpush.msrb.mxu1 %v72_v14  ;;  %v283_v22 = vld [vmem:[%s1712_s1 + $0x840] sm:$0xff]  ;;  %v152_v8 = vld [vmem:[%s1712_s1 + $0x428] sm:$0xff] }
  0x48   :  { %457 = vmatpush.msrb.mxu2 %v132_v15  ;;  %476 = vmatpush.msrb.mxu3 %v200_v16  ;;  %v279_v26 = vld [vmem:[%s1712_s1 + $0x820] sm:$0xff]  ;;  %v240_v9 = vld [vmem:[%s1712_s1 + $0x6e8] sm:$0xff]  ;;  %v77_v15 = vld [vmem:[%s1712_s1 + $0x1d0] sm:$0xff] }
  0x49   :  { %426 = vmatpush.msrb.mxu0 %v287_v17  ;;  %437 = vmatpush.msrb.mxu1 %v68_v18  ;;  %v275_v30 = vld [vmem:[%s1712_s1 + $0x800] sm:$0xff]  ;;  %v20_v11 = vld [vmem:[%s1712_s1 + $0x8] sm:$0xff]  ;;  %v145_v16 = vld [vmem:[%s1712_s1 + $0x3f0] sm:$0xff] }
  0x4a   :  { %458 = vmatpush.msrb.mxu2 %v128_v19  ;;  %477 = vmatpush.msrb.mxu3 %v196_v20  ;;  %v1159_v58 = vld.sshfl [vmem:[#allocation1 + $0x20] sm:$0xff pattern:$0x75316420]  ;;  %v148_v12 = vld [vmem:[%s1712_s1 + $0x408] sm:$0xff]  ;;  %v73_v19 = vld [vmem:[%s1712_s1 + $0x1b0] sm:$0xff] }
  0x4b   :  { %427 = vmatpush.msrb.mxu0 %v283_v22  ;;  %438 = vmatpush.msrb.mxu1 %v64_v23  ;;  %v1087_v34 = vld.sshfl [vmem:[#allocation1] sm:$0xff pattern:$0x75316420]  ;;  %v1119_v45 = vld.sshfl [vmem:[#allocation1 + $0x8] sm:$0xff pattern:$0x75316420] }
  0x4c   :  { %459 = vmatpush.msrb.mxu2 %v124_v24  ;;  %478 = vmatpush.msrb.mxu3 %v192_v25  ;;  %v236_v13 = vld [vmem:[%s1712_s1 + $0x6c8] sm:$0xff]  ;;  %v141_v20 = vld [vmem:[%s1712_s1 + $0x3d0] sm:$0xff] }
  0x4d   :  { %428 = vmatpush.msrb.mxu0 %v279_v26  ;;  %439 = vmatpush.msrb.mxu1 %v60_v27  ;;  %v304_v14 = vld [vmem:[%s1712_s1 + $0x8e8] sm:$0xff]  ;;  %v69_v23 = vld [vmem:[%s1712_s1 + $0x190] sm:$0xff] }
  0x4e   :  { %460 = vmatpush.msrb.mxu2 %v120_v28  ;;  %479 = vmatpush.msrb.mxu3 %v188_v29  ;;  %v232_v17 = vld [vmem:[%s1712_s1 + $0x6a8] sm:$0xff]  ;;  %v137_v24 = vld [vmem:[%s1712_s1 + $0x3b0] sm:$0xff] }
  0x4f   :  { %429 = vmatpush.msrb.mxu0 %v275_v30  ;;  %440 = vmatpush.msrb.mxu1 %v56_v31  ;;  %v300_v18 = vld [vmem:[%s1712_s1 + $0x8c8] sm:$0xff]  ;;  %v65_v27 = vld [vmem:[%s1712_s1 + $0x170] sm:$0xff] }
  0x50   :  { %461 = vmatpush.msrb.mxu2 %v116_v32  ;;  %480 = vmatpush.msrb.mxu3 %v184_v33  ;;  %v296_v22 = vld [vmem:[%s1712_s1 + $0x8a8] sm:$0xff]  ;;  %v133_v28 = vld [vmem:[%s1712_s1 + $0x390] sm:$0xff] }
  0x51   :  { %350 = vmatmul.f32.vlgmr.msra.gmra.mxu0 %v1087_v34  ;;  %441 = vmatpush.msrb.mxu1 %v52_v37  ;;  %v224_v25 = vld [vmem:[%s1712_s1 + $0x668] sm:$0xff]  ;;  %v61_v31 = vld [vmem:[%s1712_s1 + $0x150] sm:$0xff] }
  0x52   :  { %494 = vmatpush.msra.mxu0 %v272_v36  ;;  %462 = vmatpush.msrb.mxu2 %v112_v38  ;;  %v292_v26 = vld [vmem:[%s1712_s1 + $0x888] sm:$0xff]  ;;  %v129_v32 = vld [vmem:[%s1712_s1 + $0x370] sm:$0xff] }
  0x53   :  { %481 = vmatpush.msrb.mxu3 %v180_v39  ;;  %442 = vmatpush.msrb.mxu1 %v48_v42  ;;  %v220_v29 = vld [vmem:[%s1712_s1 + $0x648] sm:$0xff]  ;;  %v57_v37 = vld [vmem:[%s1712_s1 + $0x130] sm:$0xff] }
  0x54   :  { %410 = vmatmul.f32.vlgmr.msra.gmra.mxu3 %v1105_v40  ;;  %495 = vmatpush.msra.mxu0 %v268_v41  ;;  %v288_v30 = vld [vmem:[%s1712_s1 + $0x868] sm:$0xff]  ;;  %v125_v38 = vld [vmem:[%s1712_s1 + $0x350] sm:$0xff] }
  0x55   :  { %463 = vmatpush.msrb.mxu2 %v108_v43  ;;  %482 = vmatpush.msrb.mxu3 %v176_v44  ;;  %v216_v33 = vld [vmem:[%s1712_s1 + $0x628] sm:$0xff]  ;;  %v53_v42 = vld [vmem:[%s1712_s1 + $0x110] sm:$0xff] }
  0x56   :  { %370 = vmatmul.f32.vlgmr.msra.gmra.mxu1 %v1119_v45  ;;  %496 = vmatpush.msra.mxu0 %v264_v46  ;;  %v284_v36 = vld [vmem:[%s1712_s1 + $0x848] sm:$0xff]  ;;  %v121_v43 = vld [vmem:[%s1712_s1 + $0x330] sm:$0xff] }
  0x57   :  { %443 = vmatpush.msrb.mxu1 %v44_v47  ;;  %464 = vmatpush.msrb.mxu2 %v104_v48  ;;  %v212_v39 = vld [vmem:[%s1712_s1 + $0x608] sm:$0xff]  ;;  %v49_v46 = vld [vmem:[%s1712_s1 + $0xf0] sm:$0xff] }
  0x58   :  { %483 = vmatpush.msrb.mxu3 %v172_v49  ;;  %497 = vmatpush.msra.mxu0 %v260_v50  ;;  %v280_v41 = vld [vmem:[%s1712_s1 + $0x828] sm:$0xff]  ;;  %v117_v47 = vld [vmem:[%s1712_s1 + $0x310] sm:$0xff] }
  0x59   :  { %444 = vmatpush.msrb.mxu1 %v40_v51  ;;  %465 = vmatpush.msrb.mxu2 %v100_v52  ;;  %v276_v44 = vld [vmem:[%s1712_s1 + $0x808] sm:$0xff]  ;;  %v209_v48 = vld [vmem:[%s1712_s1 + $0x5f0] sm:$0xff] }
  0x5a   :  { %484 = vmatpush.msrb.mxu3 %v168_v53  ;;  %498 = vmatpush.msra.mxu0 %v256_v54  ;;  %v45_v49 = vld [vmem:[%s1712_s1 + $0xd0] sm:$0xff] }
  0x5b   :  { %445 = vmatpush.msrb.mxu1 %v36_v55  ;;  %466 = vmatpush.msrb.mxu2 %v96_v56  ;;  %v113_v50 = vld [vmem:[%s1712_s1 + $0x2f0] sm:$0xff] }
  0x5c   :  { %485 = vmatpush.msrb.mxu3 %v164_v57  ;;  %757 = vmatmul.msk.f32.vlgmr.msrb.gmra.mxu0 %vm331_vm0, %v1159_v58  ;;  %v205_v51 = vld [vmem:[%s1712_s1 + $0x5d0] sm:$0xff] }
  0x5d   :  { %446 = vmatpush.msrb.mxu1 %v32_v59  ;;  %499 = vmatpush.msra.mxu0 %v252_v60  ;;  %v273_v52 = vld [vmem:[%s1712_s1 + $0x7f0] sm:$0xff] }
  0x5e   :  { %467 = vmatpush.msrb.mxu2 %v92_v61  ;;  %486 = vmatpush.msrb.mxu3 %v160_v62  ;;  %v41_v53 = vld [vmem:[%s1712_s1 + $0xb0] sm:$0xff] }
  0x5f   :  { %762 = vset.pattern.permute.xlu0 %v772_v3  ;;  %500 = vmatpush.msra.mxu0 %v248_v0  ;;  %v109_v54 = vld [vmem:[%s1712_s1 + $0x2d0] sm:$0xff] }
  0x60   :  { %311 = vperm.xlu0 %762, %v763_v63   ;;  %447 = vmatpush.msrb.mxu1 %v28_v1  ;;  %v201_v55 = vld [vmem:[%s1712_s1 + $0x5b0] sm:$0xff] }
  0x61   :  { %468 = vmatpush.msrb.mxu2 %v88_v2  ;;  %487 = vmatpush.msrb.mxu3 %v156_v4  ;;  %v269_v56 = vld [vmem:[%s1712_s1 + $0x7d0] sm:$0xff] }
  0x62   :  { %501 = vmatpush.msra.mxu0 %v244_v5  ;;  %448 = vmatpush.msrb.mxu1 %v24_v6  ;;  %v37_v57 = vld [vmem:[%s1712_s1 + $0x90] sm:$0xff] }
  0x63   :  { %469 = vmatpush.msrb.mxu2 %v84_v7  ;;  %488 = vmatpush.msrb.mxu3 %v152_v8  ;;  %v105_v59 = vld [vmem:[%s1712_s1 + $0x2b0] sm:$0xff] }
  0x64   :  { %502 = vmatpush.msra.mxu0 %v240_v9  ;;  %449 = vmatpush.msrb.mxu1 %v20_v11  ;;  %v197_v60 = vld [vmem:[%s1712_s1 + $0x590] sm:$0xff] }
  0x65   :  { %534 = vmatpush.msra.mxu2 %v81_v10  ;;  %489 = vmatpush.msrb.mxu3 %v148_v12  ;;  %v265_v61 = vld [vmem:[%s1712_s1 + $0x7b0] sm:$0xff] }
  0x66   :  { %503 = vmatpush.msra.mxu0 %v236_v13  ;;  %522 = vmatpush.msra.mxu1 %v304_v14  ;;  %v33_v62 = vld [vmem:[%s1712_s1 + $0x70] sm:$0xff] }
  0x67   :  { %535 = vmatpush.msra.mxu2 %v77_v15  ;;  %554 = vmatpush.msra.mxu3 %v145_v16  ;;  %v101_v63 = vld [vmem:[%s1712_s1 + $0x290] sm:$0xff] }
  0x68   :  { %504 = vmatpush.msra.mxu0 %v232_v17  ;;  %523 = vmatpush.msra.mxu1 %v300_v18  ;;  %v193_v0 = vld [vmem:[%s1712_s1 + $0x570] sm:$0xff] }
  0x69   :  { %536 = vmatpush.msra.mxu2 %v73_v19  ;;  %555 = vmatpush.msra.mxu3 %v141_v20  ;;  %v261_v1 = vld [vmem:[%s1712_s1 + $0x790] sm:$0xff]  ;;  %v82_v19 = vld [vmem:[%s1712_s1 + $0x1f8] sm:$0xff] }
  0x6a   :  { %470 = vmatmul.f32.vlgmr.msrb.gmra.mxu2 %v1119_v45  ;;  %505 = vmatpush.msra.mxu0 %v228_v21  ;;  %v29_v2 = vld [vmem:[%s1712_s1 + $0x50] sm:$0xff] }
  0x6b   :  { %524 = vmatpush.msra.mxu1 %v296_v22  ;;  %537 = vmatpush.msra.mxu2 %v69_v23  ;;  %v97_v3 = vld [vmem:[%s1712_s1 + $0x270] sm:$0xff]  ;;  %v78_v23 = vld [vmem:[%s1712_s1 + $0x1d8] sm:$0xff] }
  0x6c   :  { %556 = vmatpush.msra.mxu3 %v137_v24  ;;  %506 = vmatpush.msra.mxu0 %v224_v25  ;;  %v189_v4 = vld [vmem:[%s1712_s1 + $0x550] sm:$0xff] }
  0x6d   :  { %490 = vmatmul.f32.vlgmr.msrb.gmra.mxu3 %v1089_v35  ;;  %525 = vmatpush.msra.mxu1 %v292_v26  ;;  %v257_v5 = vld [vmem:[%s1712_s1 + $0x770] sm:$0xff] }
  0x6e   :  { %538 = vmatpush.msra.mxu2 %v65_v27  ;;  %557 = vmatpush.msra.mxu3 %v133_v28  ;;  %v25_v6 = vld [vmem:[%s1712_s1 + $0x30] sm:$0xff]  ;;  %v74_v27 = vld [vmem:[%s1712_s1 + $0x1b8] sm:$0xff] }
  0x6f   :  { %450 = vmatmul.f32.vlgmr.msrb.gmra.mxu1 %v1087_v34  ;;  %507 = vmatpush.msra.mxu0 %v220_v29  ;;  %v93_v7 = vld [vmem:[%s1712_s1 + $0x250] sm:$0xff] }
  0x70   :  { %526 = vmatpush.msra.mxu1 %v288_v30  ;;  %539 = vmatpush.msra.mxu2 %v61_v31  ;;  %v185_v8 = vld [vmem:[%s1712_s1 + $0x530] sm:$0xff]  ;;  %v70_v31 = vld [vmem:[%s1712_s1 + $0x198] sm:$0xff] }
  0x71   :  { %558 = vmatpush.msra.mxu3 %v129_v32  ;;  %508 = vmatpush.msra.mxu0 %v216_v33  ;;  %v253_v9 = vld [vmem:[%s1712_s1 + $0x750] sm:$0xff] }
  0x72   :  { %527 = vmatpush.msra.mxu1 %v284_v36  ;;  %540 = vmatpush.msra.mxu2 %v57_v37  ;;  %v21_v10 = vld [vmem:[%s1712_s1 + $0x10] sm:$0xff]  ;;  %v66_v37 = vld [vmem:[%s1712_s1 + $0x178] sm:$0xff] }
  0x73   :  { %559 = vmatpush.msra.mxu3 %v125_v38  ;;  %509 = vmatpush.msra.mxu0 %v212_v39  ;;  %v89_v11 = vld [vmem:[%s1712_s1 + $0x230] sm:$0xff] }
  0x74   :  { %528 = vmatpush.msra.mxu1 %v280_v41  ;;  %541 = vmatpush.msra.mxu2 %v53_v42  ;;  %v181_v12 = vld [vmem:[%s1712_s1 + $0x510] sm:$0xff]  ;;  %v62_v42 = vld [vmem:[%s1712_s1 + $0x158] sm:$0xff] }
  0x75   :  { %560 = vmatpush.msra.mxu3 %v121_v43  ;;  %510 = vmatmul.f32.vlgmr.msra.gmra.mxu0 %v1105_v40  ;;  %v249_v13 = vld [vmem:[%s1712_s1 + $0x730] sm:$0xff] }
  0x76   :  { %529 = vmatpush.msra.mxu1 %v276_v44  ;;  %542 = vmatpush.msra.mxu2 %v49_v46  ;;  %v305_v14 = vld [vmem:[%s1712_s1 + $0x8f0] sm:$0xff] }
  0x77   :  { %561 = vmatpush.msra.mxu3 %v117_v47  ;;  %758 = vmatmul.msk.f32.vlgmr.msra.gmra.mxu1 %vm331_vm0, %v1159_v58  ;;  %v85_v15 = vld [vmem:[%s1712_s1 + $0x210] sm:$0xff]  ;;  %v58_v47 = vld [vmem:[%s1712_s1 + $0x138] sm:$0xff] }
  0x78   :  { %574 = vmatpush.msrb.mxu0 %v209_v48  ;;  %543 = vmatpush.msra.mxu2 %v45_v49  ;;  %v177_v16 = vld [vmem:[%s1712_s1 + $0x4f0] sm:$0xff]  ;;  %v274_v49 = vld [vmem:[%s1712_s1 + $0x7f8] sm:$0xff] }
  0x79   :  { %562 = vmatpush.msra.mxu3 %v113_v50  ;;  %594 = vmatpush.msrb.mxu1 %v273_v52  ;;  %v245_v17 = vld [vmem:[%s1712_s1 + $0x710] sm:$0xff]  ;;  %v146_v52 = vld [vmem:[%s1712_s1 + $0x3f8] sm:$0xff] }
  0x7a   :  { %575 = vmatpush.msrb.mxu0 %v205_v51  ;;  %544 = vmatpush.msra.mxu2 %v41_v53  ;;  %v301_v18 = vld [vmem:[%s1712_s1 + $0x8d0] sm:$0xff]  ;;  %v54_v51 = vld [vmem:[%s1712_s1 + $0x118] sm:$0xff] }
  0x7b   :  { %563 = vmatpush.msra.mxu3 %v109_v54  ;;  %595 = vmatpush.msrb.mxu1 %v269_v56  ;;  %v173_v20 = vld [vmem:[%s1712_s1 + $0x4d0] sm:$0xff]  ;;  %v270_v53 = vld [vmem:[%s1712_s1 + $0x7d8] sm:$0xff] }
  0x7c   :  { %576 = vmatpush.msrb.mxu0 %v201_v55  ;;  %545 = vmatpush.msra.mxu2 %v37_v57  ;;  %v241_v21 = vld [vmem:[%s1712_s1 + $0x6f0] sm:$0xff]  ;;  %v50_v55 = vld [vmem:[%s1712_s1 + $0xf8] sm:$0xff] }
  0x7d   :  { %564 = vmatpush.msra.mxu3 %v105_v59  ;;  %596 = vmatpush.msrb.mxu1 %v265_v61  ;;  %v297_v22 = vld [vmem:[%s1712_s1 + $0x8b0] sm:$0xff]  ;;  %v142_v56 = vld [vmem:[%s1712_s1 + $0x3d8] sm:$0xff] }
  0x7e   :  { %577 = vmatpush.msrb.mxu0 %v197_v60  ;;  %546 = vmatpush.msra.mxu2 %v33_v62  ;;  %v169_v24 = vld [vmem:[%s1712_s1 + $0x4b0] sm:$0xff]  ;;  %v210_v57 = vld [vmem:[%s1712_s1 + $0x5f8] sm:$0xff] }
  0x7f   :  { %565 = vmatpush.msra.mxu3 %v101_v63  ;;  %597 = vmatpush.msrb.mxu1 %v261_v1  ;;  %v237_v25 = vld [vmem:[%s1712_s1 + $0x6d0] sm:$0xff]  ;;  %v266_v59 = vld [vmem:[%s1712_s1 + $0x7b8] sm:$0xff] }
  0x80   :  { %578 = vmatpush.msrb.mxu0 %v193_v0  ;;  %547 = vmatpush.msra.mxu2 %v29_v2  ;;  %v293_v26 = vld [vmem:[%s1712_s1 + $0x890] sm:$0xff]  ;;  %v46_v60 = vld [vmem:[%s1712_s1 + $0xd8] sm:$0xff] }
  0x81   :  { %566 = vmatpush.msra.mxu3 %v97_v3  ;;  %598 = vmatpush.msrb.mxu1 %v257_v5  ;;  %v165_v28 = vld [vmem:[%s1712_s1 + $0x490] sm:$0xff]  ;;  %v138_v61 = vld [vmem:[%s1712_s1 + $0x3b8] sm:$0xff] }
  0x82   :  { %579 = vmatpush.msrb.mxu0 %v189_v4  ;;  %548 = vmatpush.msra.mxu2 %v25_v6  ;;  %v233_v29 = vld [vmem:[%s1712_s1 + $0x6b0] sm:$0xff]  ;;  %v206_v62 = vld [vmem:[%s1712_s1 + $0x5d8] sm:$0xff] }
  0x83   :  { %567 = vmatpush.msra.mxu3 %v93_v7  ;;  %599 = vmatpush.msrb.mxu1 %v253_v9  ;;  %v289_v30 = vld [vmem:[%s1712_s1 + $0x870] sm:$0xff]  ;;  %v262_v63 = vld [vmem:[%s1712_s1 + $0x798] sm:$0xff] }
  0x84   :  { %580 = vmatpush.msrb.mxu0 %v185_v8  ;;  %549 = vmatpush.msra.mxu2 %v21_v10  ;;  %v161_v32 = vld [vmem:[%s1712_s1 + $0x470] sm:$0xff]  ;;  %v42_v0 = vld [vmem:[%s1712_s1 + $0xb8] sm:$0xff] }
  0x85   :  { %568 = vmatpush.msra.mxu3 %v89_v11  ;;  %600 = vmatpush.msrb.mxu1 %v249_v13  ;;  %v229_v33 = vld [vmem:[%s1712_s1 + $0x690] sm:$0xff]  ;;  %v134_v1 = vld [vmem:[%s1712_s1 + $0x398] sm:$0xff] }
  0x86   :  { %581 = vmatpush.msrb.mxu0 %v181_v12  ;;  %622 = vmatpush.msrb.mxu2 %v305_v14  ;;  %v285_v36 = vld [vmem:[%s1712_s1 + $0x850] sm:$0xff]  ;;  %v202_v2 = vld [vmem:[%s1712_s1 + $0x5b8] sm:$0xff] }
  0x87   :  { %569 = vmatpush.msra.mxu3 %v85_v15  ;;  %601 = vmatpush.msrb.mxu1 %v245_v17  ;;  %v157_v38 = vld [vmem:[%s1712_s1 + $0x450] sm:$0xff]  ;;  %v258_v3 = vld [vmem:[%s1712_s1 + $0x778] sm:$0xff] }
  0x88   :  { %582 = vmatpush.msrb.mxu0 %v177_v16  ;;  %623 = vmatpush.msrb.mxu2 %v301_v18  ;;  %v225_v39 = vld [vmem:[%s1712_s1 + $0x670] sm:$0xff]  ;;  %v38_v4 = vld [vmem:[%s1712_s1 + $0x98] sm:$0xff] }
  0x89   :  { %634 = vmatpush.msrb.mxu3 %v82_v19  ;;  %602 = vmatpush.msrb.mxu1 %v241_v21  ;;  %v281_v41 = vld [vmem:[%s1712_s1 + $0x830] sm:$0xff]  ;;  %v130_v5 = vld [vmem:[%s1712_s1 + $0x378] sm:$0xff] }
  0x8a   :  { %583 = vmatpush.msrb.mxu0 %v173_v20  ;;  %624 = vmatpush.msrb.mxu2 %v297_v22  ;;  %v153_v43 = vld [vmem:[%s1712_s1 + $0x430] sm:$0xff]  ;;  %v198_v6 = vld [vmem:[%s1712_s1 + $0x598] sm:$0xff] }
  0x8b   :  { %635 = vmatpush.msrb.mxu3 %v78_v23  ;;  %603 = vmatpush.msrb.mxu1 %v237_v25  ;;  %v221_v44 = vld [vmem:[%s1712_s1 + $0x650] sm:$0xff]  ;;  %v254_v7 = vld [vmem:[%s1712_s1 + $0x758] sm:$0xff] }
  0x8c   :  { %584 = vmatpush.msrb.mxu0 %v169_v24  ;;  %625 = vmatpush.msrb.mxu2 %v293_v26  ;;  %v277_v46 = vld [vmem:[%s1712_s1 + $0x810] sm:$0xff]  ;;  %v34_v8 = vld [vmem:[%s1712_s1 + $0x78] sm:$0xff] }
  0x8d   :  { %636 = vmatpush.msrb.mxu3 %v74_v27  ;;  %604 = vmatpush.msrb.mxu1 %v233_v29  ;;  %v149_v48 = vld [vmem:[%s1712_s1 + $0x410] sm:$0xff]  ;;  %v126_v9 = vld [vmem:[%s1712_s1 + $0x358] sm:$0xff] }
  0x8e   :  { %585 = vmatpush.msrb.mxu0 %v165_v28  ;;  %626 = vmatpush.msrb.mxu2 %v289_v30  ;;  %v217_v50 = vld [vmem:[%s1712_s1 + $0x630] sm:$0xff]  ;;  %v194_v10 = vld [vmem:[%s1712_s1 + $0x578] sm:$0xff] }
  0x8f   :  { %637 = vmatpush.msrb.mxu3 %v70_v31  ;;  %605 = vmatpush.msrb.mxu1 %v229_v33  ;;  %v213_v54 = vld [vmem:[%s1712_s1 + $0x610] sm:$0xff]  ;;  %v250_v11 = vld [vmem:[%s1712_s1 + $0x738] sm:$0xff] }
  0x90   :  { %586 = vmatpush.msrb.mxu0 %v161_v32  ;;  %627 = vmatpush.msrb.mxu2 %v285_v36  ;;  %v30_v12 = vld [vmem:[%s1712_s1 + $0x58] sm:$0xff] }
  0x91   :  { %638 = vmatpush.msrb.mxu3 %v66_v37  ;;  %606 = vmatpush.msrb.mxu1 %v225_v39  ;;  %v122_v13 = vld [vmem:[%s1712_s1 + $0x338] sm:$0xff] }
  0x92   :  { %587 = vmatpush.msrb.mxu0 %v157_v38  ;;  %628 = vmatpush.msrb.mxu2 %v281_v41  ;;  %v190_v14 = vld [vmem:[%s1712_s1 + $0x558] sm:$0xff] }
  0x93   :  { %639 = vmatpush.msrb.mxu3 %v62_v42  ;;  %607 = vmatpush.msrb.mxu1 %v221_v44  ;;  %v246_v15 = vld [vmem:[%s1712_s1 + $0x718] sm:$0xff] }
  0x94   :  { %588 = vmatpush.msrb.mxu0 %v153_v43  ;;  %629 = vmatpush.msrb.mxu2 %v277_v46  ;;  %v26_v16 = vld [vmem:[%s1712_s1 + $0x38] sm:$0xff] }
  0x95   :  { %640 = vmatpush.msrb.mxu3 %v58_v47  ;;  %550 = vmatmul.f32.vlgmr.msra.gmra.mxu2 %v1087_v34  ;;  %v118_v17 = vld [vmem:[%s1712_s1 + $0x318] sm:$0xff] }
  0x96   :  { %589 = vmatpush.msrb.mxu0 %v149_v48  ;;  %694 = vmatpush.msra.mxu2 %v274_v49  ;;  %v186_v18 = vld [vmem:[%s1712_s1 + $0x538] sm:$0xff] }
  0x97   :  { %608 = vmatpush.msrb.mxu1 %v217_v50  ;;  %641 = vmatpush.msrb.mxu3 %v54_v51  ;;  %v242_v19 = vld [vmem:[%s1712_s1 + $0x6f8] sm:$0xff] }
  0x98   :  { %654 = vmatpush.msra.mxu0 %v146_v52  ;;  %570 = vmatmul.f32.vlgmr.msra.gmra.mxu3 %v1119_v45  ;;  %v22_v20 = vld [vmem:[%s1712_s1 + $0x18] sm:$0xff] }
  0x99   :  { %695 = vmatpush.msra.mxu2 %v270_v53  ;;  %609 = vmatpush.msrb.mxu1 %v213_v54  ;;  %v114_v21 = vld [vmem:[%s1712_s1 + $0x2f8] sm:$0xff] }
  0x9a   :  { %642 = vmatpush.msrb.mxu3 %v50_v55  ;;  %655 = vmatpush.msra.mxu0 %v142_v56  ;;  %v182_v22 = vld [vmem:[%s1712_s1 + $0x518] sm:$0xff] }
  0x9b   :  { %674 = vmatpush.msra.mxu1 %v210_v57  ;;  %696 = vmatpush.msra.mxu2 %v266_v59  ;;  %v238_v23 = vld [vmem:[%s1712_s1 + $0x6d8] sm:$0xff] }
  0x9c   :  { %643 = vmatpush.msrb.mxu3 %v46_v60  ;;  %656 = vmatpush.msra.mxu0 %v138_v61  ;;  %v306_v24 = vld [vmem:[%s1712_s1 + $0x8f8] sm:$0xff] }
  0x9d   :  { %675 = vmatpush.msra.mxu1 %v206_v62  ;;  %697 = vmatpush.msra.mxu2 %v262_v63  ;;  %v110_v25 = vld [vmem:[%s1712_s1 + $0x2d8] sm:$0xff] }
  0x9e   :  { %644 = vmatpush.msrb.mxu3 %v42_v0  ;;  %759 = vmatmul.msk.f32.vlgmr.msrb.gmra.mxu2 %vm331_vm0, %v1159_v58  ;;  %v178_v26 = vld [vmem:[%s1712_s1 + $0x4f8] sm:$0xff] }
  0x9f   :  { %657 = vmatpush.msra.mxu0 %v134_v1  ;;  %676 = vmatpush.msra.mxu1 %v202_v2  ;;  %v234_v27 = vld [vmem:[%s1712_s1 + $0x6b8] sm:$0xff] }
  0xa0   :  { %698 = vmatpush.msra.mxu2 %v258_v3  ;;  %645 = vmatpush.msrb.mxu3 %v38_v4  ;;  %v302_v28 = vld [vmem:[%s1712_s1 + $0x8d8] sm:$0xff] }
  0xa1   :  { %590 = vmatmul.f32.vlgmr.msrb.gmra.mxu0 %v1089_v35  ;;  %677 = vmatpush.msra.mxu1 %v198_v6  ;;  %v106_v29 = vld [vmem:[%s1712_s1 + $0x2b8] sm:$0xff] }
  0xa2   :  { %658 = vmatpush.msra.mxu0 %v130_v5  ;;  %699 = vmatpush.msra.mxu2 %v254_v7  ;;  %v174_v30 = vld [vmem:[%s1712_s1 + $0x4d8] sm:$0xff] }
  0xa3   :  { %646 = vmatpush.msrb.mxu3 %v34_v8  ;;  %610 = vmatmul.f32.vlgmr.msrb.gmra.mxu1 %v1105_v40  ;;  %v230_v31 = vld [vmem:[%s1712_s1 + $0x698] sm:$0xff] }
  0xa4   :  { %659 = vmatpush.msra.mxu0 %v126_v9  ;;  %678 = vmatpush.msra.mxu1 %v194_v10  ;;  %v298_v32 = vld [vmem:[%s1712_s1 + $0x8b8] sm:$0xff] }
  0xa5   :  { %700 = vmatpush.msra.mxu2 %v250_v11  ;;  %647 = vmatpush.msrb.mxu3 %v30_v12  ;;  %v102_v33 = vld [vmem:[%s1712_s1 + $0x298] sm:$0xff] }
  0xa6   :  { %660 = vmatpush.msra.mxu0 %v122_v13  ;;  %679 = vmatpush.msra.mxu1 %v190_v14  ;;  %v170_v36 = vld [vmem:[%s1712_s1 + $0x4b8] sm:$0xff] }
  0xa7   :  { %701 = vmatpush.msra.mxu2 %v246_v15  ;;  %648 = vmatpush.msrb.mxu3 %v26_v16  ;;  %v226_v37 = vld [vmem:[%s1712_s1 + $0x678] sm:$0xff] }
  0xa8   :  { %661 = vmatpush.msra.mxu0 %v118_v17  ;;  %680 = vmatpush.msra.mxu1 %v186_v18  ;;  %v294_v38 = vld [vmem:[%s1712_s1 + $0x898] sm:$0xff] }
  0xa9   :  { %702 = vmatpush.msra.mxu2 %v242_v19  ;;  %649 = vmatpush.msrb.mxu3 %v22_v20  ;;  %v98_v39 = vld [vmem:[%s1712_s1 + $0x278] sm:$0xff] }
  0xaa   :  { %662 = vmatpush.msra.mxu0 %v114_v21  ;;  %681 = vmatpush.msra.mxu1 %v182_v22  ;;  %v166_v41 = vld [vmem:[%s1712_s1 + $0x498] sm:$0xff] }
  0xab   :  { %703 = vmatpush.msra.mxu2 %v238_v23  ;;  %722 = vmatpush.msra.mxu3 %v306_v24  ;;  %v222_v42 = vld [vmem:[%s1712_s1 + $0x658] sm:$0xff] }
  0xac   :  { %663 = vmatpush.msra.mxu0 %v110_v25  ;;  %682 = vmatpush.msra.mxu1 %v178_v26  ;;  %v290_v43 = vld [vmem:[%s1712_s1 + $0x878] sm:$0xff] }
  0xad   :  { %704 = vmatpush.msra.mxu2 %v234_v27  ;;  %723 = vmatpush.msra.mxu3 %v302_v28  ;;  %v94_v44 = vld [vmem:[%s1712_s1 + $0x258] sm:$0xff] }
  0xae   :  { %664 = vmatpush.msra.mxu0 %v106_v29  ;;  %683 = vmatpush.msra.mxu1 %v174_v30  ;;  %v162_v46 = vld [vmem:[%s1712_s1 + $0x478] sm:$0xff] }
  0xaf   :  { %705 = vmatpush.msra.mxu2 %v230_v31  ;;  %724 = vmatpush.msra.mxu3 %v298_v32  ;;  %v218_v47 = vld [vmem:[%s1712_s1 + $0x638] sm:$0xff] }
  0xb0   :  { %665 = vmatpush.msra.mxu0 %v102_v33  ;;  %684 = vmatpush.msra.mxu1 %v170_v36  ;;  %v286_v48 = vld [vmem:[%s1712_s1 + $0x858] sm:$0xff] }
  0xb1   :  { %706 = vmatpush.msra.mxu2 %v226_v37  ;;  %725 = vmatpush.msra.mxu3 %v294_v38  ;;  %v90_v49 = vld [vmem:[%s1712_s1 + $0x238] sm:$0xff] }
  0xb2   :  { %666 = vmatpush.msra.mxu0 %v98_v39  ;;  %650 = vmatmul.f32.vlgmr.msrb.gmra.mxu3 %v1087_v34  ;;  %v158_v50 = vld [vmem:[%s1712_s1 + $0x458] sm:$0xff] }
  0xb3   :  { %685 = vmatpush.msra.mxu1 %v166_v41  ;;  %707 = vmatpush.msra.mxu2 %v222_v42  ;;  %v214_v34 = vld [vmem:[%s1712_s1 + $0x618] sm:$0xff] }
  0xb4   :  { %726 = vmatpush.msra.mxu3 %v290_v43  ;;  %667 = vmatpush.msra.mxu0 %v94_v44  ;;  %v282_v51 = vld [vmem:[%s1712_s1 + $0x838] sm:$0xff] }
  0xb5   :  { %686 = vmatpush.msra.mxu1 %v162_v46  ;;  %708 = vmatpush.msra.mxu2 %v218_v47  ;;  %v86_v52 = vld [vmem:[%s1712_s1 + $0x218] sm:$0xff] }
  0xb6   :  { %727 = vmatpush.msra.mxu3 %v286_v48  ;;  %668 = vmatpush.msra.mxu0 %v90_v49  ;;  %v154_v53 = vld [vmem:[%s1712_s1 + $0x438] sm:$0xff] }
  0xb7   :  { %687 = vmatpush.msra.mxu1 %v158_v50  ;;  %v278_v54 = vld [vmem:[%s1712_s1 + $0x818] sm:$0xff]  ;;  %709 = vmatpush.msra.mxu2 %v214_v34 }
  0xb8   :  { %728 = vmatpush.msra.mxu3 %v282_v51  ;;  %710 = vmatmul.f32.vlgmr.msra.gmra.mxu2 %v1105_v40  ;;  %v150_v55 = vld [vmem:[%s1712_s1 + $0x418] sm:$0xff] }
  0xb9   :  { %669 = vmatpush.msra.mxu0 %v86_v52  ;;  %688 = vmatpush.msra.mxu1 %v154_v53 }
  0xba   :  { %729 = vmatpush.msra.mxu3 %v278_v54  ;;  %670 = vmatmul.f32.vlgmr.msra.gmra.mxu0 %v1119_v45 }
  0xbb   :  { %760 = vmatmul.msk.f32.vlgmr.msra.gmra.mxu3 %vm331_vm0, %v1159_v58  ;;  %689 = vmatpush.msra.mxu1 %v150_v55 }
  0xbc   :  { %690 = vmatmul.f32.vlgmr.msra.gmra.mxu1 %v1089_v35 }
  0xc3   :  { %v391_v60 = vpop.f32.mrf.mxu2 }
  0xce   :  { %v351_v56 = vpop.f32.mrf.mxu0 }
  0xd2   :  { %v312_v57 = vpop.permute.xlu0 %311 }
  0xd3   :  { %v371_v59 = vpop.f32.mrf.mxu1  ;;  %v352_v40 = vadd.f32 %v351_v56, %v312_v57 }
  0xd5   :  { %v372_v62 = vadd.f32 %v371_v59, %v352_v40 }
  0xd7   :  { %v411_v61 = vpop.f32.mrf.mxu3  ;;  %v392_v3 = vadd.f32 %v391_v60, %v372_v62 }
  0xd9   :  { %v431_v63 = vpop.f32.mrf.mxu0  ;;  %v412_v6 = vadd.f32 %v411_v61, %v392_v3 }
  0xdb   :  { %v432_v35 = vadd.f32 %v431_v63, %v412_v6 }
  0xec   :  { %v451_v0 = vpop.f32.mrf.mxu1 }
  0xed   :  { %v452_v1 = vadd.f32 %v451_v0, %v312_v57  ;;  %v471_v2 = vpop.f32.mrf.mxu2 }
  0xef   :  { %v472_v4 = vadd.f32 %v471_v2, %v452_v1 }
  0xf0   :  { %v491_v45 = vpop.f32.mrf.mxu3 }
  0xf1   :  { %v492_v5 = vadd.f32 %v491_v45, %v472_v4 }
  0xf2   :  { %v511_v58 = vpop.f32.mrf.mxu0 }
  0xf3   :  { %v512_v7 = vadd.f32 %v511_v58, %v492_v5 }
  0xf4   :  { %v531_v8 = vpop.f32.mrf.mxu1 }
  0xf5   :  { %v532_v9 = vadd.f32 %v531_v8, %v512_v7 }
  0xf7   :  { %764 = vtanh.f32 %v532_v9 }
  0xf8   :  { %766 = vtanh.f32 %v432_v35 }
  0xfd   :  { %v765_v10 = vpop.eup %764 }
  0xfe   :  { %v742_v11 = vrot.slane %v765_v10, 4  ;;  %v767_v12 = vpop.eup %766 }
 0x100   :  { %v745_v13 = vsel %vm744_vm1, %v767_v12, %v742_v11 }
 0x101   :  { %749 = vst [vmem:[%s1715_s3] sm:$0xff] %v745_v13 }
 0x118   :  { %v551_v14 = vpop.f32.mrf.mxu2 }
 0x119   :  { %v552_v16 = vadd.f32 %v551_v14, %v312_v57 }
 0x11b   :  { %v571_v15 = vpop.f32.mrf.mxu3 }
 0x11c   :  { %v572_v19 = vadd.f32 %v571_v15, %v552_v16 }
 0x11e   :  { %v591_v17 = vpop.f32.mrf.mxu0 }
 0x11f   :  { %v592_v22 = vadd.f32 %v591_v17, %v572_v19 }
 0x120   :  { %v611_v18 = vpop.f32.mrf.mxu1 }
 0x121   :  { %v631_v20 = vpop.f32.mrf.mxu2  ;;  %v612_v27 = vadd.f32 %v611_v18, %v592_v22 }
 0x123   :  { %v632_v32 = vadd.f32 %v631_v20, %v612_v27 }
 0x135   :  { %v651_v21 = vpop.f32.mrf.mxu3 }
 0x136   :  { %v652_v23 = vadd.f32 %v651_v21, %v312_v57 }
 0x137   :  { %v671_v24 = vpop.f32.mrf.mxu0 }
 0x138   :  { %v672_v25 = vadd.f32 %v671_v24, %v652_v23 }
 0x139   :  { %v691_v26 = vpop.f32.mrf.mxu1 }
 0x13a   :  { %v692_v28 = vadd.f32 %v691_v26, %v672_v25 }
 0x13b   :  { %v711_v29 = vpop.f32.mrf.mxu2 }
 0x13c   :  { %v712_v30 = vadd.f32 %v711_v29, %v692_v28 }
 0x13e   :  { %v731_v31 = vpop.f32.mrf.mxu3 }
 0x13f   :  { %v732_v33 = vadd.f32 %v731_v31, %v712_v30 }
 0x141   :  { %768 = vtanh.f32 %v732_v33 }
 0x142   :  { %770 = vtanh.f32 %v632_v32 }
 0x147   :  { %v769_v36 = vpop.eup %768 }
 0x148   :  { %v743_v37 = vrot.slane %v769_v36, 4  ;;  %v771_v38 = vpop.eup %770 }
 0x14a   :  { %v746_v39 = vsel %vm744_vm1, %v771_v38, %v743_v37 }
 0x14b   :  { %752 = vst.msk [vmem:[%s1715_s3 + $0x8] sm:$0xff] %vm751_vm3, %v746_v39 }

</bundles_post_ra>
